<compile_context>
chip_gen: v5e
topology: v5e:2x2
jax: 0.10.0
libtpu: 0.0.40
codegen_flags: <defaults>
</compile_context>

<pallas_src>
import functools

import jax
import jax.numpy as jnp
from jax import lax
from jax.experimental import pallas as pl
from jax.experimental.pallas import tpu as pltpu

BN_EPS = 1e-5
_VMEM_LIMIT = 64 * 1024 * 1024


def _pick_tile(n, cap):
    """Largest divisor of n that is <= cap and a multiple of 8 (or n itself)."""
    cap = max(1, min(cap, n))
    for t in range(cap, 0, -1):
        if n % t == 0 and (t % 8 == 0 or t == n):
            return t
    return n


# ------------- fused (b0 | b1a | b2a) 1x1x1 conv + folded BN + ReLU -------------
def _fused_pw_kernel(x_ref, w_ref, s_ref, b_ref, o0_ref, o1_ref, o2_ref, *, c0, c1):
    y = jnp.dot(x_ref[...], w_ref[...], preferred_element_type=jnp.float32)
    y = jnp.maximum(y * s_ref[...] + b_ref[...], 0.0)
    o0_ref[...] = y[:, :c0].astype(o0_ref.dtype)
    o1_ref[...] = y[:, c0:c0 + c1].astype(o1_ref.dtype)
    o2_ref[...] = y[:, c0 + c1:].astype(o2_ref.dtype)


def fused_pointwise_conv_bn_relu(x, w_cat, s_cat, b_cat, c_splits, tile_m=512):
    # x: (N,T,H,W,Cin) bf16; w_cat: (Cin, Cpw) bf16; s/b: (1, Cpw) f32.
    N, T, H, W, Cin = x.shape
    c0, c1, c2 = c_splits
    Cpw = c0 + c1 + c2
    M = N * T * H * W
    tm = _pick_tile(M, tile_m)
    x2 = x.reshape(M, Cin)
    outs = pl.pallas_call(
        functools.partial(_fused_pw_kernel, c0=c0, c1=c1),
        out_shape=(
            jax.ShapeDtypeStruct((M, c0), jnp.bfloat16),
            jax.ShapeDtypeStruct((M, c1), jnp.bfloat16),
            jax.ShapeDtypeStruct((M, c2), jnp.bfloat16),
        ),
        grid=(M // tm,),
        in_specs=[
            pl.BlockSpec((tm, Cin), lambda i: (i, 0)),
            pl.BlockSpec((Cin, Cpw), lambda i: (0, 0)),
            pl.BlockSpec((1, Cpw), lambda i: (0, 0)),
            pl.BlockSpec((1, Cpw), lambda i: (0, 0)),
        ],
        out_specs=(
            pl.BlockSpec((tm, c0), lambda i: (i, 0)),
            pl.BlockSpec((tm, c1), lambda i: (i, 0)),
            pl.BlockSpec((tm, c2), lambda i: (i, 0)),
        ),
        compiler_params=pltpu.CompilerParams(dimension_semantics=("parallel",)),
    )(x2, w_cat, s_cat, b_cat)
    b0, b1a, b2a = outs
    return (b0.reshape(N, T, H, W, c0),
            b1a.reshape(N, T, H, W, c1),
            b2a.reshape(N, T, H, W, c2))


# ----------- (1,3,3) spatial conv, pad (0,1,1) + BN + ReLU (im2col dot) -----------
def _spatial_kernel(x_ref, w_ref, s_ref, b_ref, o_ref):
    # x_ref: (1, H, W, Cin) bf16; w_ref: (9*Cin, Cout) bf16; o_ref: (1, H, W, Cout)
    _, H, W, Cin = x_ref.shape
    Cout = o_ref.shape[-1]
    x = x_ref[0]
    # Build the zero halo in VMEM (no pre-padded HBM tensor).
    zr = jnp.zeros((1, W, Cin), x.dtype)
    xh = jnp.concatenate([zr, x, zr], axis=0)                  # (H+2, W, Cin)
    zc = jnp.zeros((H + 2, 1, Cin), x.dtype)
    xp = jnp.concatenate([zc, xh, zc], axis=1)                 # (H+2, W+2, Cin)
    # im2col: concatenate the 9 shifted views along the K axis -> one big dot.
    cols = [xp[kh:kh + H, kw:kw + W, :] for kh in range(3) for kw in range(3)]
    patches = jnp.concatenate(cols, axis=-1).reshape(H * W, 9 * Cin)
    y = jnp.dot(patches, w_ref[...], preferred_element_type=jnp.float32)
    y = jnp.maximum(y * s_ref[...] + b_ref[...], 0.0)
    o_ref[0] = y.reshape(H, W, Cout).astype(o_ref.dtype)


def spatial_conv_bn_relu(x, w, scale, bias):
    # x: (N,T,H,W,Cin) bf16; w: (9*Cin, Cout) bf16; scale/bias: (1, Cout) f32
    N, T, H, W, Cin = x.shape
    Cout = w.shape[-1]
    x2 = x.reshape(N * T, H, W, Cin)
    out = pl.pallas_call(
        _spatial_kernel,
        out_shape=jax.ShapeDtypeStruct((N * T, H, W, Cout), jnp.bfloat16),
        grid=(N * T,),
        in_specs=[
            pl.BlockSpec((1, H, W, Cin), lambda i: (i, 0, 0, 0)),
            pl.BlockSpec((9 * Cin, Cout), lambda i: (0, 0)),
            pl.BlockSpec((1, Cout), lambda i: (0, 0)),
            pl.BlockSpec((1, Cout), lambda i: (0, 0)),
        ],
        out_specs=pl.BlockSpec((1, H, W, Cout), lambda i: (i, 0, 0, 0)),
        compiler_params=pltpu.CompilerParams(
            dimension_semantics=("parallel",), vmem_limit_bytes=_VMEM_LIMIT),
    )(x2, w, scale, bias)
    return out.reshape(N, T, H, W, Cout)


# ----------- (3,1,1) temporal conv, pad (1,0,0) + BN + ReLU (single dot) -----------
def _temporal_kernel(x_ref, w_ref, s_ref, b_ref, o_ref):
    # x_ref: (1, T, HWt, Cin) bf16; w_ref: (3*Cin, Cout) bf16; o_ref: (1, T, HWt, Cout)
    _, T, HWt, Cin = x_ref.shape
    Cout = o_ref.shape[-1]
    x = x_ref[0]
    z = jnp.zeros((1, HWt, Cin), x.dtype)
    xp = jnp.concatenate([z, x, z], axis=0)                    # (T+2, HWt, Cin)
    cols = [xp[kt:kt + T] for kt in range(3)]
    patches = jnp.concatenate(cols, axis=-1).reshape(T * HWt, 3 * Cin)
    y = jnp.dot(patches, w_ref[...], preferred_element_type=jnp.float32)
    y = jnp.maximum(y * s_ref[...] + b_ref[...], 0.0)
    o_ref[0] = y.reshape(T, HWt, Cout).astype(o_ref.dtype)


def temporal_conv_bn_relu(x, w, scale, bias, tile_hw=512):
    # Temporal conv only mixes T, so we tile H*W freely (no halo needed).
    N, T, H, W, Cin = x.shape
    Cout = w.shape[-1]
    HW = H * W
    thw = _pick_tile(HW, tile_hw)
    x2 = x.reshape(N, T, HW, Cin)
    out = pl.pallas_call(
        _temporal_kernel,
        out_shape=jax.ShapeDtypeStruct((N, T, HW, Cout), jnp.bfloat16),
        grid=(N, HW // thw),
        in_specs=[
            pl.BlockSpec((1, T, thw, Cin), lambda n, j: (n, 0, j, 0)),
            pl.BlockSpec((3 * Cin, Cout), lambda n, j: (0, 0)),
            pl.BlockSpec((1, Cout), lambda n, j: (0, 0)),
            pl.BlockSpec((1, Cout), lambda n, j: (0, 0)),
        ],
        out_specs=pl.BlockSpec((1, T, thw, Cout), lambda n, j: (n, 0, j, 0)),
        compiler_params=pltpu.CompilerParams(
            dimension_semantics=("parallel", "parallel"),
            vmem_limit_bytes=_VMEM_LIMIT),
    )(x2, w, scale, bias)
    return out.reshape(N, T, H, W, Cout)


# --------- fused separable MaxPool3d(3,3,3, stride 1, pad 1) + 1x1x1 conv ---------
def _max3_along(v, axis):
    n = v.shape[axis]
    pad_shape = list(v.shape)
    pad_shape[axis] = 1
    p = jnp.full(pad_shape, -jnp.inf, v.dtype)
    fwd = jnp.concatenate([lax.slice_in_dim(v, 1, n, axis=axis), p], axis=axis)
    bwd = jnp.concatenate([p, lax.slice_in_dim(v, 0, n - 1, axis=axis)], axis=axis)
    return jnp.maximum(v, jnp.maximum(fwd, bwd))


def _pool_pw_kernel(x_ref, w_ref, s_ref, b_ref, o_ref):
    # x_ref: (1, T, H, W, Cin) bf16; w_ref: (Cin, Cout) bf16; o_ref: (1, T*H*W, Cout)
    _, T, H, W, Cin = x_ref.shape
    m = x_ref[0]
    m = _max3_along(m, 0)          # separable: T, then H, then W
    m = _max3_along(m, 1)
    m = _max3_along(m, 2)
    y = jnp.dot(m.reshape(T * H * W, Cin), w_ref[...],
                preferred_element_type=jnp.float32)
    y = jnp.maximum(y * s_ref[...] + b_ref[...], 0.0)
    o_ref[0] = y.astype(o_ref.dtype)


def maxpool_pointwise_conv_bn_relu(x, w, scale, bias):
    # TODO(synk): at production S3D shapes this whole-sample block should be
    # tiled over T/H with a 1-row halo instead of loading (T,H,W,C) at once.
    N, T, H, W, Cin = x.shape
    Cout = w.shape[-1]
    out = pl.pallas_call(
        _pool_pw_kernel,
        out_shape=jax.ShapeDtypeStruct((N, T * H * W, Cout), jnp.bfloat16),
        grid=(N,),
        in_specs=[
            pl.BlockSpec((1, T, H, W, Cin), lambda n: (n, 0, 0, 0, 0)),
            pl.BlockSpec((Cin, Cout), lambda n: (0, 0)),
            pl.BlockSpec((1, Cout), lambda n: (0, 0)),
            pl.BlockSpec((1, Cout), lambda n: (0, 0)),
        ],
        out_specs=pl.BlockSpec((1, T * H * W, Cout), lambda n: (n, 0, 0)),
        compiler_params=pltpu.CompilerParams(
            dimension_semantics=("parallel",), vmem_limit_bytes=_VMEM_LIMIT),
    )(x, w, scale, bias)
    return out.reshape(N, T, H, W, Cout)


# ------------------ fused SelfGating (all branches) + channel concat ------------------
def _chan_sum_kernel(x0_ref, x1_ref, x2_ref, x3_ref, o_ref):
    # xi: (1, tile, Ci) bf16; o_ref: (1, 1, Ctot) f32, accumulated over the tile axis.
    @pl.when(pl.program_id(1) == 0)
    def _():
        o_ref[...] = jnp.zeros_like(o_ref)

    s = jnp.concatenate(
        [jnp.sum(r[0].astype(jnp.float32), axis=0, keepdims=True)
         for r in (x0_ref, x1_ref, x2_ref, x3_ref)], axis=-1)
    o_ref[...] += s[None]


def _gate_apply_kernel(g_ref, x0_ref, x1_ref, x2_ref, x3_ref, o_ref, *, splits):
    # g_ref: (1, 1, Ctot) f32; xi: (1, tile, Ci) bf16; o_ref: (1, tile, Ctot) f32.
    g = g_ref[0]                                               # (1, Ctot)
    offs = [0]
    for c in splits:
        offs.append(offs[-1] + c)
    ys = []
    for idx, r in enumerate((x0_ref, x1_ref, x2_ref, x3_ref)):
        gi = g[:, offs[idx]:offs[idx + 1]]
        ys.append(r[0].astype(jnp.float32) * gi)
    o_ref[0] = jnp.concatenate(ys, axis=-1)                    # lane-dense store


def gated_concat(branches, fc_params, tile_thw=512):
    # branches: four (N,T,H,W,Ci) bf16 tensors; fc_params: four (W:(Ci,Ci), b:(1,Ci)) f32.
    N, T, H, W, _ = branches[0].shape
    THW = T * H * W
    splits = tuple(int(b.shape[-1]) for b in branches)
    Ctot = sum(splits)
    tile = _pick_tile(THW, tile_thw)
    flats = [b.reshape(N, THW, c) for b, c in zip(branches, splits)]

    # Pass 1: tiled per-sample channel sums (reduction over THW).
    sums = pl.pallas_call(
        _chan_sum_kernel,
        out_shape=jax.ShapeDtypeStruct((N, 1, Ctot), jnp.float32),
        grid=(N, THW // tile),
        in_specs=[pl.BlockSpec((1, tile, c), lambda n, t: (n, t, 0)) for c in splits],
        out_specs=pl.BlockSpec((1, 1, Ctot), lambda n, t: (n, 0, 0)),
        compiler_params=pltpu.CompilerParams(
            dimension_semantics=("parallel", "arbitrary")),
    )(*flats)

    # Tiny FC + sigmoid per branch in plain JAX ((N, Ci) matmuls).
    means = sums[:, 0, :] / float(THW)                         # (N, Ctot) f32
    gates = []
    off = 0
    for (wfc, bfc), c in zip(fc_params, splits):
        gates.append(jax.nn.sigmoid(means[:, off:off + c] @ wfc + bfc))
        off += c
    gates = jnp.concatenate(gates, axis=-1)[:, None, :]        # (N, 1, Ctot) f32

    # Pass 2: tiled gate apply + channel concat into the final (lane-dense) output.
    out = pl.pallas_call(
        functools.partial(_gate_apply_kernel, splits=splits),
        out_shape=jax.ShapeDtypeStruct((N, THW, Ctot), jnp.float32),
        grid=(N, THW // tile),
        in_specs=([pl.BlockSpec((1, 1, Ctot), lambda n, t: (n, 0, 0))] +
                  [pl.BlockSpec((1, tile, c), lambda n, t: (n, t, 0)) for c in splits]),
        out_specs=pl.BlockSpec((1, tile, Ctot), lambda n, t: (n, t, 0)),
        compiler_params=pltpu.CompilerParams(
            dimension_semantics=("parallel", "parallel")),
    )(gates, *flats)
    return out.reshape(N, T, H, W, Ctot)


# --------------------------- parameters (synthetic) ---------------------------
def _fold_bn(gamma, beta, mean, var):
    scale = gamma / jnp.sqrt(var + BN_EPS)
    bias = beta - mean * scale
    return scale[None, :], bias[None, :]


def _make_conv_bn(key, wshape, cout):
    k1, k2, k3, k4, k5 = jax.random.split(key, 5)
    w = 0.1 * jax.random.normal(k1, wshape, jnp.float32)
    gamma = 1.0 + 0.1 * jax.random.normal(k2, (cout,), jnp.float32)
    beta = 0.1 * jax.random.normal(k3, (cout,), jnp.float32)
    mean = 0.1 * jax.random.normal(k4, (cout,), jnp.float32)
    var = jax.random.uniform(k5, (cout,), jnp.float32, 0.5, 1.5)
    s, b = _fold_bn(gamma, beta, mean, var)
    return w, s, b


def init_inception_params(key, input_dim, n0, n1a, n1b, n2a, n2b, n3b):
    keys = jax.random.split(key, 12)
    p = {}
    p["b0"] = _make_conv_bn(keys[0], (input_dim, n0), n0)
    p["b1a"] = _make_conv_bn(keys[1], (input_dim, n1a), n1a)
    p["b1b_s"] = _make_conv_bn(keys[2], (3, 3, n1a, n1b), n1b)
    p["b1b_t"] = _make_conv_bn(keys[3], (3, n1b, n1b), n1b)
    p["b2a"] = _make_conv_bn(keys[4], (input_dim, n2a), n2a)
    p["b2b_s"] = _make_conv_bn(keys[5], (3, 3, n2a, n2b), n2b)
    p["b2b_t"] = _make_conv_bn(keys[6], (3, n2b, n2b), n2b)
    p["b3b"] = _make_conv_bn(keys[7], (input_dim, n3b), n3b)

    def _fc(k, c):
        k1, k2 = jax.random.split(k)
        return (0.1 * jax.random.normal(k1, (c, c), jnp.float32),
                0.1 * jax.random.normal(k2, (1, c), jnp.float32))

    p["g0"] = _fc(keys[8], n0)
    p["g1"] = _fc(keys[9], n1b)
    p["g2"] = _fc(keys[10], n2b)
    p["g3"] = _fc(keys[11], n3b)
    return p


# ------------------------------ InceptionBlock ------------------------------
def inception_block(x_ncdhw, params, gating=True):
    # x_ncdhw: (N, C, T, H, W) like PyTorch; internally channels-last bf16.
    x = jnp.transpose(x_ncdhw, (0, 2, 3, 4, 1)).astype(jnp.bfloat16)   # (N,T,H,W,C)

    # ---- fused 1x1x1 convs over the shared input (b0 | b1a | b2a) ----
    w0, s0, bb0 = params["b0"]
    w1a, s1a, bb1a = params["b1a"]
    w2a, s2a, bb2a = params["b2a"]
    c0, c1a, c2a = w0.shape[1], w1a.shape[1], w2a.shape[1]
    pw_w = jnp.concatenate([w0, w1a, w2a], axis=1).astype(jnp.bfloat16)
    pw_s = jnp.concatenate([s0, s1a, s2a], axis=1)
    pw_b = jnp.concatenate([bb0, bb1a, bb2a], axis=1)
    b0, b1, b2 = fused_pointwise_conv_bn_relu(x, pw_w, pw_s, pw_b, (c0, c1a, c2a))

    # ---- branch 1: separable 3x3x3 ----
    ws, ss, bs = params["b1b_s"]
    b1 = spatial_conv_bn_relu(b1, ws.reshape(-1, ws.shape[-1]).astype(jnp.bfloat16), ss, bs)
    wt, st, bt = params["b1b_t"]
    b1 = temporal_conv_bn_relu(b1, wt.reshape(-1, wt.shape[-1]).astype(jnp.bfloat16), st, bt)

    # ---- branch 2: separable 3x3x3 ----
    ws, ss, bs = params["b2b_s"]
    b2 = spatial_conv_bn_relu(b2, ws.reshape(-1, ws.shape[-1]).astype(jnp.bfloat16), ss, bs)
    wt, st, bt = params["b2b_t"]
    b2 = temporal_conv_bn_relu(b2, wt.reshape(-1, wt.shape[-1]).astype(jnp.bfloat16), st, bt)

    # ---- branch 3: fused separable maxpool + 1x1x1 conv ----
    w3, s3, bb3 = params["b3b"]
    b3 = maxpool_pointwise_conv_bn_relu(x, w3.astype(jnp.bfloat16), s3, bb3)

    if gating:
        out = gated_concat([b0, b1, b2, b3],
                           [params["g0"], params["g1"], params["g2"], params["g3"]])
    else:
        out = jnp.concatenate([b0, b1, b2, b3], axis=-1).astype(jnp.float32)

    return jnp.transpose(out, (0, 4, 1, 2, 3))                 # back to (N, C, T, H, W)


if __name__ == "__main__":
    key = jax.random.PRNGKey(0)
    kx, kp = jax.random.split(key)

    N, C, T, H, W = 2, 4, 4, 8, 8
    n0, n1a, n1b, n2a, n2b, n3b = 8, 4, 8, 4, 8, 8

    x = jax.random.normal(kx, (N, C, T, H, W), jnp.float32)
    params = init_inception_params(kp, C, n0, n1a, n1b, n2a, n2b, n3b)

    fwd = jax.jit(functools.partial(inception_block, gating=True))
    out = fwd(x, params)
    out = jax.block_until_ready(out)

    expected_cout = n0 + n1b + n2b + n3b
    assert out.shape == (N, expected_cout, T, H, W), out.shape
    assert bool(jnp.all(jnp.isfinite(out)))
    print("KERNEL_OK")
</pallas_src>

<mosaic_0001>
module attributes {stable_mosaic.version = 11 : i64} {
  func.func @_pool_pw_kernel(%arg0: i32, %arg1: memref<1x4x8x8x4xbf16, #tpu.memory_space<vmem>>, %arg2: memref<4x8xbf16, #tpu.memory_space<vmem>>, %arg3: memref<1x8xf32, #tpu.memory_space<vmem>>, %arg4: memref<1x8xf32, #tpu.memory_space<vmem>>, %arg5: memref<1x256x8xbf16, #tpu.memory_space<vmem>>) attributes {dimension_semantics = [#tpu.dimension_semantics<parallel>], iteration_bounds = array<i64: 2>, scalar_prefetch = 0 : i64, scratch_operands = 0 : i64, tpu.core_type = #tpu.core_type<tc>, window_params = [{transform_indices = @transform_0, window_bounds = array<i64: 1, 4, 8, 8, 4>}, {pipeline_mode = #tpu.pipeline_mode<synchronous>, transform_indices = @transform_1, window_bounds = array<i64: 4, 8>}, {pipeline_mode = #tpu.pipeline_mode<synchronous>, transform_indices = @transform_2, window_bounds = array<i64: 1, 8>}, {pipeline_mode = #tpu.pipeline_mode<synchronous>, transform_indices = @transform_3, window_bounds = array<i64: 1, 8>}, {transform_indices = @transform_4, window_bounds = array<i64: 1, 256, 8>}]} {
    %c0 = arith.constant 0 : index
    %c0_0 = arith.constant 0 : index
    %c0_1 = arith.constant 0 : index
    %c0_2 = arith.constant 0 : index
    %c0_3 = arith.constant 0 : index
    %0 = vector.load %arg1[%c0, %c0_0, %c0_1, %c0_2, %c0_3] : memref<1x4x8x8x4xbf16, #tpu.memory_space<vmem>>, vector<1x4x8x8x4xbf16>
    %1 = vector.shape_cast %0 : vector<1x4x8x8x4xbf16> to vector<4x8x8x4xbf16>
    %cst = arith.constant 0xFF80 : bf16
    %2 = vector.broadcast %cst : bf16 to vector<1x8x8x4xbf16>
    %3 = vector.extract_strided_slice %1 {offsets = [1, 0, 0, 0], sizes = [3, 8, 8, 4], strides = [1, 1, 1, 1]} : vector<4x8x8x4xbf16> to vector<3x8x8x4xbf16>
    %4 = tpu.concatenate %3, %2 in 0 : vector<3x8x8x4xbf16>, vector<1x8x8x4xbf16> -> vector<4x8x8x4xbf16>
    %5 = vector.extract_strided_slice %1 {offsets = [0, 0, 0, 0], sizes = [3, 8, 8, 4], strides = [1, 1, 1, 1]} : vector<4x8x8x4xbf16> to vector<3x8x8x4xbf16>
    %6 = tpu.concatenate %2, %5 in 0 : vector<1x8x8x4xbf16>, vector<3x8x8x4xbf16> -> vector<4x8x8x4xbf16>
    %7 = arith.maximumf %4, %6 : vector<4x8x8x4xbf16>
    %8 = arith.maximumf %1, %7 : vector<4x8x8x4xbf16>
    %cst_4 = arith.constant 0xFF80 : bf16
    %9 = vector.broadcast %cst_4 : bf16 to vector<4x1x8x4xbf16>
    %10 = vector.extract_strided_slice %8 {offsets = [0, 1, 0, 0], sizes = [4, 7, 8, 4], strides = [1, 1, 1, 1]} : vector<4x8x8x4xbf16> to vector<4x7x8x4xbf16>
    %11 = tpu.concatenate %10, %9 in 1 : vector<4x7x8x4xbf16>, vector<4x1x8x4xbf16> -> vector<4x8x8x4xbf16>
    %12 = vector.extract_strided_slice %8 {offsets = [0, 0, 0, 0], sizes = [4, 7, 8, 4], strides = [1, 1, 1, 1]} : vector<4x8x8x4xbf16> to vector<4x7x8x4xbf16>
    %13 = tpu.concatenate %9, %12 in 1 : vector<4x1x8x4xbf16>, vector<4x7x8x4xbf16> -> vector<4x8x8x4xbf16>
    %14 = arith.maximumf %11, %13 : vector<4x8x8x4xbf16>
    %15 = arith.maximumf %8, %14 : vector<4x8x8x4xbf16>
    %cst_5 = arith.constant 0xFF80 : bf16
    %16 = vector.broadcast %cst_5 : bf16 to vector<4x8x1x4xbf16>
    %17 = vector.extract_strided_slice %15 {offsets = [0, 0, 1, 0], sizes = [4, 8, 7, 4], strides = [1, 1, 1, 1]} : vector<4x8x8x4xbf16> to vector<4x8x7x4xbf16>
    %18 = tpu.concatenate %17, %16 in 2 : vector<4x8x7x4xbf16>, vector<4x8x1x4xbf16> -> vector<4x8x8x4xbf16>
    %19 = vector.extract_strided_slice %15 {offsets = [0, 0, 0, 0], sizes = [4, 8, 7, 4], strides = [1, 1, 1, 1]} : vector<4x8x8x4xbf16> to vector<4x8x7x4xbf16>
    %20 = tpu.concatenate %16, %19 in 2 : vector<4x8x1x4xbf16>, vector<4x8x7x4xbf16> -> vector<4x8x8x4xbf16>
    %21 = arith.maximumf %18, %20 : vector<4x8x8x4xbf16>
    %22 = arith.maximumf %15, %21 : vector<4x8x8x4xbf16>
    %23 = vector.shape_cast %22 : vector<4x8x8x4xbf16> to vector<256x4xbf16>
    %c0_6 = arith.constant 0 : index
    %c0_7 = arith.constant 0 : index
    %24 = vector.load %arg2[%c0_6, %c0_7] : memref<4x8xbf16, #tpu.memory_space<vmem>>, vector<4x8xbf16>
    %cst_8 = arith.constant dense<0.000000e+00> : vector<256x8xf32>
    %25 = tpu.matmul %23, %24, %cst_8 {dimension_numbers = #tpu.dot_dimension_numbers<[1], [0], [0], [1], [0, 0, 1, 1], [], []>} : vector<256x4xbf16>, vector<4x8xbf16>, vector<256x8xf32> -> vector<256x8xf32>
    %c0_9 = arith.constant 0 : index
    %c0_10 = arith.constant 0 : index
    %26 = vector.load %arg3[%c0_9, %c0_10] : memref<1x8xf32, #tpu.memory_space<vmem>>, vector<1x8xf32>
    %27 = vector.broadcast %26 : vector<1x8xf32> to vector<256x8xf32>
    %28 = arith.mulf %25, %27 : vector<256x8xf32>
    %c0_11 = arith.constant 0 : index
    %c0_12 = arith.constant 0 : index
    %29 = vector.load %arg4[%c0_11, %c0_12] : memref<1x8xf32, #tpu.memory_space<vmem>>, vector<1x8xf32>
    %30 = vector.broadcast %29 : vector<1x8xf32> to vector<256x8xf32>
    %31 = arith.addf %28, %30 : vector<256x8xf32>
    %cst_13 = arith.constant 0.000000e+00 : f32
    %32 = vector.broadcast %cst_13 : f32 to vector<256x8xf32>
    %33 = arith.maximumf %31, %32 : vector<256x8xf32>
    %34 = arith.truncf %33 : vector<256x8xf32> to vector<256x8xbf16>
    %c0_14 = arith.constant 0 : index
    %c0_15 = arith.constant 0 : index
    %c0_16 = arith.constant 0 : index
    %35 = vector.load %arg5[%c0_14, %c0_15, %c0_16] : memref<1x256x8xbf16, #tpu.memory_space<vmem>>, vector<1x256x8xbf16>
    %36 = vector.shape_cast %35 : vector<1x256x8xbf16> to vector<256x8xbf16>
    %37 = vector.shape_cast %34 : vector<256x8xbf16> to vector<1x256x8xbf16>
    tpu.vector_store %arg5[%c0_14, %c0_15, %c0_16], %37 {strides = array<i32>} : memref<1x256x8xbf16, #tpu.memory_space<vmem>>, vector<1x256x8xbf16>,
    return
  }
  func.func @transform_0(%arg0: i32) -> (i32, i32, i32, i32, i32) {
    %c0_i32 = arith.constant 0 : i32
    %c0_i32_0 = arith.constant 0 : i32
    %c0_i32_1 = arith.constant 0 : i32
    %c0_i32_2 = arith.constant 0 : i32
    %c0_i32_3 = arith.constant 0 : i32
    return %arg0, %c0_i32, %c0_i32_0, %c0_i32_1, %c0_i32_2 : i32, i32, i32, i32, i32
  }
  func.func @transform_1(%arg0: i32) -> (i32, i32) {
    %c0_i32 = arith.constant 0 : i32
    %c0_i32_0 = arith.constant 0 : i32
    %c0_i32_1 = arith.constant 0 : i32
    return %c0_i32, %c0_i32_0 : i32, i32
  }
  func.func @transform_2(%arg0: i32) -> (i32, i32) {
    %c0_i32 = arith.constant 0 : i32
    %c0_i32_0 = arith.constant 0 : i32
    %c0_i32_1 = arith.constant 0 : i32
    return %c0_i32, %c0_i32_0 : i32, i32
  }
  func.func @transform_3(%arg0: i32) -> (i32, i32) {
    %c0_i32 = arith.constant 0 : i32
    %c0_i32_0 = arith.constant 0 : i32
    %c0_i32_1 = arith.constant 0 : i32
    return %c0_i32, %c0_i32_0 : i32, i32
  }
  func.func @transform_4(%arg0: i32) -> (i32, i32, i32) {
    %c0_i32 = arith.constant 0 : i32
    %c0_i32_0 = arith.constant 0 : i32
    %c0_i32_1 = arith.constant 0 : i32
    return %arg0, %c0_i32, %c0_i32_0 : i32, i32, i32
  }
}

module attributes {stable_mosaic.version = 11 : i64} {
  func.func @_fused_pw_kernel(%arg0: i32, %arg1: memref<512x4xbf16, #tpu.memory_space<vmem>>, %arg2: memref<4x16xbf16, #tpu.memory_space<vmem>>, %arg3: memref<1x16xf32, #tpu.memory_space<vmem>>, %arg4: memref<1x16xf32, #tpu.memory_space<vmem>>, %arg5: memref<512x8xbf16, #tpu.memory_space<vmem>>, %arg6: memref<512x4xbf16, #tpu.memory_space<vmem>>, %arg7: memref<512x4xbf16, #tpu.memory_space<vmem>>) attributes {dimension_semantics = [#tpu.dimension_semantics<parallel>], iteration_bounds = array<i64: 1>, scalar_prefetch = 0 : i64, scratch_operands = 0 : i64, tpu.core_type = #tpu.core_type<tc>, window_params = [{transform_indices = @transform_0, window_bounds = array<i64: 512, 4>}, {pipeline_mode = #tpu.pipeline_mode<synchronous>, transform_indices = @transform_1, window_bounds = array<i64: 4, 16>}, {pipeline_mode = #tpu.pipeline_mode<synchronous>, transform_indices = @transform_2, window_bounds = array<i64: 1, 16>}, {pipeline_mode = #tpu.pipeline_mode<synchronous>, transform_indices = @transform_3, window_bounds = array<i64: 1, 16>}, {transform_indices = @transform_4, window_bounds = array<i64: 512, 8>}, {transform_indices = @transform_5, window_bounds = array<i64: 512, 4>}, {transform_indices = @transform_6, window_bounds = array<i64: 512, 4>}]} {
    %c0 = arith.constant 0 : index
    %c0_0 = arith.constant 0 : index
    %0 = vector.load %arg1[%c0, %c0_0] : memref<512x4xbf16, #tpu.memory_space<vmem>>, vector<512x4xbf16>
    %c0_1 = arith.constant 0 : index
    %c0_2 = arith.constant 0 : index
    %1 = vector.load %arg2[%c0_1, %c0_2] : memref<4x16xbf16, #tpu.memory_space<vmem>>, vector<4x16xbf16>
    %cst = arith.constant dense<0.000000e+00> : vector<512x16xf32>
    %2 = tpu.matmul %0, %1, %cst {dimension_numbers = #tpu.dot_dimension_numbers<[1], [0], [0], [1], [0, 0, 1, 1], [], []>} : vector<512x4xbf16>, vector<4x16xbf16>, vector<512x16xf32> -> vector<512x16xf32>
    %c0_3 = arith.constant 0 : index
    %c0_4 = arith.constant 0 : index
    %3 = vector.load %arg3[%c0_3, %c0_4] : memref<1x16xf32, #tpu.memory_space<vmem>>, vector<1x16xf32>
    %4 = vector.broadcast %3 : vector<1x16xf32> to vector<512x16xf32>
    %5 = arith.mulf %2, %4 : vector<512x16xf32>
    %c0_5 = arith.constant 0 : index
    %c0_6 = arith.constant 0 : index
    %6 = vector.load %arg4[%c0_5, %c0_6] : memref<1x16xf32, #tpu.memory_space<vmem>>, vector<1x16xf32>
    %7 = vector.broadcast %6 : vector<1x16xf32> to vector<512x16xf32>
    %8 = arith.addf %5, %7 : vector<512x16xf32>
    %cst_7 = arith.constant 0.000000e+00 : f32
    %9 = vector.broadcast %cst_7 : f32 to vector<512x16xf32>
    %10 = arith.maximumf %8, %9 : vector<512x16xf32>
    %11 = vector.extract_strided_slice %10 {offsets = [0, 0], sizes = [512, 8], strides = [1, 1]} : vector<512x16xf32> to vector<512x8xf32>
    %12 = arith.truncf %11 : vector<512x8xf32> to vector<512x8xbf16>
    %c0_8 = arith.constant 0 : index
    %c0_9 = arith.constant 0 : index
    %13 = vector.load %arg5[%c0_8, %c0_9] : memref<512x8xbf16, #tpu.memory_space<vmem>>, vector<512x8xbf16>
    tpu.vector_store %arg5[%c0_8, %c0_9], %12 {strides = array<i32>} : memref<512x8xbf16, #tpu.memory_space<vmem>>, vector<512x8xbf16>,
    %14 = vector.extract_strided_slice %10 {offsets = [0, 8], sizes = [512, 4], strides = [1, 1]} : vector<512x16xf32> to vector<512x4xf32>
    %15 = arith.truncf %14 : vector<512x4xf32> to vector<512x4xbf16>
    %c0_10 = arith.constant 0 : index
    %c0_11 = arith.constant 0 : index
    %16 = vector.load %arg6[%c0_10, %c0_11] : memref<512x4xbf16, #tpu.memory_space<vmem>>, vector<512x4xbf16>
    tpu.vector_store %arg6[%c0_10, %c0_11], %15 {strides = array<i32>} : memref<512x4xbf16, #tpu.memory_space<vmem>>, vector<512x4xbf16>,
    %17 = vector.extract_strided_slice %10 {offsets = [0, 12], sizes = [512, 4], strides = [1, 1]} : vector<512x16xf32> to vector<512x4xf32>
    %18 = arith.truncf %17 : vector<512x4xf32> to vector<512x4xbf16>
    %c0_12 = arith.constant 0 : index
    %c0_13 = arith.constant 0 : index
    %19 = vector.load %arg7[%c0_12, %c0_13] : memref<512x4xbf16, #tpu.memory_space<vmem>>, vector<512x4xbf16>
    tpu.vector_store %arg7[%c0_12, %c0_13], %18 {strides = array<i32>} : memref<512x4xbf16, #tpu.memory_space<vmem>>, vector<512x4xbf16>,
    return
  }
  func.func @transform_0(%arg0: i32) -> (i32, i32) {
    %c0_i32 = arith.constant 0 : i32
    %c0_i32_0 = arith.constant 0 : i32
    return %arg0, %c0_i32 : i32, i32
  }
  func.func @transform_1(%arg0: i32) -> (i32, i32) {
    %c0_i32 = arith.constant 0 : i32
    %c0_i32_0 = arith.constant 0 : i32
    %c0_i32_1 = arith.constant 0 : i32
    return %c0_i32, %c0_i32_0 : i32, i32
  }
  func.func @transform_2(%arg0: i32) -> (i32, i32) {
    %c0_i32 = arith.constant 0 : i32
    %c0_i32_0 = arith.constant 0 : i32
    %c0_i32_1 = arith.constant 0 : i32
    return %c0_i32, %c0_i32_0 : i32, i32
  }
  func.func @transform_3(%arg0: i32) -> (i32, i32) {
    %c0_i32 = arith.constant 0 : i32
    %c0_i32_0 = arith.constant 0 : i32
    %c0_i32_1 = arith.constant 0 : i32
    return %c0_i32, %c0_i32_0 : i32, i32
  }
  func.func @transform_4(%arg0: i32) -> (i32, i32) {
    %c0_i32 = arith.constant 0 : i32
    %c0_i32_0 = arith.constant 0 : i32
    return %arg0, %c0_i32 : i32, i32
  }
  func.func @transform_5(%arg0: i32) -> (i32, i32) {
    %c0_i32 = arith.constant 0 : i32
    %c0_i32_0 = arith.constant 0 : i32
    return %arg0, %c0_i32 : i32, i32
  }
  func.func @transform_6(%arg0: i32) -> (i32, i32) {
    %c0_i32 = arith.constant 0 : i32
    %c0_i32_0 = arith.constant 0 : i32
    return %arg0, %c0_i32 : i32, i32
  }
}

module attributes {stable_mosaic.version = 11 : i64} {
  func.func @_spatial_kernel(%arg0: i32, %arg1: memref<1x8x8x4xbf16, #tpu.memory_space<vmem>>, %arg2: memref<36x8xbf16, #tpu.memory_space<vmem>>, %arg3: memref<1x8xf32, #tpu.memory_space<vmem>>, %arg4: memref<1x8xf32, #tpu.memory_space<vmem>>, %arg5: memref<1x8x8x8xbf16, #tpu.memory_space<vmem>>) attributes {dimension_semantics = [#tpu.dimension_semantics<parallel>], iteration_bounds = array<i64: 8>, scalar_prefetch = 0 : i64, scratch_operands = 0 : i64, tpu.core_type = #tpu.core_type<tc>, window_params = [{transform_indices = @transform_0, window_bounds = array<i64: 1, 8, 8, 4>}, {pipeline_mode = #tpu.pipeline_mode<synchronous>, transform_indices = @transform_1, window_bounds = array<i64: 36, 8>}, {pipeline_mode = #tpu.pipeline_mode<synchronous>, transform_indices = @transform_2, window_bounds = array<i64: 1, 8>}, {pipeline_mode = #tpu.pipeline_mode<synchronous>, transform_indices = @transform_3, window_bounds = array<i64: 1, 8>}, {transform_indices = @transform_4, window_bounds = array<i64: 1, 8, 8, 8>}]} {
    %c0 = arith.constant 0 : index
    %c0_0 = arith.constant 0 : index
    %c0_1 = arith.constant 0 : index
    %c0_2 = arith.constant 0 : index
    %0 = vector.load %arg1[%c0, %c0_0, %c0_1, %c0_2] : memref<1x8x8x4xbf16, #tpu.memory_space<vmem>>, vector<1x8x8x4xbf16>
    %1 = vector.shape_cast %0 : vector<1x8x8x4xbf16> to vector<8x8x4xbf16>
    %cst = arith.constant 0.000000e+00 : bf16
    %2 = vector.broadcast %cst : bf16 to vector<1x8x4xbf16>
    %3 = tpu.concatenate %2, %1, %2 in 0 : vector<1x8x4xbf16>, vector<8x8x4xbf16>, vector<1x8x4xbf16> -> vector<10x8x4xbf16>
    %cst_3 = arith.constant 0.000000e+00 : bf16
    %4 = vector.broadcast %cst_3 : bf16 to vector<10x1x4xbf16>
    %5 = tpu.concatenate %4, %3, %4 in 1 : vector<10x1x4xbf16>, vector<10x8x4xbf16>, vector<10x1x4xbf16> -> vector<10x10x4xbf16>
    %6 = vector.extract_strided_slice %5 {offsets = [0, 0, 0], sizes = [8, 8, 4], strides = [1, 1, 1]} : vector<10x10x4xbf16> to vector<8x8x4xbf16>
    %7 = vector.extract_strided_slice %5 {offsets = [0, 1, 0], sizes = [8, 8, 4], strides = [1, 1, 1]} : vector<10x10x4xbf16> to vector<8x8x4xbf16>
    %8 = vector.extract_strided_slice %5 {offsets = [0, 2, 0], sizes = [8, 8, 4], strides = [1, 1, 1]} : vector<10x10x4xbf16> to vector<8x8x4xbf16>
    %9 = vector.extract_strided_slice %5 {offsets = [1, 0, 0], sizes = [8, 8, 4], strides = [1, 1, 1]} : vector<10x10x4xbf16> to vector<8x8x4xbf16>
    %10 = vector.extract_strided_slice %5 {offsets = [1, 1, 0], sizes = [8, 8, 4], strides = [1, 1, 1]} : vector<10x10x4xbf16> to vector<8x8x4xbf16>
    %11 = vector.extract_strided_slice %5 {offsets = [1, 2, 0], sizes = [8, 8, 4], strides = [1, 1, 1]} : vector<10x10x4xbf16> to vector<8x8x4xbf16>
    %12 = vector.extract_strided_slice %5 {offsets = [2, 0, 0], sizes = [8, 8, 4], strides = [1, 1, 1]} : vector<10x10x4xbf16> to vector<8x8x4xbf16>
    %13 = vector.extract_strided_slice %5 {offsets = [2, 1, 0], sizes = [8, 8, 4], strides = [1, 1, 1]} : vector<10x10x4xbf16> to vector<8x8x4xbf16>
    %14 = vector.extract_strided_slice %5 {offsets = [2, 2, 0], sizes = [8, 8, 4], strides = [1, 1, 1]} : vector<10x10x4xbf16> to vector<8x8x4xbf16>
    %15 = tpu.concatenate %6, %7, %8, %9, %10, %11, %12, %13, %14 in 2 : vector<8x8x4xbf16>, vector<8x8x4xbf16>, vector<8x8x4xbf16>, vector<8x8x4xbf16>, vector<8x8x4xbf16>, vector<8x8x4xbf16>, vector<8x8x4xbf16>, vector<8x8x4xbf16>, vector<8x8x4xbf16> -> vector<8x8x36xbf16>
    %16 = vector.shape_cast %15 : vector<8x8x36xbf16> to vector<64x36xbf16>
    %c0_4 = arith.constant 0 : index
    %c0_5 = arith.constant 0 : index
    %17 = vector.load %arg2[%c0_4, %c0_5] : memref<36x8xbf16, #tpu.memory_space<vmem>>, vector<36x8xbf16>
    %cst_6 = arith.constant dense<0.000000e+00> : vector<64x8xf32>
    %18 = tpu.matmul %16, %17, %cst_6 {dimension_numbers = #tpu.dot_dimension_numbers<[1], [0], [0], [1], [0, 0, 1, 1], [], []>} : vector<64x36xbf16>, vector<36x8xbf16>, vector<64x8xf32> -> vector<64x8xf32>
    %c0_7 = arith.constant 0 : index
    %c0_8 = arith.constant 0 : index
    %19 = vector.load %arg3[%c0_7, %c0_8] : memref<1x8xf32, #tpu.memory_space<vmem>>, vector<1x8xf32>
    %20 = vector.broadcast %19 : vector<1x8xf32> to vector<64x8xf32>
    %21 = arith.mulf %18, %20 : vector<64x8xf32>
    %c0_9 = arith.constant 0 : index
    %c0_10 = arith.constant 0 : index
    %22 = vector.load %arg4[%c0_9, %c0_10] : memref<1x8xf32, #tpu.memory_space<vmem>>, vector<1x8xf32>
    %23 = vector.broadcast %22 : vector<1x8xf32> to vector<64x8xf32>
    %24 = arith.addf %21, %23 : vector<64x8xf32>
    %cst_11 = arith.constant 0.000000e+00 : f32
    %25 = vector.broadcast %cst_11 : f32 to vector<64x8xf32>
    %26 = arith.maximumf %24, %25 : vector<64x8xf32>
    %27 = vector.shape_cast %26 : vector<64x8xf32> to vector<8x8x8xf32>
    %28 = arith.truncf %27 : vector<8x8x8xf32> to vector<8x8x8xbf16>
    %c0_12 = arith.constant 0 : index
    %c0_13 = arith.constant 0 : index
    %c0_14 = arith.constant 0 : index
    %c0_15 = arith.constant 0 : index
    %29 = vector.load %arg5[%c0_12, %c0_13, %c0_14, %c0_15] : memref<1x8x8x8xbf16, #tpu.memory_space<vmem>>, vector<1x8x8x8xbf16>
    %30 = vector.shape_cast %29 : vector<1x8x8x8xbf16> to vector<8x8x8xbf16>
    %31 = vector.shape_cast %28 : vector<8x8x8xbf16> to vector<1x8x8x8xbf16>
    tpu.vector_store %arg5[%c0_12, %c0_13, %c0_14, %c0_15], %31 {strides = array<i32>} : memref<1x8x8x8xbf16, #tpu.memory_space<vmem>>, vector<1x8x8x8xbf16>,
    return
  }
  func.func @transform_0(%arg0: i32) -> (i32, i32, i32, i32) {
    %c0_i32 = arith.constant 0 : i32
    %c0_i32_0 = arith.constant 0 : i32
    %c0_i32_1 = arith.constant 0 : i32
    %c0_i32_2 = arith.constant 0 : i32
    return %arg0, %c0_i32, %c0_i32_0, %c0_i32_1 : i32, i32, i32, i32
  }
  func.func @transform_1(%arg0: i32) -> (i32, i32) {
    %c0_i32 = arith.constant 0 : i32
    %c0_i32_0 = arith.constant 0 : i32
    %c0_i32_1 = arith.constant 0 : i32
    return %c0_i32, %c0_i32_0 : i32, i32
  }
  func.func @transform_2(%arg0: i32) -> (i32, i32) {
    %c0_i32 = arith.constant 0 : i32
    %c0_i32_0 = arith.constant 0 : i32
    %c0_i32_1 = arith.constant 0 : i32
    return %c0_i32, %c0_i32_0 : i32, i32
  }
  func.func @transform_3(%arg0: i32) -> (i32, i32) {
    %c0_i32 = arith.constant 0 : i32
    %c0_i32_0 = arith.constant 0 : i32
    %c0_i32_1 = arith.constant 0 : i32
    return %c0_i32, %c0_i32_0 : i32, i32
  }
  func.func @transform_4(%arg0: i32) -> (i32, i32, i32, i32) {
    %c0_i32 = arith.constant 0 : i32
    %c0_i32_0 = arith.constant 0 : i32
    %c0_i32_1 = arith.constant 0 : i32
    %c0_i32_2 = arith.constant 0 : i32
    return %arg0, %c0_i32, %c0_i32_0, %c0_i32_1 : i32, i32, i32, i32
  }
}

module attributes {stable_mosaic.version = 11 : i64} {
  func.func @_temporal_kernel(%arg0: i32, %arg1: i32, %arg2: memref<1x4x64x8xbf16, #tpu.memory_space<vmem>>, %arg3: memref<24x8xbf16, #tpu.memory_space<vmem>>, %arg4: memref<1x8xf32, #tpu.memory_space<vmem>>, %arg5: memref<1x8xf32, #tpu.memory_space<vmem>>, %arg6: memref<1x4x64x8xbf16, #tpu.memory_space<vmem>>) attributes {dimension_semantics = [#tpu.dimension_semantics<parallel>, #tpu.dimension_semantics<parallel>], iteration_bounds = array<i64: 2, 1>, scalar_prefetch = 0 : i64, scratch_operands = 0 : i64, tpu.core_type = #tpu.core_type<tc>, window_params = [{transform_indices = @transform_0, window_bounds = array<i64: 1, 4, 64, 8>}, {pipeline_mode = #tpu.pipeline_mode<synchronous>, transform_indices = @transform_1, window_bounds = array<i64: 24, 8>}, {pipeline_mode = #tpu.pipeline_mode<synchronous>, transform_indices = @transform_2, window_bounds = array<i64: 1, 8>}, {pipeline_mode = #tpu.pipeline_mode<synchronous>, transform_indices = @transform_3, window_bounds = array<i64: 1, 8>}, {transform_indices = @transform_4, window_bounds = array<i64: 1, 4, 64, 8>}]} {
    %c0 = arith.constant 0 : index
    %c0_0 = arith.constant 0 : index
    %c0_1 = arith.constant 0 : index
    %c0_2 = arith.constant 0 : index
    %0 = vector.load %arg2[%c0, %c0_0, %c0_1, %c0_2] : memref<1x4x64x8xbf16, #tpu.memory_space<vmem>>, vector<1x4x64x8xbf16>
    %1 = vector.shape_cast %0 : vector<1x4x64x8xbf16> to vector<4x64x8xbf16>
    %cst = arith.constant 0.000000e+00 : bf16
    %2 = vector.broadcast %cst : bf16 to vector<1x64x8xbf16>
    %3 = tpu.concatenate %2, %1, %2 in 0 : vector<1x64x8xbf16>, vector<4x64x8xbf16>, vector<1x64x8xbf16> -> vector<6x64x8xbf16>
    %4 = vector.extract_strided_slice %3 {offsets = [0, 0, 0], sizes = [4, 64, 8], strides = [1, 1, 1]} : vector<6x64x8xbf16> to vector<4x64x8xbf16>
    %5 = vector.extract_strided_slice %3 {offsets = [1, 0, 0], sizes = [4, 64, 8], strides = [1, 1, 1]} : vector<6x64x8xbf16> to vector<4x64x8xbf16>
    %6 = vector.extract_strided_slice %3 {offsets = [2, 0, 0], sizes = [4, 64, 8], strides = [1, 1, 1]} : vector<6x64x8xbf16> to vector<4x64x8xbf16>
    %7 = tpu.concatenate %4, %5, %6 in 2 : vector<4x64x8xbf16>, vector<4x64x8xbf16>, vector<4x64x8xbf16> -> vector<4x64x24xbf16>
    %8 = vector.shape_cast %7 : vector<4x64x24xbf16> to vector<256x24xbf16>
    %c0_3 = arith.constant 0 : index
    %c0_4 = arith.constant 0 : index
    %9 = vector.load %arg3[%c0_3, %c0_4] : memref<24x8xbf16, #tpu.memory_space<vmem>>, vector<24x8xbf16>
    %cst_5 = arith.constant dense<0.000000e+00> : vector<256x8xf32>
    %10 = tpu.matmul %8, %9, %cst_5 {dimension_numbers = #tpu.dot_dimension_numbers<[1], [0], [0], [1], [0, 0, 1, 1], [], []>} : vector<256x24xbf16>, vector<24x8xbf16>, vector<256x8xf32> -> vector<256x8xf32>
    %c0_6 = arith.constant 0 : index
    %c0_7 = arith.constant 0 : index
    %11 = vector.load %arg4[%c0_6, %c0_7] : memref<1x8xf32, #tpu.memory_space<vmem>>, vector<1x8xf32>
    %12 = vector.broadcast %11 : vector<1x8xf32> to vector<256x8xf32>
    %13 = arith.mulf %10, %12 : vector<256x8xf32>
    %c0_8 = arith.constant 0 : index
    %c0_9 = arith.constant 0 : index
    %14 = vector.load %arg5[%c0_8, %c0_9] : memref<1x8xf32, #tpu.memory_space<vmem>>, vector<1x8xf32>
    %15 = vector.broadcast %14 : vector<1x8xf32> to vector<256x8xf32>
    %16 = arith.addf %13, %15 : vector<256x8xf32>
    %cst_10 = arith.constant 0.000000e+00 : f32
    %17 = vector.broadcast %cst_10 : f32 to vector<256x8xf32>
    %18 = arith.maximumf %16, %17 : vector<256x8xf32>
    %19 = vector.shape_cast %18 : vector<256x8xf32> to vector<4x64x8xf32>
    %20 = arith.truncf %19 : vector<4x64x8xf32> to vector<4x64x8xbf16>
    %c0_11 = arith.constant 0 : index
    %c0_12 = arith.constant 0 : index
    %c0_13 = arith.constant 0 : index
    %c0_14 = arith.constant 0 : index
    %21 = vector.load %arg6[%c0_11, %c0_12, %c0_13, %c0_14] : memref<1x4x64x8xbf16, #tpu.memory_space<vmem>>, vector<1x4x64x8xbf16>
    %22 = vector.shape_cast %21 : vector<1x4x64x8xbf16> to vector<4x64x8xbf16>
    %23 = vector.shape_cast %20 : vector<4x64x8xbf16> to vector<1x4x64x8xbf16>
    tpu.vector_store %arg6[%c0_11, %c0_12, %c0_13, %c0_14], %23 {strides = array<i32>} : memref<1x4x64x8xbf16, #tpu.memory_space<vmem>>, vector<1x4x64x8xbf16>,
    return
  }
  func.func @transform_0(%arg0: i32, %arg1: i32) -> (i32, i32, i32, i32) {
    %c0_i32 = arith.constant 0 : i32
    %c0_i32_0 = arith.constant 0 : i32
    %c0_i32_1 = arith.constant 0 : i32
    return %arg0, %c0_i32, %arg1, %c0_i32_0 : i32, i32, i32, i32
  }
  func.func @transform_1(%arg0: i32, %arg1: i32) -> (i32, i32) {
    %c0_i32 = arith.constant 0 : i32
    %c0_i32_0 = arith.constant 0 : i32
    %c0_i32_1 = arith.constant 0 : i32
    return %c0_i32, %c0_i32_0 : i32, i32
  }
  func.func @transform_2(%arg0: i32, %arg1: i32) -> (i32, i32) {
    %c0_i32 = arith.constant 0 : i32
    %c0_i32_0 = arith.constant 0 : i32
    %c0_i32_1 = arith.constant 0 : i32
    return %c0_i32, %c0_i32_0 : i32, i32
  }
  func.func @transform_3(%arg0: i32, %arg1: i32) -> (i32, i32) {
    %c0_i32 = arith.constant 0 : i32
    %c0_i32_0 = arith.constant 0 : i32
    %c0_i32_1 = arith.constant 0 : i32
    return %c0_i32, %c0_i32_0 : i32, i32
  }
  func.func @transform_4(%arg0: i32, %arg1: i32) -> (i32, i32, i32, i32) {
    %c0_i32 = arith.constant 0 : i32
    %c0_i32_0 = arith.constant 0 : i32
    %c0_i32_1 = arith.constant 0 : i32
    return %arg0, %c0_i32, %arg1, %c0_i32_0 : i32, i32, i32, i32
  }
}

module attributes {stable_mosaic.version = 11 : i64} {
  func.func @_chan_sum_kernel(%arg0: i32, %arg1: i32, %arg2: memref<1x256x8xbf16, #tpu.memory_space<vmem>>, %arg3: memref<1x256x8xbf16, #tpu.memory_space<vmem>>, %arg4: memref<1x256x8xbf16, #tpu.memory_space<vmem>>, %arg5: memref<1x256x8xbf16, #tpu.memory_space<vmem>>, %arg6: memref<1x1x32xf32, #tpu.memory_space<vmem>>) attributes {dimension_semantics = [#tpu.dimension_semantics<parallel>, #tpu.dimension_semantics<arbitrary>], iteration_bounds = array<i64: 2, 1>, scalar_prefetch = 0 : i64, scratch_operands = 0 : i64, tpu.core_type = #tpu.core_type<tc>, window_params = [{transform_indices = @transform_0, window_bounds = array<i64: 1, 256, 8>}, {transform_indices = @transform_1, window_bounds = array<i64: 1, 256, 8>}, {transform_indices = @transform_2, window_bounds = array<i64: 1, 256, 8>}, {transform_indices = @transform_3, window_bounds = array<i64: 1, 256, 8>}, {transform_indices = @transform_4, window_bounds = array<i64: 1, 1, 32>}]} {
    %c0_i32 = arith.constant 0 : i32
    %0 = arith.cmpi eq, %arg1, %c0_i32 : i32
    %1 = arith.extui %0 : i1 to i32
    %c0_i32_0 = arith.constant 0 : i32
    %2 = arith.cmpi ne, %1, %c0_i32_0 : i32
    scf.if %2 {
      %cst_21 = arith.constant 0.000000e+00 : f32
      %28 = vector.broadcast %cst_21 : f32 to vector<1x1x32xf32>
      %c0_22 = arith.constant 0 : index
      %c0_23 = arith.constant 0 : index
      %c0_24 = arith.constant 0 : index
      %29 = vector.load %arg6[%c0_22, %c0_23, %c0_24] : memref<1x1x32xf32, #tpu.memory_space<vmem>>, vector<1x1x32xf32>
      tpu.vector_store %arg6[%c0_22, %c0_23, %c0_24], %28 {strides = array<i32>} : memref<1x1x32xf32, #tpu.memory_space<vmem>>, vector<1x1x32xf32>,
    } else {
    }
    %c0 = arith.constant 0 : index
    %c0_1 = arith.constant 0 : index
    %c0_2 = arith.constant 0 : index
    %3 = vector.load %arg2[%c0, %c0_1, %c0_2] : memref<1x256x8xbf16, #tpu.memory_space<vmem>>, vector<1x256x8xbf16>
    %4 = vector.shape_cast %3 : vector<1x256x8xbf16> to vector<256x8xbf16>
    %5 = arith.extf %4 : vector<256x8xbf16> to vector<256x8xf32>
    %cst = arith.constant dense<0.000000e+00> : vector<8xf32>
    %6 = vector.multi_reduction <add>, %5, %cst [0] : vector<256x8xf32> to vector<8xf32>
    %7 = vector.shape_cast %6 : vector<8xf32> to vector<1x8xf32>
    %c0_3 = arith.constant 0 : index
    %c0_4 = arith.constant 0 : index
    %c0_5 = arith.constant 0 : index
    %8 = vector.load %arg3[%c0_3, %c0_4, %c0_5] : memref<1x256x8xbf16, #tpu.memory_space<vmem>>, vector<1x256x8xbf16>
    %9 = vector.shape_cast %8 : vector<1x256x8xbf16> to vector<256x8xbf16>
    %10 = arith.extf %9 : vector<256x8xbf16> to vector<256x8xf32>
    %cst_6 = arith.constant dense<0.000000e+00> : vector<8xf32>
    %11 = vector.multi_reduction <add>, %10, %cst_6 [0] : vector<256x8xf32> to vector<8xf32>
    %12 = vector.shape_cast %11 : vector<8xf32> to vector<1x8xf32>
    %c0_7 = arith.constant 0 : index
    %c0_8 = arith.constant 0 : index
    %c0_9 = arith.constant 0 : index
    %13 = vector.load %arg4[%c0_7, %c0_8, %c0_9] : memref<1x256x8xbf16, #tpu.memory_space<vmem>>, vector<1x256x8xbf16>
    %14 = vector.shape_cast %13 : vector<1x256x8xbf16> to vector<256x8xbf16>
    %15 = arith.extf %14 : vector<256x8xbf16> to vector<256x8xf32>
    %cst_10 = arith.constant dense<0.000000e+00> : vector<8xf32>
    %16 = vector.multi_reduction <add>, %15, %cst_10 [0] : vector<256x8xf32> to vector<8xf32>
    %17 = vector.shape_cast %16 : vector<8xf32> to vector<1x8xf32>
    %c0_11 = arith.constant 0 : index
    %c0_12 = arith.constant 0 : index
    %c0_13 = arith.constant 0 : index
    %18 = vector.load %arg5[%c0_11, %c0_12, %c0_13] : memref<1x256x8xbf16, #tpu.memory_space<vmem>>, vector<1x256x8xbf16>
    %19 = vector.shape_cast %18 : vector<1x256x8xbf16> to vector<256x8xbf16>
    %20 = arith.extf %19 : vector<256x8xbf16> to vector<256x8xf32>
    %cst_14 = arith.constant dense<0.000000e+00> : vector<8xf32>
    %21 = vector.multi_reduction <add>, %20, %cst_14 [0] : vector<256x8xf32> to vector<8xf32>
    %22 = vector.shape_cast %21 : vector<8xf32> to vector<1x8xf32>
    %23 = tpu.concatenate %7, %12, %17, %22 in 1 : vector<1x8xf32>, vector<1x8xf32>, vector<1x8xf32>, vector<1x8xf32> -> vector<1x32xf32>
    %c0_15 = arith.constant 0 : index
    %c0_16 = arith.constant 0 : index
    %c0_17 = arith.constant 0 : index
    %24 = vector.load %arg6[%c0_15, %c0_16, %c0_17] : memref<1x1x32xf32, #tpu.memory_space<vmem>>, vector<1x1x32xf32>
    %25 = vector.shape_cast %23 : vector<1x32xf32> to vector<1x1x32xf32>
    %26 = arith.addf %24, %25 : vector<1x1x32xf32>
    %c0_18 = arith.constant 0 : index
    %c0_19 = arith.constant 0 : index
    %c0_20 = arith.constant 0 : index
    %27 = vector.load %arg6[%c0_18, %c0_19, %c0_20] : memref<1x1x32xf32, #tpu.memory_space<vmem>>, vector<1x1x32xf32>
    tpu.vector_store %arg6[%c0_18, %c0_19, %c0_20], %26 {strides = array<i32>} : memref<1x1x32xf32, #tpu.memory_space<vmem>>, vector<1x1x32xf32>,
    return
  }
  func.func @transform_0(%arg0: i32, %arg1: i32) -> (i32, i32, i32) {
    %c0_i32 = arith.constant 0 : i32
    %c0_i32_0 = arith.constant 0 : i32
    return %arg0, %arg1, %c0_i32 : i32, i32, i32
  }
  func.func @transform_1(%arg0: i32, %arg1: i32) -> (i32, i32, i32) {
    %c0_i32 = arith.constant 0 : i32
    %c0_i32_0 = arith.constant 0 : i32
    return %arg0, %arg1, %c0_i32 : i32, i32, i32
  }
  func.func @transform_2(%arg0: i32, %arg1: i32) -> (i32, i32, i32) {
    %c0_i32 = arith.constant 0 : i32
    %c0_i32_0 = arith.constant 0 : i32
    return %arg0, %arg1, %c0_i32 : i32, i32, i32
  }
  func.func @transform_3(%arg0: i32, %arg1: i32) -> (i32, i32, i32) {
    %c0_i32 = arith.constant 0 : i32
    %c0_i32_0 = arith.constant 0 : i32
    return %arg0, %arg1, %c0_i32 : i32, i32, i32
  }
  func.func @transform_4(%arg0: i32, %arg1: i32) -> (i32, i32, i32) {
    %c0_i32 = arith.constant 0 : i32
    %c0_i32_0 = arith.constant 0 : i32
    %c0_i32_1 = arith.constant 0 : i32
    return %arg0, %c0_i32, %c0_i32_0 : i32, i32, i32
  }
}

module attributes {stable_mosaic.version = 11 : i64} {
  func.func @_gate_apply_kernel(%arg0: i32, %arg1: i32, %arg2: memref<1x1x32xf32, #tpu.memory_space<vmem>>, %arg3: memref<1x256x8xbf16, #tpu.memory_space<vmem>>, %arg4: memref<1x256x8xbf16, #tpu.memory_space<vmem>>, %arg5: memref<1x256x8xbf16, #tpu.memory_space<vmem>>, %arg6: memref<1x256x8xbf16, #tpu.memory_space<vmem>>, %arg7: memref<1x256x32xf32, #tpu.memory_space<vmem>>) attributes {dimension_semantics = [#tpu.dimension_semantics<parallel>, #tpu.dimension_semantics<parallel>], iteration_bounds = array<i64: 2, 1>, scalar_prefetch = 0 : i64, scratch_operands = 0 : i64, tpu.core_type = #tpu.core_type<tc>, window_params = [{transform_indices = @transform_0, window_bounds = array<i64: 1, 1, 32>}, {transform_indices = @transform_1, window_bounds = array<i64: 1, 256, 8>}, {transform_indices = @transform_2, window_bounds = array<i64: 1, 256, 8>}, {transform_indices = @transform_3, window_bounds = array<i64: 1, 256, 8>}, {transform_indices = @transform_4, window_bounds = array<i64: 1, 256, 8>}, {transform_indices = @transform_5, window_bounds = array<i64: 1, 256, 32>}]} {
    %c0 = arith.constant 0 : index
    %c0_0 = arith.constant 0 : index
    %c0_1 = arith.constant 0 : index
    %0 = vector.load %arg2[%c0, %c0_0, %c0_1] : memref<1x1x32xf32, #tpu.memory_space<vmem>>, vector<1x1x32xf32>
    %1 = vector.shape_cast %0 : vector<1x1x32xf32> to vector<1x32xf32>
    %2 = vector.extract_strided_slice %1 {offsets = [0, 0], sizes = [1, 8], strides = [1, 1]} : vector<1x32xf32> to vector<1x8xf32>
    %c0_2 = arith.constant 0 : index
    %c0_3 = arith.constant 0 : index
    %c0_4 = arith.constant 0 : index
    %3 = vector.load %arg3[%c0_2, %c0_3, %c0_4] : memref<1x256x8xbf16, #tpu.memory_space<vmem>>, vector<1x256x8xbf16>
    %4 = vector.shape_cast %3 : vector<1x256x8xbf16> to vector<256x8xbf16>
    %5 = arith.extf %4 : vector<256x8xbf16> to vector<256x8xf32>
    %6 = vector.broadcast %2 : vector<1x8xf32> to vector<256x8xf32>
    %7 = arith.mulf %5, %6 : vector<256x8xf32>
    %8 = vector.extract_strided_slice %1 {offsets = [0, 8], sizes = [1, 8], strides = [1, 1]} : vector<1x32xf32> to vector<1x8xf32>
    %c0_5 = arith.constant 0 : index
    %c0_6 = arith.constant 0 : index
    %c0_7 = arith.constant 0 : index
    %9 = vector.load %arg4[%c0_5, %c0_6, %c0_7] : memref<1x256x8xbf16, #tpu.memory_space<vmem>>, vector<1x256x8xbf16>
    %10 = vector.shape_cast %9 : vector<1x256x8xbf16> to vector<256x8xbf16>
    %11 = arith.extf %10 : vector<256x8xbf16> to vector<256x8xf32>
    %12 = vector.broadcast %8 : vector<1x8xf32> to vector<256x8xf32>
    %13 = arith.mulf %11, %12 : vector<256x8xf32>
    %14 = vector.extract_strided_slice %1 {offsets = [0, 16], sizes = [1, 8], strides = [1, 1]} : vector<1x32xf32> to vector<1x8xf32>
    %c0_8 = arith.constant 0 : index
    %c0_9 = arith.constant 0 : index
    %c0_10 = arith.constant 0 : index
    %15 = vector.load %arg5[%c0_8, %c0_9, %c0_10] : memref<1x256x8xbf16, #tpu.memory_space<vmem>>, vector<1x256x8xbf16>
    %16 = vector.shape_cast %15 : vector<1x256x8xbf16> to vector<256x8xbf16>
    %17 = arith.extf %16 : vector<256x8xbf16> to vector<256x8xf32>
    %18 = vector.broadcast %14 : vector<1x8xf32> to vector<256x8xf32>
    %19 = arith.mulf %17, %18 : vector<256x8xf32>
    %20 = vector.extract_strided_slice %1 {offsets = [0, 24], sizes = [1, 8], strides = [1, 1]} : vector<1x32xf32> to vector<1x8xf32>
    %c0_11 = arith.constant 0 : index
    %c0_12 = arith.constant 0 : index
    %c0_13 = arith.constant 0 : index
    %21 = vector.load %arg6[%c0_11, %c0_12, %c0_13] : memref<1x256x8xbf16, #tpu.memory_space<vmem>>, vector<1x256x8xbf16>
    %22 = vector.shape_cast %21 : vector<1x256x8xbf16> to vector<256x8xbf16>
    %23 = arith.extf %22 : vector<256x8xbf16> to vector<256x8xf32>
    %24 = vector.broadcast %20 : vector<1x8xf32> to vector<256x8xf32>
    %25 = arith.mulf %23, %24 : vector<256x8xf32>
    %26 = tpu.concatenate %7, %13, %19, %25 in 1 : vector<256x8xf32>, vector<256x8xf32>, vector<256x8xf32>, vector<256x8xf32> -> vector<256x32xf32>
    %c0_14 = arith.constant 0 : index
    %c0_15 = arith.constant 0 : index
    %c0_16 = arith.constant 0 : index
    %27 = vector.load %arg7[%c0_14, %c0_15, %c0_16] : memref<1x256x32xf32, #tpu.memory_space<vmem>>, vector<1x256x32xf32>
    %28 = vector.shape_cast %27 : vector<1x256x32xf32> to vector<256x32xf32>
    %29 = vector.shape_cast %26 : vector<256x32xf32> to vector<1x256x32xf32>
    tpu.vector_store %arg7[%c0_14, %c0_15, %c0_16], %29 {strides = array<i32>} : memref<1x256x32xf32, #tpu.memory_space<vmem>>, vector<1x256x32xf32>,
    return
  }
  func.func @transform_0(%arg0: i32, %arg1: i32) -> (i32, i32, i32) {
    %c0_i32 = arith.constant 0 : i32
    %c0_i32_0 = arith.constant 0 : i32
    %c0_i32_1 = arith.constant 0 : i32
    return %arg0, %c0_i32, %c0_i32_0 : i32, i32, i32
  }
  func.func @transform_1(%arg0: i32, %arg1: i32) -> (i32, i32, i32) {
    %c0_i32 = arith.constant 0 : i32
    %c0_i32_0 = arith.constant 0 : i32
    return %arg0, %arg1, %c0_i32 : i32, i32, i32
  }
  func.func @transform_2(%arg0: i32, %arg1: i32) -> (i32, i32, i32) {
    %c0_i32 = arith.constant 0 : i32
    %c0_i32_0 = arith.constant 0 : i32
    return %arg0, %arg1, %c0_i32 : i32, i32, i32
  }
  func.func @transform_3(%arg0: i32, %arg1: i32) -> (i32, i32, i32) {
    %c0_i32 = arith.constant 0 : i32
    %c0_i32_0 = arith.constant 0 : i32
    return %arg0, %arg1, %c0_i32 : i32, i32, i32
  }
  func.func @transform_4(%arg0: i32, %arg1: i32) -> (i32, i32, i32) {
    %c0_i32 = arith.constant 0 : i32
    %c0_i32_0 = arith.constant 0 : i32
    return %arg0, %arg1, %c0_i32 : i32, i32, i32
  }
  func.func @transform_5(%arg0: i32, %arg1: i32) -> (i32, i32, i32) {
    %c0_i32 = arith.constant 0 : i32
    %c0_i32_0 = arith.constant 0 : i32
    return %arg0, %arg1, %c0_i32 : i32, i32, i32
  }
}

</mosaic_0001>

<bundles_post_ra>
// kernel: inception_block.9
= control target key start
LH: loop header
LB: loop body
LE: loop exit
PB: predicated region body
PF: predicated region fallthrough
CT: control target
= control target key end

     0   :  { %s935_s15 = smov 0   ;;  %s1347_s0 = inlined_call_operand.vmem [shape: bf16[8,8,8,4], index: 0, kind: input, shape index: {}]   ;;  %s1348_s1 = inlined_call_operand.vmem [shape: bf16[36,8], index: 1, kind: input, shape index: {}]   ;;  %s1349_s2 = inlined_call_operand.vmem [shape: f32[1,8], index: 2, kind: input, shape index: {}]   ;;  %s1350_s3 = inlined_call_operand.vmem [shape: f32[1,8], index: 3, kind: input, shape index: {}]   ;;  %s1351_s4 = inlined_call_operand.vmem [shape: bf16[8,8,8,8], index: 4, kind: output, shape index: {}]  }
   0x1 LB: > { %s838_s16 = sadd.s32 4294967295, %s899_s15   ;;  %p842_p0 = scmp.ge.s32.totalorder %s899_s15, 1  ;;  %s899_s15 = sphi %s935_s15, %s14_s15  }
   0x2   : > { %p162_p1 = scmp.lt.s32.totalorder %s899_s15, 9 }
   0x4   : > { %p163_p2 = pnand %p842_p0, %p162_p1 }
   0x5   : > { %p188_p3 = scmp.lt.s32.totalorder (!%p163_p2), %s838_s16, 7  ;;  %s901_s21 = smov (!%p163_p2), 8  }
   0x6   : > { %166 = sbr.rel (%p163_p2) target bundleno = 456 (0x1c8), region = 36  ;;  %s902_s22 = smov (!%p163_p2), 12  }
   0x7   : > { %s903_s23 = smov (!%p163_p2), 4   ;;  %s904_s24 = smov (!%p163_p2), 16  }
   0x8   : > { %s905_s25 = smov (!%p163_p2), 20   ;;  %s907_s26 = smov (!%p163_p2), 24  }
   0x9   : > { %s908_s27 = smov (!%p163_p2), 28   ;;  %s909_s28 = smov (!%p163_p2), 32  }
   0xb   : > { %s1357_s16 = smov (!%p188_p3, %s838_s16), 7  ;;  %vm279_vm0 = vcmask 1040384   ;;  %vm280_vm1 = vsmask.f32 256  ;;  %vm291_vm2 = vcmask 1044480   ;;  %vm512_vm6 = vcmask 31744  }
   0xc   : > { %s861_s17 = sshll.u32 %s1357_s16, 5  ;;  %vm292_vm3 = vsmask.f32 4352  ;;  %vm959_vm4 = vmand %vm279_vm0, %vm280_vm1  ;;  %vm529_vm7 = vcmask 64512   ;;  %vm546_vm8 = vcmask 97280   ;;  %vm701_vm9 = vcmask 1041408  }
   0xd   : > { %s951_s20 = scalar_lea.vmem %s1347_s0, %s861_s17  ;;  %vm965_vm5 = vmand %vm291_vm2, %vm292_vm3  ;;  %vm563_vm10 = vcmask 130048   ;;  %vm580_vm11 = vcmask 162816   ;;  %vm597_vm12 = vcmask 195584   ;;  %vm614_vm13 = vcmask 228352   ;;  %s1326_s18 = scalar_lea.vmem %s1351_s4, %s861_s17 }
   0xe   : > { %v205_v0 = vld [vmem:[%s951_s20 + $0x18] sm:$0xf]  ;;  %v204_v1 = vld [vmem:[%s951_s20 + $0x14] sm:$0xf]  ;;  %v202_v2 = vld [vmem:[%s951_s20 + $0xc] sm:$0xf] }
   0xf   : > { %v257_v3 = vshrl.u32 %v205_v0, 16  ;;  %v260_v4 = vshll.u32 %v205_v0, 16  ;;  %v250_v5 = vshrl.u32 %v204_v1, 16  ;;  %v253_v6 = vshll.u32 %v204_v1, 16  ;;  %v203_v7 = vld [vmem:[%s951_s20 + $0x10] sm:$0xf] }
  0x10   : > { %v236_v8 = vshrl.u32 %v202_v2, 16  ;;  %v239_v9 = vshll.u32 %v202_v2, 16  ;;  %v243_v10 = vshrl.u32 %v203_v7, 16  ;;  %v246_v11 = vshll.u32 %v203_v7, 16  ;;  %v206_v42 = vld [vmem:[%s951_s20 + $0x1c] sm:$0xf] }
  0x11   : > { %v259_v12 = vrot.slane %v257_v3, 7  ;;  %v252_v13 = vrot.slane %v250_v5, 7  ;;  %v264_v44 = vshrl.u32 %v206_v42, 16  ;;  %v267_v50 = vshll.u32 %v206_v42, 16  ;;  %v201_v57 = vld [vmem:[%s951_s20 + $0x8] sm:$0xf] }
  0x12   : > { %v238_v15 = vrot.slane %v236_v8, 7  ;;  %v245_v16 = vrot.slane %v243_v10, 7  ;;  %v229_v58 = vshrl.u32 %v201_v57, 16  ;;  %v232_v61 = vshll.u32 %v201_v57, 16  ;;  %v199_v62 = vld [vmem:[%s951_s20] sm:$0xf] }
  0x13   : > { %v262_v17 = vor.u32 %v260_v4, %v259_v12  ;;  %v255_v19 = vor.u32 %v253_v6, %v252_v13  ;;  %v266_v49 = vrot.slane %v264_v44, 7  ;;  %v200_v2 = vld [vmem:[%s951_s20 + $0x4] sm:$0xf]  ;;  %v215_v4 = vshrl.u32 %v199_v62, 16 }
  0x14   : > { %v241_v20 = vor.u32 %v239_v9, %v238_v15  ;;  %v248_v21 = vor.u32 %v246_v11, %v245_v16  ;;  %v231_v60 = vrot.slane %v229_v58, 7  ;;  %v222_v6 = vshrl.u32 %v200_v2, 16 }
  0x15   : > { %v289_v22 = vsel %vm959_vm4, 0, %v262_v17  ;;  %v288_v23 = vsel %vm959_vm4, 0, %v255_v19  ;;  %v269_v54 = vor.u32 %v267_v50, %v266_v49  ;;  %v217_v8 = vrot.slane %v215_v4, 7 }
  0x16   : > { %v975_v24 = vsel %vm965_vm5, %v289_v22, 0  ;;  %v979_v25 = vsel %vm965_vm5, %v288_v23, 0  ;;  %v286_v26 = vsel %vm959_vm4, 0, %v241_v20  ;;  %v287_v27 = vsel %vm959_vm4, 0, %v248_v21 }
  0x17   : > { %v986_v28 = vrot.slane %v975_v24, 1  ;;  %v989_v29 = vrot.slane %v979_v25, 1  ;;  %v348_v30 = vshll.u32 %v979_v25, 16  ;;  %v994_v31 = vsel %vm965_vm5, %v286_v26, 0 }
  0x18   : > { %v998_v32 = vsel %vm965_vm5, %v287_v27, 0  ;;  %v346_v33 = vshrl.u32 %v979_v25, 16  ;;  %v332_v35 = vshrl.u32 %v994_v31, 16  ;;  %v334_v36 = vshll.u32 %v994_v31, 16 }
  0x19   : > { %405 = vrot.lane.b32.xlu1 %v986_v28, %s901_s21  ;;  %403 = vrot.lane.b32.xlu0 %v989_v29, %s901_s21  ;;  %v350_v34 = vrot.slane %v348_v30, 1  ;;  %v355_v40 = vshll.u32 %v975_v24, 16  ;;  %v341_v41 = vshll.u32 %v998_v32, 16  ;;  %v1017_v43 = vrot.slane %v994_v31, 1 }
  0x1a   : > { %416 = vrot.lane.b32.xlu2 %v998_v32, %s902_s22  ;;  %v336_v37 = vrot.slane %v334_v36, 1  ;;  %v353_v45 = vshrl.u32 %v975_v24, 16  ;;  %v339_v47 = vshrl.u32 %v998_v32, 16  ;;  %v1032_v53 = vrot.slane %v998_v32, 1 }
  0x1b   : > { %v1009_v38 = vor.u32 %v350_v34, %v346_v33  ;;  %v357_v46 = vrot.slane %v355_v40, 1  ;;  %v343_v48 = vrot.slane %v341_v41, 1  ;;  %v290_v55 = vsel %vm959_vm4, 0, %v269_v54 }
  0x1c   : > { %v1011_v39 = vor.u32 %v336_v37, %v332_v35  ;;  %v1044_v56 = vsel %vm965_vm5, %v290_v55, 0  ;;  %v234_v63 = vor.u32 %v232_v61, %v231_v60  ;;  %v218_v9 = vshll.u32 %v199_v62, 16 }
  0x1d   : > { %v1027_v51 = vor.u32 %v357_v46, %v353_v45  ;;  %v1029_v52 = vor.u32 %v343_v48, %v339_v47  ;;  %v427_v59 = vshll.u32 %v1044_v56, 16  ;;  %v425_v0 = vshrl.u32 %v1044_v56, 16 }
  0x1e   : > { %v285_v3 = vsel %vm959_vm4, 0, %v234_v63  ;;  %v224_v10 = vrot.slane %v222_v6, 7  ;;  %v225_v11 = vshll.u32 %v200_v2, 16  ;;  %v906_v12 = vmov 0  }
  0x1f   : > { %v429_v1 = vrot.slane %v427_v59, 1  ;;  %v1067_v5 = vsel %vm965_vm5, %v285_v3, 0  ;;  %v210_v13 = vrot.slane %v906_v12, 7  ;;  %v220_v15 = vor.u32 %v218_v9, %v217_v8 }
  0x20   : > { %v227_v16 = vor.u32 %v225_v11, %v224_v10  ;;  %v447_v17 = vrot.slane %v1044_v56, 1  ;;  %v327_v42 = vshll.u32 %v1067_v5, 16  ;;  %v325_v45 = vshrl.u32 %v1067_v5, 16 }
  0x21   : > { %371 = vrot.lane.b32.xlu1 %v1009_v38, %s903_s23  ;;  %367 = vrot.lane.b32.xlu0 %v1011_v39, %s903_s23  ;;  %v430_v7 = vor.u32 %v429_v1, %v425_v0  ;;  %v282_v19 = vsel %vm959_vm4, 0, %v210_v13  ;;  %v283_v20 = vsel %vm959_vm4, 0, %v220_v15  ;;  %v1135_v54 = vrot.slane %v1067_v5, 1 }
  0x22   : > { %399 = vrot.lane.b32.xlu2 %v1017_v43, %s901_s21  ;;  %v284_v21 = vsel %vm959_vm4, 0, %v227_v16  ;;  %v1088_v22 = vsel %vm965_vm5, %v282_v19, 0  ;;  %v1092_v23 = vsel %vm965_vm5, %v283_v20, 0  ;;  %v329_v46 = vrot.slane %v327_v42, 1 }
  0x23   : > { %v1096_v14 = vsel %vm965_vm5, %v284_v21, 0  ;;  %v306_v26 = vshll.u32 %v1088_v22, 16  ;;  %v313_v27 = vshll.u32 %v1092_v23, 16  ;;  %v304_v33 = vshrl.u32 %v1088_v22, 16  ;;  %v652_v21 = vld [vmem:[%s1348_s1 + $0x10] sm:$0x3] }
  0x24   : > { %v320_v30 = vshll.u32 %v1096_v14, 16  ;;  %v311_v35 = vshrl.u32 %v1092_v23, 16  ;;  %v318_v36 = vshrl.u32 %v1096_v14, 16  ;;  %v1118_v47 = vor.u32 %v329_v46, %v325_v45 }
  0x25   : > { %v308_v34 = vrot.slane %v306_v26, 1  ;;  %v315_v18 = vrot.slane %v313_v27, 1  ;;  %v383_v48 = vrot.slane %v1088_v22, 1  ;;  %v384_v49 = vrot.slane %v1092_v23, 1 }
  0x26   : > { %v322_v37 = vrot.slane %v320_v30, 1  ;;  %v1132_v50 = vrot.slane %v1096_v14, 1  ;;  %vm631_vm14 = vcmask 261120   ;;  %vm688_vm15 = vcmask 293888  }
  0x27   : > { %v309_v40 = vor.u32 %v308_v34, %v304_v33  ;;  %v316_v41 = vor.u32 %v315_v18, %v311_v35  ;;  %vm774_vm0 = vcmask 60416  }
  0x28   : > { %v1111_v44 = vor.u32 %v322_v37, %v318_v36  ;;  %v863_v37 = vld [vmem:[%s1348_s1] sm:$0xff] }
  0x29   : > { %373 = vrot.lane.b32.xlu1 %v1027_v51, %s903_s23  ;;  %369 = vrot.lane.b32.xlu0 %v1029_v52, %s903_s23 }
  0x2a   : > { %401 = vrot.lane.b32.xlu2 %v1032_v53, %s901_s21 }
  0x31   : > { %420 = vrot.lane.b32.xlu1 %v975_v24, %s902_s22  ;;  %418 = vrot.lane.b32.xlu0 %v979_v25, %s902_s22 }
  0x32   : > { %422 = vrot.lane.b32.xlu2 %v1044_v56, %s902_s22 }
  0x39   : > { %441 = vrot.lane.b32.xlu1 %v1009_v38, %s904_s24  ;;  %439 = vrot.lane.b32.xlu0 %v1029_v52, %s904_s24 }
  0x3a   : > { %443 = vrot.lane.b32.xlu2 %v1027_v51, %s904_s24 }
  0x41   : > { %456 = vrot.lane.b32.xlu1 %v1032_v53, %s905_s25  ;;  %445 = vrot.lane.b32.xlu0 %v430_v7, %s904_s24 }
  0x42   : > { %458 = vrot.lane.b32.xlu2 %v989_v29, %s905_s25 }
  0x49   : > { %462 = vrot.lane.b32.xlu1 %v447_v17, %s905_s25  ;;  %460 = vrot.lane.b32.xlu0 %v986_v28, %s905_s25 }
  0x4a   : > { %472 = vrot.lane.b32.xlu2 %v979_v25, %s907_s26 }
  0x51   : > { %476 = vrot.lane.b32.xlu1 %v1044_v56, %s907_s26  ;;  %474 = vrot.lane.b32.xlu0 %v975_v24, %s907_s26 }
  0x52   : > { %478 = vrot.lane.b32.xlu2 %v1088_v22, %s907_s26 }
  0x59   : > { %359 = vrot.lane.b32.xlu0 %v309_v40, %s903_s23  ;;  %361 = vrot.lane.b32.xlu1 %v316_v41, %s903_s23 }
  0x5a   : > { %363 = vrot.lane.b32.xlu2 %v1111_v44, %s903_s23 }
  0x61   : > { %365 = vrot.lane.b32.xlu0 %v1118_v47, %s903_s23  ;;  %488 = vrot.lane.b32.xlu1 %v1009_v38, %s908_s27 }
  0x62   : > { %490 = vrot.lane.b32.xlu2 %v1027_v51, %s908_s27 }
  0x69   : > { %492 = vrot.lane.b32.xlu0 %v430_v7, %s908_s27  ;;  %494 = vrot.lane.b32.xlu1 %v309_v40, %s908_s27 }
  0x6a   : > { %391 = vrot.lane.b32.xlu2 %v383_v48, %s901_s21 }
  0x71   : > { %393 = vrot.lane.b32.xlu0 %v384_v49, %s901_s21  ;;  %395 = vrot.lane.b32.xlu1 %v1132_v50, %s901_s21 }
  0x72   : > { %397 = vrot.lane.b32.xlu2 %v1135_v54, %s901_s21 }
  0x74   : > { %v417_v38 = vpop.permute.xlu2 %416 }
  0x79   : > { %504 = vrot.lane.b32.xlu0 %v989_v29, %s909_s28  ;;  %506 = vrot.lane.b32.xlu1 %v986_v28, %s909_s28 }
  0x7a   : > { %508 = vrot.lane.b32.xlu2 %v447_v17, %s909_s28 }
  0x7c   : > { %v400_v51 = vpop.permute.xlu2 %399 }
  0x81   : > { %510 = vrot.lane.b32.xlu0 %v383_v48, %s909_s28  ;;  %408 = vrot.lane.b32.xlu1 %v1092_v23, %s902_s22 }
  0x82   : > { %410 = vrot.lane.b32.xlu2 %v1096_v14, %s902_s22 }
  0x84   : > { %v402_v55 = vpop.permute.xlu2 %401 }
  0x89   : > { %412 = vrot.lane.b32.xlu0 %v1067_v5, %s902_s22  ;;  %414 = vrot.lane.b32.xlu1 %v994_v31, %s902_s22 }
  0x8a   : > { %431 = vrot.lane.b32.xlu2 %v316_v41, %s904_s24 }
  0x8b   : > { %v406_v28 = vpop.permute.xlu1 %405  ;;  %v404_v29 = vpop.permute.xlu0 %403 }
  0x8c   : > { %v423_v56 = vpop.permute.xlu2 %422 }
  0x91   : > { %433 = vrot.lane.b32.xlu0 %v1111_v44, %s904_s24  ;;  %435 = vrot.lane.b32.xlu1 %v1118_v47, %s904_s24 }
  0x92   : > { %437 = vrot.lane.b32.xlu2 %v1011_v39, %s904_s24 }
  0x93   : > { %v372_v57 = vpop.permute.xlu1 %371  ;;  %v368_v58 = vpop.permute.xlu0 %367 }
  0x94   : > { %v526_v59 = vsel %vm512_vm6, %v979_v25, %v372_v57  ;;  %v522_v60 = vsel %vm512_vm6, %v994_v31, %v368_v58  ;;  %v1167_v61 = vpop.permute.xlu2 %443 }
  0x95   : > { %v539_v62 = vsel %vm529_vm7, %v522_v60, %v400_v51  ;;  %v543_v63 = vsel %vm529_vm7, %v526_v59, %v404_v29 }
  0x96   : > { %v1172_v0 = vsel %vm546_vm8, %v539_v62, %v417_v38 }
  0x99   : > { %448 = vrot.lane.b32.xlu0 %v384_v49, %s905_s25  ;;  %450 = vrot.lane.b32.xlu1 %v1132_v50, %s905_s25 }
  0x9a   : > { %452 = vrot.lane.b32.xlu2 %v1135_v54, %s905_s25 }
  0x9b   : > { %v374_v25 = vpop.permute.xlu1 %373  ;;  %v370_v1 = vpop.permute.xlu0 %369 }
  0x9c   : > { %v528_v2 = vsel %vm512_vm6, %v975_v24, %v374_v25  ;;  %v524_v3 = vsel %vm512_vm6, %v998_v32, %v370_v1  ;;  %v1183_v4 = vpop.permute.xlu2 %458 }
  0x9d   : > { %v545_v6 = vsel %vm529_vm7, %v528_v2, %v406_v28  ;;  %v541_v7 = vsel %vm529_vm7, %v524_v3, %v402_v55 }
  0x9e   : > { %v1188_v8 = vsel %vm546_vm8, %v545_v6, %v423_v56 }
  0xa1   : > { %454 = vrot.lane.b32.xlu0 %v1017_v43, %s905_s25  ;;  %464 = vrot.lane.b32.xlu1 %v1096_v14, %s907_s26 }
  0xa2   : > { %466 = vrot.lane.b32.xlu2 %v1067_v5, %s907_s26 }
  0xa3   : > { %v421_v24 = vpop.permute.xlu1 %420  ;;  %v419_v9 = vpop.permute.xlu0 %418 }
  0xa4   : > { %v1197_v10 = vsel %vm546_vm8, %v543_v63, %v421_v24  ;;  %v558_v11 = vsel %vm546_vm8, %v541_v7, %v419_v9  ;;  %v1200_v12 = vpop.permute.xlu2 %472 }
  0xa5   : > { %v577_v62 = vsel %vm563_vm10, %v1197_v10, %v1167_v61 }
  0xa9   : > { %468 = vrot.lane.b32.xlu0 %v994_v31, %s907_s26  ;;  %470 = vrot.lane.b32.xlu1 %v998_v32, %s907_s26 }
  0xaa   : > { %480 = vrot.lane.b32.xlu2 %v1111_v44, %s908_s27 }
  0xab   : > { %v442_v13 = vpop.permute.xlu1 %441  ;;  %v440_v15 = vpop.permute.xlu0 %439 }
  0xac   : > { %v1208_v16 = vpop.permute.xlu2 %478 }
  0xb1   : > { %482 = vrot.lane.b32.xlu0 %v1118_v47, %s908_s27  ;;  %484 = vrot.lane.b32.xlu1 %v1011_v39, %s908_s27 }
  0xb2   : > { %486 = vrot.lane.b32.xlu2 %v1029_v52, %s908_s27 }
  0xb3   : > { %v457_v31 = vpop.permute.xlu1 %456  ;;  %v1216_v17 = vpop.permute.xlu0 %445 }
  0xb4   : > { %v364_v32 = vpop.permute.xlu2 %363  ;;  %v579_v3 = vsel %vm563_vm10, %v1188_v8, %v1216_v17 }
  0xb5   : > { %v518_v19 = vsel %vm512_vm6, %v1096_v14, %v364_v32  ;;  %v682_v14 = vunpack.c.l.b16 %v652_v21 }
  0xb7   : > { %v685_v30 = vpack.c.b16 %v682_v14, %v682_v14 }
  0xb9   : > { %496 = vrot.lane.b32.xlu0 %v1132_v50, %s909_s28  ;;  %498 = vrot.lane.b32.xlu1 %v1135_v54, %s909_s28  ;;  %v703_v33 = vsel %vm701_vm9, %v685_v30, 0  ;;  %v575_v50 = vsel %vm563_vm10, %v558_v11, %v442_v13 }
  0xba   : > { %500 = vrot.lane.b32.xlu2 %v1017_v43, %s909_s28  ;;  %866 = vmatpush.bf16.msra.mxu2 %v703_v33  ;;  %v864_v43 = vld [vmem:[%s1348_s1 + $0x8] sm:$0xff]  ;;  %v592_v55 = vsel %vm580_vm11, %v575_v50, %v1183_v4 }
  0xbb   : > { %v1226_v39 = vpop.permute.xlu1 %462  ;;  %v461_v20 = vpop.permute.xlu0 %460  ;;  %867 = vmatpush.bf16.msra.mxu3 %v703_v33  ;;  %710 = vmatpush.bf16.msra.mxu0 %v703_v33 }
  0xbc   : > { %v491_v52 = vpop.permute.xlu2 %490  ;;  %865 = vmatpush.bf16.msra.mxu1 %v703_v33  ;;  %v594_v25 = vsel %vm580_vm11, %v577_v62, %v461_v20  ;;  %v596_v6 = vsel %vm580_vm11, %v579_v3, %v1226_v39 }
  0xbd   : > { %v613_v24 = vsel %vm597_vm12, %v596_v6, %v1208_v16  ;;  %v891_v6 = vld [vmem:[%s1349_s2] ss:$0 sm:$0xff] }
  0xbe   : > { %869 = vmatpush.bf16.msra.mxu2 %v864_v43 }
  0xbf   : > { %870 = vmatpush.bf16.msra.mxu3 %v864_v43  ;;  %711 = vmatpush.bf16.msra.mxu0 %v864_v43 }
  0xc0   : > { %868 = vmatpush.bf16.msra.mxu1 %v864_v43 }
  0xc1   : > { %502 = vrot.lane.b32.xlu0 %v1032_v53, %s909_s28 }
  0xc2   : > { %872 = vmatpush.bf16.msra.mxu2 %v863_v37 }
  0xc3   : > { %v477_v26 = vpop.permute.xlu1 %476  ;;  %v475_v27 = vpop.permute.xlu0 %474  ;;  %873 = vmatpush.bf16.msra.mxu3 %v863_v37  ;;  %712 = vmatpush.bf16.msra.mxu0 %v863_v37 }
  0xc4   : > { %v392_v34 = vpop.permute.xlu2 %391  ;;  %871 = vmatpush.bf16.msra.mxu1 %v863_v37  ;;  %v609_v28 = vsel %vm597_vm12, %v592_v55, %v475_v27  ;;  %v611_v4 = vsel %vm597_vm12, %v594_v25, %v477_v26 }
  0xc5   : > { %v626_v57 = vsel %vm614_vm13, %v609_v28, %v491_v52 }
  0xcb   : > { %v360_v35 = vpop.permute.xlu0 %359  ;;  %v362_v18 = vpop.permute.xlu1 %361 }
  0xcc   : > { %v514_v53 = vsel %vm512_vm6, %v1088_v22, %v360_v35  ;;  %v516_v36 = vsel %vm512_vm6, %v1092_v23, %v362_v18  ;;  %v398_v41 = vpop.permute.xlu2 %397 }
  0xcd   : > { %v1244_v40 = vsel %vm529_vm7, %v514_v53, %v392_v34 }
  0xd3   : > { %v366_v42 = vpop.permute.xlu0 %365  ;;  %v489_v44 = vpop.permute.xlu1 %488 }
  0xd4   : > { %v520_v22 = vsel %vm512_vm6, %v1067_v5, %v366_v42  ;;  %v509_v47 = vpop.permute.xlu2 %508  ;;  %v573_v5 = vsel %vm563_vm10, %v1172_v0, %v440_v15 }
  0xd5   : > { %v1249_v45 = vsel %vm529_vm7, %v520_v22, %v398_v41  ;;  %v590_v51 = vsel %vm580_vm11, %v573_v5, %v457_v31 }
  0xd6   : > { %v607_v29 = vsel %vm597_vm12, %v590_v51, %v1200_v12 }
  0xd7   : > { %v624_v58 = vsel %vm614_vm13, %v607_v29, %v489_v44 }
  0xdb   : > { %v493_v23 = vpop.permute.xlu0 %492  ;;  %v495_v46 = vpop.permute.xlu1 %494 }
  0xdc   : > { %v411_v56 = vpop.permute.xlu2 %410  ;;  %v628_v61 = vsel %vm614_vm13, %v611_v4, %v493_v23  ;;  %v630_v11 = vsel %vm614_vm13, %v613_v24, %v495_v46 }
  0xdd   : > { %v645_v9 = vsel %vm631_vm14, %v628_v61, %v509_v47  ;;  %v892_v61 = vld [vmem:[%s1350_s3] ss:$0 sm:$0xff] }
  0xde   : > { %v667_v15 = vunpack.c.l.b16 %v645_v9 }
  0xe3   : > { %v394_v48 = vpop.permute.xlu0 %393  ;;  %v396_v49 = vpop.permute.xlu1 %395 }
  0xe4   : > { %v533_v54 = vsel %vm529_vm7, %v516_v36, %v394_v48  ;;  %v1254_v38 = vsel %vm529_vm7, %v518_v19, %v396_v49  ;;  %v432_v10 = vpop.permute.xlu2 %431 }
  0xe5   : > { %v550_v36 = vsel %vm546_vm8, %v533_v54, %v411_v56 }
  0xeb   : > { %v505_v59 = vpop.permute.xlu0 %504  ;;  %v507_v60 = vpop.permute.xlu1 %506 }
  0xec   : > { %v641_v63 = vsel %vm631_vm14, %v624_v58, %v505_v59  ;;  %v643_v0 = vsel %vm631_vm14, %v626_v57, %v507_v60  ;;  %v438_v39 = vpop.permute.xlu2 %437 }
  0xed   : > { %v665_v1 = vunpack.c.l.b16 %v641_v63  ;;  %v666_v2 = vunpack.c.l.b16 %v643_v0 }
  0xef   : > { %v671_v7 = vpack.c.b16 %v666_v2, %v665_v1 }
  0xf1   : > { %857 = vmatmul.msk.bf16.vlgmr.msra.gmra.mxu2 %vm688_vm15, %v671_v7 }
  0xf3   : > { %v511_v8 = vpop.permute.xlu0 %510  ;;  %v409_v12 = vpop.permute.xlu1 %408 }
  0xf4   : > { %v647_v13 = vsel %vm631_vm14, %v630_v11, %v511_v8  ;;  %v453_v16 = vpop.permute.xlu2 %452  ;;  %v548_v35 = vsel %vm546_vm8, %v1244_v40, %v409_v12 }
  0xf5   : > { %v668_v31 = vunpack.c.l.b16 %v647_v13  ;;  %v565_v41 = vsel %vm563_vm10, %v548_v35, %v432_v10 }
  0xf7   : > { %v672_v17 = vpack.c.b16 %v668_v31, %v667_v15 }
  0xf9   : > { %858 = vmatmul.msk.bf16.vlgmr.msra.gmra.mxu3 %vm688_vm15, %v672_v17 }
  0xfb   : > { %v413_v32 = vpop.permute.xlu0 %412  ;;  %v415_v19 = vpop.permute.xlu1 %414 }
  0xfc   : > { %v467_v26 = vpop.permute.xlu2 %466  ;;  %v552_v46 = vsel %vm546_vm8, %v1254_v38, %v413_v32  ;;  %v554_v48 = vsel %vm546_vm8, %v1249_v45, %v415_v19 }
  0xfd   : > { %v571_v56 = vsel %vm563_vm10, %v554_v48, %v438_v39 }
 0x103   : > { %v434_v20 = vpop.permute.xlu0 %433  ;;  %v436_v52 = vpop.permute.xlu1 %435 }
 0x104   : > { %v481_v33 = vpop.permute.xlu2 %480  ;;  %v567_v42 = vsel %vm563_vm10, %v550_v36, %v434_v20  ;;  %v569_v40 = vsel %vm563_vm10, %v552_v46, %v436_v52 }
 0x105   : > { %v586_v28 = vsel %vm580_vm11, %v569_v40, %v453_v16 }
 0x10b   : > { %v449_v21 = vpop.permute.xlu0 %448  ;;  %v451_v14 = vpop.permute.xlu1 %450 }
 0x10c   : > { %v487_v37 = vpop.permute.xlu2 %486  ;;  %v582_v44 = vsel %vm580_vm11, %v565_v41, %v449_v21  ;;  %v584_v22 = vsel %vm580_vm11, %v567_v42, %v451_v14 }
 0x10d   : > { %v601_v47 = vsel %vm597_vm12, %v584_v22, %v467_v26 }
 0x113   : > { %v455_v27 = vpop.permute.xlu0 %454  ;;  %v465_v30 = vpop.permute.xlu1 %464 }
 0x114   : > { %v599_v23 = vsel %vm597_vm12, %v582_v44, %v465_v30  ;;  %v588_v45 = vsel %vm580_vm11, %v571_v56, %v455_v27  ;;  %v501_v59 = vpop.permute.xlu2 %500 }
 0x115   : > { %v616_v49 = vsel %vm614_vm13, %v599_v23, %v481_v33 }
 0x11b   : > { %v469_v43 = vpop.permute.xlu0 %468  ;;  %v471_v34 = vpop.permute.xlu1 %470 }
 0x11c   : > { %v603_v57 = vsel %vm597_vm12, %v586_v28, %v469_v43  ;;  %v605_v62 = vsel %vm597_vm12, %v588_v45, %v471_v34 }
 0x11d   : > { %v622_v0 = vsel %vm614_vm13, %v605_v62, %v487_v37 }
 0x123   : > { %v483_v18 = vpop.permute.xlu0 %482  ;;  %v485_v53 = vpop.permute.xlu1 %484 }
 0x124   : > { %v618_v50 = vsel %vm614_vm13, %v601_v47, %v483_v18  ;;  %v620_v58 = vsel %vm614_vm13, %v603_v57, %v485_v53 }
 0x125   : > { %v637_v63 = vsel %vm631_vm14, %v620_v58, %v501_v59 }
 0x126   : > { %v663_v2 = vunpack.c.l.b16 %v637_v63 }
 0x12b   : > { %v497_v54 = vpop.permute.xlu0 %496  ;;  %v499_v5 = vpop.permute.xlu1 %498 }
 0x12c   : > { %v633_v51 = vsel %vm631_vm14, %v616_v49, %v497_v54  ;;  %v635_v55 = vsel %vm631_vm14, %v618_v50, %v499_v5 }
 0x12d   : > { %v661_v38 = vunpack.c.l.b16 %v633_v51  ;;  %v662_v29 = vunpack.c.l.b16 %v635_v55 }
 0x12f   : > { %v669_v60 = vpack.c.b16 %v662_v29, %v661_v38 }
 0x131   : > { %855 = vmatmul.msk.bf16.vlgmr.msra.gmra.mxu0 %vm688_vm15, %v669_v60 }
 0x133   : > { %v503_v25 = vpop.permute.xlu0 %502 }
 0x134   : > { %v639_v1 = vsel %vm631_vm14, %v622_v0, %v503_v25 }
 0x135   : > { %v664_v3 = vunpack.c.l.b16 %v639_v1 }
 0x137   : > { %v670_v4 = vpack.c.b16 %v664_v3, %v663_v2 }
 0x139   : > { %856 = vmatmul.msk.bf16.vlgmr.msra.gmra.mxu1 %vm688_vm15, %v670_v4 }
 0x174   : > { %v724_v7 = vpop.f32.mrf.mxu2 }
 0x175   : > { %v742_v24 = vmul.f32 %v891_v6, %v724_v7 }
 0x177   : > { %v754_v9 = vadd.f32 %v892_v61, %v742_v24 }
 0x179   : > { %v762_v10 = vmax.f32 %v754_v9, 0.0 }
 0x17b   : > { %v770_v11 = vpack.c.bf16 %v762_v10, %v762_v10 }
 0x17c   : > { %v726_v8 = vpop.f32.mrf.mxu2  ;;  %v729_v12 = vpop.f32.mrf.mxu3 }
 0x17d   : > { %779 = vst.msk [vmem:[%s1326_s18 + $0x10] sm:$0xf] %vm774_vm0, %v770_v11  ;;  %v743_v13 = vmul.f32 %v891_v6, %v726_v8  ;;  %v744_v15 = vmul.f32 %v891_v6, %v729_v12 }
 0x17f   : > { %v755_v31 = vadd.f32 %v892_v61, %v743_v13  ;;  %v756_v17 = vadd.f32 %v892_v61, %v744_v15 }
 0x181   : > { %v763_v32 = vmax.f32 %v755_v31, 0.0  ;;  %v764_v19 = vmax.f32 %v756_v17, 0.0 }
 0x183   : > { %v771_v39 = vpack.c.bf16 %v763_v32, %v763_v32  ;;  %v772_v20 = vpack.c.bf16 %v764_v19, %v764_v19 }
 0x184   : > { %v731_v52 = vpop.f32.mrf.mxu3 }
 0x185   : > { %780 = vst.msk [vmem:[%s1326_s18 + $0x14] sm:$0xf] %vm774_vm0, %v771_v39  ;;  %v745_v16 = vmul.f32 %v891_v6, %v731_v52 }
 0x186   : > { %781 = vst.msk [vmem:[%s1326_s18 + $0x18] sm:$0xf] %vm774_vm0, %v772_v20 }
 0x187   : > { %v757_v21 = vadd.f32 %v892_v61, %v745_v16 }
 0x189   : > { %v765_v14 = vmax.f32 %v757_v21, 0.0 }
 0x18b   : > { %v773_v26 = vpack.c.bf16 %v765_v14, %v765_v14 }
 0x18d   : > { %782 = vst.msk [vmem:[%s1326_s18 + $0x1c] sm:$0xf] %vm774_vm0, %v773_v26 }
 0x1ae   : > { %v714_v27 = vpop.f32.mrf.mxu0 }
 0x1af   : > { %v738_v30 = vmul.f32 %v891_v6, %v714_v27 }
 0x1b1   : > { %v750_v33 = vadd.f32 %v892_v61, %v738_v30 }
 0x1b3   : > { %v758_v43 = vmax.f32 %v750_v33, 0.0 }
 0x1b5   : > { %v766_v34 = vpack.c.bf16 %v758_v43, %v758_v43 }
 0x1b6   : > { %v716_v35 = vpop.f32.mrf.mxu0  ;;  %v719_v18 = vpop.f32.mrf.mxu1 }
 0x1b7   : > { %775 = vst.msk [vmem:[%s1326_s18] sm:$0xf] %vm774_vm0, %v766_v34  ;;  %v739_v53 = vmul.f32 %v891_v6, %v716_v35  ;;  %v740_v36 = vmul.f32 %v891_v6, %v719_v18 }
 0x1b9   : > { %v751_v37 = vadd.f32 %v892_v61, %v739_v53  ;;  %v752_v41 = vadd.f32 %v892_v61, %v740_v36 }
 0x1bb   : > { %v759_v42 = vmax.f32 %v751_v37, 0.0  ;;  %v760_v44 = vmax.f32 %v752_v41, 0.0 }
 0x1bd   : > { %v767_v22 = vpack.c.bf16 %v759_v42, %v759_v42  ;;  %v768_v23 = vpack.c.bf16 %v760_v44, %v760_v44 }
 0x1be   : > { %v721_v46 = vpop.f32.mrf.mxu1 }
 0x1bf   : > { %776 = vst.msk [vmem:[%s1326_s18 + $0x4] sm:$0xf] %vm774_vm0, %v767_v22  ;;  %v741_v40 = vmul.f32 %v891_v6, %v721_v46 }
 0x1c0   : > { %777 = vst.msk [vmem:[%s1326_s18 + $0x8] sm:$0xf] %vm774_vm0, %v768_v23 }
 0x1c1   : > { %v753_v47 = vadd.f32 %v892_v61, %v741_v40 }
 0x1c3   : > { %v761_v48 = vmax.f32 %v753_v47, 0.0 }
 0x1c5   : > { %v769_v49 = vpack.c.bf16 %v761_v48, %v761_v48 }
 0x1c7   : > { %778 = vst.msk [vmem:[%s1326_s18 + $0xc] sm:$0xf] %vm774_vm0, %v769_v49 }
 0x1c8 PF: > { %s14_s15 = sadd.s32 1, %s899_s15  }
 0x1c9   : > { %p11_p4 = scmp.ge.s32.totalorder %s14_s15, 10  }
 0x1cb   :  { %13 = sbr.rel (!%p11_p4) target bundleno = 1 (0x1), region = 66 }

// kernel: inception_block.13
= control target key start
LH: loop header
LB: loop body
LE: loop exit
PB: predicated region body
PF: predicated region fallthrough
CT: control target
= control target key end

     0   :  { %s1994_s15 = smov 0   ;;  %s2771_s0 = inlined_call_operand.vmem [shape: bf16[2,4,8,8,4], index: 0, kind: input, shape index: {}]   ;;  %s2772_s1 = inlined_call_operand.vmem [shape: bf16[4,8], index: 1, kind: input, shape index: {}]   ;;  %s2773_s2 = inlined_call_operand.vmem [shape: f32[1,8], index: 2, kind: input, shape index: {}]   ;;  %s2774_s3 = inlined_call_operand.vmem [shape: f32[1,8], index: 3, kind: input, shape index: {}]   ;;  %s2775_s4 = inlined_call_operand.vmem [shape: bf16[2,256,8], index: 4, kind: output, shape index: {}]  }
   0x1 LB: > { %s1838_s16 = sadd.s32 4294967295, %s1966_s15   ;;  %p1842_p0 = scmp.ge.s32.totalorder %s1966_s15, 1  ;;  %s1966_s15 = sphi %s1994_s15, %s14_s15  }
   0x2   : > { %p162_p1 = scmp.lt.s32.totalorder %s1966_s15, 3 }
   0x4   : > { %p163_p2 = pnand %p1842_p0, %p162_p1 }
   0x5   : > { %p188_p3 = scmp.lt.s32.totalorder (!%p163_p2), %s1838_s16, 1 }
   0x6   : > { %166 = sbr.rel (%p163_p2) target bundleno = 357 (0x165), region = 36 }
   0xb   : > { %v1391_v0 = vld [vmem:[%s2772_s1] sm:$0x3]  ;;  %vm1521_vm0 = vcmask 1041408   ;;  %s2781_s16 = smov (!%p188_p3, %s1838_s16), 1  ;;  %v1968_v2 = vmov 4286644096  }
   0xc   : > { %v1523_v1 = vsel %vm1521_vm0, %v1391_v0, 0  ;;  %s1865_s19 = sshll.u32 %s2781_s16, 7  ;;  %v2015_v3 = vunpack.c.l.bf16 %v1968_v2  ;;  %vm969_vm1 = vcmask 1043456   ;;  %vm970_vm2 = vsmask.f32 3328 }
   0xd   : > { %1532 = vmatpush.bf16.msra.mxu0 %v1523_v1  ;;  %1946 = vmatpush.bf16.msra.mxu1 %v1523_v1  ;;  %s2013_s22 = scalar_lea.vmem %s2771_s0, %s1865_s19  ;;  %vm1100_vm3 = vcmask 1040384   ;;  %vm1101_vm4 = vsmask.f32 256  ;;  %vm2106_vm5 = vmand %vm969_vm1, %vm970_vm2  ;;  %vm1472_vm7 = vcmask 31744   ;;  %vm1750_vm8 = vcmask 60416   ;;  %s2631_s29 = scalar_lea.vmem %s2775_s4, %s1865_s19 }
   0xe   : > { %1947 = vmatpush.bf16.msra.mxu2 %v1523_v1  ;;  %1948 = vmatpush.bf16.msra.mxu3 %v1523_v1  ;;  %v1868_v4 = vld [vmem:[%s2013_s22] sm:$0xff]   ;;  %v2019_v5 = vld [vmem:[%s2013_s22 + $0x8] sm:$0xff]   ;;  %vm2112_vm6 = vmand %vm1100_vm3, %vm1101_vm4 }
   0xf   : > { %v1934_v6 = vld [vmem:[%s2013_s22 + $0x20] sm:$0xff]   ;;  %v1869_v7 = vunpack.c.l.bf16 %v1868_v4  ;;  %v1870_v8 = vunpack.c.h.bf16 %v1868_v4  ;;  %v1873_v9 = vunpack.c.l.bf16 %v2019_v5  ;;  %v2024_v11 = vld [vmem:[%s2013_s22 + $0x28] sm:$0xff]  }
  0x10   : > { %v1885_v10 = vunpack.c.l.bf16 %v1934_v6  ;;  %v1938_v12 = vld [vmem:[%s2013_s22 + $0x40] sm:$0xff]   ;;  %v2028_v13 = vld [vmem:[%s2013_s22 + $0x48] sm:$0xff]   ;;  %v1886_v14 = vunpack.c.h.bf16 %v1934_v6  ;;  %v1889_v15 = vunpack.c.l.bf16 %v2024_v11 }
  0x11   : > { %v1901_v16 = vunpack.c.l.bf16 %v1938_v12  ;;  %v1902_v17 = vunpack.c.h.bf16 %v1938_v12  ;;  %v1942_v18 = vld [vmem:[%s2013_s22 + $0x60] sm:$0xff]   ;;  %v2033_v19 = vld [vmem:[%s2013_s22 + $0x68] sm:$0xff]   ;;  %v1905_v21 = vunpack.c.l.bf16 %v2028_v13 }
  0x12   : > { %v265_v20 = vmax.f32 %v1885_v10, %v2015_v3  ;;  %v1917_v22 = vunpack.c.l.bf16 %v1942_v18  ;;  %v1918_v23 = vunpack.c.h.bf16 %v1942_v18  ;;  %v266_v24 = vmax.f32 %v1886_v14, %v2015_v3 }
  0x13   : > { %v267_v25 = vmax.f32 %v1889_v15, %v2015_v3  ;;  %v273_v26 = vmax.f32 %v1901_v16, %v1869_v7  ;;  %v274_v28 = vmax.f32 %v1902_v17, %v1870_v8  ;;  %v275_v29 = vmax.f32 %v1905_v21, %v1873_v9 }
  0x14   : > { %v361_v27 = vmax.f32 %v1869_v7, %v265_v20  ;;  %v1921_v30 = vunpack.c.l.bf16 %v2033_v19  ;;  %v2040_v31 = vmax.f32 %v1870_v8, %v266_v24  ;;  %v281_v34 = vmax.f32 %v1917_v22, %v1885_v10 }
  0x15   : > { %v2042_v32 = vmax.f32 %v1873_v9, %v267_v25  ;;  %v369_v33 = vmax.f32 %v1885_v10, %v273_v26  ;;  %v2044_v35 = vmax.f32 %v1886_v14, %v274_v28  ;;  %v2046_v36 = vmax.f32 %v1889_v15, %v275_v29 }
  0x16   : > { %v282_v37 = vmax.f32 %v1918_v23, %v1886_v14  ;;  %v283_v38 = vmax.f32 %v1921_v30, %v1889_v15  ;;  %v457_v39 = vmax.f32 %v2040_v31, %v2015_v3  ;;  %v377_v41 = vmax.f32 %v1901_v16, %v281_v34 }
  0x17   : > { %v458_v40 = vmax.f32 %v2042_v32, %v361_v27  ;;  %v289_v42 = vmax.f32 %v2015_v3, %v1901_v16  ;;  %v465_v43 = vmax.f32 %v2044_v35, %v2015_v3  ;;  %v466_v44 = vmax.f32 %v2046_v36, %v369_v33 }
  0x18   : > { %v2055_v45 = vmax.f32 %v1902_v17, %v282_v37  ;;  %v2057_v46 = vmax.f32 %v1905_v21, %v283_v38  ;;  %v2059_v47 = vmax.f32 %v361_v27, %v457_v39  ;;  %v290_v49 = vmax.f32 %v2015_v3, %v1902_v17 }
  0x19   : > { %v2062_v48 = vmax.f32 %v2040_v31, %v458_v40  ;;  %v291_v50 = vmax.f32 %v2015_v3, %v1905_v21  ;;  %v2066_v51 = vmax.f32 %v369_v33, %v465_v43  ;;  %v2069_v52 = vmax.f32 %v2044_v35, %v466_v44 }
  0x1a   : > { %v473_v53 = vmax.f32 %v2055_v45, %v2015_v3  ;;  %v474_v54 = vmax.f32 %v2057_v46, %v377_v41  ;;  %v585_v55 = vpack.c.bf16 %v2059_v47, %v2059_v47  ;;  %v2078_v57 = vmax.f32 %v1917_v22, %v289_v42 }
  0x1b   : > { %v586_v56 = vpack.c.bf16 %v2062_v48, %v2062_v48  ;;  %v2080_v58 = vmax.f32 %v1918_v23, %v290_v49  ;;  %v593_v59 = vpack.c.bf16 %v2066_v51, %v2066_v51  ;;  %v594_v60 = vpack.c.bf16 %v2069_v52, %v2069_v52 }
  0x1c   : > { %v2086_v61 = vmax.f32 %v377_v41, %v473_v53  ;;  %v2089_v62 = vmax.f32 %v2055_v45, %v474_v54  ;;  %v649_v63 = vunpack.c.l.b16 %v585_v55  ;;  %v2091_v1 = vmax.f32 %v1921_v30, %v291_v50 }
  0x1d   : > { %v650_v0 = vunpack.c.l.b16 %v586_v56  ;;  %v481_v2 = vmax.f32 %v2080_v58, %v2015_v3  ;;  %v657_v4 = vunpack.c.l.b16 %v593_v59  ;;  %v658_v6 = vunpack.c.l.b16 %v594_v60 }
  0x1e   : > { %v601_v7 = vpack.c.bf16 %v2086_v61, %v2086_v61  ;;  %v602_v8 = vpack.c.bf16 %v2089_v62, %v2089_v62  ;;  %v681_v9 = vpack.c.b16 %v649_v63, %v649_v63  ;;  %v482_v12 = vmax.f32 %v2091_v1, %v2078_v57 }
  0x1f   : > { %v682_v10 = vpack.c.b16 %v650_v0, %v650_v0  ;;  %v2102_v14 = vmax.f32 %v2078_v57, %v481_v2  ;;  %v689_v15 = vpack.c.b16 %v657_v4, %v657_v4  ;;  %v690_v16 = vpack.c.b16 %v658_v6, %v658_v6 }
  0x20   : > { %v665_v17 = vunpack.c.l.b16 %v601_v7  ;;  %v666_v18 = vunpack.c.l.b16 %v602_v8  ;;  %v714_v20 = vshrl.u32 %v681_v9, 16  ;;  %v716_v21 = vshll.u32 %v681_v9, 16 }
  0x21   : > { %v721_v22 = vshrl.u32 %v682_v10, 16  ;;  %v723_v23 = vshll.u32 %v682_v10, 16  ;;  %v770_v24 = vshrl.u32 %v689_v15, 16  ;;  %v772_v25 = vshll.u32 %v689_v15, 16 }
  0x22   : > { %v777_v26 = vshrl.u32 %v690_v16, 16  ;;  %v779_v27 = vshll.u32 %v690_v16, 16  ;;  %v718_v28 = vrot.slane %v716_v21, 1  ;;  %v1004_v33 = vrot.slane %v714_v20, 7 }
  0x23   : > { %v725_v29 = vrot.slane %v723_v23, 1  ;;  %v1006_v34 = vrot.slane %v721_v22, 7  ;;  %v774_v38 = vrot.slane %v772_v25, 1  ;;  %v1020_v40 = vrot.slane %v770_v24, 7 }
  0x24   : > { %v781_v39 = vrot.slane %v779_v27, 1  ;;  %v1022_v41 = vrot.slane %v777_v26, 7  ;;  %v719_v42 = vor.u32 %v718_v28, %v714_v20  ;;  %v1005_v44 = vor.u32 %v1004_v33, %v716_v21 }
  0x25   : > { %v726_v43 = vor.u32 %v725_v29, %v721_v22  ;;  %v1007_v49 = vor.u32 %v1006_v34, %v723_v23  ;;  %v775_v50 = vor.u32 %v774_v38, %v770_v24  ;;  %v1021_v54 = vor.u32 %v1020_v40, %v772_v25 }
  0x26   : > { %v782_v53 = vor.u32 %v781_v39, %v777_v26  ;;  %v1023_v55 = vor.u32 %v1022_v41, %v779_v27  ;;  %v972_v56 = vsel %vm2106_vm5, %v719_v42, 4286644096  ;;  %v1103_v59 = vsel %vm2112_vm6, 4286644096, %v1005_v44 }
  0x27   : > { %v973_v57 = vsel %vm2106_vm5, %v726_v43, 4286644096  ;;  %v697_v60 = vpack.c.b16 %v665_v17, %v665_v17  ;;  %v1104_v63 = vsel %vm2112_vm6, 4286644096, %v1007_v49  ;;  %v1135_v0 = vunpack.c.l.bf16 %v972_v56 }
  0x28   : > { %v1136_v2 = vunpack.c.l.bf16 %v973_v57  ;;  %v1167_v4 = vunpack.c.l.bf16 %v1103_v59  ;;  %v1168_v6 = vunpack.c.l.bf16 %v1104_v63  ;;  %v980_v7 = vsel %vm2106_vm5, %v775_v50, 4286644096 }
  0x29   : > { %v981_v8 = vsel %vm2106_vm5, %v782_v53, 4286644096  ;;  %v1111_v9 = vsel %vm2112_vm6, 4286644096, %v1021_v54  ;;  %v1112_v15 = vsel %vm2112_vm6, 4286644096, %v1023_v55  ;;  %v1143_v16 = vunpack.c.l.bf16 %v980_v7 }
  0x2a   : > { %v1199_v10 = vmax.f32 %v1135_v0, %v1167_v4  ;;  %v1144_v17 = vunpack.c.l.bf16 %v981_v8  ;;  %v1200_v20 = vmax.f32 %v1136_v2, %v1168_v6  ;;  %v1175_v21 = vunpack.c.l.bf16 %v1111_v9  ;;  %v2148_v2 = vld [vmem:[%s2013_s22 + $0x10] sm:$0xff]  }
  0x2b   : > { %v1176_v22 = vunpack.c.l.bf16 %v1112_v15  ;;  %v698_v23 = vpack.c.b16 %v666_v18, %v666_v18  ;;  %v826_v25 = vshrl.u32 %v697_v60, 16  ;;  %v828_v26 = vshll.u32 %v697_v60, 16  ;;  %v2153_v9 = vld [vmem:[%s2013_s22 + $0x30] sm:$0xff]  }
  0x2c   : > { %v1327_v24 = vmax.f32 %v2059_v47, %v1199_v10  ;;  %v2134_v27 = vmax.f32 %v2080_v58, %v482_v12  ;;  %v1328_v28 = vmax.f32 %v2062_v48, %v1200_v20  ;;  %v1207_v29 = vmax.f32 %v1143_v16, %v1175_v21  ;;  %v2159_v20 = vld [vmem:[%s2013_s22 + $0x50] sm:$0xff]  }
  0x2d   : > { %v1208_v33 = vmax.f32 %v1144_v17, %v1176_v22  ;;  %v833_v34 = vshrl.u32 %v698_v23, 16  ;;  %v830_v39 = vrot.slane %v828_v26, 1  ;;  %v835_v40 = vshll.u32 %v698_v23, 16 }
  0x2e   : > { %v1359_v38 = vpack.c.bf16 %v1327_v24, %v1327_v24  ;;  %v1036_v41 = vrot.slane %v826_v25, 7  ;;  %v1360_v42 = vpack.c.bf16 %v1328_v28, %v1328_v28  ;;  %v1335_v43 = vmax.f32 %v2066_v51, %v1207_v29 }
  0x2f   : > { %v1336_v18 = vmax.f32 %v2069_v52, %v1208_v33  ;;  %v1038_v47 = vrot.slane %v833_v34, 7  ;;  %v831_v49 = vor.u32 %v830_v39, %v826_v25  ;;  %v837_v12 = vrot.slane %v835_v40, 1 }
  0x30   : > { %v1424_v44 = vunpack.c.l.b16 %v1359_v38  ;;  %v1037_v50 = vor.u32 %v1036_v41, %v828_v26  ;;  %v1425_v53 = vunpack.c.l.b16 %v1360_v42  ;;  %v1367_v48 = vpack.c.bf16 %v1335_v43, %v1335_v43 }
  0x31   : > { %v1368_v54 = vpack.c.bf16 %v1336_v18, %v1336_v18  ;;  %v1039_v55 = vor.u32 %v1038_v47, %v835_v40  ;;  %v838_v56 = vor.u32 %v837_v12, %v833_v34  ;;  %v988_v57 = vsel %vm2106_vm5, %v831_v49, 4286644096 }
  0x32   : > { %v1119_v51 = vsel %vm2112_vm6, 4286644096, %v1037_v50  ;;  %v609_v52 = vpack.c.bf16 %v2102_v14, %v2102_v14  ;;  %v1456_v59 = vpack.c.b16 %v1425_v53, %v1424_v44  ;;  %v1432_v60 = vunpack.c.l.b16 %v1367_v48 }
  0x33   : > { %v1433_v63 = vunpack.c.l.b16 %v1368_v54  ;;  %v1120_v0 = vsel %vm2112_vm6, 4286644096, %v1039_v55  ;;  %v989_v4 = vsel %vm2106_vm5, %v838_v56, 4286644096  ;;  %v1151_v6 = vunpack.c.l.bf16 %v988_v57 }
  0x34   : > { %v1183_v7 = vunpack.c.l.bf16 %v1119_v51  ;;  %v1184_v8 = vunpack.c.l.bf16 %v1120_v0  ;;  %1847 = vmatmul.msk.bf16.vlgmr.msra.gmra.mxu0 %vm1472_vm7, %v1456_v59  ;;  %v1152_v15 = vunpack.c.l.bf16 %v989_v4  ;;  %v610_v16 = vpack.c.bf16 %v2134_v27, %v2134_v27 }
  0x35   : > { %v1460_v10 = vpack.c.b16 %v1433_v63, %v1432_v60  ;;  %v673_v17 = vunpack.c.l.b16 %v609_v52  ;;  %v1874_v22 = vunpack.c.h.bf16 %v2019_v5  ;;  %v1877_v23 = vunpack.c.l.bf16 %v2148_v2 }
  0x36   : > { %v1215_v21 = vmax.f32 %v1151_v6, %v1183_v7  ;;  %v2164_v24 = vunpack.c.h.bf16 %v2024_v11  ;;  %v1216_v25 = vmax.f32 %v1152_v15, %v1184_v8  ;;  %v674_v26 = vunpack.c.l.b16 %v610_v16 }
  0x37   : > { %1851 = vmatmul.msk.bf16.vlgmr.msra.gmra.mxu1 %vm1472_vm7, %v1460_v10  ;;  %v705_v28 = vpack.c.b16 %v673_v17, %v673_v17  ;;  %v2168_v29 = vunpack.c.l.bf16 %v2153_v9  ;;  %v2174_v5 = vunpack.c.h.bf16 %v2028_v13  ;;  %v2177_v38 = vunpack.c.l.bf16 %v2159_v20  ;;  %v2213_v17 = vld [vmem:[%s2013_s22 + $0x70] sm:$0xff]  }
  0x38   : > { %v1343_v33 = vmax.f32 %v2086_v61, %v1215_v21  ;;  %v268_v34 = vmax.f32 %v2164_v24, %v2015_v3  ;;  %v1344_v11 = vmax.f32 %v2089_v62, %v1216_v25  ;;  %v706_v39 = vpack.c.b16 %v674_v26, %v674_v26 }
  0x39   : > { %v882_v40 = vshrl.u32 %v705_v28, 16  ;;  %v884_v41 = vshll.u32 %v705_v28, 16  ;;  %v269_v43 = vmax.f32 %v2168_v29, %v2015_v3  ;;  %v276_v61 = vmax.f32 %v2174_v5, %v1874_v22 }
  0x3a   : > { %v1375_v42 = vpack.c.bf16 %v1343_v33, %v1343_v33  ;;  %v2182_v18 = vmax.f32 %v1874_v22, %v268_v34  ;;  %v1376_v47 = vpack.c.bf16 %v1344_v11, %v1344_v11  ;;  %v889_v13 = vshrl.u32 %v706_v39, 16 }
  0x3b   : > { %v886_v44 = vrot.slane %v884_v41, 1  ;;  %v891_v49 = vshll.u32 %v706_v39, 16  ;;  %v1052_v50 = vrot.slane %v882_v40, 7  ;;  %v2185_v53 = vmax.f32 %v1877_v23, %v269_v43 }
  0x3c   : > { %v1440_v12 = vunpack.c.l.b16 %v1375_v42  ;;  %v459_v62 = vmax.f32 %v2182_v18, %v2040_v31  ;;  %v1441_v48 = vunpack.c.l.b16 %v1376_v47  ;;  %v1054_v56 = vrot.slane %v889_v13, 7 }
  0x3d   : > { %v887_v54 = vor.u32 %v886_v44, %v882_v40  ;;  %v893_v55 = vrot.slane %v891_v49, 1  ;;  %v1053_v57 = vor.u32 %v1052_v50, %v884_v41  ;;  %v460_v51 = vmax.f32 %v2185_v53, %v2042_v32 }
  0x3e   : > { %v2192_v52 = vmax.f32 %v2042_v32, %v459_v62  ;;  %v277_v59 = vmax.f32 %v2177_v38, %v1877_v23  ;;  %v1464_v60 = vpack.c.b16 %v1441_v48, %v1440_v12  ;;  %v1055_v31 = vor.u32 %v1054_v56, %v891_v49 }
  0x3f   : > { %v894_v63 = vor.u32 %v893_v55, %v889_v13  ;;  %v996_v0 = vsel %vm2106_vm5, %v887_v54, 4286644096  ;;  %v1127_v4 = vsel %vm2112_vm6, 4286644096, %v1053_v57  ;;  %v2200_v7 = vmax.f32 %v2182_v18, %v460_v51 }
  0x40   : > { %v1159_v6 = vunpack.c.l.bf16 %v996_v0  ;;  %v587_v8 = vpack.c.bf16 %v2192_v52, %v2192_v52  ;;  %1855 = vmatmul.msk.bf16.vlgmr.msra.gmra.mxu2 %vm1472_vm7, %v1464_v60  ;;  %v1128_v10 = vsel %vm2112_vm6, 4286644096, %v1055_v31  ;;  %v1191_v15 = vunpack.c.l.bf16 %v1127_v4 }
  0x41   : > { %v997_v32 = vsel %vm2106_vm5, %v894_v63, 4286644096  ;;  %v2210_v16 = vmax.f32 %v2164_v24, %v276_v61  ;;  %v1192_v22 = vunpack.c.l.bf16 %v1128_v10  ;;  %v588_v23 = vpack.c.bf16 %v2200_v7, %v2200_v7 }
  0x42   : > { %v1160_v21 = vunpack.c.l.bf16 %v997_v32  ;;  %v651_v25 = vunpack.c.l.b16 %v587_v8  ;;  %v1223_v26 = vmax.f32 %v1159_v6, %v1191_v15  ;;  %v2218_v28 = vmax.f32 %v2168_v29, %v277_v59 }
  0x43   : > { %v467_v33 = vmax.f32 %v2210_v16, %v2044_v35  ;;  %v1922_v34 = vunpack.c.h.bf16 %v2033_v19  ;;  %v652_v39 = vunpack.c.l.b16 %v588_v23  ;;  %v1925_v41 = vunpack.c.l.bf16 %v2213_v17 }
  0x44   : > { %v1224_v11 = vmax.f32 %v1160_v21, %v1192_v22  ;;  %v683_v40 = vpack.c.b16 %v651_v25, %v651_v25  ;;  %v1351_v42 = vmax.f32 %v2102_v14, %v1223_v26  ;;  %v468_v43 = vmax.f32 %v2218_v28, %v2046_v36 }
  0x45   : > { %v2228_v61 = vmax.f32 %v2046_v36, %v467_v33  ;;  %v284_v47 = vmax.f32 %v1922_v34, %v2164_v24  ;;  %v684_v44 = vpack.c.b16 %v652_v39, %v652_v39  ;;  %v285_v36 = vmax.f32 %v1925_v41, %v2168_v29 }
  0x46   : > { %v1352_v35 = vmax.f32 %v2134_v27, %v1224_v11  ;;  %v728_v13 = vshrl.u32 %v683_v40, 16  ;;  %v730_v49 = vshll.u32 %v683_v40, 16  ;;  %v1383_v12 = vpack.c.bf16 %v1351_v42, %v1351_v42 }
  0x47   : > { %v2235_v50 = vmax.f32 %v2210_v16, %v468_v43  ;;  %v595_v14 = vpack.c.bf16 %v2228_v61, %v2228_v61  ;;  %v735_v54 = vshrl.u32 %v684_v44, 16  ;;  %v737_v24 = vshll.u32 %v684_v44, 16 }
  0x48   : > { %v1384_v62 = vpack.c.bf16 %v1352_v35, %v1352_v35  ;;  %v732_v48 = vrot.slane %v730_v49, 1  ;;  %v1448_v55 = vunpack.c.l.b16 %v1383_v12  ;;  %v1008_v27 = vrot.slane %v728_v13, 7 }
  0x49   : > { %v596_v56 = vpack.c.bf16 %v2235_v50, %v2235_v50  ;;  %v659_v57 = vunpack.c.l.b16 %v595_v14  ;;  %v739_v60 = vrot.slane %v737_v24, 1  ;;  %v1010_v63 = vrot.slane %v735_v54, 7 }
  0x4a   : > { %v1449_v51 = vunpack.c.l.b16 %v1384_v62  ;;  %v733_v59 = vor.u32 %v732_v48, %v728_v13  ;;  %v1009_v0 = vor.u32 %v1008_v27, %v730_v49  ;;  %v2245_v6 = vmax.f32 %v2174_v5, %v284_v47 }
  0x4b   : > { %v660_v31 = vunpack.c.l.b16 %v596_v56  ;;  %v691_v4 = vpack.c.b16 %v659_v57, %v659_v57  ;;  %v740_v8 = vor.u32 %v739_v60, %v735_v54  ;;  %v1011_v10 = vor.u32 %v1010_v63, %v737_v24 }
  0x4c   : > { %v1468_v29 = vpack.c.b16 %v1449_v51, %v1448_v55  ;;  %v974_v32 = vsel %vm2106_vm5, %v733_v59, 4286644096  ;;  %v1105_v15 = vsel %vm2112_vm6, 4286644096, %v1009_v0  ;;  %v2257_v13 = vmax.f32 %v2177_v38, %v285_v36 }
  0x4d   : > { %v1137_v21 = vunpack.c.l.bf16 %v974_v32  ;;  %v692_v22 = vpack.c.b16 %v660_v31, %v660_v31  ;;  %v784_v23 = vshrl.u32 %v691_v4, 16  ;;  %v975_v25 = vsel %vm2106_vm5, %v740_v8, 4286644096 }
  0x4e   : > { %1859 = vmatmul.msk.bf16.vlgmr.msra.gmra.mxu3 %vm1472_vm7, %v1468_v29  ;;  %v1106_v26 = vsel %vm2112_vm6, 4286644096, %v1011_v10  ;;  %v1169_v33 = vunpack.c.l.bf16 %v1105_v15  ;;  %v786_v11 = vshll.u32 %v691_v4, 16  ;;  %v1138_v39 = vunpack.c.l.bf16 %v975_v25 }
  0x4f   : > { %v1170_v40 = vunpack.c.l.bf16 %v1106_v26  ;;  %v791_v42 = vshrl.u32 %v692_v22, 16  ;;  %v793_v43 = vshll.u32 %v692_v22, 16  ;;  %v1024_v44 = vrot.slane %v784_v23, 7 }
  0x50   : > { %v1201_v47 = vmax.f32 %v1137_v21, %v1169_v33  ;;  %v788_v35 = vrot.slane %v786_v11, 1  ;;  %v475_v62 = vmax.f32 %v2245_v6, %v2055_v45  ;;  %v476_v55 = vmax.f32 %v2257_v13, %v2057_v46  ;;  %v2286_v21 = vld [vmem:[%s2013_s22 + $0x18] sm:$0xff]  }
  0x51   : > { %v1202_v49 = vmax.f32 %v1138_v39, %v1170_v40  ;;  %v795_v12 = vrot.slane %v793_v43, 1  ;;  %v1026_v14 = vrot.slane %v791_v42, 7  ;;  %v1025_v24 = vor.u32 %v1024_v44, %v786_v11 }
  0x52   : > { %v1329_v48 = vmax.f32 %v2192_v52, %v1201_v47  ;;  %v789_v54 = vor.u32 %v788_v35, %v784_v23  ;;  %v2266_v36 = vmax.f32 %v2057_v46, %v475_v62  ;;  %v2273_v52 = vmax.f32 %v2245_v6, %v476_v55 }
  0x53   : > { %v1330_v27 = vmax.f32 %v2200_v7, %v1202_v49  ;;  %v796_v56 = vor.u32 %v795_v12, %v791_v42  ;;  %v1027_v57 = vor.u32 %v1026_v14, %v793_v43  ;;  %v1113_v45 = vsel %vm2112_vm6, 4286644096, %v1025_v24  ;;  %v2296_v42 = vld [vmem:[%s2013_s22 + $0x38] sm:$0xff]  }
  0x54   : > { %v1361_v51 = vpack.c.bf16 %v1329_v48, %v1329_v48  ;;  %v982_v59 = vsel %vm2106_vm5, %v789_v54, 4286644096  ;;  %v1177_v4 = vunpack.c.l.bf16 %v1113_v45  ;;  %v603_v32 = vpack.c.bf16 %v2266_v36, %v2266_v36 }
  0x55   : > { %v1362_v60 = vpack.c.bf16 %v1330_v27, %v1330_v27  ;;  %v983_v7 = vsel %vm2106_vm5, %v796_v56, 4286644096  ;;  %v1114_v63 = vsel %vm2112_vm6, 4286644096, %v1027_v57  ;;  %v1145_v46 = vunpack.c.l.bf16 %v982_v59 }
  0x56   : > { %v1426_v0 = vunpack.c.l.b16 %v1361_v51  ;;  %v1146_v31 = vunpack.c.l.bf16 %v983_v7  ;;  %v1178_v29 = vunpack.c.l.bf16 %v1114_v63  ;;  %v604_v10 = vpack.c.bf16 %v2273_v52, %v2273_v52 }
  0x57   : > { %v1427_v8 = vunpack.c.l.b16 %v1362_v60  ;;  %v292_v15 = vmax.f32 %v2015_v3, %v2174_v5  ;;  %v1209_v22 = vmax.f32 %v1145_v46, %v1177_v4  ;;  %v293_v25 = vmax.f32 %v2015_v3, %v2177_v38 }
  0x58   : > { %v1210_v23 = vmax.f32 %v1146_v31, %v1178_v29  ;;  %v1878_v26 = vunpack.c.h.bf16 %v2148_v2  ;;  %v667_v11 = vunpack.c.l.b16 %v603_v32  ;;  %v668_v39 = vunpack.c.l.b16 %v604_v10  ;;  %v2334_v29 = vld [vmem:[%s2013_s22 + $0x58] sm:$0xff]  }
  0x59   : > { %v1457_v33 = vpack.c.b16 %v1427_v8, %v1426_v0  ;;  %v2293_v40 = vmax.f32 %v1922_v34, %v292_v15  ;;  %v1337_v5 = vmax.f32 %v2228_v61, %v1209_v22  ;;  %v2302_v47 = vmax.f32 %v1925_v41, %v293_v25 }
  0x5a   : > { %v1338_v43 = vmax.f32 %v2235_v50, %v1210_v23  ;;  %v1881_v38 = vunpack.c.l.bf16 %v2286_v21  ;;  %v699_v2 = vpack.c.b16 %v667_v11, %v667_v11  ;;  %v700_v35 = vpack.c.b16 %v668_v39, %v668_v39 }
  0x5b   : > { %1848 = vmatmul.msk.bf16.gmra.mxu0 %vm1472_vm7, %v1457_v33  ;;  %v483_v19 = vmax.f32 %v2293_v40, %v2080_v58  ;;  %v2309_v34 = vunpack.c.h.bf16 %v2153_v9  ;;  %v1369_v44 = vpack.c.bf16 %v1337_v5, %v1337_v5  ;;  %v484_v50 = vmax.f32 %v2302_v47, %v2091_v1 }
  0x5c   : > { %v1370_v61 = vpack.c.bf16 %v1338_v43, %v1338_v43  ;;  %v2314_v41 = vunpack.c.l.bf16 %v2296_v42  ;;  %v840_v49 = vshrl.u32 %v699_v2, 16  ;;  %v842_v12 = vshll.u32 %v699_v2, 16 }
  0x5d   : > { %v847_v14 = vshrl.u32 %v700_v35, 16  ;;  %v849_v62 = vshll.u32 %v700_v35, 16  ;;  %v1434_v48 = vunpack.c.l.b16 %v1369_v44  ;;  %v2317_v24 = vmax.f32 %v2091_v1, %v483_v19 }
  0x5e   : > { %v1435_v54 = vunpack.c.l.b16 %v1370_v61  ;;  %v2320_v58 = vmax.f32 %v2293_v40, %v484_v50  ;;  %v844_v9 = vrot.slane %v842_v12, 1  ;;  %v1040_v27 = vrot.slane %v840_v49, 7 }
  0x5f   : > { %v851_v55 = vrot.slane %v849_v62, 1  ;;  %v1042_v56 = vrot.slane %v847_v14, 7  ;;  %v611_v51 = vpack.c.bf16 %v2317_v24, %v2317_v24  ;;  %v270_v45 = vmax.f32 %v2309_v34, %v2015_v3 }
  0x60   : > { %v1461_v57 = vpack.c.b16 %v1435_v54, %v1434_v48  ;;  %v612_v59 = vpack.c.bf16 %v2320_v58, %v2320_v58  ;;  %v845_v1 = vor.u32 %v844_v9, %v840_v49  ;;  %v1041_v7 = vor.u32 %v1040_v27, %v842_v12 }
  0x61   : > { %v852_v60 = vor.u32 %v851_v55, %v847_v14  ;;  %v1043_v63 = vor.u32 %v1042_v56, %v849_v62  ;;  %v675_v46 = vunpack.c.l.b16 %v611_v51  ;;  %v271_v31 = vmax.f32 %v2314_v41, %v2015_v3 }
  0x62   : > { %1852 = vmatmul.msk.bf16.gmra.mxu1 %vm1472_vm7, %v1461_v57  ;;  %v676_v0 = vunpack.c.l.b16 %v612_v59  ;;  %v2331_v4 = vmax.f32 %v1878_v26, %v270_v45  ;;  %v990_v8 = vsel %vm2106_vm5, %v845_v1, 4286644096  ;;  %v1121_v10 = vsel %vm2112_vm6, 4286644096, %v1041_v7 }
  0x63   : > { %v991_v32 = vsel %vm2106_vm5, %v852_v60, 4286644096  ;;  %v2343_v15 = vunpack.c.h.bf16 %v2159_v20  ;;  %v1122_v22 = vsel %vm2112_vm6, 4286644096, %v1043_v63  ;;  %v1153_v23 = vunpack.c.l.bf16 %v990_v8 }
  0x64   : > { %v1154_v25 = vunpack.c.l.bf16 %v991_v32  ;;  %v1185_v33 = vunpack.c.l.bf16 %v1121_v10  ;;  %v1186_v11 = vunpack.c.l.bf16 %v1122_v22  ;;  %v707_v39 = vpack.c.b16 %v675_v46, %v675_v46 }
  0x65   : > { %v708_v5 = vpack.c.b16 %v676_v0, %v676_v0  ;;  %v2349_v43 = vmax.f32 %v1881_v38, %v271_v31  ;;  %v461_v35 = vmax.f32 %v2331_v4, %v2182_v18  ;;  %v2354_v20 = vunpack.c.l.bf16 %v2334_v29 }
  0x66   : > { %v1217_v2 = vmax.f32 %v1153_v23, %v1185_v33  ;;  %v278_v19 = vmax.f32 %v2343_v15, %v1878_v26  ;;  %v1218_v44 = vmax.f32 %v1154_v25, %v1186_v11  ;;  %v896_v61 = vshrl.u32 %v707_v39, 16  ;;  %v2380_v11 = vld [vmem:[%s2013_s22 + $0x78] sm:$0xff]  }
  0x67   : > { %v898_v50 = vshll.u32 %v707_v39, 16  ;;  %v903_v49 = vshrl.u32 %v708_v5, 16  ;;  %v905_v14 = vshll.u32 %v708_v5, 16  ;;  %v462_v62 = vmax.f32 %v2349_v43, %v2185_v53 }
  0x68   : > { %v1345_v12 = vmax.f32 %v2266_v36, %v1217_v2  ;;  %v2361_v48 = vmax.f32 %v2185_v53, %v461_v35  ;;  %v1346_v18 = vmax.f32 %v2273_v52, %v1218_v44  ;;  %v1056_v9 = vrot.slane %v896_v61, 7 }
  0x69   : > { %v900_v54 = vrot.slane %v898_v50, 1  ;;  %v1058_v55 = vrot.slane %v903_v49, 7  ;;  %v907_v26 = vrot.slane %v905_v14, 1  ;;  %v2365_v56 = vmax.f32 %v2331_v4, %v462_v62 }
  0x6a   : > { %v1377_v27 = vpack.c.bf16 %v1345_v12, %v1345_v12  ;;  %v589_v36 = vpack.c.bf16 %v2361_v48, %v2361_v48  ;;  %v1378_v57 = vpack.c.bf16 %v1346_v18, %v1346_v18  ;;  %v1057_v59 = vor.u32 %v1056_v9, %v898_v50 }
  0x6b   : > { %v901_v51 = vor.u32 %v900_v54, %v896_v61  ;;  %v1059_v45 = vor.u32 %v1058_v55, %v905_v14  ;;  %v908_v53 = vor.u32 %v907_v26, %v903_v49  ;;  %v590_v52 = vpack.c.bf16 %v2365_v56, %v2365_v56 }
  0x6c   : > { %v1442_v1 = vunpack.c.l.b16 %v1377_v27  ;;  %v653_v60 = vunpack.c.l.b16 %v589_v36  ;;  %v1443_v7 = vunpack.c.l.b16 %v1378_v57  ;;  %v1129_v46 = vsel %vm2112_vm6, 4286644096, %v1057_v59 }
  0x6d   : > { %v998_v63 = vsel %vm2106_vm5, %v901_v51, 4286644096  ;;  %v1130_v0 = vsel %vm2112_vm6, 4286644096, %v1059_v45  ;;  %v999_v31 = vsel %vm2106_vm5, %v908_v53, 4286644096  ;;  %v1193_v32 = vunpack.c.l.bf16 %v1129_v46 }
  0x6e   : > { %v1161_v8 = vunpack.c.l.bf16 %v998_v63  ;;  %v1194_v10 = vunpack.c.l.bf16 %v1130_v0  ;;  %v1465_v22 = vpack.c.b16 %v1443_v7, %v1442_v1  ;;  %v1162_v23 = vunpack.c.l.bf16 %v999_v31 }
  0x6f   : > { %v654_v25 = vunpack.c.l.b16 %v590_v52  ;;  %v685_v33 = vpack.c.b16 %v653_v60, %v653_v60  ;;  %v279_v5 = vmax.f32 %v2354_v20, %v1881_v38  ;;  %v2386_v2 = vmax.f32 %v2309_v34, %v278_v19 }
  0x70   : > { %v1225_v39 = vmax.f32 %v1161_v8, %v1193_v32  ;;  %v1926_v35 = vunpack.c.h.bf16 %v2213_v17  ;;  %1856 = vmatmul.msk.bf16.gmra.mxu2 %vm1472_vm7, %v1465_v22  ;;  %v1226_v44 = vmax.f32 %v1162_v23, %v1194_v10  ;;  %v1929_v38 = vunpack.c.l.bf16 %v2380_v11 }
  0x71   : > { %v686_v61 = vpack.c.b16 %v654_v25, %v654_v25  ;;  %v742_v50 = vshrl.u32 %v685_v33, 16  ;;  %v744_v49 = vshll.u32 %v685_v33, 16  ;;  %v2392_v14 = vmax.f32 %v2314_v41, %v279_v5 }
  0x72   : > { %v1353_v12 = vmax.f32 %v2317_v24, %v1225_v39  ;;  %v469_v62 = vmax.f32 %v2386_v2, %v2210_v16  ;;  %v1354_v19 = vmax.f32 %v2320_v58, %v1226_v44  ;;  %v286_v5 = vmax.f32 %v1926_v35, %v2309_v34 }
  0x73   : > { %v746_v18 = vrot.slane %v744_v49, 1  ;;  %v749_v54 = vshrl.u32 %v686_v61, 16  ;;  %v751_v9 = vshll.u32 %v686_v61, 16  ;;  %v1012_v27 = vrot.slane %v742_v50, 7 }
  0x74   : > { %v1385_v55 = vpack.c.bf16 %v1353_v12, %v1353_v12  ;;  %v470_v26 = vmax.f32 %v2392_v14, %v2218_v28  ;;  %v2401_v24 = vmax.f32 %v2218_v28, %v469_v62  ;;  %v1386_v36 = vpack.c.bf16 %v1354_v19, %v1354_v19 }
  0x75   : > { %v747_v57 = vor.u32 %v746_v18, %v742_v50  ;;  %v753_v51 = vrot.slane %v751_v9, 1  ;;  %v1014_v59 = vrot.slane %v749_v54, 7  ;;  %v1013_v45 = vor.u32 %v1012_v27, %v744_v49 }
  0x76   : > { %v1450_v16 = vunpack.c.l.b16 %v1385_v55  ;;  %v2404_v1 = vmax.f32 %v2386_v2, %v470_v26  ;;  %v597_v58 = vpack.c.bf16 %v2401_v24, %v2401_v24  ;;  %v1451_v53 = vunpack.c.l.b16 %v1386_v36 }
  0x77   : > { %v754_v52 = vor.u32 %v753_v51, %v749_v54  ;;  %v976_v60 = vsel %vm2106_vm5, %v747_v57, 4286644096  ;;  %v1015_v7 = vor.u32 %v1014_v59, %v751_v9  ;;  %v1107_v28 = vsel %vm2112_vm6, 4286644096, %v1013_v45 }
  0x78   : > { %v1139_v63 = vunpack.c.l.bf16 %v976_v60  ;;  %v598_v46 = vpack.c.bf16 %v2404_v1, %v2404_v1  ;;  %v661_v0 = vunpack.c.l.b16 %v597_v58  ;;  %v1469_v31 = vpack.c.b16 %v1451_v53, %v1450_v16 }
  0x79   : > { %v977_v8 = vsel %vm2106_vm5, %v754_v52, 4286644096  ;;  %v1108_v32 = vsel %vm2112_vm6, 4286644096, %v1015_v7  ;;  %v1171_v10 = vunpack.c.l.bf16 %v1107_v28  ;;  %v287_v44 = vmax.f32 %v1929_v38, %v2314_v41 }
  0x7a   : > { %v1140_v22 = vunpack.c.l.bf16 %v977_v8  ;;  %v1172_v23 = vunpack.c.l.bf16 %v1108_v32  ;;  %v662_v25 = vunpack.c.l.b16 %v598_v46  ;;  %v693_v33 = vpack.c.b16 %v661_v0, %v661_v0  ;;  %1860 = vmatmul.msk.bf16.gmra.mxu3 %vm1472_vm7, %v1469_v31 }
  0x7b   : > { %v1203_v39 = vmax.f32 %v1139_v63, %v1171_v10  ;;  %v294_v61 = vmax.f32 %v2015_v3, %v2343_v15  ;;  %v2429_v18 = vmax.f32 %v2343_v15, %v286_v5  ;;  %v2432_v54 = vmax.f32 %v2354_v20, %v287_v44 }
  0x7c   : > { %v1204_v50 = vmax.f32 %v1140_v22, %v1172_v23  ;;  %v694_v49 = vpack.c.b16 %v662_v25, %v662_v25  ;;  %v798_v12 = vshrl.u32 %v693_v33, 16  ;;  %v800_v62 = vshll.u32 %v693_v33, 16 }
  0x7d   : > { %v1331_v19 = vmax.f32 %v2361_v48, %v1203_v39  ;;  %v295_v34 = vmax.f32 %v2015_v3, %v2354_v20  ;;  %v477_v57 = vmax.f32 %v2429_v18, %v2245_v6  ;;  %v478_v15 = vmax.f32 %v2432_v54, %v2257_v13 }
  0x7e   : > { %v1332_v41 = vmax.f32 %v2365_v56, %v1204_v50  ;;  %v802_v9 = vrot.slane %v800_v62, 1  ;;  %v805_v55 = vshrl.u32 %v694_v49, 16  ;;  %v807_v27 = vshll.u32 %v694_v49, 16 }
  0x7f   : > { %v1363_v26 = vpack.c.bf16 %v1331_v19, %v1331_v19  ;;  %v1028_v36 = vrot.slane %v798_v12, 7  ;;  %v2442_v20 = vmax.f32 %v2257_v13, %v477_v57  ;;  %v2445_v56 = vmax.f32 %v2429_v18, %v478_v15 }
  0x80   : > { %v1364_v48 = vpack.c.bf16 %v1332_v41, %v1332_v41  ;;  %v803_v51 = vor.u32 %v802_v9, %v798_v12  ;;  %v809_v59 = vrot.slane %v807_v27, 1  ;;  %v1030_v16 = vrot.slane %v805_v55, 7 }
  0x81   : > { %v1428_v45 = vunpack.c.l.b16 %v1363_v26  ;;  %v1029_v58 = vor.u32 %v1028_v36, %v800_v62  ;;  %v605_v63 = vpack.c.bf16 %v2442_v20, %v2442_v20  ;;  %v606_v13 = vpack.c.bf16 %v2445_v56, %v2445_v56 }
  0x82   : > { %v1429_v53 = vunpack.c.l.b16 %v1364_v48  ;;  %v810_v52 = vor.u32 %v809_v59, %v805_v55  ;;  %v984_v6 = vsel %vm2106_vm5, %v803_v51, 4286644096  ;;  %v1031_v60 = vor.u32 %v1030_v16, %v807_v27 }
  0x83   : > { %v1115_v7 = vsel %vm2112_vm6, 4286644096, %v1029_v58  ;;  %v1147_v28 = vunpack.c.l.bf16 %v984_v6  ;;  %v669_v22 = vunpack.c.l.b16 %v605_v63  ;;  %v670_v23 = vunpack.c.l.b16 %v606_v13 }
  0x84   : > { %v1458_v46 = vpack.c.b16 %v1429_v53, %v1428_v45  ;;  %v985_v0 = vsel %vm2106_vm5, %v810_v52, 4286644096  ;;  %v1116_v31 = vsel %vm2112_vm6, 4286644096, %v1031_v60  ;;  %v1179_v8 = vunpack.c.l.bf16 %v1115_v7 }
  0x85   : > { %v1148_v32 = vunpack.c.l.bf16 %v985_v0  ;;  %v1180_v10 = vunpack.c.l.bf16 %v1116_v31  ;;  %v2462_v33 = vmax.f32 %v1926_v35, %v294_v61  ;;  %v2466_v39 = vmax.f32 %v1929_v38, %v295_v34 }
  0x86   : > { %1849 = vmatmul.msk.bf16.gmra.mxu0 %vm1472_vm7, %v1458_v46  ;;  %v1211_v25 = vmax.f32 %v1147_v28, %v1179_v8  ;;  %v1882_v5 = vunpack.c.h.bf16 %v2286_v21  ;;  %v701_v50 = vpack.c.b16 %v669_v22, %v669_v22  ;;  %v702_v49 = vpack.c.b16 %v670_v23, %v670_v23 }
  0x87   : > { %v1212_v44 = vmax.f32 %v1148_v32, %v1180_v10  ;;  %v2470_v12 = vunpack.c.h.bf16 %v2296_v42  ;;  %v485_v19 = vmax.f32 %v2462_v33, %v2293_v40  ;;  %v486_v17 = vmax.f32 %v2466_v39, %v2302_v47 }
  0x88   : > { %v1339_v62 = vmax.f32 %v2401_v24, %v1211_v25  ;;  %v464_v35 = vmax.f32 %v2015_v3, %v2349_v43  ;;  %v854_v61 = vshrl.u32 %v701_v50, 16  ;;  %v856_v34 = vshll.u32 %v701_v50, 16 }
  0x89   : > { %v1340_v38 = vmax.f32 %v2404_v1, %v1212_v44  ;;  %v861_v41 = vshrl.u32 %v702_v49, 16  ;;  %v863_v55 = vshll.u32 %v702_v49, 16  ;;  %v2481_v42 = vmax.f32 %v2302_v47, %v485_v19 }
  0x8a   : > { %v1371_v9 = vpack.c.bf16 %v1339_v62, %v1339_v62  ;;  %v2484_v24 = vmax.f32 %v2462_v33, %v486_v17  ;;  %v858_v27 = vrot.slane %v856_v34, 1  ;;  %v1044_v26 = vrot.slane %v854_v61, 7 }
  0x8b   : > { %v1372_v40 = vpack.c.bf16 %v1340_v38, %v1340_v38  ;;  %v1046_v36 = vrot.slane %v861_v41, 7  ;;  %v865_v15 = vrot.slane %v863_v55, 1  ;;  %v613_v1 = vpack.c.bf16 %v2481_v42, %v2481_v42 }
  0x8c   : > { %v1436_v57 = vunpack.c.l.b16 %v1371_v9  ;;  %v614_v48 = vpack.c.bf16 %v2484_v24, %v2484_v24  ;;  %v859_v59 = vor.u32 %v858_v27, %v854_v61  ;;  %v1045_v16 = vor.u32 %v1044_v26, %v856_v34 }
  0x8d   : > { %v1437_v51 = vunpack.c.l.b16 %v1372_v40  ;;  %v1047_v47 = vor.u32 %v1046_v36, %v863_v55  ;;  %v866_v45 = vor.u32 %v865_v15, %v861_v41  ;;  %v677_v58 = vunpack.c.l.b16 %v613_v1 }
  0x8e   : > { %v678_v53 = vunpack.c.l.b16 %v614_v48  ;;  %v272_v52 = vmax.f32 %v2470_v12, %v2015_v3  ;;  %v992_v60 = vsel %vm2106_vm5, %v859_v59, 4286644096  ;;  %v1123_v7 = vsel %vm2112_vm6, 4286644096, %v1045_v16 }
  0x8f   : > { %v1462_v6 = vpack.c.b16 %v1437_v51, %v1436_v57  ;;  %v1124_v28 = vsel %vm2112_vm6, 4286644096, %v1047_v47  ;;  %v993_v63 = vsel %vm2106_vm5, %v866_v45, 4286644096  ;;  %v1155_v13 = vunpack.c.l.bf16 %v992_v60 }
  0x90   : > { %v1187_v46 = vunpack.c.l.bf16 %v1123_v7  ;;  %v1188_v0 = vunpack.c.l.bf16 %v1124_v28  ;;  %v1156_v31 = vunpack.c.l.bf16 %v993_v63  ;;  %v709_v8 = vpack.c.b16 %v677_v58, %v677_v58 }
  0x91   : > { %1853 = vmatmul.msk.bf16.gmra.mxu1 %vm1472_vm7, %v1462_v6  ;;  %v710_v32 = vpack.c.b16 %v678_v53, %v678_v53  ;;  %v368_v10 = vmax.f32 %v1882_v5, %v272_v52  ;;  %v2504_v23 = vunpack.c.h.bf16 %v2334_v29  ;;  %v472_v25 = vmax.f32 %v2015_v3, %v2392_v14 }
  0x92   : > { %v1219_v22 = vmax.f32 %v1155_v13, %v1187_v46  ;;  %v1930_v44 = vunpack.c.h.bf16 %v2380_v11  ;;  %v1220_v50 = vmax.f32 %v1156_v31, %v1188_v0  ;;  %v910_v49 = vshrl.u32 %v709_v8, 16 }
  0x93   : > { %v912_v62 = vshll.u32 %v709_v8, 16  ;;  %v917_v19 = vshrl.u32 %v710_v32, 16  ;;  %v919_v38 = vshll.u32 %v710_v32, 16  ;;  %v463_v61 = vmax.f32 %v368_v10, %v2331_v4 }
  0x94   : > { %v1347_v17 = vmax.f32 %v2442_v20, %v1219_v22  ;;  %v2511_v34 = vmax.f32 %v368_v10, %v464_v35  ;;  %v1348_v41 = vmax.f32 %v2445_v56, %v1220_v50  ;;  %v1060_v9 = vrot.slane %v910_v49, 7 }
  0x95   : > { %v914_v29 = vrot.slane %v912_v62, 1  ;;  %v1062_v55 = vrot.slane %v917_v19, 7  ;;  %v921_v27 = vrot.slane %v919_v38, 1  ;;  %v2515_v26 = vmax.f32 %v2349_v43, %v463_v61 }
  0x96   : > { %v1379_v40 = vpack.c.bf16 %v1347_v17, %v1347_v17  ;;  %v592_v36 = vpack.c.bf16 %v2511_v34, %v2511_v34  ;;  %v1380_v57 = vpack.c.bf16 %v1348_v41, %v1348_v41  ;;  %v1061_v15 = vor.u32 %v1060_v9, %v912_v62 }
  0x97   : > { %v915_v20 = vor.u32 %v914_v29, %v910_v49  ;;  %v1063_v1 = vor.u32 %v1062_v55, %v919_v38  ;;  %v922_v35 = vor.u32 %v921_v27, %v917_v19  ;;  %v591_v56 = vpack.c.bf16 %v2515_v26, %v2515_v26 }
  0x98   : > { %v1444_v4 = vunpack.c.l.b16 %v1379_v40  ;;  %v656_v48 = vunpack.c.l.b16 %v592_v36  ;;  %v1445_v51 = vunpack.c.l.b16 %v1380_v57  ;;  %v1131_v43 = vsel %vm2112_vm6, 4286644096, %v1061_v15 }
  0x99   : > { %v1000_v59 = vsel %vm2106_vm5, %v915_v20, 4286644096  ;;  %v1132_v16 = vsel %vm2112_vm6, 4286644096, %v1063_v1  ;;  %v1001_v47 = vsel %vm2106_vm5, %v922_v35, 4286644096  ;;  %v1195_v58 = vunpack.c.l.bf16 %v1131_v43 }
  0x9a   : > { %v1163_v45 = vunpack.c.l.bf16 %v1000_v59  ;;  %v1196_v53 = vunpack.c.l.bf16 %v1132_v16  ;;  %v1466_v52 = vpack.c.b16 %v1445_v51, %v1444_v4  ;;  %v1164_v6 = vunpack.c.l.bf16 %v1001_v47 }
  0x9b   : > { %v655_v60 = vunpack.c.l.b16 %v591_v56  ;;  %v688_v7 = vpack.c.b16 %v656_v48, %v656_v48  ;;  %v280_v63 = vmax.f32 %v2504_v23, %v1882_v5  ;;  %v288_v13 = vmax.f32 %v1930_v44, %v2470_v12 }
  0x9c   : > { %v1227_v28 = vmax.f32 %v1163_v45, %v1195_v58  ;;  %v480_v46 = vmax.f32 %v2015_v3, %v2432_v54  ;;  %1857 = vmatmul.msk.bf16.gmra.mxu2 %vm1472_vm7, %v1466_v52  ;;  %v1228_v0 = vmax.f32 %v1164_v6, %v1196_v53  ;;  %v296_v5 = vmax.f32 %v2015_v3, %v2504_v23 }
  0x9d   : > { %v687_v31 = vpack.c.b16 %v655_v60, %v655_v60  ;;  %v763_v8 = vshrl.u32 %v688_v7, 16  ;;  %v765_v32 = vshll.u32 %v688_v7, 16  ;;  %v376_v22 = vmax.f32 %v2470_v12, %v280_v63 }
  0x9e   : > { %v1355_v10 = vmax.f32 %v2481_v42, %v1227_v28  ;;  %v384_v21 = vmax.f32 %v2504_v23, %v288_v13  ;;  %v1356_v50 = vmax.f32 %v2484_v24, %v1228_v0  ;;  %v392_v58 = vmax.f32 %v1930_v44, %v296_v5 }
  0x9f   : > { %v756_v49 = vshrl.u32 %v687_v31, 16  ;;  %v758_v62 = vshll.u32 %v687_v31, 16  ;;  %v767_v19 = vrot.slane %v765_v32, 1  ;;  %v1018_v38 = vrot.slane %v763_v8, 7 }
  0xa0   : > { %v1387_v17 = vpack.c.bf16 %v1355_v10, %v1355_v10  ;;  %v471_v61 = vmax.f32 %v376_v22, %v2386_v2  ;;  %v2545_v41 = vmax.f32 %v376_v22, %v472_v25  ;;  %v1388_v29 = vpack.c.bf16 %v1356_v50, %v1356_v50 }
  0xa1   : > { %v760_v42 = vrot.slane %v758_v62, 1  ;;  %v768_v9 = vor.u32 %v767_v19, %v763_v8  ;;  %v1016_v12 = vrot.slane %v756_v49, 7  ;;  %v1019_v40 = vor.u32 %v1018_v38, %v765_v32 }
  0xa2   : > { %v1452_v55 = vunpack.c.l.b16 %v1387_v17  ;;  %v2548_v27 = vmax.f32 %v2392_v14, %v471_v61  ;;  %v600_v24 = vpack.c.bf16 %v2545_v41, %v2545_v41  ;;  %v1453_v23 = vunpack.c.l.b16 %v1388_v29 }
  0xa3   : > { %v761_v36 = vor.u32 %v760_v42, %v756_v49  ;;  %v979_v57 = vsel %vm2106_vm5, %v768_v9, 4286644096  ;;  %v1017_v2 = vor.u32 %v1016_v12, %v758_v62  ;;  %v1110_v25 = vsel %vm2112_vm6, 4286644096, %v1019_v40 }
  0xa4   : > { %v1142_v20 = vunpack.c.l.bf16 %v979_v57  ;;  %v599_v15 = vpack.c.bf16 %v2548_v27, %v2548_v27  ;;  %v664_v1 = vunpack.c.l.b16 %v600_v24  ;;  %v1470_v4 = vpack.c.b16 %v1453_v23, %v1452_v55 }
  0xa5   : > { %v978_v14 = vsel %vm2106_vm5, %v761_v36, 4286644096  ;;  %v1109_v35 = vsel %vm2112_vm6, 4286644096, %v1017_v2  ;;  %v1174_v56 = vunpack.c.l.bf16 %v1110_v25  ;;  %v479_v47 = vmax.f32 %v384_v21, %v2429_v18 }
  0xa6   : > { %v1141_v48 = vunpack.c.l.bf16 %v978_v14  ;;  %v1173_v51 = vunpack.c.l.bf16 %v1109_v35  ;;  %v663_v59 = vunpack.c.l.b16 %v599_v15  ;;  %v696_v43 = vpack.c.b16 %v664_v1, %v664_v1  ;;  %1861 = vmatmul.msk.bf16.gmra.mxu3 %vm1472_vm7, %v1470_v4 }
  0xa7   : > { %v1206_v16 = vmax.f32 %v1142_v20, %v1174_v56  ;;  %v2564_v45 = vmax.f32 %v384_v21, %v480_v46  ;;  %v2570_v28 = vmax.f32 %v2432_v54, %v479_v47  ;;  %v487_v13 = vmax.f32 %v392_v58, %v2462_v33 }
  0xa8   : > { %v1205_v53 = vmax.f32 %v1141_v48, %v1173_v51  ;;  %v695_v52 = vpack.c.b16 %v663_v59, %v663_v59  ;;  %v819_v6 = vshrl.u32 %v696_v43, 16  ;;  %v821_v60 = vshll.u32 %v696_v43, 16 }
  0xa9   : > { %v1334_v7 = vmax.f32 %v2511_v34, %v1206_v16  ;;  %v608_v63 = vpack.c.bf16 %v2564_v45, %v2564_v45  ;;  %v607_v8 = vpack.c.bf16 %v2570_v28, %v2570_v28  ;;  %v488_v20 = vmax.f32 %v2015_v3, %v2466_v39 }
  0xaa   : > { %v1333_v18 = vmax.f32 %v2515_v26, %v1205_v53  ;;  %v812_v46 = vshrl.u32 %v695_v52, 16  ;;  %v814_v0 = vshll.u32 %v695_v52, 16  ;;  %v823_v11 = vrot.slane %v821_v60, 1 }
  0xab   : > { %v1366_v44 = vpack.c.bf16 %v1334_v7, %v1334_v7  ;;  %v1034_v31 = vrot.slane %v819_v6, 7  ;;  %v672_v32 = vunpack.c.l.b16 %v608_v63  ;;  %v671_v50 = vunpack.c.l.b16 %v607_v8 }
  0xac   : > { %v1365_v34 = vpack.c.bf16 %v1333_v18, %v1333_v18  ;;  %v816_v10 = vrot.slane %v814_v0, 1  ;;  %v824_v54 = vor.u32 %v823_v11, %v819_v6  ;;  %v1032_v22 = vrot.slane %v812_v46, 7  ;;  %v2616_v11 = vld [vmem:[%s2774_s3] ss:$0 sm:$0xff] }
  0xad   : > { %v1431_v21 = vunpack.c.l.b16 %v1366_v44  ;;  %v1035_v5 = vor.u32 %v1034_v31, %v821_v60  ;;  %v704_v49 = vpack.c.b16 %v672_v32, %v672_v32  ;;  %v703_v61 = vpack.c.b16 %v671_v50, %v671_v50 }
  0xae   : > { %v1430_v33 = vunpack.c.l.b16 %v1365_v34  ;;  %v817_v62 = vor.u32 %v816_v10, %v812_v46  ;;  %v987_v26 = vsel %vm2106_vm5, %v824_v54, 4286644096  ;;  %v1033_v19 = vor.u32 %v1032_v22, %v814_v0 }
  0xaf   : > { %v1118_v17 = vsel %vm2112_vm6, 4286644096, %v1035_v5  ;;  %v1150_v38 = vunpack.c.l.bf16 %v987_v26  ;;  %v875_v29 = vshrl.u32 %v704_v49, 16  ;;  %v868_v23 = vshrl.u32 %v703_v61, 16 }
  0xb0   : > { %v1459_v42 = vpack.c.b16 %v1431_v21, %v1430_v33  ;;  %v986_v9 = vsel %vm2106_vm5, %v817_v62, 4286644096  ;;  %v1117_v12 = vsel %vm2112_vm6, 4286644096, %v1033_v19  ;;  %v1182_v55 = vunpack.c.l.bf16 %v1118_v17 }
  0xb1   : > { %v1149_v40 = vunpack.c.l.bf16 %v986_v9  ;;  %v1181_v24 = vunpack.c.l.bf16 %v1117_v12  ;;  %v870_v36 = vshll.u32 %v703_v61, 16  ;;  %v877_v2 = vshll.u32 %v704_v49, 16  ;;  %v1534_v15 = vpop.f32.mrf.mxu0 }
  0xb2   : > { %1850 = vmatmul.msk.bf16.gmra.mxu0 %vm1472_vm7, %v1459_v42  ;;  %v1214_v57 = vmax.f32 %v1150_v38, %v1182_v55  ;;  %v1050_v25 = vrot.slane %v875_v29, 7  ;;  %v1048_v14 = vrot.slane %v868_v23, 7  ;;  %v2590_v35 = vmax.f32 %v2466_v39, %v487_v13 }
  0xb3   : > { %v1213_v1 = vmax.f32 %v1149_v40, %v1181_v24  ;;  %v872_v4 = vrot.slane %v870_v36, 1  ;;  %v879_v48 = vrot.slane %v877_v2, 1  ;;  %v2593_v59 = vmax.f32 %v392_v58, %v488_v20  ;;  %v2605_v58 = vld [vmem:[%s2773_s2] ss:$0 sm:$0xff] }
  0xb4   : > { %v1342_v56 = vmax.f32 %v2545_v41, %v1214_v57  ;;  %v1051_v51 = vor.u32 %v1050_v25, %v877_v2  ;;  %v1049_v47 = vor.u32 %v1048_v14, %v870_v36  ;;  %v615_v3 = vpack.c.bf16 %v2590_v35, %v2590_v35  ;;  %v1554_v53 = vpop.f32.mrf.mxu1 }
  0xb5   : > { %v1341_v43 = vmax.f32 %v2548_v27, %v1213_v1  ;;  %v873_v16 = vor.u32 %v872_v4, %v868_v23  ;;  %v880_v6 = vor.u32 %v879_v48, %v875_v29  ;;  %v616_v41 = vpack.c.bf16 %v2593_v59, %v2593_v59 }
  0xb6   : > { %v1374_v52 = vpack.c.bf16 %v1342_v56, %v1342_v56  ;;  %v1126_v39 = vsel %vm2112_vm6, 4286644096, %v1051_v51  ;;  %v1125_v7 = vsel %vm2112_vm6, 4286644096, %v1049_v47  ;;  %v679_v8 = vunpack.c.l.b16 %v615_v3 }
  0xb7   : > { %v1373_v27 = vpack.c.bf16 %v1341_v43, %v1341_v43  ;;  %v994_v60 = vsel %vm2106_vm5, %v873_v16, 4286644096  ;;  %v1190_v63 = vunpack.c.l.bf16 %v1126_v39  ;;  %v995_v18 = vsel %vm2106_vm5, %v880_v6, 4286644096 }
  0xb8   : > { %v1439_v13 = vunpack.c.l.b16 %v1374_v52  ;;  %v1157_v46 = vunpack.c.l.bf16 %v994_v60  ;;  %v1189_v0 = vunpack.c.l.bf16 %v1125_v7  ;;  %v1158_v31 = vunpack.c.l.bf16 %v995_v18 }
  0xb9   : > { %v1438_v44 = vunpack.c.l.b16 %v1373_v27  ;;  %v680_v32 = vunpack.c.l.b16 %v616_v41  ;;  %v1618_v10 = vmul.f32 %v2605_v58, %v1534_v15  ;;  %v1626_v54 = vmul.f32 %v2605_v58, %v1554_v53  ;;  %v1536_v22 = vpop.f32.mrf.mxu0 }
  0xba   : > { %v1221_v34 = vmax.f32 %v1157_v46, %v1189_v0  ;;  %v1222_v5 = vmax.f32 %v1158_v31, %v1190_v63  ;;  %v711_v50 = vpack.c.b16 %v679_v8, %v679_v8  ;;  %v1619_v19 = vmul.f32 %v2605_v58, %v1536_v22 }
  0xbb   : > { %v1463_v21 = vpack.c.b16 %v1439_v13, %v1438_v44  ;;  %v712_v49 = vpack.c.b16 %v680_v32, %v680_v32  ;;  %v1654_v62 = vadd.f32 %v2616_v11, %v1618_v10  ;;  %v1662_v26 = vadd.f32 %v2616_v11, %v1626_v54 }
  0xbc   : > { %v1349_v33 = vmax.f32 %v2570_v28, %v1221_v34  ;;  %v1350_v17 = vmax.f32 %v2564_v45, %v1222_v5  ;;  %v924_v38 = vshrl.u32 %v711_v50, 16  ;;  %v926_v61 = vshll.u32 %v711_v50, 16  ;;  %v1556_v36 = vpop.f32.mrf.mxu1 }
  0xbd   : > { %1854 = vmatmul.msk.bf16.gmra.mxu1 %vm1472_vm7, %v1463_v21  ;;  %v931_v29 = vshrl.u32 %v712_v49, 16  ;;  %v933_v9 = vshll.u32 %v712_v49, 16  ;;  %v1686_v12 = vmax.f32 %v1654_v62, 0.0  ;;  %v1694_v55 = vmax.f32 %v1662_v26, 0.0 }
  0xbe   : > { %v1381_v42 = vpack.c.bf16 %v1349_v33, %v1349_v33  ;;  %v1382_v28 = vpack.c.bf16 %v1350_v17, %v1350_v17  ;;  %v928_v40 = vrot.slane %v926_v61, 1  ;;  %v1064_v24 = vrot.slane %v924_v38, 7 }
  0xbf   : > { %v1066_v23 = vrot.slane %v931_v29, 7  ;;  %v935_v57 = vrot.slane %v933_v9, 1  ;;  %v1718_v2 = vpack.c.bf16 %v1686_v12, %v1686_v12  ;;  %v1726_v25 = vpack.c.bf16 %v1694_v55, %v1694_v55 }
  0xc0   : > { %v1446_v45 = vunpack.c.l.b16 %v1381_v42  ;;  %v1447_v20 = vunpack.c.l.b16 %v1382_v28  ;;  %v929_v15 = vor.u32 %v928_v40, %v924_v38  ;;  %v1065_v1 = vor.u32 %v1064_v24, %v926_v61 }
  0xc1   : > { %v1067_v4 = vor.u32 %v1066_v23, %v933_v9  ;;  %v936_v14 = vor.u32 %v935_v57, %v931_v29  ;;  %1751 = vst.msk [vmem:[%s2631_s29] sm:$0xf] %vm1750_vm8, %v1718_v2  ;;  %v1655_v56 = vadd.f32 %v2616_v11, %v1619_v19  ;;  %v1627_v48 = vmul.f32 %v2605_v58, %v1556_v36 }
  0xc2   : > { %v1467_v51 = vpack.c.b16 %v1447_v20, %v1446_v45  ;;  %v1002_v43 = vsel %vm2106_vm5, %v929_v15, 4286644096  ;;  %v1133_v16 = vsel %vm2112_vm6, 4286644096, %v1065_v1  ;;  %1759 = vst.msk [vmem:[%s2631_s29 + $0x20] sm:$0xf] %vm1750_vm8, %v1726_v25 }
  0xc3   : > { %v1134_v47 = vsel %vm2112_vm6, 4286644096, %v1067_v4  ;;  %v1003_v3 = vsel %vm2106_vm5, %v936_v14, 4286644096  ;;  %v1165_v53 = vunpack.c.l.bf16 %v1002_v43  ;;  %v1197_v52 = vunpack.c.l.bf16 %v1133_v16  ;;  %v1574_v39 = vpop.f32.mrf.mxu2 }
  0xc4   : > { %v1198_v6 = vunpack.c.l.bf16 %v1134_v47  ;;  %1858 = vmatmul.msk.bf16.gmra.mxu2 %vm1472_vm7, %v1467_v51  ;;  %v1166_v41 = vunpack.c.l.bf16 %v1003_v3  ;;  %v1634_v27 = vmul.f32 %v2605_v58, %v1574_v39  ;;  %v1687_v60 = vmax.f32 %v1655_v56, 0.0 }
  0xc5   : > { %v1663_v37 = vadd.f32 %v2616_v11, %v1627_v48  ;;  %v1229_v7 = vmax.f32 %v1165_v53, %v1197_v52 }
  0xc6   : > { %v1230_v63 = vmax.f32 %v1166_v41, %v1198_v6  ;;  %v1670_v30 = vadd.f32 %v2616_v11, %v1634_v27  ;;  %v1719_v13 = vpack.c.bf16 %v1687_v60, %v1687_v60 }
  0xc7   : > { %v1695_v18 = vmax.f32 %v1663_v37, 0.0  ;;  %v1357_v46 = vmax.f32 %v2590_v35, %v1229_v7 }
  0xc8   : > { %v1358_v0 = vmax.f32 %v2593_v59, %v1230_v63  ;;  %v1702_v44 = vmax.f32 %v1670_v30, 0.0  ;;  %1752 = vst.msk [vmem:[%s2631_s29 + $0x4] sm:$0xf] %vm1750_vm8, %v1719_v13 }
  0xc9   : > { %v1727_v31 = vpack.c.bf16 %v1695_v18, %v1695_v18  ;;  %v1389_v8 = vpack.c.bf16 %v1357_v46, %v1357_v46 }
  0xca   : > { %v1390_v32 = vpack.c.bf16 %v1358_v0, %v1358_v0  ;;  %v1734_v34 = vpack.c.bf16 %v1702_v44, %v1702_v44 }
  0xcb   : > { %1760 = vst.msk [vmem:[%s2631_s29 + $0x24] sm:$0xf] %vm1750_vm8, %v1727_v31  ;;  %v1454_v10 = vunpack.c.l.b16 %v1389_v8  ;;  %v1576_v54 = vpop.f32.mrf.mxu2 }
  0xcc   : > { %v1455_v22 = vunpack.c.l.b16 %v1390_v32  ;;  %1767 = vst.msk [vmem:[%s2631_s29 + $0x40] sm:$0xf] %vm1750_vm8, %v1734_v34  ;;  %v1635_v35 = vmul.f32 %v2605_v58, %v1576_v54 }
  0xce   : > { %v1471_v21 = vpack.c.b16 %v1455_v22, %v1454_v10  ;;  %v1671_v59 = vadd.f32 %v2616_v11, %v1635_v35 }
  0xd0   : > { %1862 = vmatmul.msk.bf16.gmra.mxu3 %vm1472_vm7, %v1471_v21  ;;  %v1703_v50 = vmax.f32 %v1671_v59, 0.0 }
  0xd1   : > { %v1594_v5 = vpop.f32.mrf.mxu3 }
  0xd2   : > { %v1642_v49 = vmul.f32 %v2605_v58, %v1594_v5  ;;  %v1735_v33 = vpack.c.bf16 %v1703_v50, %v1703_v50 }
  0xd4   : > { %v1678_v62 = vadd.f32 %v2616_v11, %v1642_v49  ;;  %1768 = vst.msk [vmem:[%s2631_s29 + $0x44] sm:$0xf] %vm1750_vm8, %v1735_v33 }
  0xd6   : > { %v1710_v26 = vmax.f32 %v1678_v62, 0.0 }
  0xd8   : > { %v1742_v19 = vpack.c.bf16 %v1710_v26, %v1710_v26  ;;  %v1539_v17 = vpop.f32.mrf.mxu0 }
  0xd9   : > { %v1596_v38 = vpop.f32.mrf.mxu3  ;;  %v1620_v61 = vmul.f32 %v2605_v58, %v1539_v17 }
  0xda   : > { %1775 = vst.msk [vmem:[%s2631_s29 + $0x60] sm:$0xf] %vm1750_vm8, %v1742_v19  ;;  %v1643_v29 = vmul.f32 %v2605_v58, %v1596_v38 }
  0xdb   : > { %v1656_v42 = vadd.f32 %v2616_v11, %v1620_v61 }
  0xdc   : > { %v1679_v9 = vadd.f32 %v2616_v11, %v1643_v29 }
  0xdd   : > { %v1688_v12 = vmax.f32 %v1656_v42, 0.0 }
  0xde   : > { %v1711_v55 = vmax.f32 %v1679_v9, 0.0 }
  0xdf   : > { %v1720_v28 = vpack.c.bf16 %v1688_v12, %v1688_v12  ;;  %v1559_v40 = vpop.f32.mrf.mxu1 }
  0xe0   : > { %v1743_v24 = vpack.c.bf16 %v1711_v55, %v1711_v55  ;;  %v1628_v23 = vmul.f32 %v2605_v58, %v1559_v40  ;;  %v1541_v2 = vpop.f32.mrf.mxu0 }
  0xe1   : > { %1753 = vst.msk [vmem:[%s2631_s29 + $0x8] sm:$0xf] %vm1750_vm8, %v1720_v28  ;;  %v1621_v20 = vmul.f32 %v2605_v58, %v1541_v2 }
  0xe2   : > { %1776 = vst.msk [vmem:[%s2631_s29 + $0x64] sm:$0xf] %vm1750_vm8, %v1743_v24  ;;  %v1664_v36 = vadd.f32 %v2616_v11, %v1628_v23 }
  0xe3   : > { %v1657_v1 = vadd.f32 %v2616_v11, %v1621_v20 }
  0xe4   : > { %v1696_v45 = vmax.f32 %v1664_v36, 0.0 }
  0xe5   : > { %v1689_v14 = vmax.f32 %v1657_v1, 0.0 }
  0xe6   : > { %v1728_v57 = vpack.c.bf16 %v1696_v45, %v1696_v45 }
  0xe7   : > { %v1561_v25 = vpop.f32.mrf.mxu1  ;;  %v1721_v48 = vpack.c.bf16 %v1689_v14, %v1689_v14 }
  0xe8   : > { %1761 = vst.msk [vmem:[%s2631_s29 + $0x28] sm:$0xf] %vm1750_vm8, %v1728_v57  ;;  %v1629_v15 = vmul.f32 %v2605_v58, %v1561_v25 }
  0xe9   : > { %1754 = vst.msk [vmem:[%s2631_s29 + $0xc] sm:$0xf] %vm1750_vm8, %v1721_v48 }
  0xea   : > { %v1665_v4 = vadd.f32 %v2616_v11, %v1629_v15 }
  0xec   : > { %v1697_v56 = vmax.f32 %v1665_v4, 0.0 }
  0xee   : > { %v1729_v51 = vpack.c.bf16 %v1697_v56, %v1697_v56 }
  0xf0   : > { %1762 = vst.msk [vmem:[%s2631_s29 + $0x2c] sm:$0xf] %vm1750_vm8, %v1729_v51 }
  0xf3   : > { %v1579_v43 = vpop.f32.mrf.mxu2 }
  0xf4   : > { %v1636_v16 = vmul.f32 %v2605_v58, %v1579_v43 }
  0xf6   : > { %v1672_v47 = vadd.f32 %v2616_v11, %v1636_v16 }
  0xf8   : > { %v1704_v3 = vmax.f32 %v1672_v47, 0.0 }
  0xfa   : > { %v1736_v53 = vpack.c.bf16 %v1704_v3, %v1704_v3 }
  0xfb   : > { %v1581_v52 = vpop.f32.mrf.mxu2 }
  0xfc   : > { %1769 = vst.msk [vmem:[%s2631_s29 + $0x48] sm:$0xf] %vm1750_vm8, %v1736_v53  ;;  %v1637_v6 = vmul.f32 %v2605_v58, %v1581_v52 }
  0xfd   : > { %v1599_v39 = vpop.f32.mrf.mxu3 }
  0xfe   : > { %v1644_v41 = vmul.f32 %v2605_v58, %v1599_v39  ;;  %v1673_v27 = vadd.f32 %v2616_v11, %v1637_v6 }
 0x100   : > { %v1680_v60 = vadd.f32 %v2616_v11, %v1644_v41  ;;  %v1705_v37 = vmax.f32 %v1673_v27, 0.0 }
 0x102   : > { %v1712_v7 = vmax.f32 %v1680_v60, 0.0  ;;  %v1737_v63 = vpack.c.bf16 %v1705_v37, %v1705_v37 }
 0x103   : > { %v1544_v30 = vpop.f32.mrf.mxu0 }
 0x104   : > { %v1622_v13 = vmul.f32 %v2605_v58, %v1544_v30  ;;  %v1744_v18 = vpack.c.bf16 %v1712_v7, %v1712_v7  ;;  %1770 = vst.msk [vmem:[%s2631_s29 + $0x4c] sm:$0xf] %vm1750_vm8, %v1737_v63 }
 0x105   : > { %v1601_v46 = vpop.f32.mrf.mxu3 }
 0x106   : > { %v1658_v0 = vadd.f32 %v2616_v11, %v1622_v13  ;;  %1777 = vst.msk [vmem:[%s2631_s29 + $0x68] sm:$0xf] %vm1750_vm8, %v1744_v18  ;;  %v1645_v44 = vmul.f32 %v2605_v58, %v1601_v46 }
 0x108   : > { %v1690_v31 = vmax.f32 %v1658_v0, 0.0  ;;  %v1681_v8 = vadd.f32 %v2616_v11, %v1645_v44 }
 0x10a   : > { %v1722_v32 = vpack.c.bf16 %v1690_v31, %v1690_v31  ;;  %v1713_v34 = vmax.f32 %v1681_v8, 0.0 }
 0x10b   : > { %v1546_v59 = vpop.f32.mrf.mxu0 }
 0x10c   : > { %1755 = vst.msk [vmem:[%s2631_s29 + $0x10] sm:$0xf] %vm1750_vm8, %v1722_v32  ;;  %v1745_v10 = vpack.c.bf16 %v1713_v34, %v1713_v34  ;;  %v1623_v5 = vmul.f32 %v2605_v58, %v1546_v59 }
 0x10e   : > { %v1564_v54 = vpop.f32.mrf.mxu1  ;;  %1778 = vst.msk [vmem:[%s2631_s29 + $0x6c] sm:$0xf] %vm1750_vm8, %v1745_v10  ;;  %v1659_v49 = vadd.f32 %v2616_v11, %v1623_v5 }
 0x10f   : > { %v1630_v22 = vmul.f32 %v2605_v58, %v1564_v54 }
 0x110   : > { %v1691_v26 = vmax.f32 %v1659_v49, 0.0 }
 0x111   : > { %v1666_v35 = vadd.f32 %v2616_v11, %v1630_v22 }
 0x112   : > { %v1723_v17 = vpack.c.bf16 %v1691_v26, %v1691_v26 }
 0x113   : > { %v1698_v21 = vmax.f32 %v1666_v35, 0.0 }
 0x114   : > { %1756 = vst.msk [vmem:[%s2631_s29 + $0x14] sm:$0xf] %vm1750_vm8, %v1723_v17 }
 0x115   : > { %v1730_v50 = vpack.c.bf16 %v1698_v21, %v1698_v21 }
 0x116   : > { %v1566_v33 = vpop.f32.mrf.mxu1 }
 0x117   : > { %1763 = vst.msk [vmem:[%s2631_s29 + $0x30] sm:$0xf] %vm1750_vm8, %v1730_v50  ;;  %v1631_v62 = vmul.f32 %v2605_v58, %v1566_v33 }
 0x119   : > { %v1667_v19 = vadd.f32 %v2616_v11, %v1631_v62 }
 0x11b   : > { %v1699_v38 = vmax.f32 %v1667_v19, 0.0 }
 0x11d   : > { %v1731_v61 = vpack.c.bf16 %v1699_v38, %v1699_v38 }
 0x11f   : > { %1764 = vst.msk [vmem:[%s2631_s29 + $0x34] sm:$0xf] %vm1750_vm8, %v1731_v61  ;;  %v1584_v29 = vpop.f32.mrf.mxu2 }
 0x120   : > { %v1638_v42 = vmul.f32 %v2605_v58, %v1584_v29 }
 0x122   : > { %v1674_v9 = vadd.f32 %v2616_v11, %v1638_v42 }
 0x124   : > { %v1706_v12 = vmax.f32 %v1674_v9, 0.0 }
 0x126   : > { %v1738_v55 = vpack.c.bf16 %v1706_v12, %v1706_v12 }
 0x127   : > { %v1586_v28 = vpop.f32.mrf.mxu2 }
 0x128   : > { %1771 = vst.msk [vmem:[%s2631_s29 + $0x50] sm:$0xf] %vm1750_vm8, %v1738_v55  ;;  %v1639_v40 = vmul.f32 %v2605_v58, %v1586_v28 }
 0x129   : > { %v1604_v24 = vpop.f32.mrf.mxu3 }
 0x12a   : > { %v1646_v23 = vmul.f32 %v2605_v58, %v1604_v24  ;;  %v1675_v36 = vadd.f32 %v2616_v11, %v1639_v40 }
 0x12c   : > { %v1682_v45 = vadd.f32 %v2616_v11, %v1646_v23  ;;  %v1707_v57 = vmax.f32 %v1675_v36, 0.0 }
 0x12e   : > { %v1714_v2 = vmax.f32 %v1682_v45, 0.0  ;;  %v1739_v25 = vpack.c.bf16 %v1707_v57, %v1707_v57 }
 0x12f   : > { %v1549_v20 = vpop.f32.mrf.mxu0 }
 0x130   : > { %v1624_v15 = vmul.f32 %v2605_v58, %v1549_v20  ;;  %v1746_v1 = vpack.c.bf16 %v1714_v2, %v1714_v2  ;;  %1772 = vst.msk [vmem:[%s2631_s29 + $0x54] sm:$0xf] %vm1750_vm8, %v1739_v25 }
 0x131   : > { %v1606_v4 = vpop.f32.mrf.mxu3 }
 0x132   : > { %v1660_v14 = vadd.f32 %v2616_v11, %v1624_v15  ;;  %1779 = vst.msk [vmem:[%s2631_s29 + $0x70] sm:$0xf] %vm1750_vm8, %v1746_v1  ;;  %v1647_v56 = vmul.f32 %v2605_v58, %v1606_v4 }
 0x134   : > { %v1692_v48 = vmax.f32 %v1660_v14, 0.0  ;;  %v1683_v51 = vadd.f32 %v2616_v11, %v1647_v56 }
 0x136   : > { %v1724_v43 = vpack.c.bf16 %v1692_v48, %v1692_v48  ;;  %v1715_v16 = vmax.f32 %v1683_v51, 0.0 }
 0x137   : > { %v1551_v47 = vpop.f32.mrf.mxu0 }
 0x138   : > { %1757 = vst.msk [vmem:[%s2631_s29 + $0x18] sm:$0xf] %vm1750_vm8, %v1724_v43  ;;  %v1625_v3 = vmul.f32 %v2605_v58, %v1551_v47  ;;  %v1747_v53 = vpack.c.bf16 %v1715_v16, %v1715_v16 }
 0x13a   : > { %v1569_v52 = vpop.f32.mrf.mxu1  ;;  %v1661_v6 = vadd.f32 %v2616_v11, %v1625_v3  ;;  %1780 = vst.msk [vmem:[%s2631_s29 + $0x74] sm:$0xf] %vm1750_vm8, %v1747_v53 }
 0x13b   : > { %v1632_v39 = vmul.f32 %v2605_v58, %v1569_v52 }
 0x13c   : > { %v1693_v41 = vmax.f32 %v1661_v6, 0.0 }
 0x13d   : > { %v1668_v27 = vadd.f32 %v2616_v11, %v1632_v39 }
 0x13e   : > { %v1725_v60 = vpack.c.bf16 %v1693_v41, %v1693_v41 }
 0x13f   : > { %v1700_v37 = vmax.f32 %v1668_v27, 0.0 }
 0x140   : > { %1758 = vst.msk [vmem:[%s2631_s29 + $0x1c] sm:$0xf] %vm1750_vm8, %v1725_v60 }
 0x141   : > { %v1732_v7 = vpack.c.bf16 %v1700_v37, %v1700_v37 }
 0x142   : > { %v1571_v63 = vpop.f32.mrf.mxu1 }
 0x143   : > { %1765 = vst.msk [vmem:[%s2631_s29 + $0x38] sm:$0xf] %vm1750_vm8, %v1732_v7  ;;  %v1633_v30 = vmul.f32 %v2605_v58, %v1571_v63 }
 0x145   : > { %v1669_v13 = vadd.f32 %v2616_v11, %v1633_v30 }
 0x147   : > { %v1701_v18 = vmax.f32 %v1669_v13, 0.0  ;;  %v1589_v46 = vpop.f32.mrf.mxu2 }
 0x148   : > { %v1640_v0 = vmul.f32 %v2605_v58, %v1589_v46 }
 0x149   : > { %v1733_v44 = vpack.c.bf16 %v1701_v18, %v1701_v18 }
 0x14a   : > { %v1676_v31 = vadd.f32 %v2616_v11, %v1640_v0 }
 0x14b   : > { %1766 = vst.msk [vmem:[%s2631_s29 + $0x3c] sm:$0xf] %vm1750_vm8, %v1733_v44 }
 0x14c   : > { %v1708_v8 = vmax.f32 %v1676_v31, 0.0 }
 0x14e   : > { %v1740_v32 = vpack.c.bf16 %v1708_v8, %v1708_v8 }
 0x14f   : > { %v1591_v34 = vpop.f32.mrf.mxu2 }
 0x150   : > { %1773 = vst.msk [vmem:[%s2631_s29 + $0x58] sm:$0xf] %vm1750_vm8, %v1740_v32  ;;  %v1641_v10 = vmul.f32 %v2605_v58, %v1591_v34 }
 0x152   : > { %v1677_v54 = vadd.f32 %v2616_v11, %v1641_v10 }
 0x153   : > { %v1609_v22 = vpop.f32.mrf.mxu3 }
 0x154   : > { %v1648_v35 = vmul.f32 %v2605_v58, %v1609_v22  ;;  %v1709_v21 = vmax.f32 %v1677_v54, 0.0 }
 0x156   : > { %v1684_v59 = vadd.f32 %v2616_v11, %v1648_v35  ;;  %v1741_v5 = vpack.c.bf16 %v1709_v21, %v1709_v21 }
 0x158   : > { %v1716_v50 = vmax.f32 %v1684_v59, 0.0  ;;  %1774 = vst.msk [vmem:[%s2631_s29 + $0x5c] sm:$0xf] %vm1750_vm8, %v1741_v5 }
 0x15a   : > { %v1748_v49 = vpack.c.bf16 %v1716_v50, %v1716_v50 }
 0x15b   : > { %v1611_v33 = vpop.f32.mrf.mxu3 }
 0x15c   : > { %1781 = vst.msk [vmem:[%s2631_s29 + $0x78] sm:$0xf] %vm1750_vm8, %v1748_v49  ;;  %v1649_v62 = vmul.f32 %v2605_v58, %v1611_v33 }
 0x15e   : > { %v1685_v26 = vadd.f32 %v2616_v11, %v1649_v62 }
 0x160   : > { %v1717_v19 = vmax.f32 %v1685_v26, 0.0 }
 0x162   : > { %v1749_v17 = vpack.c.bf16 %v1717_v19, %v1717_v19 }
 0x164   : > { %1782 = vst.msk [vmem:[%s2631_s29 + $0x7c] sm:$0xf] %vm1750_vm8, %v1749_v17 }
 0x165 PF: > { %s14_s15 = sadd.s32 1, %s1966_s15  }
 0x166   : > { %p11_p4 = scmp.ge.s32.totalorder %s14_s15, 4  }
 0x168   :  { %13 = sbr.rel (!%p11_p4) target bundleno = 1 (0x1), region = 66 }

// kernel: inception_block.8
= control target key start
LH: loop header
LB: loop body
LE: loop exit
PB: predicated region body
PF: predicated region fallthrough
CT: control target
= control target key end

     0   :  { %vm343_vm0 = vcmask 1041408   ;;  %vm246_vm1 = vcmask 31744   ;;  %vm780_vm2 = vcmask 60416   ;;  %s1635_s23 = smov 116   ;;  %s1636_s24 = smov 120   ;;  %vm1101_vm3 = vcmask 27648   ;;  %s3129_s1 = inlined_call_operand.vmem [shape: bf16[4,16], index: 1, kind: input, shape index: {}]   ;;  %s3130_s0 = inlined_call_operand.vmem [shape: bf16[512,4], index: 0, kind: input, shape index: {}]   ;;  %s3131_s2 = inlined_call_operand.vmem [shape: f32[1,16], index: 2, kind: input, shape index: {}]   ;;  %s3132_s3 = inlined_call_operand.vmem [shape: f32[1,16], index: 3, kind: input, shape index: {}]   ;;  %s3133_s4 = inlined_call_operand.vmem [shape: bf16[512,8], index: 4, kind: output, shape index: {0}]   ;;  %s3134_s6 = inlined_call_operand.vmem [shape: bf16[512,4], index: 6, kind: output, shape index: {2}]   ;;  %s3135_s5 = inlined_call_operand.vmem [shape: bf16[512,4], index: 5, kind: output, shape index: {1}]  }
   0x1   :  { %v85_v0 = vld [vmem:[%s3129_s1] sm:$0x3]  ;;  %v1595_v6 = vld [vmem:[%s3130_s0 + $0x8] sm:$0xff]  ;;  %v1596_v10 = vld [vmem:[%s3130_s0 + $0x10] sm:$0xff] }
   0x2   :  { %v345_v1 = vsel %vm343_vm0, %v85_v0, 0  ;;  %v1594_v2 = vld [vmem:[%s3130_s0] sm:$0xff]  ;;  %v1603_v7 = vld [vmem:[%s3130_s0 + $0x48] sm:$0xff]  ;;  %v1604_v11 = vld [vmem:[%s3130_s0 + $0x50] sm:$0xff] }
   0x3   :  { %v1602_v3 = vld [vmem:[%s3130_s0 + $0x40] sm:$0xff]  ;;  %354 = vmatpush.bf16.msra.mxu0 %v345_v1  ;;  %1626 = vmatpush.bf16.msra.mxu1 %v345_v1  ;;  %v1619_v8 = vld [vmem:[%s3130_s0 + $0xc8] sm:$0xff]  ;;  %v1620_v12 = vld [vmem:[%s3130_s0 + $0xd0] sm:$0xff] }
   0x4   :  { %v1618_v4 = vld [vmem:[%s3130_s0 + $0xc0] sm:$0xff]  ;;  %1628 = vmatpush.bf16.msra.mxu3 %v345_v1  ;;  %1627 = vmatpush.bf16.msra.mxu2 %v345_v1  ;;  %v1611_v9 = vld [vmem:[%s3130_s0 + $0x88] sm:$0xff]  ;;  %v1612_v13 = vld [vmem:[%s3130_s0 + $0x90] sm:$0xff] }
   0x5   :  { %v1610_v5 = vld [vmem:[%s3130_s0 + $0x80] sm:$0xff]  ;;  %v1605_v14 = vld [vmem:[%s3130_s0 + $0x58] sm:$0xff]  ;;  %v1599_v28 = vld [vmem:[%s3130_s0 + $0x28] sm:$0xff] }
   0x6   :  { %1562 = vmatmul.msk.bf16.vlgmr.msra.gmra.mxu0 %vm246_vm1, %v1594_v2  ;;  %1570 = vmatmul.msk.bf16.vlgmr.msra.gmra.mxu1 %vm246_vm1, %v1602_v3  ;;  %v1597_v15 = vld [vmem:[%s3130_s0 + $0x18] sm:$0xff]  ;;  %v1606_v18 = vld [vmem:[%s3130_s0 + $0x60] sm:$0xff]  ;;  %v1623_v29 = vld [vmem:[%s3130_s0 + $0xe8] sm:$0xff] }
   0x7   :  { %1586 = vmatmul.msk.bf16.vlgmr.msra.gmra.mxu3 %vm246_vm1, %v1618_v4  ;;  %1578 = vmatmul.msk.bf16.vlgmr.msra.gmra.mxu2 %vm246_vm1, %v1610_v5  ;;  %v1613_v16 = vld [vmem:[%s3130_s0 + $0x98] sm:$0xff]  ;;  %v1614_v19 = vld [vmem:[%s3130_s0 + $0xa0] sm:$0xff]  ;;  %v1607_v46 = vld [vmem:[%s3130_s0 + $0x68] sm:$0xff] }
   0x8   :  { %v1621_v17 = vld [vmem:[%s3130_s0 + $0xd8] sm:$0xff]  ;;  %v1598_v20 = vld [vmem:[%s3130_s0 + $0x20] sm:$0xff]  ;;  %v1615_v47 = vld [vmem:[%s3130_s0 + $0xa8] sm:$0xff] }
   0x9   :  { %v1622_v21 = vld [vmem:[%s3130_s0 + $0xe0] sm:$0xff] }
   0xa   :  { %v1758_v22 = vld [vmem:[%s3131_s2] ss:$0 sm:$0xff] }
   0xb   :  { %v1763_v23 = vld [vmem:[%s3132_s3] ss:$0 sm:$0xff] }
  0x16   :  { %1563 = vmatmul.msk.bf16.gmra.mxu0 %vm246_vm1, %v1595_v6  ;;  %1571 = vmatmul.msk.bf16.gmra.mxu1 %vm246_vm1, %v1603_v7 }
  0x17   :  { %1587 = vmatmul.msk.bf16.gmra.mxu3 %vm246_vm1, %v1619_v8  ;;  %1579 = vmatmul.msk.bf16.gmra.mxu2 %vm246_vm1, %v1611_v9 }
  0x26   :  { %1564 = vmatmul.msk.bf16.gmra.mxu0 %vm246_vm1, %v1596_v10  ;;  %1572 = vmatmul.msk.bf16.gmra.mxu1 %vm246_vm1, %v1604_v11 }
  0x27   :  { %1588 = vmatmul.msk.bf16.gmra.mxu3 %vm246_vm1, %v1620_v12  ;;  %1580 = vmatmul.msk.bf16.gmra.mxu2 %vm246_vm1, %v1612_v13 }
  0x36   :  { %1573 = vmatmul.msk.bf16.gmra.mxu1 %vm246_vm1, %v1605_v14  ;;  %1565 = vmatmul.msk.bf16.gmra.mxu0 %vm246_vm1, %v1597_v15 }
  0x37   :  { %1581 = vmatmul.msk.bf16.gmra.mxu2 %vm246_vm1, %v1613_v16  ;;  %1589 = vmatmul.msk.bf16.gmra.mxu3 %vm246_vm1, %v1621_v17 }
  0x46   :  { %1574 = vmatmul.msk.bf16.gmra.mxu1 %vm246_vm1, %v1606_v18  ;;  %1566 = vmatmul.msk.bf16.gmra.mxu0 %vm246_vm1, %v1598_v20 }
  0x47   :  { %1582 = vmatmul.msk.bf16.gmra.mxu2 %vm246_vm1, %v1614_v19  ;;  %1590 = vmatmul.msk.bf16.gmra.mxu3 %vm246_vm1, %v1622_v21 }
  0x56   :  { %1567 = vmatmul.msk.bf16.gmra.mxu0 %vm246_vm1, %v1599_v28  ;;  %1575 = vmatmul.msk.bf16.gmra.mxu1 %vm246_vm1, %v1607_v46 }
  0x57   :  { %1591 = vmatmul.msk.bf16.gmra.mxu3 %vm246_vm1, %v1623_v29  ;;  %1583 = vmatmul.msk.bf16.gmra.mxu2 %vm246_vm1, %v1615_v47 }
  0x83   :  { %v356_v24 = vpop.f32.mrf.mxu0  ;;  %v396_v25 = vpop.f32.mrf.mxu1 }
  0x84   :  { %v520_v26 = vmul.f32 %v1758_v22, %v356_v24  ;;  %v536_v27 = vmul.f32 %v1758_v22, %v396_v25 }
  0x86   :  { %v588_v30 = vadd.f32 %v1763_v23, %v520_v26  ;;  %v604_v31 = vadd.f32 %v1763_v23, %v536_v27 }
  0x88   :  { %v652_v32 = vmax.f32 %v588_v30, 0.0  ;;  %v668_v33 = vmax.f32 %v604_v31, 0.0 }
  0x8a   :  { %v716_v34 = vpack.c.bf16 %v652_v32, %v652_v32  ;;  %v732_v35 = vpack.c.bf16 %v668_v33, %v668_v33  ;;  %v476_v36 = vpop.f32.mrf.mxu3  ;;  %v436_v37 = vpop.f32.mrf.mxu2 }
  0x8b   :  { %v568_v38 = vmul.f32 %v1758_v22, %v476_v36  ;;  %v358_v39 = vpop.f32.mrf.mxu0  ;;  %v398_v40 = vpop.f32.mrf.mxu1  ;;  %v552_v41 = vmul.f32 %v1758_v22, %v436_v37 }
  0x8c   :  { %781 = vst.msk [vmem:[%s3133_s4] sm:$0xf] %vm780_vm2, %v716_v34  ;;  %v521_v42 = vmul.f32 %v1758_v22, %v358_v39  ;;  %v537_v43 = vmul.f32 %v1758_v22, %v398_v40  ;;  %1198 = vrot.lane.b32.xlu2 %v732_v35, %s1635_s23  ;;  %941 = vrot.lane.b32.xlu1 %v732_v35, %s1636_s24 }
  0x8d   :  { %797 = vst.msk [vmem:[%s3133_s4 + $0x40] sm:$0xf] %vm780_vm2, %v732_v35  ;;  %v636_v44 = vadd.f32 %v1763_v23, %v568_v38  ;;  %v620_v45 = vadd.f32 %v1763_v23, %v552_v41  ;;  %909 = vrot.lane.b32.xlu0 %v716_v34, %s1636_s24 }
  0x8e   :  { %v589_v48 = vadd.f32 %v1763_v23, %v521_v42  ;;  %v605_v49 = vadd.f32 %v1763_v23, %v537_v43 }
  0x8f   :  { %v700_v50 = vmax.f32 %v636_v44, 0.0  ;;  %v684_v51 = vmax.f32 %v620_v45, 0.0  ;;  %v1608_v44 = vld [vmem:[%s3130_s0 + $0x70] sm:$0xff] }
  0x90   :  { %v653_v52 = vmax.f32 %v589_v48, 0.0  ;;  %v669_v53 = vmax.f32 %v605_v49, 0.0  ;;  %1576 = vmatmul.msk.bf16.gmra.mxu1 %vm246_vm1, %v1608_v44 }
  0x91   :  { %v1804_v54 = vpack.c.bf16 %v700_v50, %v700_v50  ;;  %v748_v55 = vpack.c.bf16 %v684_v51, %v684_v51 }
  0x92   :  { %v1806_v56 = vpack.c.bf16 %v653_v52, %v653_v52  ;;  %v1808_v57 = vpack.c.bf16 %v669_v53, %v669_v53  ;;  %v478_v58 = vpop.f32.mrf.mxu3  ;;  %v438_v59 = vpop.f32.mrf.mxu2 }
  0x93   :  { %829 = vst.msk [vmem:[%s3133_s4 + $0xc0] sm:$0xf] %vm780_vm2, %v1804_v54  ;;  %v569_v60 = vmul.f32 %v1758_v22, %v478_v58  ;;  %v553_v61 = vmul.f32 %v1758_v22, %v438_v59  ;;  %v361_v62 = vpop.f32.mrf.mxu0  ;;  %v401_v63 = vpop.f32.mrf.mxu1 }
  0x94   :  { %782 = vst.msk [vmem:[%s3133_s4 + $0x4] sm:$0xf] %vm780_vm2, %v1806_v56  ;;  %973 = vrot.lane.b32.xlu2 %v748_v55, %s1636_s24  ;;  %1166 = vrot.lane.b32.xlu1 %v716_v34, %s1635_s23  ;;  %v522_v0 = vmul.f32 %v1758_v22, %v361_v62  ;;  %v538_v1 = vmul.f32 %v1758_v22, %v401_v63  ;;  %v1600_v62 = vld [vmem:[%s3130_s0 + $0x30] sm:$0xff] }
  0x95   :  { %798 = vst.msk [vmem:[%s3133_s4 + $0x44] sm:$0xf] %vm780_vm2, %v1808_v57  ;;  %v637_v2 = vadd.f32 %v1763_v23, %v569_v60  ;;  %v621_v3 = vadd.f32 %v1763_v23, %v553_v61  ;;  %1005 = vrot.lane.b32.xlu0 %v1804_v54, %s1636_s24  ;;  %v1616_v63 = vld [vmem:[%s3130_s0 + $0xb0] sm:$0xff]  ;;  %1568 = vmatmul.msk.bf16.gmra.mxu0 %vm246_vm1, %v1600_v62 }
  0x96   :  { %813 = vst.msk [vmem:[%s3133_s4 + $0x80] sm:$0xf] %vm780_vm2, %v748_v55  ;;  %v590_v4 = vadd.f32 %v1763_v23, %v522_v0  ;;  %v606_v5 = vadd.f32 %v1763_v23, %v538_v1  ;;  %1584 = vmatmul.msk.bf16.gmra.mxu2 %vm246_vm1, %v1616_v63 }
  0x97   :  { %v701_v6 = vmax.f32 %v637_v2, 0.0  ;;  %v685_v7 = vmax.f32 %v621_v3, 0.0 }
  0x98   :  { %v654_v8 = vmax.f32 %v590_v4, 0.0  ;;  %v670_v9 = vmax.f32 %v606_v5, 0.0 }
  0x99   :  { %v1841_v10 = vpack.c.bf16 %v701_v6, %v701_v6  ;;  %v1843_v11 = vpack.c.bf16 %v685_v7, %v685_v7 }
  0x9a   :  { %v1845_v12 = vpack.c.bf16 %v654_v8, %v654_v8  ;;  %v1847_v13 = vpack.c.bf16 %v670_v9, %v670_v9  ;;  %v481_v14 = vpop.f32.mrf.mxu3  ;;  %v441_v15 = vpop.f32.mrf.mxu2 }
  0x9b   :  { %830 = vst.msk [vmem:[%s3133_s4 + $0xc4] sm:$0xf] %vm780_vm2, %v1841_v10  ;;  %v363_v16 = vpop.f32.mrf.mxu0  ;;  %v570_v17 = vmul.f32 %v1758_v22, %v481_v14  ;;  %v403_v18 = vpop.f32.mrf.mxu1  ;;  %v554_v19 = vmul.f32 %v1758_v22, %v441_v15 }
  0x9c   :  { %814 = vst.msk [vmem:[%s3133_s4 + $0x84] sm:$0xf] %vm780_vm2, %v1843_v11  ;;  %943 = vrot.lane.b32.xlu2 %v1808_v57, %s1636_s24  ;;  %1007 = vrot.lane.b32.xlu1 %v1841_v10, %s1636_s24  ;;  %v523_v20 = vmul.f32 %v1758_v22, %v363_v16  ;;  %v539_v21 = vmul.f32 %v1758_v22, %v403_v18 }
  0x9d   :  { %783 = vst.msk [vmem:[%s3133_s4 + $0x8] sm:$0xf] %vm780_vm2, %v1845_v12  ;;  %1230 = vrot.lane.b32.xlu0 %v748_v55, %s1635_s23  ;;  %v638_v24 = vadd.f32 %v1763_v23, %v570_v17  ;;  %v622_v25 = vadd.f32 %v1763_v23, %v554_v19 }
  0x9e   :  { %v591_v26 = vadd.f32 %v1763_v23, %v523_v20  ;;  %799 = vst.msk [vmem:[%s3133_s4 + $0x48] sm:$0xf] %vm780_vm2, %v1847_v13  ;;  %v607_v27 = vadd.f32 %v1763_v23, %v539_v21 }
  0x9f   :  { %v702_v28 = vmax.f32 %v638_v24, 0.0  ;;  %v686_v31 = vmax.f32 %v622_v25, 0.0 }
  0xa0   :  { %v655_v29 = vmax.f32 %v591_v26, 0.0  ;;  %v671_v30 = vmax.f32 %v607_v27, 0.0 }
  0xa1   :  { %v1882_v32 = vpack.c.bf16 %v702_v28, %v702_v28  ;;  %v1904_v40 = vpack.c.bf16 %v686_v31, %v686_v31 }
  0xa2   :  { %v1884_v33 = vpack.c.bf16 %v655_v29, %v655_v29  ;;  %v1886_v34 = vpack.c.bf16 %v671_v30, %v671_v30  ;;  %v443_v35 = vpop.f32.mrf.mxu2  ;;  %v483_v36 = vpop.f32.mrf.mxu3 }
  0xa3   :  { %831 = vst.msk [vmem:[%s3133_s4 + $0xc8] sm:$0xf] %vm780_vm2, %v1882_v32  ;;  %v555_v37 = vmul.f32 %v1758_v22, %v443_v35  ;;  %v571_v38 = vmul.f32 %v1758_v22, %v483_v36  ;;  %v366_v39 = vpop.f32.mrf.mxu0  ;;  %v406_v45 = vpop.f32.mrf.mxu1 }
  0xa4   :  { %784 = vst.msk [vmem:[%s3133_s4 + $0xc] sm:$0xf] %vm780_vm2, %v1884_v33  ;;  %1232 = vrot.lane.b32.xlu1 %v1843_v11, %s1635_s23  ;;  %1168 = vrot.lane.b32.xlu2 %v1806_v56, %s1635_s23  ;;  %v524_v41 = vmul.f32 %v1758_v22, %v366_v39  ;;  %v540_v47 = vmul.f32 %v1758_v22, %v406_v45  ;;  %v1609_v39 = vld [vmem:[%s3130_s0 + $0x78] sm:$0xff] }
  0xa5   :  { %911 = vrot.lane.b32.xlu0 %v1806_v56, %s1636_s24  ;;  %800 = vst.msk [vmem:[%s3133_s4 + $0x4c] sm:$0xf] %vm780_vm2, %v1886_v34  ;;  %v623_v42 = vadd.f32 %v1763_v23, %v555_v37  ;;  %v639_v43 = vadd.f32 %v1763_v23, %v571_v38  ;;  %1577 = vmatmul.msk.bf16.gmra.mxu1 %vm246_vm1, %v1609_v39 }
  0xa6   :  { %815 = vst.msk [vmem:[%s3133_s4 + $0x88] sm:$0xf] %vm780_vm2, %v1904_v40  ;;  %v592_v46 = vadd.f32 %v1763_v23, %v524_v41  ;;  %v608_v51 = vadd.f32 %v1763_v23, %v540_v47 }
  0xa7   :  { %v687_v48 = vmax.f32 %v623_v42, 0.0  ;;  %v703_v49 = vmax.f32 %v639_v43, 0.0 }
  0xa8   :  { %v656_v50 = vmax.f32 %v592_v46, 0.0  ;;  %v672_v55 = vmax.f32 %v608_v51, 0.0 }
  0xa9   :  { %v1928_v52 = vpack.c.bf16 %v687_v48, %v687_v48  ;;  %v1930_v53 = vpack.c.bf16 %v703_v49, %v703_v49  ;;  %v1601_v48 = vld [vmem:[%s3130_s0 + $0x38] sm:$0xff] }
  0xaa   :  { %v486_v56 = vpop.f32.mrf.mxu3  ;;  %v1937_v58 = vpack.c.bf16 %v656_v50, %v656_v50  ;;  %v1949_v60 = vpack.c.bf16 %v672_v55, %v672_v55  ;;  %v446_v1 = vpop.f32.mrf.mxu2  ;;  %1569 = vmatmul.msk.bf16.gmra.mxu0 %vm246_vm1, %v1601_v48 }
  0xab   :  { %816 = vst.msk [vmem:[%s3133_s4 + $0x8c] sm:$0xf] %vm780_vm2, %v1928_v52  ;;  %v572_v59 = vmul.f32 %v1758_v22, %v486_v56  ;;  %v408_v0 = vpop.f32.mrf.mxu1  ;;  %v556_v3 = vmul.f32 %v1758_v22, %v446_v1  ;;  %v368_v19 = vpop.f32.mrf.mxu0 }
  0xac   :  { %1009 = vrot.lane.b32.xlu2 %v1882_v32, %s1636_s24  ;;  %913 = vrot.lane.b32.xlu1 %v1845_v12, %s1636_s24  ;;  %832 = vst.msk [vmem:[%s3133_s4 + $0xcc] sm:$0xf] %vm780_vm2, %v1930_v53  ;;  %v541_v2 = vmul.f32 %v1758_v22, %v408_v0  ;;  %v525_v21 = vmul.f32 %v1758_v22, %v368_v19 }
  0xad   :  { %1200 = vrot.lane.b32.xlu0 %v1808_v57, %s1635_s23  ;;  %785 = vst.msk [vmem:[%s3133_s4 + $0x10] sm:$0xf] %vm780_vm2, %v1937_v58  ;;  %v640_v61 = vadd.f32 %v1763_v23, %v572_v59  ;;  %v1624_v57 = vld [vmem:[%s3130_s0 + $0xf0] sm:$0xff]  ;;  %v624_v6 = vadd.f32 %v1763_v23, %v556_v3 }
  0xae   :  { %801 = vst.msk [vmem:[%s3133_s4 + $0x50] sm:$0xf] %vm780_vm2, %v1949_v60  ;;  %1592 = vmatmul.msk.bf16.gmra.mxu3 %vm246_vm1, %v1624_v57  ;;  %v609_v5 = vadd.f32 %v1763_v23, %v541_v2  ;;  %v593_v25 = vadd.f32 %v1763_v23, %v525_v21 }
  0xaf   :  { %v704_v4 = vmax.f32 %v640_v61, 0.0  ;;  %v688_v9 = vmax.f32 %v624_v6, 0.0 }
  0xb0   :  { %v673_v8 = vmax.f32 %v609_v5, 0.0  ;;  %v657_v28 = vmax.f32 %v593_v25, 0.0 }
  0xb1   :  { %v1980_v7 = vpack.c.bf16 %v704_v4, %v704_v4  ;;  %v1994_v17 = vpack.c.bf16 %v688_v9, %v688_v9 }
  0xb2   :  { %v488_v14 = vpop.f32.mrf.mxu3  ;;  %v1992_v16 = vpack.c.bf16 %v673_v8, %v673_v8  ;;  %v448_v20 = vpop.f32.mrf.mxu2  ;;  %v2024_v30 = vpack.c.bf16 %v657_v28, %v657_v28 }
  0xb3   :  { %833 = vst.msk [vmem:[%s3133_s4 + $0xd0] sm:$0xf] %vm780_vm2, %v1980_v7  ;;  %v573_v15 = vmul.f32 %v1758_v22, %v488_v14  ;;  %v557_v24 = vmul.f32 %v1758_v22, %v448_v20  ;;  %v411_v35 = vpop.f32.mrf.mxu1  ;;  %v371_v41 = vpop.f32.mrf.mxu0 }
  0xb4   :  { %1234 = vrot.lane.b32.xlu2 %v1904_v40, %s1635_s23  ;;  %1202 = vrot.lane.b32.xlu1 %v1847_v13, %s1635_s23  ;;  %802 = vst.msk [vmem:[%s3133_s4 + $0x54] sm:$0xf] %vm780_vm2, %v1992_v16  ;;  %v542_v36 = vmul.f32 %v1758_v22, %v411_v35 }
  0xb5   :  { %975 = vrot.lane.b32.xlu0 %v1843_v11, %s1636_s24  ;;  %v641_v18 = vadd.f32 %v1763_v23, %v573_v15  ;;  %817 = vst.msk [vmem:[%s3133_s4 + $0x90] sm:$0xf] %vm780_vm2, %v1994_v17  ;;  %v625_v26 = vadd.f32 %v1763_v23, %v557_v24 }
  0xb6   :  { %786 = vst.msk [vmem:[%s3133_s4 + $0x14] sm:$0xf] %vm780_vm2, %v2024_v30  ;;  %v610_v37 = vadd.f32 %v1763_v23, %v542_v36 }
  0xb7   :  { %v705_v11 = vmax.f32 %v641_v18, 0.0  ;;  %v689_v29 = vmax.f32 %v625_v26, 0.0 }
  0xb8   :  { %v674_v38 = vmax.f32 %v610_v37, 0.0 }
  0xb9   :  { %v2013_v27 = vpack.c.bf16 %v705_v11, %v705_v11  ;;  %v2026_v31 = vpack.c.bf16 %v689_v29, %v689_v29 }
  0xba   :  { %v451_v55 = vpop.f32.mrf.mxu2  ;;  %v491_v61 = vpop.f32.mrf.mxu3 }
  0xbb   :  { %834 = vst.msk [vmem:[%s3133_s4 + $0xd4] sm:$0xf] %vm780_vm2, %v2013_v27  ;;  %v413_v42 = vpop.f32.mrf.mxu1  ;;  %v373_v51 = vpop.f32.mrf.mxu0  ;;  %v558_v59 = vmul.f32 %v1758_v22, %v451_v55  ;;  %v574_v62 = vmul.f32 %v1758_v22, %v491_v61 }
  0xbc   :  { %1204 = vrot.lane.b32.xlu2 %v1886_v34, %s1635_s23  ;;  %977 = vrot.lane.b32.xlu1 %v1904_v40, %s1636_s24  ;;  %818 = vst.msk [vmem:[%s3133_s4 + $0x94] sm:$0xf] %vm780_vm2, %v2026_v31  ;;  %v1617_v40 = vld [vmem:[%s3130_s0 + $0xb8] sm:$0xff]  ;;  %v543_v43 = vmul.f32 %v1758_v22, %v413_v42  ;;  %v527_v56 = vmul.f32 %v1758_v22, %v373_v51 }
  0xbd   :  { %945 = vrot.lane.b32.xlu0 %v1847_v13, %s1636_s24  ;;  %v2046_v13 = vpack.c.bf16 %v674_v38, %v674_v38  ;;  %1585 = vmatmul.msk.bf16.gmra.mxu2 %vm246_vm1, %v1617_v40  ;;  %v626_v0 = vadd.f32 %v1763_v23, %v558_v59  ;;  %v642_v1 = vadd.f32 %v1763_v23, %v574_v62 }
  0xbe   :  { %v611_v45 = vadd.f32 %v1763_v23, %v543_v43  ;;  %v595_v63 = vadd.f32 %v1763_v23, %v527_v56 }
  0xbf   :  { %803 = vst.msk [vmem:[%s3133_s4 + $0x58] sm:$0xf] %vm780_vm2, %v2046_v13  ;;  %v690_v2 = vmax.f32 %v626_v0, 0.0  ;;  %v706_v3 = vmax.f32 %v642_v1, 0.0 }
  0xc0   :  { %v675_v47 = vmax.f32 %v611_v45, 0.0  ;;  %v659_v57 = vmax.f32 %v595_v63, 0.0 }
  0xc1   :  { %v2109_v5 = vpack.c.bf16 %v690_v2, %v690_v2  ;;  %v2111_v6 = vpack.c.bf16 %v706_v3, %v706_v3 }
  0xc2   :  { %v2078_v50 = vpack.c.bf16 %v675_v47, %v675_v47  ;;  %v2107_v4 = vpack.c.bf16 %v659_v57, %v659_v57  ;;  %v453_v15 = vpop.f32.mrf.mxu2 }
  0xc3   :  { %819 = vst.msk [vmem:[%s3133_s4 + $0x98] sm:$0xf] %vm780_vm2, %v2109_v5  ;;  %v559_v18 = vmul.f32 %v1758_v22, %v453_v15  ;;  %v376_v28 = vpop.f32.mrf.mxu0 }
  0xc4   :  { %979 = vrot.lane.b32.xlu2 %v1928_v52, %s1636_s24  ;;  %915 = vrot.lane.b32.xlu1 %v1884_v33, %s1636_s24  ;;  %804 = vst.msk [vmem:[%s3133_s4 + $0x5c] sm:$0xf] %vm780_vm2, %v2078_v50  ;;  %v528_v35 = vmul.f32 %v1758_v22, %v376_v28 }
  0xc5   :  { %1170 = vrot.lane.b32.xlu0 %v1845_v12, %s1635_s23  ;;  %v526_v12 = vmul.f32 %v1758_v22, %v371_v41  ;;  %788 = vst.msk [vmem:[%s3133_s4 + $0x1c] sm:$0xf] %vm780_vm2, %v2107_v4 }
  0xc6   :  { %835 = vst.msk [vmem:[%s3133_s4 + $0xd8] sm:$0xf] %vm780_vm2, %v2111_v6 }
  0xc7   :  { %v594_v44 = vadd.f32 %v1763_v23, %v526_v12 }
  0xc9   :  { %v658_v46 = vmax.f32 %v594_v44, 0.0 }
  0xca   :  { %v456_v37 = vpop.f32.mrf.mxu2 }
  0xcb   :  { %v2076_v49 = vpack.c.bf16 %v658_v46, %v658_v46  ;;  %v560_v39 = vmul.f32 %v1758_v22, %v456_v37  ;;  %v378_v59 = vpop.f32.mrf.mxu0 }
  0xcc   :  { %947 = vrot.lane.b32.xlu1 %v1886_v34, %s1636_s24  ;;  %917 = vrot.lane.b32.xlu2 %v1937_v58, %s1636_s24  ;;  %v1625_v34 = vld [vmem:[%s3130_s0 + $0xf8] sm:$0xff]  ;;  %v529_v62 = vmul.f32 %v1758_v22, %v378_v59 }
  0xcd   :  { %1011 = vrot.lane.b32.xlu0 %v1930_v53, %s1636_s24  ;;  %787 = vst.msk [vmem:[%s3133_s4 + $0x18] sm:$0xf] %vm780_vm2, %v2076_v49  ;;  %1593 = vmatmul.msk.bf16.gmra.mxu3 %vm246_vm1, %v1625_v34  ;;  %v628_v41 = vadd.f32 %v1763_v23, %v560_v39 }
  0xce   :  { %v597_v1 = vadd.f32 %v1763_v23, %v529_v62 }
  0xcf   :  { %v692_v43 = vmax.f32 %v628_v41, 0.0 }
  0xd0   :  { %v661_v3 = vmax.f32 %v597_v1, 0.0 }
  0xd1   :  { %v2195_v46 = vpack.c.bf16 %v692_v43, %v692_v43 }
  0xd2   :  { %v458_v48 = vpop.f32.mrf.mxu2 }
  0xd3   :  { %821 = vst.msk [vmem:[%s3133_s4 + $0xa0] sm:$0xf] %vm780_vm2, %v2195_v46 }
  0xd4   :  { %1172 = vrot.lane.b32.xlu1 %v1884_v33, %s1635_s23  ;;  %949 = vrot.lane.b32.xlu2 %v1949_v60, %s1636_s24  ;;  %v493_v33 = vpop.f32.mrf.mxu3 }
  0xd5   :  { %1236 = vrot.lane.b32.xlu0 %v1928_v52, %s1635_s23  ;;  %v575_v52 = vmul.f32 %v1758_v22, %v493_v33  ;;  %v2252_v33 = vpack.c.bf16 %v661_v3, %v661_v3 }
  0xd7   :  { %v643_v8 = vadd.f32 %v1763_v23, %v575_v52  ;;  %790 = vst.msk [vmem:[%s3133_s4 + $0x24] sm:$0xf] %vm780_vm2, %v2252_v33 }
  0xd9   :  { %v707_v9 = vmax.f32 %v643_v8, 0.0 }
  0xdb   :  { %v2136_v14 = vpack.c.bf16 %v707_v9, %v707_v9  ;;  %v381_v9 = vpop.f32.mrf.mxu0 }
  0xdc   :  { %1013 = vrot.lane.b32.xlu1 %v1980_v7, %s1636_s24  ;;  %1174 = vrot.lane.b32.xlu2 %v1937_v58, %s1635_s23  ;;  %v416_v58 = vpop.f32.mrf.mxu1  ;;  %v496_v47 = vpop.f32.mrf.mxu3 }
  0xdd   :  { %1206 = vrot.lane.b32.xlu0 %v1949_v60, %s1635_s23  ;;  %836 = vst.msk [vmem:[%s3133_s4 + $0xdc] sm:$0xf] %vm780_vm2, %v2136_v14  ;;  %v627_v60 = vadd.f32 %v1763_v23, %v559_v18  ;;  %v544_v19 = vmul.f32 %v1758_v22, %v416_v58  ;;  %v576_v34 = vmul.f32 %v1758_v22, %v496_v47 }
  0xde   :  { %v530_v18 = vmul.f32 %v1758_v22, %v381_v9 }
  0xdf   :  { %v691_v21 = vmax.f32 %v627_v60, 0.0  ;;  %v612_v24 = vadd.f32 %v1763_v23, %v544_v19 }
  0xe1   :  { %v2157_v11 = vpack.c.bf16 %v691_v21, %v691_v21  ;;  %v676_v25 = vmax.f32 %v612_v24, 0.0  ;;  %v598_v21 = vadd.f32 %v1763_v23, %v530_v18 }
  0xe3   :  { %820 = vst.msk [vmem:[%s3133_s4 + $0x9c] sm:$0xf] %vm780_vm2, %v2157_v11  ;;  %v2164_v26 = vpack.c.bf16 %v676_v25, %v676_v25  ;;  %v662_v25 = vmax.f32 %v598_v21, 0.0 }
  0xe4   :  { %1208 = vrot.lane.b32.xlu1 %v1992_v16, %s1635_s23  ;;  %919 = vrot.lane.b32.xlu2 %v2024_v30, %s1636_s24  ;;  %v418_v29 = vpop.f32.mrf.mxu1  ;;  %v498_v52 = vpop.f32.mrf.mxu3 }
  0xe5   :  { %981 = vrot.lane.b32.xlu0 %v1994_v17, %s1636_s24  ;;  %805 = vst.msk [vmem:[%s3133_s4 + $0x60] sm:$0xf] %vm780_vm2, %v2164_v26  ;;  %v545_v36 = vmul.f32 %v1758_v22, %v418_v29  ;;  %v577_v8 = vmul.f32 %v1758_v22, %v498_v52  ;;  %v2292_v29 = vpack.c.bf16 %v662_v25, %v662_v25 }
  0xe6   :  { %v1199_v20 = vpop.permute.xlu2 %1198 }
  0xe7   :  { %1374 = vst.msk [vmem:[%s3134_s6 + $0x40] sm:$0xf] %vm1101_vm3, %v1199_v20  ;;  %v613_v40 = vadd.f32 %v1763_v23, %v545_v36  ;;  %v645_v15 = vadd.f32 %v1763_v23, %v577_v8  ;;  %v383_v36 = vpop.f32.mrf.mxu0 }
  0xe8   :  { %791 = vst.msk [vmem:[%s3133_s4 + $0x28] sm:$0xf] %vm780_vm2, %v2292_v29 }
  0xe9   :  { %v677_v12 = vmax.f32 %v613_v40, 0.0  ;;  %v709_v19 = vmax.f32 %v645_v15, 0.0 }
  0xeb   :  { %v2189_v45 = vpack.c.bf16 %v677_v12, %v677_v12  ;;  %v2281_v24 = vpack.c.bf16 %v709_v19, %v709_v19 }
  0xec   :  { %983 = vrot.lane.b32.xlu1 %v2026_v31, %s1636_s24  ;;  %1015 = vrot.lane.b32.xlu2 %v2013_v27, %s1636_s24  ;;  %v501_v28 = vpop.f32.mrf.mxu3  ;;  %v421_v37 = vpop.f32.mrf.mxu1 }
  0xed   :  { %951 = vrot.lane.b32.xlu0 %v1992_v16, %s1636_s24  ;;  %v596_v16 = vadd.f32 %v1763_v23, %v528_v35  ;;  %806 = vst.msk [vmem:[%s3133_s4 + $0x64] sm:$0xf] %vm780_vm2, %v2189_v45  ;;  %v578_v35 = vmul.f32 %v1758_v22, %v501_v28  ;;  %v546_v39 = vmul.f32 %v1758_v22, %v421_v37 }
  0xee   :  { %v974_v38 = vpop.permute.xlu2 %973  ;;  %838 = vst.msk [vmem:[%s3133_s4 + $0xe4] sm:$0xf] %vm780_vm2, %v2281_v24 }
  0xef   :  { %1134 = vst.msk [vmem:[%s3135_s5 + $0x80] sm:$0xf] %vm1101_vm3, %v974_v38  ;;  %v660_v42 = vmax.f32 %v596_v16, 0.0  ;;  %v531_v38 = vmul.f32 %v1758_v22, %v383_v36 }
  0xf1   :  { %v2187_v44 = vpack.c.bf16 %v660_v42, %v660_v42  ;;  %v599_v41 = vadd.f32 %v1763_v23, %v531_v38  ;;  %v614_v42 = vadd.f32 %v1763_v23, %v546_v39 }
  0xf3   :  { %789 = vst.msk [vmem:[%s3133_s4 + $0x20] sm:$0xf] %vm780_vm2, %v2187_v44  ;;  %v663_v43 = vmax.f32 %v599_v41, 0.0  ;;  %v678_v47 = vmax.f32 %v614_v42, 0.0 }
  0xf4   :  { %953 = vrot.lane.b32.xlu1 %v2046_v13, %s1636_s24  ;;  %1210 = vrot.lane.b32.xlu2 %v2046_v13, %s1635_s23  ;;  %v561_v13 = vmul.f32 %v1758_v22, %v458_v48  ;;  %v423_v59 = vpop.f32.mrf.mxu1 }
  0xf5   :  { %1176 = vrot.lane.b32.xlu0 %v2024_v30, %s1635_s23  ;;  %v644_v30 = vadd.f32 %v1763_v23, %v576_v34  ;;  %v461_v34 = vpop.f32.mrf.mxu2 }
  0xf6   :  { %v944_v51 = vpop.permute.xlu2 %943  ;;  %v629_v55 = vadd.f32 %v1763_v23, %v561_v13  ;;  %v2325_v13 = vpack.c.bf16 %v663_v43, %v663_v43 }
  0xf7   :  { %1119 = vst.msk [vmem:[%s3135_s5 + $0x44] sm:$0xf] %vm1101_vm3, %v944_v51  ;;  %v708_v56 = vmax.f32 %v644_v30, 0.0  ;;  %v503_v51 = vpop.f32.mrf.mxu3  ;;  %v562_v30 = vmul.f32 %v1758_v22, %v461_v34 }
  0xf8   :  { %v693_v61 = vmax.f32 %v629_v55, 0.0  ;;  %v579_v55 = vmul.f32 %v1758_v22, %v503_v51  ;;  %792 = vst.msk [vmem:[%s3133_s4 + $0x2c] sm:$0xf] %vm780_vm2, %v2325_v13 }
  0xf9   :  { %v2223_v63 = vpack.c.bf16 %v708_v56, %v708_v56  ;;  %v2338_v56 = vpack.c.bf16 %v678_v47, %v678_v47  ;;  %v630_v62 = vadd.f32 %v1763_v23, %v562_v30 }
  0xfa   :  { %v2229_v0 = vpack.c.bf16 %v693_v61, %v693_v61  ;;  %v547_v61 = vmul.f32 %v1758_v22, %v423_v59  ;;  %v647_v1 = vadd.f32 %v1763_v23, %v579_v55 }
  0xfb   :  { %837 = vst.msk [vmem:[%s3133_s4 + $0xe0] sm:$0xf] %vm780_vm2, %v2223_v63  ;;  %v694_v52 = vmax.f32 %v630_v62, 0.0 }
  0xfc   :  { %985 = vrot.lane.b32.xlu2 %v2109_v5, %s1636_s24  ;;  %1178 = vrot.lane.b32.xlu1 %v2076_v49, %s1635_s23  ;;  %822 = vst.msk [vmem:[%s3133_s4 + $0xa4] sm:$0xf] %vm780_vm2, %v2229_v0  ;;  %v711_v8 = vmax.f32 %v647_v1, 0.0 }
  0xfd   :  { %921 = vrot.lane.b32.xlu0 %v2076_v49, %s1636_s24  ;;  %807 = vst.msk [vmem:[%s3133_s4 + $0x68] sm:$0xf] %vm780_vm2, %v2338_v56  ;;  %v2368_v15 = vpack.c.bf16 %v694_v52, %v694_v52 }
  0xfe   :  { %v942_v57 = vpop.permute.xlu1 %941  ;;  %v1169_v2 = vpop.permute.xlu2 %1168  ;;  %v2370_v18 = vpack.c.bf16 %v711_v8, %v711_v8 }
  0xff   :  { %1118 = vst.msk [vmem:[%s3135_s5 + $0x40] sm:$0xf] %vm1101_vm3, %v942_v57  ;;  %v910_v49 = vpop.permute.xlu0 %909 }
 0x100   :  { %1102 = vst.msk [vmem:[%s3135_s5] sm:$0xf] %vm1101_vm3, %v910_v49  ;;  %v615_v49 = vadd.f32 %v1763_v23, %v547_v61 }
 0x101   :  { %1359 = vst.msk [vmem:[%s3134_s6 + $0x4] sm:$0xf] %vm1101_vm3, %v1169_v2 }
 0x102   :  { %v679_v9 = vmax.f32 %v615_v49, 0.0  ;;  %823 = vst.msk [vmem:[%s3133_s4 + $0xa8] sm:$0xf] %vm780_vm2, %v2368_v15 }
 0x103   :  { %840 = vst.msk [vmem:[%s3133_s4 + $0xec] sm:$0xf] %vm780_vm2, %v2370_v18 }
 0x104   :  { %955 = vrot.lane.b32.xlu2 %v2078_v50, %s1636_s24  ;;  %923 = vrot.lane.b32.xlu1 %v2107_v4, %s1636_s24 }
 0x105   :  { %1017 = vrot.lane.b32.xlu0 %v2111_v6, %s1636_s24 }
 0x106   :  { %v1167_v58 = vpop.permute.xlu1 %1166  ;;  %v1010_v60 = vpop.permute.xlu2 %1009 }
 0x107   :  { %1358 = vst.msk [vmem:[%s3134_s6] sm:$0xf] %vm1101_vm3, %v1167_v58  ;;  %v1006_v20 = vpop.permute.xlu0 %1005  ;;  %v463_v58 = vpop.f32.mrf.mxu2 }
 0x108   :  { %1150 = vst.msk [vmem:[%s3135_s5 + $0xc0] sm:$0xf] %vm1101_vm3, %v1006_v20  ;;  %v563_v19 = vmul.f32 %v1758_v22, %v463_v58 }
 0x109   :  { %1152 = vst.msk [vmem:[%s3135_s5 + $0xc8] sm:$0xf] %vm1101_vm3, %v1010_v60  ;;  %v2372_v60 = vpack.c.bf16 %v679_v9, %v679_v9 }
 0x10a   :  { %v631_v20 = vadd.f32 %v1763_v23, %v563_v19 }
 0x10b   :  { %808 = vst.msk [vmem:[%s3133_s4 + $0x6c] sm:$0xf] %vm780_vm2, %v2372_v60 }
 0x10c   :  { %1180 = vrot.lane.b32.xlu2 %v2107_v4, %s1635_s23  ;;  %1019 = vrot.lane.b32.xlu1 %v2136_v14, %s1636_s24  ;;  %v646_v4 = vadd.f32 %v1763_v23, %v578_v35  ;;  %v695_v35 = vmax.f32 %v631_v20, 0.0 }
 0x10d   :  { %1212 = vrot.lane.b32.xlu0 %v2078_v50, %s1635_s23  ;;  %v426_v36 = vpop.f32.mrf.mxu1 }
 0x10e   :  { %v1008_v16 = vpop.permute.xlu1 %1007  ;;  %v1235_v40 = vpop.permute.xlu2 %1234  ;;  %v710_v12 = vmax.f32 %v646_v4, 0.0  ;;  %v548_v37 = vmul.f32 %v1758_v22, %v426_v36 }
 0x10f   :  { %1151 = vst.msk [vmem:[%s3135_s5 + $0xc4] sm:$0xf] %vm1101_vm3, %v1008_v16  ;;  %v1231_v50 = vpop.permute.xlu0 %1230 }
 0x110   :  { %1390 = vst.msk [vmem:[%s3134_s6 + $0x80] sm:$0xf] %vm1101_vm3, %v1231_v50  ;;  %v2323_v48 = vpack.c.bf16 %v710_v12, %v710_v12  ;;  %v616_v16 = vadd.f32 %v1763_v23, %v548_v37 }
 0x111   :  { %1392 = vst.msk [vmem:[%s3134_s6 + $0x88] sm:$0xf] %vm1101_vm3, %v1235_v40 }
 0x112   :  { %839 = vst.msk [vmem:[%s3133_s4 + $0xe8] sm:$0xf] %vm780_vm2, %v2323_v48  ;;  %v386_v40 = vpop.f32.mrf.mxu0 }
 0x113   :  { %v532_v41 = vmul.f32 %v1758_v22, %v386_v40 }
 0x114   :  { %1214 = vrot.lane.b32.xlu1 %v2164_v26, %s1635_s23  ;;  %925 = vrot.lane.b32.xlu2 %v2187_v44, %s1636_s24 }
 0x115   :  { %987 = vrot.lane.b32.xlu0 %v2157_v11, %s1636_s24  ;;  %v428_v50 = vpop.f32.mrf.mxu1 }
 0x116   :  { %v1233_v57 = vpop.permute.xlu1 %1232  ;;  %v1205_v2 = vpop.permute.xlu2 %1204  ;;  %v549_v42 = vmul.f32 %v1758_v22, %v428_v50 }
 0x117   :  { %1391 = vst.msk [vmem:[%s3134_s6 + $0x84] sm:$0xf] %vm1101_vm3, %v1233_v57  ;;  %v912_v3 = vpop.permute.xlu0 %911 }
 0x118   :  { %1377 = vst.msk [vmem:[%s3134_s6 + $0x4c] sm:$0xf] %vm1101_vm3, %v1205_v2  ;;  %v617_v34 = vadd.f32 %v1763_v23, %v549_v42 }
 0x119   :  { %1103 = vst.msk [vmem:[%s3135_s5 + $0x4] sm:$0xf] %vm1101_vm3, %v912_v3  ;;  %v466_v55 = vpop.f32.mrf.mxu2 }
 0x11a   :  { %v681_v30 = vmax.f32 %v617_v34, 0.0  ;;  %v564_v62 = vmul.f32 %v1758_v22, %v466_v55  ;;  %v388_v57 = vpop.f32.mrf.mxu0 }
 0x11b   :  { %v533_v3 = vmul.f32 %v1758_v22, %v388_v57 }
 0x11c   :  { %989 = vrot.lane.b32.xlu1 %v2195_v46, %s1636_s24  ;;  %1021 = vrot.lane.b32.xlu2 %v2223_v63, %s1636_s24  ;;  %v2467_v61 = vpack.c.bf16 %v681_v30, %v681_v30  ;;  %v632_v49 = vadd.f32 %v1763_v23, %v564_v62 }
 0x11d   :  { %957 = vrot.lane.b32.xlu0 %v2164_v26, %s1636_s24  ;;  %v2409_v26 = vpack.c.bf16 %v695_v35, %v695_v35  ;;  %v601_v19 = vadd.f32 %v1763_v23, %v533_v3 }
 0x11e   :  { %v980_v21 = vpop.permute.xlu2 %979  ;;  %v914_v25 = vpop.permute.xlu1 %913  ;;  %810 = vst.msk [vmem:[%s3133_s4 + $0x74] sm:$0xf] %vm780_vm2, %v2467_v61  ;;  %v696_v20 = vmax.f32 %v632_v49, 0.0 }
 0x11f   :  { %1137 = vst.msk [vmem:[%s3135_s5 + $0x8c] sm:$0xf] %vm1101_vm3, %v980_v21  ;;  %v1201_v28 = vpop.permute.xlu0 %1200 }
 0x120   :  { %1375 = vst.msk [vmem:[%s3134_s6 + $0x44] sm:$0xf] %vm1101_vm3, %v1201_v28  ;;  %v2503_v28 = vpack.c.bf16 %v696_v20, %v696_v20 }
 0x121   :  { %1104 = vst.msk [vmem:[%s3135_s5 + $0x8] sm:$0xf] %vm1101_vm3, %v914_v25  ;;  %v665_v25 = vmax.f32 %v601_v19, 0.0 }
 0x122   :  { %824 = vst.msk [vmem:[%s3133_s4 + $0xac] sm:$0xf] %vm780_vm2, %v2409_v26 }
 0x123   :  { %v2507_v36 = vpack.c.bf16 %v665_v25, %v665_v25  ;;  %825 = vst.msk [vmem:[%s3133_s4 + $0xb0] sm:$0xf] %vm780_vm2, %v2503_v28 }
 0x124   :  { %959 = vrot.lane.b32.xlu1 %v2189_v45, %s1636_s24  ;;  %1216 = vrot.lane.b32.xlu2 %v2189_v45, %s1635_s23 }
 0x125   :  { %1182 = vrot.lane.b32.xlu0 %v2187_v44, %s1635_s23  ;;  %v680_v44 = vmax.f32 %v616_v16, 0.0  ;;  %794 = vst.msk [vmem:[%s3133_s4 + $0x34] sm:$0xf] %vm780_vm2, %v2507_v36 }
 0x126   :  { %v1203_v38 = vpop.permute.xlu1 %1202  ;;  %v918_v39 = vpop.permute.xlu2 %917 }
 0x127   :  { %v976_v4 = vpop.permute.xlu0 %975  ;;  %1376 = vst.msk [vmem:[%s3134_s6 + $0x48] sm:$0xf] %vm1101_vm3, %v1203_v38  ;;  %v2436_v45 = vpack.c.bf16 %v680_v44, %v680_v44  ;;  %v468_v44 = vpop.f32.mrf.mxu2 }
 0x128   :  { %1135 = vst.msk [vmem:[%s3135_s5 + $0x84] sm:$0xf] %vm1101_vm3, %v976_v4  ;;  %v565_v50 = vmul.f32 %v1758_v22, %v468_v44  ;;  %v391_v55 = vpop.f32.mrf.mxu0 }
 0x129   :  { %1106 = vst.msk [vmem:[%s3135_s5 + $0x10] sm:$0xf] %vm1101_vm3, %v918_v39 }
 0x12a   :  { %809 = vst.msk [vmem:[%s3133_s4 + $0x70] sm:$0xf] %vm780_vm2, %v2436_v45  ;;  %v633_v42 = vadd.f32 %v1763_v23, %v565_v50 }
 0x12c   :  { %991 = vrot.lane.b32.xlu2 %v2229_v0, %s1636_s24  ;;  %1184 = vrot.lane.b32.xlu1 %v2252_v33, %s1635_s23 }
 0x12d   :  { %927 = vrot.lane.b32.xlu0 %v2252_v33, %s1636_s24  ;;  %v600_v33 = vadd.f32 %v1763_v23, %v532_v41  ;;  %v431_v41 = vpop.f32.mrf.mxu1 }
 0x12e   :  { %v978_v12 = vpop.permute.xlu1 %977  ;;  %v950_v43 = vpop.permute.xlu2 %949 }
 0x12f   :  { %v946_v47 = vpop.permute.xlu0 %945  ;;  %1136 = vst.msk [vmem:[%s3135_s5 + $0x88] sm:$0xf] %vm1101_vm3, %v978_v12  ;;  %v664_v51 = vmax.f32 %v600_v33, 0.0  ;;  %v550_v12 = vmul.f32 %v1758_v22, %v431_v41  ;;  %v697_v33 = vmax.f32 %v633_v42, 0.0 }
 0x130   :  { %1120 = vst.msk [vmem:[%s3135_s5 + $0x48] sm:$0xf] %vm1101_vm3, %v946_v47 }
 0x131   :  { %1122 = vst.msk [vmem:[%s3135_s5 + $0x50] sm:$0xf] %vm1101_vm3, %v950_v43  ;;  %v2465_v59 = vpack.c.bf16 %v664_v51, %v664_v51  ;;  %v506_v1 = vpop.f32.mrf.mxu3  ;;  %v618_v51 = vadd.f32 %v1763_v23, %v550_v12  ;;  %v2569_v30 = vpack.c.bf16 %v697_v33, %v697_v33 }
 0x132   :  { %v580_v2 = vmul.f32 %v1758_v22, %v506_v1  ;;  %v1633_v1 = vld [vmem:[%s3131_s2] ss:$0 sm:$0xff] }
 0x133   :  { %793 = vst.msk [vmem:[%s3133_s4 + $0x30] sm:$0xf] %vm780_vm2, %v2465_v59  ;;  %v534_v57 = vmul.f32 %v1633_v1, %v391_v55 }
 0x134   :  { %961 = vrot.lane.b32.xlu2 %v2338_v56, %s1636_s24  ;;  %929 = vrot.lane.b32.xlu1 %v2292_v29, %s1636_s24  ;;  %v648_v9 = vadd.f32 %v1763_v23, %v580_v2  ;;  %826 = vst.msk [vmem:[%s3133_s4 + $0xb4] sm:$0xf] %vm780_vm2, %v2569_v30 }
 0x135   :  { %1023 = vrot.lane.b32.xlu0 %v2281_v24, %s1636_s24  ;;  %v433_v62 = vpop.f32.mrf.mxu1 }
 0x136   :  { %v916_v52 = vpop.permute.xlu1 %915  ;;  %v1175_v8 = vpop.permute.xlu2 %1174  ;;  %v712_v21 = vmax.f32 %v648_v9, 0.0  ;;  %v551_v2 = vmul.f32 %v1633_v1, %v433_v62 }
 0x137   :  { %v1171_v58 = vpop.permute.xlu0 %1170  ;;  %1105 = vst.msk [vmem:[%s3135_s5 + $0xc] sm:$0xf] %vm1101_vm3, %v916_v52 }
 0x138   :  { %1360 = vst.msk [vmem:[%s3134_s6 + $0x8] sm:$0xf] %vm1101_vm3, %v1171_v58  ;;  %v2505_v35 = vpack.c.bf16 %v712_v21, %v712_v21 }
 0x139   :  { %1362 = vst.msk [vmem:[%s3134_s6 + $0x10] sm:$0xf] %vm1101_vm3, %v1175_v8  ;;  %v508_v37 = vpop.f32.mrf.mxu3 }
 0x13a   :  { %841 = vst.msk [vmem:[%s3133_s4 + $0xf0] sm:$0xf] %vm780_vm2, %v2505_v35  ;;  %v581_v38 = vmul.f32 %v1758_v22, %v508_v37  ;;  %v682_v22 = vmax.f32 %v618_v51, 0.0 }
 0x13c   :  { %1186 = vrot.lane.b32.xlu2 %v2292_v29, %s1635_s23  ;;  %1025 = vrot.lane.b32.xlu1 %v2323_v48, %s1636_s24  ;;  %v649_v4 = vadd.f32 %v1763_v23, %v581_v38  ;;  %v2580_v23 = vpack.c.bf16 %v682_v22, %v682_v22 }
 0x13d   :  { %1218 = vrot.lane.b32.xlu0 %v2338_v56, %s1635_s23 }
 0x13e   :  { %v948_v29 = vpop.permute.xlu1 %947  ;;  %v920_v39 = vpop.permute.xlu2 %919  ;;  %v713_v56 = vmax.f32 %v649_v4, 0.0  ;;  %811 = vst.msk [vmem:[%s3133_s4 + $0x78] sm:$0xf] %vm780_vm2, %v2580_v23 }
 0x13f   :  { %v1012_v16 = vpop.permute.xlu0 %1011  ;;  %1121 = vst.msk [vmem:[%s3135_s5 + $0x4c] sm:$0xf] %vm1101_vm3, %v948_v29 }
 0x140   :  { %1153 = vst.msk [vmem:[%s3135_s5 + $0xcc] sm:$0xf] %vm1101_vm3, %v1012_v16  ;;  %v2544_v40 = vpack.c.bf16 %v713_v56, %v713_v56  ;;  %v471_v3 = vpop.f32.mrf.mxu2 }
 0x141   :  { %1107 = vst.msk [vmem:[%s3135_s5 + $0x14] sm:$0xf] %vm1101_vm3, %v920_v39  ;;  %v566_v8 = vmul.f32 %v1633_v1, %v471_v3 }
 0x142   :  { %842 = vst.msk [vmem:[%s3133_s4 + $0xf4] sm:$0xf] %vm780_vm2, %v2544_v40 }
 0x144   :  { %1220 = vrot.lane.b32.xlu1 %v2372_v60, %s1635_s23  ;;  %931 = vrot.lane.b32.xlu2 %v2325_v13, %s1636_s24 }
 0x145   :  { %993 = vrot.lane.b32.xlu0 %v2368_v15, %s1636_s24 }
 0x146   :  { %v1173_v43 = vpop.permute.xlu1 %1172  ;;  %v1016_v47 = vpop.permute.xlu2 %1015 }
 0x147   :  { %v1237_v34 = vpop.permute.xlu0 %1236  ;;  %1361 = vst.msk [vmem:[%s3134_s6 + $0xc] sm:$0xf] %vm1101_vm3, %v1173_v43  ;;  %v393_v43 = vpop.f32.mrf.mxu0 }
 0x148   :  { %1393 = vst.msk [vmem:[%s3134_s6 + $0x8c] sm:$0xf] %vm1101_vm3, %v1237_v34  ;;  %v473_v4 = vpop.f32.mrf.mxu2  ;;  %v535_v33 = vmul.f32 %v1633_v1, %v393_v43 }
 0x149   :  { %1155 = vst.msk [vmem:[%s3135_s5 + $0xd4] sm:$0xf] %vm1101_vm3, %v1016_v47  ;;  %v567_v50 = vmul.f32 %v1633_v1, %v473_v4 }
 0x14c   :  { %995 = vrot.lane.b32.xlu1 %v2409_v26, %s1636_s24  ;;  %1027 = vrot.lane.b32.xlu2 %v2370_v18, %s1636_s24 }
 0x14d   :  { %963 = vrot.lane.b32.xlu0 %v2372_v60, %s1636_s24  ;;  %v1634_v60 = vld [vmem:[%s3132_s3] ss:$0 sm:$0xff] }
 0x14e   :  { %v1014_v49 = vpop.permute.xlu1 %1013  ;;  %v1211_v52 = vpop.permute.xlu2 %1210  ;;  %v602_v58 = vadd.f32 %v1634_v60, %v534_v57  ;;  %v619_v19 = vadd.f32 %v1634_v60, %v551_v2  ;;  %v634_v20 = vadd.f32 %v1634_v60, %v566_v8  ;;  %v635_v42 = vadd.f32 %v1634_v60, %v567_v50 }
 0x14f   :  { %v1207_v9 = vpop.permute.xlu0 %1206  ;;  %1154 = vst.msk [vmem:[%s3135_s5 + $0xd0] sm:$0xf] %vm1101_vm3, %v1014_v49  ;;  %v603_v22 = vadd.f32 %v1634_v60, %v535_v33 }
 0x150   :  { %1378 = vst.msk [vmem:[%s3134_s6 + $0x50] sm:$0xf] %vm1101_vm3, %v1207_v9  ;;  %v666_v21 = vmax.f32 %v602_v58, 0.0  ;;  %v683_v25 = vmax.f32 %v619_v19, 0.0  ;;  %v698_v37 = vmax.f32 %v634_v20, 0.0  ;;  %v511_v39 = vpop.f32.mrf.mxu3  ;;  %v699_v47 = vmax.f32 %v635_v42, 0.0 }
 0x151   :  { %1380 = vst.msk [vmem:[%s3134_s6 + $0x58] sm:$0xf] %vm1101_vm3, %v1211_v52  ;;  %v582_v16 = vmul.f32 %v1633_v1, %v511_v39  ;;  %v667_v57 = vmax.f32 %v603_v22, 0.0 }
 0x152   :  { %v2611_v38 = vpack.c.bf16 %v666_v21, %v666_v21  ;;  %v2613_v29 = vpack.c.bf16 %v683_v25, %v683_v25  ;;  %v2656_v51 = vpack.c.bf16 %v699_v47, %v699_v47 }
 0x153   :  { %v650_v41 = vadd.f32 %v1634_v60, %v582_v16 }
 0x154   :  { %965 = vrot.lane.b32.xlu1 %v2436_v45, %s1636_s24  ;;  %1222 = vrot.lane.b32.xlu2 %v2436_v45, %s1635_s23  ;;  %795 = vst.msk [vmem:[%s3133_s4 + $0x38] sm:$0xf] %vm780_vm2, %v2611_v38  ;;  %v2631_v45 = vpack.c.bf16 %v698_v37, %v698_v37 }
 0x155   :  { %1188 = vrot.lane.b32.xlu0 %v2325_v13, %s1635_s23  ;;  %812 = vst.msk [vmem:[%s3133_s4 + $0x7c] sm:$0xf] %vm780_vm2, %v2613_v29  ;;  %v714_v12 = vmax.f32 %v650_v41, 0.0 }
 0x156   :  { %v1209_v56 = vpop.permute.xlu1 %1208  ;;  %v986_v44 = vpop.permute.xlu2 %985  ;;  %827 = vst.msk [vmem:[%s3133_s4 + $0xb8] sm:$0xf] %vm780_vm2, %v2631_v45 }
 0x157   :  { %v982_v13 = vpop.permute.xlu0 %981  ;;  %1379 = vst.msk [vmem:[%s3134_s6 + $0x54] sm:$0xf] %vm1101_vm3, %v1209_v56  ;;  %v2650_v34 = vpack.c.bf16 %v714_v12, %v714_v12 }
 0x158   :  { %1138 = vst.msk [vmem:[%s3135_s5 + $0x90] sm:$0xf] %vm1101_vm3, %v982_v13  ;;  %v513_v3 = vpop.f32.mrf.mxu3 }
 0x159   :  { %1140 = vst.msk [vmem:[%s3135_s5 + $0x98] sm:$0xf] %vm1101_vm3, %v986_v44  ;;  %v583_v49 = vmul.f32 %v1633_v1, %v513_v3 }
 0x15a   :  { %843 = vst.msk [vmem:[%s3133_s4 + $0xf8] sm:$0xf] %vm780_vm2, %v2650_v34 }
 0x15b   :  { %828 = vst.msk [vmem:[%s3133_s4 + $0xbc] sm:$0xf] %vm780_vm2, %v2656_v51  ;;  %v651_v52 = vadd.f32 %v1634_v60, %v583_v49 }
 0x15c   :  { %997 = vrot.lane.b32.xlu2 %v2503_v28, %s1636_s24  ;;  %1190 = vrot.lane.b32.xlu1 %v2465_v59, %s1635_s23 }
 0x15d   :  { %933 = vrot.lane.b32.xlu0 %v2465_v59, %s1636_s24  ;;  %v731_v59 = vpack.c.bf16 %v667_v57, %v667_v57  ;;  %v715_v58 = vmax.f32 %v651_v52, 0.0 }
 0x15e   :  { %v984_v55 = vpop.permute.xlu1 %983  ;;  %v956_v62 = vpop.permute.xlu2 %955 }
 0x15f   :  { %v952_v2 = vpop.permute.xlu0 %951  ;;  %1139 = vst.msk [vmem:[%s3135_s5 + $0x94] sm:$0xf] %vm1101_vm3, %v984_v55  ;;  %v2700_v1 = vpack.c.bf16 %v715_v58, %v715_v58 }
 0x160   :  { %1123 = vst.msk [vmem:[%s3135_s5 + $0x54] sm:$0xf] %vm1101_vm3, %v952_v2 }
 0x161   :  { %1125 = vst.msk [vmem:[%s3135_s5 + $0x5c] sm:$0xf] %vm1101_vm3, %v956_v62 }
 0x162   :  { %796 = vst.msk [vmem:[%s3133_s4 + $0x3c] sm:$0xf] %vm780_vm2, %v731_v59 }
 0x163   :  { %844 = vst.msk [vmem:[%s3133_s4 + $0xfc] sm:$0xf] %vm780_vm2, %v2700_v1 }
 0x164   :  { %967 = vrot.lane.b32.xlu2 %v2467_v61, %s1636_s24  ;;  %935 = vrot.lane.b32.xlu1 %v2507_v36, %s1636_s24 }
 0x165   :  { %1029 = vrot.lane.b32.xlu0 %v2505_v35, %s1636_s24 }
 0x166   :  { %v954_v8 = vpop.permute.xlu1 %953  ;;  %v1181_v9 = vpop.permute.xlu2 %1180 }
 0x167   :  { %1124 = vst.msk [vmem:[%s3135_s5 + $0x58] sm:$0xf] %vm1101_vm3, %v954_v8  ;;  %v1177_v19 = vpop.permute.xlu0 %1176 }
 0x168   :  { %1363 = vst.msk [vmem:[%s3134_s6 + $0x14] sm:$0xf] %vm1101_vm3, %v1177_v19 }
 0x169   :  { %1365 = vst.msk [vmem:[%s3134_s6 + $0x1c] sm:$0xf] %vm1101_vm3, %v1181_v9 }
 0x16c   :  { %1192 = vrot.lane.b32.xlu2 %v2507_v36, %s1635_s23  ;;  %1031 = vrot.lane.b32.xlu1 %v2544_v40, %s1636_s24 }
 0x16d   :  { %1224 = vrot.lane.b32.xlu0 %v2467_v61, %s1635_s23 }
 0x16e   :  { %v1179_v60 = vpop.permute.xlu1 %1178  ;;  %v926_v20 = vpop.permute.xlu2 %925 }
 0x16f   :  { %1364 = vst.msk [vmem:[%s3134_s6 + $0x18] sm:$0xf] %vm1101_vm3, %v1179_v60  ;;  %v922_v21 = vpop.permute.xlu0 %921 }
 0x170   :  { %1108 = vst.msk [vmem:[%s3135_s5 + $0x18] sm:$0xf] %vm1101_vm3, %v922_v21 }
 0x171   :  { %1110 = vst.msk [vmem:[%s3135_s5 + $0x20] sm:$0xf] %vm1101_vm3, %v926_v20 }
 0x174   :  { %1226 = vrot.lane.b32.xlu1 %v2580_v23, %s1635_s23  ;;  %937 = vrot.lane.b32.xlu2 %v2611_v38, %s1636_s24 }
 0x175   :  { %999 = vrot.lane.b32.xlu0 %v2569_v30, %s1636_s24 }
 0x176   :  { %v924_v61 = vpop.permute.xlu1 %923  ;;  %v1022_v36 = vpop.permute.xlu2 %1021 }
 0x177   :  { %v1018_v25 = vpop.permute.xlu0 %1017  ;;  %1109 = vst.msk [vmem:[%s3135_s5 + $0x1c] sm:$0xf] %vm1101_vm3, %v924_v61 }
 0x178   :  { %1156 = vst.msk [vmem:[%s3135_s5 + $0xd8] sm:$0xf] %vm1101_vm3, %v1018_v25 }
 0x179   :  { %1158 = vst.msk [vmem:[%s3135_s5 + $0xe0] sm:$0xf] %vm1101_vm3, %v1022_v36 }
 0x17c   :  { %1001 = vrot.lane.b32.xlu1 %v2631_v45, %s1636_s24  ;;  %1033 = vrot.lane.b32.xlu2 %v2650_v34, %s1636_s24 }
 0x17d   :  { %969 = vrot.lane.b32.xlu0 %v2580_v23, %s1636_s24 }
 0x17e   :  { %v1020_v37 = vpop.permute.xlu1 %1019  ;;  %v1217_v39 = vpop.permute.xlu2 %1216 }
 0x17f   :  { %v1213_v4 = vpop.permute.xlu0 %1212  ;;  %1157 = vst.msk [vmem:[%s3135_s5 + $0xdc] sm:$0xf] %vm1101_vm3, %v1020_v37 }
 0x180   :  { %1381 = vst.msk [vmem:[%s3134_s6 + $0x5c] sm:$0xf] %vm1101_vm3, %v1213_v4 }
 0x181   :  { %1383 = vst.msk [vmem:[%s3134_s6 + $0x64] sm:$0xf] %vm1101_vm3, %v1217_v39 }
 0x184   :  { %971 = vrot.lane.b32.xlu1 %v2613_v29, %s1636_s24  ;;  %1240 = vrot.lane.b32.xlu2 %v2026_v31, %s1635_s23 }
 0x185   :  { %1194 = vrot.lane.b32.xlu0 %v2611_v38, %s1635_s23 }
 0x186   :  { %v1215_v23 = vpop.permute.xlu1 %1214  ;;  %v992_v16 = vpop.permute.xlu2 %991 }
 0x187   :  { %v988_v56 = vpop.permute.xlu0 %987  ;;  %1382 = vst.msk [vmem:[%s3134_s6 + $0x60] sm:$0xf] %vm1101_vm3, %v1215_v23 }
 0x188   :  { %1141 = vst.msk [vmem:[%s3135_s5 + $0x9c] sm:$0xf] %vm1101_vm3, %v988_v56 }
 0x189   :  { %1143 = vst.msk [vmem:[%s3135_s5 + $0xa4] sm:$0xf] %vm1101_vm3, %v992_v16 }
 0x18c   :  { %1228 = vrot.lane.b32.xlu2 %v2613_v29, %s1635_s23  ;;  %1196 = vrot.lane.b32.xlu1 %v731_v59, %s1635_s23 }
 0x18d   :  { %939 = vrot.lane.b32.xlu0 %v731_v59, %s1636_s24 }
 0x18e   :  { %v990_v31 = vpop.permute.xlu1 %989  ;;  %v962_v38 = vpop.permute.xlu2 %961 }
 0x18f   :  { %v958_v44 = vpop.permute.xlu0 %957  ;;  %1142 = vst.msk [vmem:[%s3135_s5 + $0xa0] sm:$0xf] %vm1101_vm3, %v990_v31 }
 0x190   :  { %1126 = vst.msk [vmem:[%s3135_s5 + $0x60] sm:$0xf] %vm1101_vm3, %v958_v44 }
 0x191   :  { %1128 = vst.msk [vmem:[%s3135_s5 + $0x68] sm:$0xf] %vm1101_vm3, %v962_v38 }
 0x194   :  { %1003 = vrot.lane.b32.xlu2 %v2656_v51, %s1636_s24  ;;  %1238 = vrot.lane.b32.xlu1 %v1994_v17, %s1635_s23 }
 0x195   :  { %1035 = vrot.lane.b32.xlu0 %v2700_v1, %s1636_s24 }
 0x196   :  { %v960_v29 = vpop.permute.xlu1 %959  ;;  %v1187_v50 = vpop.permute.xlu2 %1186 }
 0x197   :  { %1127 = vst.msk [vmem:[%s3135_s5 + $0x64] sm:$0xf] %vm1101_vm3, %v960_v29  ;;  %v1183_v13 = vpop.permute.xlu0 %1182 }
 0x198   :  { %1366 = vst.msk [vmem:[%s3134_s6 + $0x20] sm:$0xf] %vm1101_vm3, %v1183_v13 }
 0x199   :  { %1368 = vst.msk [vmem:[%s3134_s6 + $0x28] sm:$0xf] %vm1101_vm3, %v1187_v50 }
 0x19c   :  { %1246 = vrot.lane.b32.xlu2 %v2195_v46, %s1635_s23  ;;  %1244 = vrot.lane.b32.xlu1 %v2157_v11, %s1635_s23 }
 0x19d   :  { %1242 = vrot.lane.b32.xlu0 %v2109_v5, %s1635_s23 }
 0x19e   :  { %v1185_v17 = vpop.permute.xlu1 %1184  ;;  %v932_v41 = vpop.permute.xlu2 %931 }
 0x19f   :  { %1367 = vst.msk [vmem:[%s3134_s6 + $0x24] sm:$0xf] %vm1101_vm3, %v1185_v17  ;;  %v928_v42 = vpop.permute.xlu0 %927 }
 0x1a0   :  { %1111 = vst.msk [vmem:[%s3135_s5 + $0x24] sm:$0xf] %vm1101_vm3, %v928_v42 }
 0x1a1   :  { %1113 = vst.msk [vmem:[%s3135_s5 + $0x2c] sm:$0xf] %vm1101_vm3, %v932_v41 }
 0x1a4   :  { %1252 = vrot.lane.b32.xlu2 %v2409_v26, %s1635_s23  ;;  %1250 = vrot.lane.b32.xlu1 %v2368_v15, %s1635_s23 }
 0x1a5   :  { %1248 = vrot.lane.b32.xlu0 %v2229_v0, %s1635_s23 }
 0x1a6   :  { %v930_v5 = vpop.permute.xlu1 %929  ;;  %v1028_v11 = vpop.permute.xlu2 %1027 }
 0x1a7   :  { %v1024_v46 = vpop.permute.xlu0 %1023  ;;  %1112 = vst.msk [vmem:[%s3135_s5 + $0x28] sm:$0xf] %vm1101_vm3, %v930_v5 }
 0x1a8   :  { %1159 = vst.msk [vmem:[%s3135_s5 + $0xe4] sm:$0xf] %vm1101_vm3, %v1024_v46 }
 0x1a9   :  { %1161 = vst.msk [vmem:[%s3135_s5 + $0xec] sm:$0xf] %vm1101_vm3, %v1028_v11 }
 0x1ac   :  { %1258 = vrot.lane.b32.xlu2 %v2631_v45, %s1635_s23  ;;  %1256 = vrot.lane.b32.xlu1 %v2569_v30, %s1635_s23 }
 0x1ad   :  { %1254 = vrot.lane.b32.xlu0 %v2503_v28, %s1635_s23 }
 0x1ae   :  { %v1026_v0 = vpop.permute.xlu1 %1025  ;;  %v1223_v15 = vpop.permute.xlu2 %1222 }
 0x1af   :  { %v1219_v26 = vpop.permute.xlu0 %1218  ;;  %1160 = vst.msk [vmem:[%s3135_s5 + $0xe8] sm:$0xf] %vm1101_vm3, %v1026_v0 }
 0x1b0   :  { %1384 = vst.msk [vmem:[%s3134_s6 + $0x68] sm:$0xf] %vm1101_vm3, %v1219_v26 }
 0x1b1   :  { %1386 = vst.msk [vmem:[%s3134_s6 + $0x70] sm:$0xf] %vm1101_vm3, %v1223_v15 }
 0x1b4   :  { %1264 = vrot.lane.b32.xlu2 %v1841_v10, %s1635_s23  ;;  %1262 = vrot.lane.b32.xlu1 %v1804_v54, %s1635_s23 }
 0x1b5   :  { %1260 = vrot.lane.b32.xlu0 %v2656_v51, %s1635_s23 }
 0x1b6   :  { %v1221_v28 = vpop.permute.xlu1 %1220  ;;  %v998_v30 = vpop.permute.xlu2 %997 }
 0x1b7   :  { %v994_v45 = vpop.permute.xlu0 %993  ;;  %1385 = vst.msk [vmem:[%s3134_s6 + $0x6c] sm:$0xf] %vm1101_vm3, %v1221_v28 }
 0x1b8   :  { %1144 = vst.msk [vmem:[%s3135_s5 + $0xa8] sm:$0xf] %vm1101_vm3, %v994_v45 }
 0x1b9   :  { %1146 = vst.msk [vmem:[%s3135_s5 + $0xb0] sm:$0xf] %vm1101_vm3, %v998_v30 }
 0x1bc   :  { %1270 = vrot.lane.b32.xlu2 %v1980_v7, %s1635_s23  ;;  %1268 = vrot.lane.b32.xlu1 %v1930_v53, %s1635_s23 }
 0x1bd   :  { %1266 = vrot.lane.b32.xlu0 %v1882_v32, %s1635_s23 }
 0x1be   :  { %v996_v54 = vpop.permute.xlu1 %995  ;;  %v968_v10 = vpop.permute.xlu2 %967 }
 0x1bf   :  { %v964_v12 = vpop.permute.xlu0 %963  ;;  %1145 = vst.msk [vmem:[%s3135_s5 + $0xac] sm:$0xf] %vm1101_vm3, %v996_v54 }
 0x1c0   :  { %1129 = vst.msk [vmem:[%s3135_s5 + $0x6c] sm:$0xf] %vm1101_vm3, %v964_v12 }
 0x1c1   :  { %1131 = vst.msk [vmem:[%s3135_s5 + $0x74] sm:$0xf] %vm1101_vm3, %v968_v10 }
 0x1c4   :  { %1276 = vrot.lane.b32.xlu2 %v2136_v14, %s1635_s23  ;;  %1274 = vrot.lane.b32.xlu1 %v2111_v6, %s1635_s23 }
 0x1c5   :  { %1272 = vrot.lane.b32.xlu0 %v2013_v27, %s1635_s23 }
 0x1c6   :  { %v966_v32 = vpop.permute.xlu1 %965  ;;  %v1193_v53 = vpop.permute.xlu2 %1192 }
 0x1c7   :  { %1130 = vst.msk [vmem:[%s3135_s5 + $0x70] sm:$0xf] %vm1101_vm3, %v966_v32  ;;  %v1189_v7 = vpop.permute.xlu0 %1188 }
 0x1c8   :  { %1369 = vst.msk [vmem:[%s3134_s6 + $0x2c] sm:$0xf] %vm1101_vm3, %v1189_v7 }
 0x1c9   :  { %1371 = vst.msk [vmem:[%s3134_s6 + $0x34] sm:$0xf] %vm1101_vm3, %v1193_v53 }
 0x1cc   :  { %1282 = vrot.lane.b32.xlu2 %v2323_v48, %s1635_s23  ;;  %1280 = vrot.lane.b32.xlu1 %v2281_v24, %s1635_s23 }
 0x1cd   :  { %1278 = vrot.lane.b32.xlu0 %v2223_v63, %s1635_s23 }
 0x1ce   :  { %v1191_v27 = vpop.permute.xlu1 %1190  ;;  %v938_v6 = vpop.permute.xlu2 %937 }
 0x1cf   :  { %1370 = vst.msk [vmem:[%s3134_s6 + $0x30] sm:$0xf] %vm1101_vm3, %v1191_v27  ;;  %v934_v14 = vpop.permute.xlu0 %933 }
 0x1d0   :  { %1114 = vst.msk [vmem:[%s3135_s5 + $0x30] sm:$0xf] %vm1101_vm3, %v934_v14 }
 0x1d1   :  { %1116 = vst.msk [vmem:[%s3135_s5 + $0x38] sm:$0xf] %vm1101_vm3, %v938_v6 }
 0x1d4   :  { %1288 = vrot.lane.b32.xlu2 %v2544_v40, %s1635_s23  ;;  %1286 = vrot.lane.b32.xlu1 %v2505_v35, %s1635_s23 }
 0x1d5   :  { %1284 = vrot.lane.b32.xlu0 %v2370_v18, %s1635_s23 }
 0x1d6   :  { %v936_v63 = vpop.permute.xlu1 %935  ;;  %v1034_v24 = vpop.permute.xlu2 %1033 }
 0x1d7   :  { %v1030_v48 = vpop.permute.xlu0 %1029  ;;  %1115 = vst.msk [vmem:[%s3135_s5 + $0x34] sm:$0xf] %vm1101_vm3, %v936_v63 }
 0x1d8   :  { %1162 = vst.msk [vmem:[%s3135_s5 + $0xf0] sm:$0xf] %vm1101_vm3, %v1030_v48 }
 0x1d9   :  { %1164 = vst.msk [vmem:[%s3135_s5 + $0xf8] sm:$0xf] %vm1101_vm3, %v1034_v24 }
 0x1dc   :  { %1292 = vrot.lane.b32.xlu1 %v2700_v1, %s1635_s23 }
 0x1dd   :  { %1290 = vrot.lane.b32.xlu0 %v2650_v34, %s1635_s23 }
 0x1de   :  { %v1032_v18 = vpop.permute.xlu1 %1031  ;;  %v1241_v35 = vpop.permute.xlu2 %1240 }
 0x1df   :  { %v1225_v40 = vpop.permute.xlu0 %1224  ;;  %1163 = vst.msk [vmem:[%s3135_s5 + $0xf4] sm:$0xf] %vm1101_vm3, %v1032_v18 }
 0x1e0   :  { %1387 = vst.msk [vmem:[%s3134_s6 + $0x74] sm:$0xf] %vm1101_vm3, %v1225_v40 }
 0x1e1   :  { %1395 = vst.msk [vmem:[%s3134_s6 + $0x94] sm:$0xf] %vm1101_vm3, %v1241_v35 }
 0x1e6   :  { %v1227_v43 = vpop.permute.xlu1 %1226  ;;  %v1229_v47 = vpop.permute.xlu2 %1228 }
 0x1e7   :  { %v1000_v33 = vpop.permute.xlu0 %999  ;;  %1388 = vst.msk [vmem:[%s3134_s6 + $0x78] sm:$0xf] %vm1101_vm3, %v1227_v43 }
 0x1e8   :  { %1147 = vst.msk [vmem:[%s3135_s5 + $0xb4] sm:$0xf] %vm1101_vm3, %v1000_v33 }
 0x1e9   :  { %1389 = vst.msk [vmem:[%s3134_s6 + $0x7c] sm:$0xf] %vm1101_vm3, %v1229_v47 }
 0x1ee   :  { %v1002_v34 = vpop.permute.xlu1 %1001  ;;  %v1004_v51 = vpop.permute.xlu2 %1003 }
 0x1ef   :  { %v970_v22 = vpop.permute.xlu0 %969  ;;  %1148 = vst.msk [vmem:[%s3135_s5 + $0xb8] sm:$0xf] %vm1101_vm3, %v1002_v34 }
 0x1f0   :  { %1132 = vst.msk [vmem:[%s3135_s5 + $0x78] sm:$0xf] %vm1101_vm3, %v970_v22 }
 0x1f1   :  { %1149 = vst.msk [vmem:[%s3135_s5 + $0xbc] sm:$0xf] %vm1101_vm3, %v1004_v51 }
 0x1f6   :  { %v972_v55 = vpop.permute.xlu1 %971  ;;  %v1247_v62 = vpop.permute.xlu2 %1246 }
 0x1f7   :  { %1133 = vst.msk [vmem:[%s3135_s5 + $0x7c] sm:$0xf] %vm1101_vm3, %v972_v55  ;;  %v1195_v57 = vpop.permute.xlu0 %1194 }
 0x1f8   :  { %1372 = vst.msk [vmem:[%s3134_s6 + $0x38] sm:$0xf] %vm1101_vm3, %v1195_v57 }
 0x1f9   :  { %1398 = vst.msk [vmem:[%s3134_s6 + $0xa0] sm:$0xf] %vm1101_vm3, %v1247_v62 }
 0x1fe   :  { %v1253_v2 = vpop.permute.xlu2 %1252  ;;  %v1197_v59 = vpop.permute.xlu1 %1196 }
 0x1ff   :  { %1401 = vst.msk [vmem:[%s3134_s6 + $0xac] sm:$0xf] %vm1101_vm3, %v1253_v2  ;;  %v940_v3 = vpop.permute.xlu0 %939 }
 0x200   :  { %1373 = vst.msk [vmem:[%s3134_s6 + $0x3c] sm:$0xf] %vm1101_vm3, %v1197_v59 }
 0x201   :  { %1117 = vst.msk [vmem:[%s3135_s5 + $0x3c] sm:$0xf] %vm1101_vm3, %v940_v3 }
 0x206   :  { %v1259_v49 = vpop.permute.xlu2 %1258  ;;  %v1239_v52 = vpop.permute.xlu1 %1238 }
 0x207   :  { %1404 = vst.msk [vmem:[%s3134_s6 + $0xb8] sm:$0xf] %vm1101_vm3, %v1259_v49  ;;  %v1036_v8 = vpop.permute.xlu0 %1035 }
 0x208   :  { %1394 = vst.msk [vmem:[%s3134_s6 + $0x90] sm:$0xf] %vm1101_vm3, %v1239_v52 }
 0x209   :  { %1165 = vst.msk [vmem:[%s3135_s5 + $0xfc] sm:$0xf] %vm1101_vm3, %v1036_v8 }
 0x20e   :  { %v1265_v9 = vpop.permute.xlu2 %1264  ;;  %v1245_v58 = vpop.permute.xlu1 %1244 }
 0x20f   :  { %1407 = vst.msk [vmem:[%s3134_s6 + $0xc4] sm:$0xf] %vm1101_vm3, %v1265_v9  ;;  %v1243_v19 = vpop.permute.xlu0 %1242 }
 0x210   :  { %1397 = vst.msk [vmem:[%s3134_s6 + $0x9c] sm:$0xf] %vm1101_vm3, %v1245_v58 }
 0x211   :  { %1396 = vst.msk [vmem:[%s3134_s6 + $0x98] sm:$0xf] %vm1101_vm3, %v1243_v19 }
 0x216   :  { %v1271_v1 = vpop.permute.xlu2 %1270  ;;  %v1251_v60 = vpop.permute.xlu1 %1250 }
 0x217   :  { %1410 = vst.msk [vmem:[%s3134_s6 + $0xd0] sm:$0xf] %vm1101_vm3, %v1271_v1  ;;  %v1249_v20 = vpop.permute.xlu0 %1248 }
 0x218   :  { %1400 = vst.msk [vmem:[%s3134_s6 + $0xa8] sm:$0xf] %vm1101_vm3, %v1251_v60 }
 0x219   :  { %1399 = vst.msk [vmem:[%s3134_s6 + $0xa4] sm:$0xf] %vm1101_vm3, %v1249_v20 }
 0x21e   :  { %v1277_v21 = vpop.permute.xlu2 %1276  ;;  %v1257_v61 = vpop.permute.xlu1 %1256 }
 0x21f   :  { %1413 = vst.msk [vmem:[%s3134_s6 + $0xdc] sm:$0xf] %vm1101_vm3, %v1277_v21  ;;  %v1255_v36 = vpop.permute.xlu0 %1254 }
 0x220   :  { %1403 = vst.msk [vmem:[%s3134_s6 + $0xb4] sm:$0xf] %vm1101_vm3, %v1257_v61 }
 0x221   :  { %1402 = vst.msk [vmem:[%s3134_s6 + $0xb0] sm:$0xf] %vm1101_vm3, %v1255_v36 }
 0x226   :  { %v1283_v25 = vpop.permute.xlu2 %1282  ;;  %v1263_v37 = vpop.permute.xlu1 %1262 }
 0x227   :  { %1416 = vst.msk [vmem:[%s3134_s6 + $0xe8] sm:$0xf] %vm1101_vm3, %v1283_v25  ;;  %v1261_v39 = vpop.permute.xlu0 %1260 }
 0x228   :  { %1406 = vst.msk [vmem:[%s3134_s6 + $0xc0] sm:$0xf] %vm1101_vm3, %v1263_v37 }
 0x229   :  { %1405 = vst.msk [vmem:[%s3134_s6 + $0xbc] sm:$0xf] %vm1101_vm3, %v1261_v39 }
 0x22e   :  { %v1289_v4 = vpop.permute.xlu2 %1288  ;;  %v1269_v23 = vpop.permute.xlu1 %1268 }
 0x22f   :  { %1419 = vst.msk [vmem:[%s3134_s6 + $0xf4] sm:$0xf] %vm1101_vm3, %v1289_v4  ;;  %v1267_v16 = vpop.permute.xlu0 %1266 }
 0x230   :  { %1409 = vst.msk [vmem:[%s3134_s6 + $0xcc] sm:$0xf] %vm1101_vm3, %v1269_v23 }
 0x231   :  { %1408 = vst.msk [vmem:[%s3134_s6 + $0xc8] sm:$0xf] %vm1101_vm3, %v1267_v16 }
 0x236   :  { %v1275_v56 = vpop.permute.xlu1 %1274 }
 0x237   :  { %1412 = vst.msk [vmem:[%s3134_s6 + $0xd8] sm:$0xf] %vm1101_vm3, %v1275_v56  ;;  %v1273_v31 = vpop.permute.xlu0 %1272 }
 0x238   :  { %1411 = vst.msk [vmem:[%s3134_s6 + $0xd4] sm:$0xf] %vm1101_vm3, %v1273_v31 }
 0x23e   :  { %v1281_v38 = vpop.permute.xlu1 %1280 }
 0x23f   :  { %1415 = vst.msk [vmem:[%s3134_s6 + $0xe4] sm:$0xf] %vm1101_vm3, %v1281_v38  ;;  %v1279_v44 = vpop.permute.xlu0 %1278 }
 0x240   :  { %1414 = vst.msk [vmem:[%s3134_s6 + $0xe0] sm:$0xf] %vm1101_vm3, %v1279_v44 }
 0x246   :  { %v1287_v29 = vpop.permute.xlu1 %1286 }
 0x247   :  { %1418 = vst.msk [vmem:[%s3134_s6 + $0xf0] sm:$0xf] %vm1101_vm3, %v1287_v29  ;;  %v1285_v50 = vpop.permute.xlu0 %1284 }
 0x248   :  { %1417 = vst.msk [vmem:[%s3134_s6 + $0xec] sm:$0xf] %vm1101_vm3, %v1285_v50 }
 0x24e   :  { %v1293_v13 = vpop.permute.xlu1 %1292 }
 0x24f   :  { %1421 = vst.msk [vmem:[%s3134_s6 + $0xfc] sm:$0xf] %vm1101_vm3, %v1293_v13  ;;  %v1291_v17 = vpop.permute.xlu0 %1290 }
 0x250   :  { %1420 = vst.msk [vmem:[%s3134_s6 + $0xf8] sm:$0xf] %vm1101_vm3, %v1291_v17 }

// kernel: inception_block.10
= control target key start
LH: loop header
LB: loop body
LE: loop exit
PB: predicated region body
PF: predicated region fallthrough
CT: control target
= control target key end

     0   :  { %s1080_s15 = smov 0   ;;  %s1082_s16 = smov 0   ;;  %s1418_s0 = inlined_call_operand.vmem [shape: bf16[2,4,64,8], index: 0, kind: input, shape index: {}]   ;;  %s1419_s1 = inlined_call_operand.vmem [shape: bf16[24,8], index: 1, kind: input, shape index: {}]   ;;  %s1420_s2 = inlined_call_operand.vmem [shape: f32[1,8], index: 2, kind: input, shape index: {}]   ;;  %s1421_s3 = inlined_call_operand.vmem [shape: f32[1,8], index: 3, kind: input, shape index: {}]   ;;  %s1422_s4 = inlined_call_operand.vmem [shape: bf16[2,4,64,8], index: 4, kind: output, shape index: {}]  }
   0x1   :  { %s1084_s17 = smov 0  }
   0x2 LB: > { %s26_s18 = sadd.s32 1, %s1046_s16  ;;  %p883_p0 = scmp.ge.s32.totalorder %s1050_s17, 1  ;;  %s1050_s17 = sphi %s1084_s17, %s14_s17   ;;  %s1046_s16 = sphi %s1082_s16, %s1424_s16   ;;  %s1042_s15 = sphi %s1080_s15, %s1423_s15  }
   0x3   : > { %p28_p1 = scmp.ge.s32.totalorder %s26_s18, 2  ;;  %p183_p2 = scmp.lt.s32.totalorder %s1050_s17, 3 }
   0x5   : > { %s1426_s18 = smov (%p28_p1, %s26_s18), 0  ;;  %p184_p3 = pnand %p883_p0, %p183_p2 }
   0x6   : > { %p218_p4 = scmp.lt.s32.totalorder (!%p184_p3), %s1042_s15, 1  ;;  %s1053_s19 = smov (!%p184_p3), 16  }
   0x7   : > { %187 = sbr.rel (%p184_p3) target bundleno = 349 (0x15d), region = 36  ;;  %s1054_s24 = smov (!%p184_p3), 8  }
   0xc   : > { %v1052_v0 = vmov 0   ;;  %s1428_s15 = smov (!%p218_p4, %s1042_s15), 1  ;;  %v487_v17 = vld [vmem:[%s1419_s1 + $0x8] sm:$0xf]  ;;  %vm530_vm0 = vcmask 1043456   ;;  %v992_v21 = vld [vmem:[%s1419_s1] sm:$0xff] }
   0xd   : > { %407 = vrot.lane.b32.xlu1 %v1052_v0, %s1053_s19  ;;  %s974_s20 = sshll.u32 %s1428_s15, 7  ;;  %v493_v18 = vunpack.c.l.b16 %v487_v17  ;;  %vm409_vm1 = vcmask 64512   ;;  %vm455_vm2 = vcmask 130048   ;;  %vm497_vm3 = vcmask 195584  }
   0xe   : > { %s1107_s23 = scalar_lea.vmem %s1418_s0, %s974_s20  ;;  %s1283_s9 = scalar_lea.vmem %s1422_s4, %s974_s20  ;;  %vm759_vm4 = vcmask 60416  }
   0xf   : > { %v988_v1 = vld [vmem:[%s1107_s23 + $0x60] sm:$0xff]  ;;  %v1127_v5 = vld [vmem:[%s1107_s23 + $0x48] sm:$0xff]  ;;  %v990_v9 = vld [vmem:[%s1107_s23 + $0x70] sm:$0xff]  ;;  %v495_v19 = vpack.c.b16 %v493_v18, %v493_v18 }
  0x10   : > { %v1111_v2 = vld [vmem:[%s1107_s23 + $0x40] sm:$0xff]  ;;  %v989_v6 = vld [vmem:[%s1107_s23 + $0x68] sm:$0xff]  ;;  %v1152_v10 = vld [vmem:[%s1107_s23 + $0x50] sm:$0xff] }
  0x11   : > { %v1114_v3 = vld [vmem:[%s1107_s23] sm:$0xff]  ;;  %366 = vrot.lane.b32.xlu0 %v1111_v2, %s1054_s24  ;;  %v1135_v7 = vld [vmem:[%s1107_s23 + $0x8] sm:$0xff]  ;;  %v1155_v11 = vld [vmem:[%s1107_s23 + $0x30] sm:$0xff]  ;;  %v532_v20 = vsel %vm530_vm0, %v495_v19, 0 }
  0x12   : > { %350 = vrot.lane.b32.xlu2 %v1114_v3, %s1054_s24  ;;  %v980_v4 = vld [vmem:[%s1107_s23 + $0x20] sm:$0xff]  ;;  %v1138_v8 = vld [vmem:[%s1107_s23 + $0x28] sm:$0xff]  ;;  %v1163_v12 = vld [vmem:[%s1107_s23 + $0x10] sm:$0xff]  ;;  %994 = vmatpush.bf16.msra.mxu2 %v532_v20 }
  0x13   : > { %v1166_v13 = vld [vmem:[%s1107_s23 + $0x58] sm:$0xff]  ;;  %993 = vmatpush.bf16.msra.mxu1 %v532_v20  ;;  %995 = vmatpush.bf16.msra.mxu3 %v532_v20 }
  0x14   : > { %v991_v14 = vld [vmem:[%s1107_s23 + $0x78] sm:$0xff]  ;;  %540 = vmatpush.bf16.msra.mxu0 %v532_v20 }
  0x15   : > { %399 = vrot.lane.b32.xlu1 %v988_v1, %s1053_s19  ;;  %v1176_v15 = vld [vmem:[%s1107_s23 + $0x18] sm:$0xff] }
  0x16   : > { %v1184_v16 = vld [vmem:[%s1107_s23 + $0x38] sm:$0xff]  ;;  %997 = vmatpush.bf16.msra.mxu2 %v992_v21 }
  0x17   : > { %996 = vmatpush.bf16.msra.mxu1 %v992_v21  ;;  %998 = vmatpush.bf16.msra.mxu3 %v992_v21 }
  0x18   : > { %541 = vmatpush.bf16.msra.mxu0 %v992_v21 }
  0x19   : > { %374 = vrot.lane.b32.xlu0 %v988_v1, %s1054_s24 }
  0x1a   : > { %358 = vrot.lane.b32.xlu2 %v980_v4, %s1054_s24 }
  0x1d   : > { %391 = vrot.lane.b32.xlu1 %v1111_v2, %s1053_s19 }
  0x21   : > { %383 = vrot.lane.b32.xlu0 %v980_v4, %s1053_s19 }
  0x22   : > { %368 = vrot.lane.b32.xlu2 %v1127_v5, %s1054_s24 }
  0x25   : > { %401 = vrot.lane.b32.xlu1 %v989_v6, %s1053_s19 }
  0x29   : > { %376 = vrot.lane.b32.xlu0 %v989_v6, %s1054_s24 }
  0x2a   : > { %352 = vrot.lane.b32.xlu2 %v1135_v7, %s1054_s24 }
  0x2d   : > { %385 = vrot.lane.b32.xlu1 %v1138_v8, %s1053_s19 }
  0x31   : > { %360 = vrot.lane.b32.xlu0 %v1138_v8, %s1054_s24 }
  0x32   : > { %393 = vrot.lane.b32.xlu2 %v1127_v5, %s1053_s19 }
  0x35   : > { %378 = vrot.lane.b32.xlu1 %v990_v9, %s1054_s24 }
  0x39   : > { %370 = vrot.lane.b32.xlu0 %v1152_v10, %s1054_s24 }
  0x3a   : > { %403 = vrot.lane.b32.xlu2 %v990_v9, %s1053_s19 }
  0x3d   : > { %362 = vrot.lane.b32.xlu1 %v1155_v11, %s1054_s24 }
  0x41   : > { %354 = vrot.lane.b32.xlu0 %v1163_v12, %s1054_s24 }
  0x42   : > { %387 = vrot.lane.b32.xlu2 %v1155_v11, %s1053_s19 }
  0x45   : > { %372 = vrot.lane.b32.xlu1 %v1166_v13, %s1054_s24 }
  0x49   : > { %395 = vrot.lane.b32.xlu0 %v1152_v10, %s1053_s19 }
  0x4a   : > { %380 = vrot.lane.b32.xlu2 %v991_v14, %s1054_s24 }
  0x4d   : > { %356 = vrot.lane.b32.xlu1 %v1176_v15, %s1054_s24 }
  0x51   : > { %405 = vrot.lane.b32.xlu0 %v991_v14, %s1053_s19 }
  0x52   : > { %364 = vrot.lane.b32.xlu2 %v1184_v16, %s1054_s24 }
  0x55   : > { %397 = vrot.lane.b32.xlu1 %v1166_v13, %s1053_s19 }
  0x59   : > { %389 = vrot.lane.b32.xlu0 %v1184_v16, %s1053_s19 }
  0x6c   : > { %v351_v22 = vpop.permute.xlu2 %350 }
  0x6d   : > { %v412_v38 = vsel %vm409_vm1, 0, %v351_v22 }
  0x74   : > { %v359_v23 = vpop.permute.xlu2 %358 }
  0x75   : > { %v421_v30 = vsel %vm409_vm1, %v1114_v3, %v359_v23 }
  0x7c   : > { %v369_v28 = vpop.permute.xlu2 %368 }
  0x7d   : > { %v436_v37 = vsel %vm409_vm1, %v1138_v8, %v369_v28 }
  0x7f   : > { %v1199_v24 = vpop.permute.xlu1 %407 }
  0x83   : > { %v367_v25 = vpop.permute.xlu0 %366 }
  0x84   : > { %v433_v27 = vsel %vm409_vm1, %v980_v4, %v367_v25  ;;  %v353_v36 = vpop.permute.xlu2 %352 }
  0x85   : > { %v414_v48 = vsel %vm409_vm1, 0, %v353_v36 }
  0x87   : > { %v400_v26 = vpop.permute.xlu1 %399 }
  0x88   : > { %v473_v29 = vsel %vm455_vm2, %v433_v27, %v400_v26 }
  0x89   : > { %964 = vmatmul.msk.bf16.vlgmr.msra.gmra.mxu2 %vm497_vm3, %v473_v29 }
  0x8b   : > { %v375_v31 = vpop.permute.xlu0 %374 }
  0x8c   : > { %v445_v33 = vsel %vm409_vm1, %v1111_v2, %v375_v31  ;;  %v394_v43 = vpop.permute.xlu2 %393 }
  0x8d   : > { %v481_v35 = vsel %vm455_vm2, %v445_v33, %v1199_v24 }
  0x8e   : > { %968 = vmatmul.msk.bf16.vlgmr.msra.gmra.mxu3 %vm497_vm3, %v481_v35 }
  0x8f   : > { %v392_v32 = vpop.permute.xlu1 %391 }
  0x90   : > { %v465_v34 = vsel %vm455_vm2, %v421_v30, %v392_v32 }
  0x91   : > { %960 = vmatmul.msk.bf16.vlgmr.msra.gmra.mxu1 %vm497_vm3, %v465_v34 }
  0x93   : > { %v384_v39 = vpop.permute.xlu0 %383 }
  0x94   : > { %v457_v41 = vsel %vm455_vm2, %v412_v38, %v384_v39  ;;  %v404_v50 = vpop.permute.xlu2 %403 }
  0x95   : > { %956 = vmatmul.msk.bf16.vlgmr.msra.gmra.mxu0 %vm497_vm3, %v457_v41 }
  0x97   : > { %v402_v40 = vpop.permute.xlu1 %401 }
  0x98   : > { %v475_v42 = vsel %vm455_vm2, %v436_v37, %v402_v40 }
  0x99   : > { %965 = vmatmul.msk.bf16.gmra.mxu2 %vm497_vm3, %v475_v42 }
  0x9b   : > { %v377_v44 = vpop.permute.xlu0 %376 }
  0x9c   : > { %v448_v46 = vsel %vm409_vm1, %v1127_v5, %v377_v44  ;;  %v388_v59 = vpop.permute.xlu2 %387 }
  0x9d   : > { %v482_v47 = vsel %vm455_vm2, %v448_v46, %v1199_v24 }
  0x9e   : > { %969 = vmatmul.msk.bf16.gmra.mxu3 %vm497_vm3, %v482_v47 }
  0x9f   : > { %v386_v45 = vpop.permute.xlu1 %385 }
  0xa0   : > { %v459_v49 = vsel %vm455_vm2, %v414_v48, %v386_v45 }
  0xa3   : > { %v361_v51 = vpop.permute.xlu0 %360 }
  0xa4   : > { %v424_v53 = vsel %vm409_vm1, %v1135_v7, %v361_v51  ;;  %v381_v2 = vpop.permute.xlu2 %380 }
  0xa5   : > { %957 = vmatmul.msk.bf16.gmra.mxu0 %vm497_vm3, %v459_v49  ;;  %v467_v54 = vsel %vm455_vm2, %v424_v53, %v394_v43  ;;  %v454_v3 = vsel %vm409_vm1, %v1166_v13, %v381_v2 }
  0xa6   : > { %961 = vmatmul.msk.bf16.gmra.mxu1 %vm497_vm3, %v467_v54  ;;  %v484_v7 = vsel %vm455_vm2, %v454_v3, %v1199_v24 }
  0xa7   : > { %v379_v52 = vpop.permute.xlu1 %378 }
  0xa8   : > { %v451_v55 = vsel %vm409_vm1, %v1152_v10, %v379_v52 }
  0xa9   : > { %v483_v61 = vsel %vm455_vm2, %v451_v55, %v1199_v24 }
  0xab   : > { %v371_v56 = vpop.permute.xlu0 %370 }
  0xac   : > { %v439_v57 = vsel %vm409_vm1, %v1155_v11, %v371_v56  ;;  %v365_v13 = vpop.permute.xlu2 %364 }
  0xad   : > { %v477_v60 = vsel %vm455_vm2, %v439_v57, %v404_v50 }
  0xae   : > { %966 = vmatmul.msk.bf16.gmra.mxu2 %vm497_vm3, %v477_v60  ;;  %970 = vmatmul.msk.bf16.gmra.mxu3 %vm497_vm3, %v483_v61 }
  0xaf   : > { %v363_v58 = vpop.permute.xlu1 %362 }
  0xb0   : > { %v427_v4 = vsel %vm409_vm1, %v1163_v12, %v363_v58  ;;  %v430_v12 = vsel %vm409_vm1, %v1176_v15, %v365_v13  ;;  %v1272_v15 = vld [vmem:[%s1421_s3] ss:$0 sm:$0xff] }
  0xb3   : > { %v355_v62 = vpop.permute.xlu0 %354 }
  0xb4   : > { %v416_v63 = vsel %vm409_vm1, 0, %v355_v62 }
  0xb5   : > { %v461_v1 = vsel %vm455_vm2, %v416_v63, %v388_v59 }
  0xb6   : > { %958 = vmatmul.msk.bf16.gmra.mxu0 %vm497_vm3, %v461_v1 }
  0xb7   : > { %v373_v0 = vpop.permute.xlu1 %372 }
  0xb8   : > { %v442_v9 = vsel %vm409_vm1, %v1184_v16, %v373_v0  ;;  %v1267_v16 = vld [vmem:[%s1420_s2] ss:$0 sm:$0xff] }
  0xbb   : > { %v396_v5 = vpop.permute.xlu0 %395 }
  0xbc   : > { %v469_v6 = vsel %vm455_vm2, %v427_v4, %v396_v5 }
  0xbd   : > { %962 = vmatmul.msk.bf16.gmra.mxu1 %vm497_vm3, %v469_v6 }
  0xbe   : > { %971 = vmatmul.msk.bf16.gmra.mxu3 %vm497_vm3, %v484_v7 }
  0xbf   : > { %v357_v8 = vpop.permute.xlu1 %356 }
  0xc0   : > { %v418_v18 = vsel %vm409_vm1, 0, %v357_v8 }
  0xc3   : > { %v406_v10 = vpop.permute.xlu0 %405 }
  0xc4   : > { %v479_v11 = vsel %vm455_vm2, %v442_v9, %v406_v10 }
  0xc5   : > { %967 = vmatmul.msk.bf16.gmra.mxu2 %vm497_vm3, %v479_v11 }
  0xc7   : > { %v398_v14 = vpop.permute.xlu1 %397 }
  0xc8   : > { %v471_v17 = vsel %vm455_vm2, %v430_v12, %v398_v14 }
  0xcb   : > { %v390_v19 = vpop.permute.xlu0 %389 }
  0xcc   : > { %v463_v20 = vsel %vm455_vm2, %v418_v18, %v390_v19 }
  0xcd   : > { %959 = vmatmul.msk.bf16.gmra.mxu0 %vm497_vm3, %v463_v20  ;;  %963 = vmatmul.msk.bf16.gmra.mxu1 %vm497_vm3, %v471_v17 }
 0x10c   : > { %v583_v21 = vpop.f32.mrf.mxu2 }
 0x10d   : > { %v643_v22 = vmul.f32 %v1267_v16, %v583_v21 }
 0x10e   : > { %v563_v23 = vpop.f32.mrf.mxu1 }
 0x10f   : > { %v679_v24 = vadd.f32 %v1272_v15, %v643_v22  ;;  %v635_v25 = vmul.f32 %v1267_v16, %v563_v23 }
 0x111   : > { %v711_v26 = vmax.f32 %v679_v24, 0.0  ;;  %v671_v27 = vadd.f32 %v1272_v15, %v635_v25  ;;  %v603_v31 = vpop.f32.mrf.mxu3 }
 0x112   : > { %v651_v34 = vmul.f32 %v1267_v16, %v603_v31  ;;  %v543_v35 = vpop.f32.mrf.mxu0 }
 0x113   : > { %v743_v28 = vpack.c.bf16 %v711_v26, %v711_v26  ;;  %v703_v29 = vmax.f32 %v671_v27, 0.0  ;;  %v627_v36 = vmul.f32 %v1267_v16, %v543_v35 }
 0x114   : > { %v585_v30 = vpop.f32.mrf.mxu2  ;;  %v687_v39 = vadd.f32 %v1272_v15, %v651_v34 }
 0x115   : > { %776 = vst.msk [vmem:[%s1283_s9 + $0x40] sm:$0xf] %vm759_vm4, %v743_v28  ;;  %v735_v32 = vpack.c.bf16 %v703_v29, %v703_v29  ;;  %v644_v33 = vmul.f32 %v1267_v16, %v585_v30  ;;  %v663_v41 = vadd.f32 %v1272_v15, %v627_v36 }
 0x116   : > { %v565_v37 = vpop.f32.mrf.mxu1  ;;  %v719_v43 = vmax.f32 %v687_v39, 0.0 }
 0x117   : > { %768 = vst.msk [vmem:[%s1283_s9 + $0x20] sm:$0xf] %vm759_vm4, %v735_v32  ;;  %v680_v38 = vadd.f32 %v1272_v15, %v644_v33  ;;  %v636_v40 = vmul.f32 %v1267_v16, %v565_v37  ;;  %v695_v45 = vmax.f32 %v663_v41, 0.0 }
 0x118   : > { %v751_v47 = vpack.c.bf16 %v719_v43, %v719_v43 }
 0x119   : > { %v712_v42 = vmax.f32 %v680_v38, 0.0  ;;  %v672_v44 = vadd.f32 %v1272_v15, %v636_v40  ;;  %v727_v49 = vpack.c.bf16 %v695_v45, %v695_v45  ;;  %v605_v51 = vpop.f32.mrf.mxu3 }
 0x11a   : > { %v652_v54 = vmul.f32 %v1267_v16, %v605_v51  ;;  %v545_v55 = vpop.f32.mrf.mxu0  ;;  %784 = vst.msk [vmem:[%s1283_s9 + $0x60] sm:$0xf] %vm759_vm4, %v751_v47 }
 0x11b   : > { %v744_v46 = vpack.c.bf16 %v712_v42, %v712_v42  ;;  %v704_v48 = vmax.f32 %v672_v44, 0.0  ;;  %v628_v56 = vmul.f32 %v1267_v16, %v545_v55  ;;  %760 = vst.msk [vmem:[%s1283_s9] sm:$0xf] %vm759_vm4, %v727_v49 }
 0x11c   : > { %v588_v50 = vpop.f32.mrf.mxu2  ;;  %v688_v58 = vadd.f32 %v1272_v15, %v652_v54 }
 0x11d   : > { %777 = vst.msk [vmem:[%s1283_s9 + $0x44] sm:$0xf] %vm759_vm4, %v744_v46  ;;  %v736_v52 = vpack.c.bf16 %v704_v48, %v704_v48  ;;  %v645_v53 = vmul.f32 %v1267_v16, %v588_v50  ;;  %v664_v59 = vadd.f32 %v1272_v15, %v628_v56 }
 0x11e   : > { %v720_v61 = vmax.f32 %v688_v58, 0.0 }
 0x11f   : > { %v681_v57 = vadd.f32 %v1272_v15, %v645_v53  ;;  %769 = vst.msk [vmem:[%s1283_s9 + $0x24] sm:$0xf] %vm759_vm4, %v736_v52  ;;  %v696_v62 = vmax.f32 %v664_v59, 0.0 }
 0x120   : > { %v752_v0 = vpack.c.bf16 %v720_v61, %v720_v61 }
 0x121   : > { %v713_v60 = vmax.f32 %v681_v57, 0.0  ;;  %v728_v1 = vpack.c.bf16 %v696_v62, %v696_v62  ;;  %v608_v3 = vpop.f32.mrf.mxu3 }
 0x122   : > { %v653_v5 = vmul.f32 %v1267_v16, %v608_v3  ;;  %v548_v6 = vpop.f32.mrf.mxu0  ;;  %785 = vst.msk [vmem:[%s1283_s9 + $0x64] sm:$0xf] %vm759_vm4, %v752_v0 }
 0x123   : > { %v745_v63 = vpack.c.bf16 %v713_v60, %v713_v60  ;;  %v629_v7 = vmul.f32 %v1267_v16, %v548_v6  ;;  %v568_v8 = vpop.f32.mrf.mxu1  ;;  %761 = vst.msk [vmem:[%s1283_s9 + $0x4] sm:$0xf] %vm759_vm4, %v728_v1 }
 0x124   : > { %v590_v2 = vpop.f32.mrf.mxu2  ;;  %v689_v10 = vadd.f32 %v1272_v15, %v653_v5  ;;  %v637_v11 = vmul.f32 %v1267_v16, %v568_v8 }
 0x125   : > { %778 = vst.msk [vmem:[%s1283_s9 + $0x48] sm:$0xf] %vm759_vm4, %v745_v63  ;;  %v646_v4 = vmul.f32 %v1267_v16, %v590_v2  ;;  %v665_v13 = vadd.f32 %v1272_v15, %v629_v7 }
 0x126   : > { %v721_v14 = vmax.f32 %v689_v10, 0.0  ;;  %v673_v17 = vadd.f32 %v1272_v15, %v637_v11 }
 0x127   : > { %v682_v9 = vadd.f32 %v1272_v15, %v646_v4  ;;  %v697_v18 = vmax.f32 %v665_v13, 0.0 }
 0x128   : > { %v753_v20 = vpack.c.bf16 %v721_v14, %v721_v14  ;;  %v705_v21 = vmax.f32 %v673_v17, 0.0 }
 0x129   : > { %v714_v12 = vmax.f32 %v682_v9, 0.0  ;;  %v729_v22 = vpack.c.bf16 %v697_v18, %v697_v18  ;;  %v610_v23 = vpop.f32.mrf.mxu3 }
 0x12a   : > { %v737_v24 = vpack.c.bf16 %v705_v21, %v705_v21  ;;  %v654_v25 = vmul.f32 %v1267_v16, %v610_v23  ;;  %v550_v26 = vpop.f32.mrf.mxu0  ;;  %786 = vst.msk [vmem:[%s1283_s9 + $0x68] sm:$0xf] %vm759_vm4, %v753_v20 }
 0x12b   : > { %v746_v19 = vpack.c.bf16 %v714_v12, %v714_v12  ;;  %v630_v27 = vmul.f32 %v1267_v16, %v550_v26  ;;  %v570_v28 = vpop.f32.mrf.mxu1  ;;  %762 = vst.msk [vmem:[%s1283_s9 + $0x8] sm:$0xf] %vm759_vm4, %v729_v22 }
 0x12c   : > { %v690_v29 = vadd.f32 %v1272_v15, %v654_v25  ;;  %v638_v30 = vmul.f32 %v1267_v16, %v570_v28  ;;  %770 = vst.msk [vmem:[%s1283_s9 + $0x28] sm:$0xf] %vm759_vm4, %v737_v24 }
 0x12d   : > { %779 = vst.msk [vmem:[%s1283_s9 + $0x4c] sm:$0xf] %vm759_vm4, %v746_v19  ;;  %v666_v31 = vadd.f32 %v1272_v15, %v630_v27 }
 0x12e   : > { %v722_v32 = vmax.f32 %v690_v29, 0.0  ;;  %v674_v33 = vadd.f32 %v1272_v15, %v638_v30 }
 0x12f   : > { %v698_v34 = vmax.f32 %v666_v31, 0.0 }
 0x130   : > { %v754_v35 = vpack.c.bf16 %v722_v32, %v722_v32  ;;  %v706_v36 = vmax.f32 %v674_v33, 0.0 }
 0x131   : > { %v730_v37 = vpack.c.bf16 %v698_v34, %v698_v34  ;;  %v593_v38 = vpop.f32.mrf.mxu2  ;;  %v613_v39 = vpop.f32.mrf.mxu3 }
 0x132   : > { %787 = vst.msk [vmem:[%s1283_s9 + $0x6c] sm:$0xf] %vm759_vm4, %v754_v35  ;;  %v738_v40 = vpack.c.bf16 %v706_v36, %v706_v36  ;;  %v647_v41 = vmul.f32 %v1267_v16, %v593_v38  ;;  %v655_v42 = vmul.f32 %v1267_v16, %v613_v39 }
 0x133   : > { %763 = vst.msk [vmem:[%s1283_s9 + $0xc] sm:$0xf] %vm759_vm4, %v730_v37  ;;  %v553_v43 = vpop.f32.mrf.mxu0 }
 0x134   : > { %771 = vst.msk [vmem:[%s1283_s9 + $0x2c] sm:$0xf] %vm759_vm4, %v738_v40  ;;  %v683_v44 = vadd.f32 %v1272_v15, %v647_v41  ;;  %v691_v45 = vadd.f32 %v1272_v15, %v655_v42  ;;  %v631_v46 = vmul.f32 %v1267_v16, %v553_v43 }
 0x136   : > { %v715_v47 = vmax.f32 %v683_v44, 0.0  ;;  %v723_v48 = vmax.f32 %v691_v45, 0.0  ;;  %v667_v49 = vadd.f32 %v1272_v15, %v631_v46 }
 0x138   : > { %v747_v50 = vpack.c.bf16 %v715_v47, %v715_v47  ;;  %v755_v51 = vpack.c.bf16 %v723_v48, %v723_v48  ;;  %v699_v52 = vmax.f32 %v667_v49, 0.0 }
 0x139   : > { %v595_v53 = vpop.f32.mrf.mxu2  ;;  %v615_v54 = vpop.f32.mrf.mxu3 }
 0x13a   : > { %780 = vst.msk [vmem:[%s1283_s9 + $0x50] sm:$0xf] %vm759_vm4, %v747_v50  ;;  %v731_v55 = vpack.c.bf16 %v699_v52, %v699_v52  ;;  %v648_v56 = vmul.f32 %v1267_v16, %v595_v53  ;;  %v656_v57 = vmul.f32 %v1267_v16, %v615_v54  ;;  %v573_v58 = vpop.f32.mrf.mxu1 }
 0x13b   : > { %788 = vst.msk [vmem:[%s1283_s9 + $0x70] sm:$0xf] %vm759_vm4, %v755_v51  ;;  %v639_v59 = vmul.f32 %v1267_v16, %v573_v58  ;;  %v555_v60 = vpop.f32.mrf.mxu0 }
 0x13c   : > { %764 = vst.msk [vmem:[%s1283_s9 + $0x10] sm:$0xf] %vm759_vm4, %v731_v55  ;;  %v684_v61 = vadd.f32 %v1272_v15, %v648_v56  ;;  %v692_v62 = vadd.f32 %v1272_v15, %v656_v57  ;;  %v632_v63 = vmul.f32 %v1267_v16, %v555_v60 }
 0x13d   : > { %v675_v0 = vadd.f32 %v1272_v15, %v639_v59 }
 0x13e   : > { %v716_v1 = vmax.f32 %v684_v61, 0.0  ;;  %v724_v2 = vmax.f32 %v692_v62, 0.0  ;;  %v668_v3 = vadd.f32 %v1272_v15, %v632_v63 }
 0x13f   : > { %v707_v4 = vmax.f32 %v675_v0, 0.0 }
 0x140   : > { %v748_v5 = vpack.c.bf16 %v716_v1, %v716_v1  ;;  %v756_v6 = vpack.c.bf16 %v724_v2, %v724_v2  ;;  %v700_v7 = vmax.f32 %v668_v3, 0.0 }
 0x141   : > { %v739_v8 = vpack.c.bf16 %v707_v4, %v707_v4  ;;  %v618_v9 = vpop.f32.mrf.mxu3 }
 0x142   : > { %781 = vst.msk [vmem:[%s1283_s9 + $0x54] sm:$0xf] %vm759_vm4, %v748_v5  ;;  %v732_v10 = vpack.c.bf16 %v700_v7, %v700_v7  ;;  %v657_v11 = vmul.f32 %v1267_v16, %v618_v9  ;;  %v575_v13 = vpop.f32.mrf.mxu1 }
 0x143   : > { %789 = vst.msk [vmem:[%s1283_s9 + $0x74] sm:$0xf] %vm759_vm4, %v756_v6  ;;  %v640_v12 = vmul.f32 %v1267_v16, %v575_v13 }
 0x144   : > { %772 = vst.msk [vmem:[%s1283_s9 + $0x30] sm:$0xf] %vm759_vm4, %v739_v8  ;;  %v693_v14 = vadd.f32 %v1272_v15, %v657_v11 }
 0x145   : > { %765 = vst.msk [vmem:[%s1283_s9 + $0x14] sm:$0xf] %vm759_vm4, %v732_v10  ;;  %v676_v17 = vadd.f32 %v1272_v15, %v640_v12 }
 0x146   : > { %v725_v18 = vmax.f32 %v693_v14, 0.0 }
 0x147   : > { %v708_v19 = vmax.f32 %v676_v17, 0.0 }
 0x148   : > { %v757_v20 = vpack.c.bf16 %v725_v18, %v725_v18  ;;  %v598_v21 = vpop.f32.mrf.mxu2 }
 0x149   : > { %v740_v22 = vpack.c.bf16 %v708_v19, %v708_v19  ;;  %v649_v23 = vmul.f32 %v1267_v16, %v598_v21  ;;  %v620_v24 = vpop.f32.mrf.mxu3 }
 0x14a   : > { %790 = vst.msk [vmem:[%s1283_s9 + $0x78] sm:$0xf] %vm759_vm4, %v757_v20  ;;  %v658_v25 = vmul.f32 %v1267_v16, %v620_v24  ;;  %v558_v26 = vpop.f32.mrf.mxu0  ;;  %v578_v27 = vpop.f32.mrf.mxu1 }
 0x14b   : > { %773 = vst.msk [vmem:[%s1283_s9 + $0x34] sm:$0xf] %vm759_vm4, %v740_v22  ;;  %v685_v28 = vadd.f32 %v1272_v15, %v649_v23  ;;  %v633_v29 = vmul.f32 %v1267_v16, %v558_v26  ;;  %v641_v30 = vmul.f32 %v1267_v16, %v578_v27 }
 0x14c   : > { %v694_v31 = vadd.f32 %v1272_v15, %v658_v25 }
 0x14d   : > { %v717_v32 = vmax.f32 %v685_v28, 0.0  ;;  %v669_v33 = vadd.f32 %v1272_v15, %v633_v29  ;;  %v677_v34 = vadd.f32 %v1272_v15, %v641_v30 }
 0x14e   : > { %v726_v35 = vmax.f32 %v694_v31, 0.0 }
 0x14f   : > { %v749_v36 = vpack.c.bf16 %v717_v32, %v717_v32  ;;  %v701_v37 = vmax.f32 %v669_v33, 0.0  ;;  %v709_v38 = vmax.f32 %v677_v34, 0.0 }
 0x150   : > { %v758_v39 = vpack.c.bf16 %v726_v35, %v726_v35  ;;  %v600_v40 = vpop.f32.mrf.mxu2 }
 0x151   : > { %782 = vst.msk [vmem:[%s1283_s9 + $0x58] sm:$0xf] %vm759_vm4, %v749_v36  ;;  %v733_v41 = vpack.c.bf16 %v701_v37, %v701_v37  ;;  %v741_v42 = vpack.c.bf16 %v709_v38, %v709_v38  ;;  %v650_v43 = vmul.f32 %v1267_v16, %v600_v40 }
 0x152   : > { %791 = vst.msk [vmem:[%s1283_s9 + $0x7c] sm:$0xf] %vm759_vm4, %v758_v39  ;;  %v560_v44 = vpop.f32.mrf.mxu0  ;;  %v580_v45 = vpop.f32.mrf.mxu1 }
 0x153   : > { %766 = vst.msk [vmem:[%s1283_s9 + $0x18] sm:$0xf] %vm759_vm4, %v733_v41  ;;  %v686_v46 = vadd.f32 %v1272_v15, %v650_v43  ;;  %v634_v47 = vmul.f32 %v1267_v16, %v560_v44  ;;  %v642_v48 = vmul.f32 %v1267_v16, %v580_v45 }
 0x154   : > { %774 = vst.msk [vmem:[%s1283_s9 + $0x38] sm:$0xf] %vm759_vm4, %v741_v42 }
 0x155   : > { %v718_v49 = vmax.f32 %v686_v46, 0.0  ;;  %v670_v50 = vadd.f32 %v1272_v15, %v634_v47  ;;  %v678_v51 = vadd.f32 %v1272_v15, %v642_v48 }
 0x157   : > { %v750_v52 = vpack.c.bf16 %v718_v49, %v718_v49  ;;  %v702_v53 = vmax.f32 %v670_v50, 0.0  ;;  %v710_v54 = vmax.f32 %v678_v51, 0.0 }
 0x159   : > { %783 = vst.msk [vmem:[%s1283_s9 + $0x5c] sm:$0xf] %vm759_vm4, %v750_v52  ;;  %v734_v55 = vpack.c.bf16 %v702_v53, %v702_v53  ;;  %v742_v56 = vpack.c.bf16 %v710_v54, %v710_v54 }
 0x15b   : > { %767 = vst.msk [vmem:[%s1283_s9 + $0x1c] sm:$0xf] %vm759_vm4, %v734_v55 }
 0x15c   : > { %775 = vst.msk [vmem:[%s1283_s9 + $0x3c] sm:$0xf] %vm759_vm4, %v742_v56 }
 0x15d PF: > { %s14_s17 = sadd.s32 1, %s1050_s17   ;;  %s1423_s15 = smov %s1046_s16 }
 0x15e   : > { %p11_p5 = scmp.ge.s32.totalorder %s14_s17, 4   ;;  %s1424_s16 = smov %s1426_s18 }
 0x160   :  { %13 = sbr.rel (!%p11_p5) target bundleno = 2 (0x2), region = 66 }

// kernel: inception_block.14
= control target key start
LH: loop header
LB: loop body
LE: loop exit
PB: predicated region body
PF: predicated region fallthrough
CT: control target
= control target key end

     0   :  { %s1421_s15 = smov 0   ;;  %s1423_s16 = smov 0   ;;  %s1726_s0 = inlined_call_operand.vmem [shape: bf16[2,256,8], index: 0, kind: input, shape index: {}]   ;;  %s1727_s1 = inlined_call_operand.vmem [shape: bf16[2,256,8], index: 1, kind: input, shape index: {}]   ;;  %s1728_s2 = inlined_call_operand.vmem [shape: bf16[2,256,8], index: 2, kind: input, shape index: {}]   ;;  %s1729_s3 = inlined_call_operand.vmem [shape: bf16[2,256,8], index: 3, kind: input, shape index: {}]   ;;  %s1730_s4 = inlined_call_operand.vmem [shape: f32[2,1,32], index: 4, kind: output, shape index: {}]  }
   0x1   :  { %s1425_s17 = smov 0  }
   0x2 LB: > { %s26_s18 = sadd.s32 1, %s1386_s16  ;;  %p1009_p0 = scmp.ge.s32.totalorder %s1390_s17, 1  ;;  %s1390_s17 = sphi %s1425_s17, %s14_s17   ;;  %s1386_s16 = sphi %s1423_s16, %s1732_s16   ;;  %s1382_s15 = sphi %s1421_s15, %s1731_s15  }
   0x3   : > { %p28_p1 = scmp.ge.s32.totalorder %s26_s18, 2  ;;  %p232_p2 = scmp.lt.s32.totalorder %s1390_s17, 3 }
   0x5   : > { %s1734_s18 = smov (%p28_p1, %s26_s18), 0  ;;  %p233_p3 = pnand %p1009_p0, %p232_p2 }
   0x6   : > { %p288_p4 = scmp.lt.s32.totalorder (!%p233_p3), %s1382_s15, 1  ;;  %s1392_s29 = smov (!%p233_p3), 8  }
   0x7   : > { %236 = sbr.rel (%p233_p3) target bundleno = 240 (0xf0), region = 36  ;;  %s1393_s30 = smov (!%p233_p3), 16  }
   0x8   : > { %s1394_s8 = smov (!%p233_p3), 24  }
   0xc   : > { %s1736_s15 = smov (!%p288_p4, %s1382_s15), 1  ;;  %vm400_vm0 = vcmask 64512   ;;  %vm334_vm1 = vcmask 253952   ;;  %vm882_vm2 = vcmask 130048   ;;  %vm884_vm3 = vcmask 195584  }
   0xd   : > { %s1442_s19 = sshll.u32 %s1736_s15, 7  ;;  %s329_s11 = scalar_lea.vmem %s1730_s4, %s1736_s15 }
   0xe   : > { %s1448_s22 = scalar_lea.vmem %s1727_s1, %s1442_s19  ;;  %s1462_s25 = scalar_lea.vmem %s1728_s2, %s1442_s19 }
   0xf   : > { %v1089_v0 = vld [vmem:[%s1448_s22] sm:$0xff]   ;;  %v1295_v1 = vld [vmem:[%s1448_s22 + $0x8] sm:$0xff]   ;;  %v1296_v5 = vld [vmem:[%s1448_s22 + $0x10] sm:$0xff]   ;;  %s1522_s28 = scalar_lea.vmem %s1729_s3, %s1442_s19  ;;  %s1660_s7 = scalar_lea.vmem %s1726_s0, %s1442_s19 }
  0x10   : > { %v1090_v2 = vunpack.c.l.bf16 %v1089_v0  ;;  %v1091_v3 = vunpack.c.h.bf16 %v1089_v0  ;;  %v1094_v4 = vunpack.c.l.bf16 %v1295_v1  ;;  %v1095_v6 = vunpack.c.h.bf16 %v1295_v1  ;;  %v1297_v11 = vld [vmem:[%s1448_s22 + $0x18] sm:$0xff]   ;;  %v1298_v18 = vld [vmem:[%s1448_s22 + $0x20] sm:$0xff]   ;;  %v1310_v23 = vld [vmem:[%s1462_s25 + $0x8] sm:$0xff]  }
  0x11   : > { %v1098_v7 = vunpack.c.l.bf16 %v1296_v5  ;;  %v1099_v13 = vunpack.c.h.bf16 %v1296_v5  ;;  %v1102_v16 = vunpack.c.l.bf16 %v1297_v11  ;;  %v1153_v20 = vld [vmem:[%s1462_s25] sm:$0xff]   ;;  %v1103_v21 = vunpack.c.h.bf16 %v1297_v11  ;;  %v1299_v28 = vld [vmem:[%s1448_s22 + $0x28] sm:$0xff]   ;;  %v1311_v34 = vld [vmem:[%s1462_s25 + $0x10] sm:$0xff]  }
  0x12   : > { %v534_v8 = vsel %vm400_vm0, %v1090_v2, 0.0  ;;  %v535_v9 = vsel %vm400_vm0, %v1091_v3, 0.0  ;;  %v537_v10 = vsel %vm400_vm0, %v1094_v4, 0.0  ;;  %v539_v14 = vsel %vm400_vm0, %v1095_v6, 0.0  ;;  %v1300_v40 = vld [vmem:[%s1448_s22 + $0x30] sm:$0xff]   ;;  %v1312_v47 = vld [vmem:[%s1462_s25 + $0x18] sm:$0xff]  }
  0x13   : > { %v536_v12 = vadd.f32 %v535_v9, %v534_v8  ;;  %v541_v17 = vsel %vm400_vm0, %v1098_v7, 0.0  ;;  %v543_v22 = vsel %vm400_vm0, %v1099_v13, 0.0  ;;  %v1106_v25 = vunpack.c.l.bf16 %v1298_v18  ;;  %v1301_v55 = vld [vmem:[%s1448_s22 + $0x38] sm:$0xff]   ;;  %v1313_v61 = vld [vmem:[%s1462_s25 + $0x20] sm:$0xff]   ;;  %v1489_v4 = vld [vmem:[%s1448_s22 + $0x48] sm:$0xff]  }
  0x14   : > { %v545_v26 = vsel %vm400_vm0, %v1102_v16, 0.0  ;;  %v1154_v27 = vunpack.c.l.bf16 %v1153_v20  ;;  %v1155_v30 = vunpack.c.h.bf16 %v1153_v20  ;;  %v1158_v31 = vunpack.c.l.bf16 %v1310_v23  ;;  %v1302_v63 = vld [vmem:[%s1448_s22 + $0x40] sm:$0xff]   ;;  %v1493_v8 = vld [vmem:[%s1448_s22 + $0x50] sm:$0xff]  }
  0x15   : > { %v538_v15 = vadd.f32 %v537_v10, %v536_v12  ;;  %v1107_v32 = vunpack.c.h.bf16 %v1298_v18  ;;  %v547_v33 = vsel %vm400_vm0, %v1103_v21, 0.0  ;;  %v1159_v36 = vunpack.c.h.bf16 %v1310_v23  ;;  %v1500_v18 = vld [vmem:[%s1448_s22 + $0x58] sm:$0xff]  }
  0x16   : > { %v1110_v37 = vunpack.c.l.bf16 %v1299_v28  ;;  %v549_v38 = vsel %vm400_vm0, %v1106_v25, 0.0  ;;  %v667_v39 = vsel %vm400_vm0, %v1154_v27, 0.0  ;;  %v1162_v42 = vunpack.c.l.bf16 %v1311_v34 }
  0x17   : > { %v540_v19 = vadd.f32 %v539_v14, %v538_v15  ;;  %v668_v43 = vsel %vm400_vm0, %v1155_v30, 0.0  ;;  %v670_v44 = vsel %vm400_vm0, %v1158_v31, 0.0  ;;  %v1111_v45 = vunpack.c.h.bf16 %v1299_v28  ;;  %v1314_v15 = vld [vmem:[%s1462_s25 + $0x28] sm:$0xff]  }
  0x18   : > { %v551_v46 = vsel %vm400_vm0, %v1107_v32, 0.0  ;;  %v669_v48 = vadd.f32 %v668_v43, %v667_v39  ;;  %v1163_v50 = vunpack.c.h.bf16 %v1311_v34  ;;  %v672_v51 = vsel %vm400_vm0, %v1159_v36, 0.0  ;;  %v1511_v28 = vld [vmem:[%s1448_s22 + $0x68] sm:$0xff]  }
  0x19   : > { %v542_v24 = vadd.f32 %v541_v17, %v540_v19  ;;  %v1114_v52 = vunpack.c.l.bf16 %v1300_v40  ;;  %v553_v53 = vsel %vm400_vm0, %v1110_v37, 0.0  ;;  %v1166_v57 = vunpack.c.l.bf16 %v1312_v47 }
  0x1a   : > { %v671_v54 = vadd.f32 %v670_v44, %v669_v48  ;;  %v674_v58 = vsel %vm400_vm0, %v1162_v42, 0.0  ;;  %v1115_v59 = vunpack.c.h.bf16 %v1300_v40  ;;  %v555_v60 = vsel %vm400_vm0, %v1111_v45, 0.0  ;;  %v1532_v44 = vld [vmem:[%s1448_s22 + $0x78] sm:$0xff]  }
  0x1b   : > { %v544_v29 = vadd.f32 %v543_v22, %v542_v24  ;;  %v1167_v1 = vunpack.c.h.bf16 %v1312_v47  ;;  %v676_v2 = vsel %vm400_vm0, %v1163_v50, 0.0  ;;  %v1118_v3 = vunpack.c.l.bf16 %v1301_v55  ;;  %v1506_v24 = vld [vmem:[%s1448_s22 + $0x60] sm:$0xff]   ;;  %v1316_v50 = vld [vmem:[%s1462_s25 + $0x38] sm:$0xff]  }
  0x1c   : > { %v673_v62 = vadd.f32 %v672_v51, %v671_v54  ;;  %v557_v5 = vsel %vm400_vm0, %v1114_v52, 0.0  ;;  %v1119_v7 = vunpack.c.h.bf16 %v1301_v55  ;;  %v1170_v10 = vunpack.c.l.bf16 %v1313_v61  ;;  %v1217_v52 = vld [vmem:[%s1522_s28] sm:$0xff]  }
  0x1d   : > { %v546_v35 = vadd.f32 %v545_v26, %v544_v29  ;;  %v678_v11 = vsel %vm400_vm0, %v1166_v57, 0.0  ;;  %v1122_v12 = vunpack.c.l.bf16 %v1302_v63  ;;  %v1123_v13 = vunpack.c.h.bf16 %v1302_v63  ;;  %v1325_v57 = vld [vmem:[%s1522_s28 + $0x8] sm:$0xff]  }
  0x1e   : > { %v675_v6 = vadd.f32 %v674_v58, %v673_v62  ;;  %v559_v14 = vsel %vm400_vm0, %v1115_v59, 0.0  ;;  %v1126_v17 = vunpack.c.l.bf16 %v1489_v4  ;;  %v1171_v20 = vunpack.c.h.bf16 %v1313_v61 }
  0x1f   : > { %v548_v41 = vadd.f32 %v547_v33, %v546_v35  ;;  %v680_v21 = vsel %vm400_vm0, %v1167_v1, 0.0  ;;  %v1127_v22 = vunpack.c.h.bf16 %v1489_v4  ;;  %v1130_v23 = vunpack.c.l.bf16 %v1493_v8  ;;  %v1315_v35 = vld [vmem:[%s1462_s25 + $0x30] sm:$0xff]  }
  0x20   : > { %v677_v16 = vadd.f32 %v676_v2, %v675_v6  ;;  %v561_v25 = vsel %vm400_vm0, %v1118_v3, 0.0  ;;  %v1131_v27 = vunpack.c.h.bf16 %v1493_v8  ;;  %v1174_v30 = vunpack.c.l.bf16 %v1314_v15  ;;  %v1317_v3 = vld [vmem:[%s1462_s25 + $0x40] sm:$0xff]  }
  0x21   : > { %v550_v49 = vadd.f32 %v549_v38, %v548_v41  ;;  %v682_v31 = vsel %vm400_vm0, %v1170_v10, 0.0  ;;  %v1134_v32 = vunpack.c.l.bf16 %v1500_v18  ;;  %v1135_v33 = vunpack.c.h.bf16 %v1500_v18  ;;  %v1526_v38 = vld [vmem:[%s1448_s22 + $0x70] sm:$0xff]  }
  0x22   : > { %v679_v26 = vadd.f32 %v678_v11, %v677_v16  ;;  %v563_v34 = vsel %vm400_vm0, %v1119_v7, 0.0  ;;  %v1138_v37 = vunpack.c.l.bf16 %v1506_v24  ;;  %v1175_v40 = vunpack.c.h.bf16 %v1314_v15 }
  0x23   : > { %v552_v56 = vadd.f32 %v551_v46, %v550_v49  ;;  %v684_v41 = vsel %vm400_vm0, %v1171_v20, 0.0  ;;  %v1139_v42 = vunpack.c.h.bf16 %v1506_v24  ;;  %v1142_v43 = vunpack.c.l.bf16 %v1511_v28 }
  0x24   : > { %v681_v36 = vadd.f32 %v680_v21, %v679_v26  ;;  %v565_v45 = vsel %vm400_vm0, %v1122_v12, 0.0  ;;  %v1143_v47 = vunpack.c.h.bf16 %v1511_v28  ;;  %v1178_v49 = vunpack.c.l.bf16 %v1315_v35  ;;  %v1326_v12 = vld [vmem:[%s1522_s28 + $0x10] sm:$0xff]   ;;  %v1318_v26 = vld [vmem:[%s1462_s25 + $0x48] sm:$0xff]  }
  0x25   : > { %v554_v0 = vadd.f32 %v553_v53, %v552_v56  ;;  %v686_v51 = vsel %vm400_vm0, %v1174_v30, 0.0  ;;  %v1146_v53 = vunpack.c.l.bf16 %v1526_v38  ;;  %v1147_v54 = vunpack.c.h.bf16 %v1526_v38 }
  0x26   : > { %v683_v46 = vadd.f32 %v682_v31, %v681_v36  ;;  %v567_v55 = vsel %vm400_vm0, %v1123_v13, 0.0  ;;  %v1150_v58 = vunpack.c.l.bf16 %v1532_v44  ;;  %v688_v61 = vsel %vm400_vm0, %v1175_v40, 0.0 }
  0x27   : > { %v556_v9 = vadd.f32 %v555_v60, %v554_v0  ;;  %v1179_v60 = vunpack.c.h.bf16 %v1315_v35  ;;  %v569_v62 = vsel %vm400_vm0, %v1126_v17, 0.0  ;;  %v1182_v63 = vunpack.c.l.bf16 %v1316_v50  ;;  %v1327_v35 = vld [vmem:[%s1522_s28 + $0x18] sm:$0xff]  }
  0x28   : > { %v685_v56 = vadd.f32 %v684_v41, %v683_v46  ;;  %v1218_v1 = vunpack.c.l.bf16 %v1217_v52  ;;  %v690_v4 = vsel %vm400_vm0, %v1178_v49, 0.0  ;;  %v1222_v6 = vunpack.c.l.bf16 %v1325_v57 }
  0x29   : > { %v558_v19 = vadd.f32 %v557_v5, %v556_v9  ;;  %v1219_v5 = vunpack.c.h.bf16 %v1217_v52  ;;  %v1151_v7 = vunpack.c.h.bf16 %v1532_v44  ;;  %v571_v9 = vsel %vm400_vm0, %v1127_v22, 0.0 }
  0x2a   : > { %v687_v0 = vadd.f32 %v686_v51, %v685_v56  ;;  %v573_v10 = vsel %vm400_vm0, %v1130_v23, 0.0  ;;  %v692_v15 = vsel %vm400_vm0, %v1179_v60, 0.0  ;;  %v1223_v16 = vunpack.c.h.bf16 %v1325_v57  ;;  %v1328_v60 = vld [vmem:[%s1522_s28 + $0x20] sm:$0xff]  }
  0x2b   : > { %v560_v29 = vadd.f32 %v559_v14, %v558_v19  ;;  %v1183_v14 = vunpack.c.h.bf16 %v1316_v50  ;;  %v1186_v17 = vunpack.c.l.bf16 %v1317_v3  ;;  %v694_v20 = vsel %vm400_vm0, %v1182_v63, 0.0 }
  0x2c   : > { %v689_v11 = vadd.f32 %v688_v61, %v687_v0  ;;  %v800_v21 = vsel %vm400_vm0, %v1218_v1, 0.0  ;;  %v801_v22 = vsel %vm400_vm0, %v1219_v5, 0.0  ;;  %v803_v23 = vsel %vm400_vm0, %v1222_v6, 0.0 }
  0x2d   : > { %v562_v39 = vadd.f32 %v561_v25, %v560_v29  ;;  %v1226_v29 = vunpack.c.l.bf16 %v1326_v12  ;;  %v575_v30 = vsel %vm400_vm0, %v1131_v27, 0.0  ;;  %v1187_v31 = vunpack.c.h.bf16 %v1317_v3  ;;  %v1319_v27 = vld [vmem:[%s1462_s25 + $0x50] sm:$0xff]  }
  0x2e   : > { %v691_v19 = vadd.f32 %v690_v4, %v689_v11  ;;  %v802_v36 = vadd.f32 %v801_v22, %v800_v21  ;;  %v696_v40 = vsel %vm400_vm0, %v1183_v14, 0.0  ;;  %v1227_v41 = vunpack.c.h.bf16 %v1326_v12 }
  0x2f   : > { %v564_v48 = vadd.f32 %v563_v34, %v562_v39  ;;  %v577_v46 = vsel %vm400_vm0, %v1134_v32, 0.0  ;;  %v698_v51 = vsel %vm400_vm0, %v1186_v17, 0.0  ;;  %v1230_v52 = vunpack.c.l.bf16 %v1327_v35 }
  0x30   : > { %v693_v34 = vadd.f32 %v692_v15, %v691_v19  ;;  %v804_v8 = vadd.f32 %v803_v23, %v802_v36  ;;  %v579_v56 = vsel %vm400_vm0, %v1135_v33, 0.0  ;;  %v1191_v57 = vunpack.c.h.bf16 %v1318_v26  ;;  %v1320_v33 = vld [vmem:[%s1462_s25 + $0x58] sm:$0xff]  }
  0x31   : > { %v566_v59 = vadd.f32 %v565_v45, %v564_v48  ;;  %v805_v45 = vsel %vm400_vm0, %v1223_v16, 0.0  ;;  %v1190_v48 = vunpack.c.l.bf16 %v1318_v26  ;;  %v1231_v63 = vunpack.c.h.bf16 %v1327_v35 }
  0x32   : > { %v695_v49 = vadd.f32 %v694_v20, %v693_v34  ;;  %v806_v61 = vadd.f32 %v805_v45, %v804_v8  ;;  %v809_v0 = vsel %vm400_vm0, %v1227_v41, 0.0  ;;  %v581_v1 = vsel %vm400_vm0, %v1138_v37, 0.0  ;;  %v1330_v34 = vld [vmem:[%s1522_s28 + $0x30] sm:$0xff]  }
  0x33   : > { %v568_v2 = vadd.f32 %v567_v55, %v566_v59  ;;  %v807_v55 = vsel %vm400_vm0, %v1226_v29, 0.0  ;;  %v702_v5 = vsel %vm400_vm0, %v1190_v48, 0.0  ;;  %v1234_v6 = vunpack.c.l.bf16 %v1328_v60 }
  0x34   : > { %v697_v59 = vadd.f32 %v696_v40, %v695_v49  ;;  %v808_v18 = vadd.f32 %v807_v55, %v806_v61  ;;  %v1195_v11 = vunpack.c.h.bf16 %v1319_v27  ;;  %v704_v15 = vsel %vm400_vm0, %v1191_v57, 0.0  ;;  %v1331_v55 = vld [vmem:[%s1522_s28 + $0x38] sm:$0xff]  }
  0x35   : > { %v570_v13 = vadd.f32 %v569_v62, %v568_v2  ;;  %v700_v62 = vsel %vm400_vm0, %v1187_v31, 0.0  ;;  %v1194_v2 = vunpack.c.l.bf16 %v1319_v27  ;;  %v1235_v16 = vunpack.c.h.bf16 %v1328_v60 }
  0x36   : > { %v699_v3 = vadd.f32 %v698_v51, %v697_v59  ;;  %v810_v14 = vadd.f32 %v809_v0, %v808_v18  ;;  %v813_v17 = vsel %vm400_vm0, %v1231_v63, 0.0  ;;  %v585_v19 = vsel %vm400_vm0, %v1142_v43, 0.0 }
  0x37   : > { %v572_v25 = vadd.f32 %v571_v9, %v570_v13  ;;  %v811_v9 = vsel %vm400_vm0, %v1230_v52, 0.0  ;;  %v1329_v13 = vld [vmem:[%s1522_s28 + $0x28] sm:$0xff]   ;;  %v1198_v20 = vunpack.c.l.bf16 %v1320_v33  ;;  %v706_v26 = vsel %vm400_vm0, %v1194_v2, 0.0 }
  0x38   : > { %v701_v12 = vadd.f32 %v700_v62, %v699_v3  ;;  %v812_v24 = vadd.f32 %v811_v9, %v810_v14  ;;  %v1238_v29 = vunpack.c.l.bf16 %v1329_v13  ;;  %v815_v22 = vsel %vm400_vm0, %v1234_v6, 0.0 }
  0x39   : > { %v574_v39 = vadd.f32 %v573_v10, %v572_v25  ;;  %v583_v10 = vsel %vm400_vm0, %v1139_v42, 0.0  ;;  %v1321_v42 = vld [vmem:[%s1462_s25 + $0x60] sm:$0xff]   ;;  %v587_v23 = vsel %vm400_vm0, %v1143_v47, 0.0  ;;  %v708_v36 = vsel %vm400_vm0, %v1195_v11, 0.0  ;;  %v1322_v47 = vld [vmem:[%s1462_s25 + $0x68] sm:$0xff]  }
  0x3a   : > { %v703_v21 = vadd.f32 %v702_v5, %v701_v12  ;;  %v814_v35 = vadd.f32 %v813_v17, %v812_v24  ;;  %v817_v40 = vsel %vm400_vm0, %v1235_v16, 0.0  ;;  %v589_v41 = vsel %vm400_vm0, %v1146_v53, 0.0 }
  0x3b   : > { %v576_v50 = vadd.f32 %v575_v30, %v574_v39  ;;  %v1199_v30 = vunpack.c.h.bf16 %v1320_v33  ;;  %v1239_v39 = vunpack.c.h.bf16 %v1329_v13  ;;  %v1202_v45 = vunpack.c.l.bf16 %v1321_v42  ;;  %v1332_v33 = vld [vmem:[%s1522_s28 + $0x40] sm:$0xff]  }
  0x3c   : > { %v705_v31 = vadd.f32 %v704_v15, %v703_v21  ;;  %v816_v28 = vadd.f32 %v815_v22, %v814_v35  ;;  %v710_v49 = vsel %vm400_vm0, %v1198_v20, 0.0  ;;  %v1242_v8 = vunpack.c.l.bf16 %v1330_v34 }
  0x3d   : > { %v578_v32 = vadd.f32 %v577_v46, %v576_v50  ;;  %v819_v50 = vsel %vm400_vm0, %v1238_v29, 0.0  ;;  %v591_v27 = vsel %vm400_vm0, %v1147_v54, 0.0  ;;  %v1203_v51 = vunpack.c.h.bf16 %v1321_v42  ;;  %v1323_v54 = vld [vmem:[%s1462_s25 + $0x70] sm:$0xff]  }
  0x3e   : > { %v707_v46 = vadd.f32 %v706_v26, %v705_v31  ;;  %v712_v57 = vsel %vm400_vm0, %v1199_v30, 0.0  ;;  %v1243_v59 = vunpack.c.h.bf16 %v1330_v34  ;;  %v821_v60 = vsel %vm400_vm0, %v1239_v39, 0.0 }
  0x3f   : > { %v580_v4 = vadd.f32 %v579_v56, %v578_v32  ;;  %v818_v56 = vadd.f32 %v817_v40, %v816_v28  ;;  %v593_v61 = vsel %vm400_vm0, %v1150_v58, 0.0  ;;  %v1206_v32 = vunpack.c.l.bf16 %v1322_v47 }
  0x40   : > { %v709_v52 = vadd.f32 %v708_v36, %v707_v46  ;;  %v714_v0 = vsel %vm400_vm0, %v1202_v45, 0.0  ;;  %v823_v2 = vsel %vm400_vm0, %v1242_v8, 0.0  ;;  %v595_v3 = vsel %vm400_vm0, %v1151_v7, 0.0  ;;  %v1334_v36 = vld [vmem:[%s1522_s28 + $0x50] sm:$0xff]  }
  0x41   : > { %v582_v37 = vadd.f32 %v581_v1, %v580_v4  ;;  %v820_v38 = vadd.f32 %v819_v50, %v818_v56  ;;  %v1246_v1 = vunpack.c.l.bf16 %v1331_v55  ;;  %v1207_v18 = vunpack.c.h.bf16 %v1322_v47 }
  0x42   : > { %v711_v62 = vadd.f32 %v710_v49, %v709_v52  ;;  %v716_v6 = vsel %vm400_vm0, %v1203_v51, 0.0  ;;  %v1247_v9 = vunpack.c.h.bf16 %v1331_v55  ;;  %v1210_v11 = vunpack.c.l.bf16 %v1323_v54  ;;  %v1335_v51 = vld [vmem:[%s1522_s28 + $0x58] sm:$0xff]  }
  0x43   : > { %v584_v25 = vadd.f32 %v583_v10, %v582_v37  ;;  %v822_v58 = vadd.f32 %v821_v60, %v820_v38  ;;  %v825_v10 = vsel %vm400_vm0, %v1243_v59, 0.0  ;;  %v1324_v37 = vld [vmem:[%s1462_s25 + $0x78] sm:$0xff]   ;;  %v718_v44 = vsel %vm400_vm0, %v1206_v32, 0.0 }
  0x44   : > { %v713_v4 = vadd.f32 %v712_v57, %v711_v62  ;;  %v1250_v15 = vunpack.c.l.bf16 %v1332_v33  ;;  %v827_v7 = vsel %vm400_vm0, %v1246_v1, 0.0  ;;  %v1211_v16 = vunpack.c.h.bf16 %v1323_v54 }
  0x45   : > { %v586_v43 = vadd.f32 %v585_v19, %v584_v25  ;;  %v824_v13 = vadd.f32 %v823_v2, %v822_v58  ;;  %v1333_v19 = vld [vmem:[%s1522_s28 + $0x48] sm:$0xff]   ;;  %v720_v24 = vsel %vm400_vm0, %v1207_v18, 0.0  ;;  %v1251_v25 = vunpack.c.h.bf16 %v1332_v33 }
  0x46   : > { %v715_v12 = vadd.f32 %v714_v0, %v713_v4  ;;  %v829_v42 = vsel %vm400_vm0, %v1247_v9, 0.0  ;;  %v1214_v26 = vunpack.c.l.bf16 %v1324_v37  ;;  %v722_v30 = vsel %vm400_vm0, %v1210_v11, 0.0  ;;  %v1337_v58 = vld [vmem:[%s1522_s28 + $0x68] sm:$0xff]  }
  0x47   : > { %v588_v48 = vadd.f32 %v587_v23, %v586_v43  ;;  %v826_v20 = vadd.f32 %v825_v10, %v824_v13  ;;  %v1254_v31 = vunpack.c.l.bf16 %v1333_v19  ;;  %v831_v34 = vsel %vm400_vm0, %v1250_v15, 0.0 }
  0x48   : > { %v717_v17 = vadd.f32 %v716_v6, %v715_v12  ;;  %v1215_v35 = vunpack.c.h.bf16 %v1324_v37  ;;  %v1255_v45 = vunpack.c.h.bf16 %v1333_v19  ;;  %v833_v46 = vsel %vm400_vm0, %v1251_v25, 0.0  ;;  %v1338_v37 = vld [vmem:[%s1522_s28 + $0x70] sm:$0xff]  }
  0x49   : > { %v590_v53 = vadd.f32 %v589_v41, %v588_v48  ;;  %v828_v22 = vadd.f32 %v827_v7, %v826_v20  ;;  %v724_v41 = vsel %vm400_vm0, %v1211_v16, 0.0  ;;  %v726_v49 = vsel %vm400_vm0, %v1214_v26, 0.0 }
  0x4a   : > { %v719_v29 = vadd.f32 %v718_v44, %v717_v17  ;;  %v1258_v8 = vunpack.c.l.bf16 %v1334_v36  ;;  %v835_v50 = vsel %vm400_vm0, %v1254_v31, 0.0  ;;  %v728_v56 = vsel %vm400_vm0, %v1215_v35, 0.0 }
  0x4b   : > { %v592_v63 = vadd.f32 %v591_v27, %v590_v53  ;;  %v830_v39 = vadd.f32 %v829_v42, %v828_v22  ;;  %v1259_v53 = vunpack.c.h.bf16 %v1334_v36  ;;  %v837_v57 = vsel %vm400_vm0, %v1255_v45, 0.0 }
  0x4c   : > { %v721_v43 = vadd.f32 %v720_v24, %v719_v29  ;;  %v1262_v32 = vunpack.c.l.bf16 %v1335_v51  ;;  %v839_v62 = vsel %vm400_vm0, %v1258_v8, 0.0  ;;  %v1263_v0 = vunpack.c.h.bf16 %v1335_v51  ;;  %v1339_v24 = vld [vmem:[%s1522_s28 + $0x78] sm:$0xff]   ;;  %v1280_v51 = vld [vmem:[%s1660_s7 + $0x8] sm:$0xff]  }
  0x4d   : > { %v594_v5 = vadd.f32 %v593_v61, %v592_v63  ;;  %v832_v48 = vadd.f32 %v831_v34, %v830_v39  ;;  %v1336_v63 = vld [vmem:[%s1522_s28 + $0x60] sm:$0xff]   ;;  %v841_v1 = vsel %vm400_vm0, %v1259_v53, 0.0  ;;  %v1270_v12 = vunpack.c.l.bf16 %v1337_v58 }
  0x4e   : > { %v723_v28 = vadd.f32 %v722_v30, %v721_v43  ;;  %v1266_v18 = vunpack.c.l.bf16 %v1336_v63  ;;  %v843_v4 = vsel %vm400_vm0, %v1262_v32, 0.0  ;;  %v1267_v6 = vunpack.c.h.bf16 %v1336_v63 }
  0x4f   : > { %v596_v14 = vadd.f32 %v595_v3, %v594_v5  ;;  %v834_v52 = vadd.f32 %v833_v46, %v832_v48  ;;  %v845_v9 = vsel %vm400_vm0, %v1263_v0, 0.0  ;;  %v1271_v15 = vunpack.c.h.bf16 %v1337_v58  ;;  %v1282_v0 = vld [vmem:[%s1660_s7 + $0x18] sm:$0xff]   ;;  %v1283_v58 = vld [vmem:[%s1660_s7 + $0x20] sm:$0xff]  }
  0x50   : > { %v725_v27 = vadd.f32 %v724_v41, %v723_v28  ;;  %v847_v13 = vsel %vm400_vm0, %v1266_v18, 0.0  ;;  %v849_v7 = vsel %vm400_vm0, %v1267_v6, 0.0  ;;  %v1274_v19 = vunpack.c.l.bf16 %v1338_v37 }
  0x51   : > { %v597_v21 = vrot.slane %v596_v14, 4  ;;  %v836_v60 = vadd.f32 %v835_v50, %v834_v52  ;;  %v851_v20 = vsel %vm400_vm0, %v1270_v12, 0.0  ;;  %v1275_v42 = vunpack.c.h.bf16 %v1338_v37 }
  0x52   : > { %v727_v59 = vadd.f32 %v726_v49, %v725_v27  ;;  %v853_v26 = vsel %vm400_vm0, %v1271_v15, 0.0  ;;  %v1278_v22 = vunpack.c.l.bf16 %v1339_v24  ;;  %v1279_v31 = vunpack.c.h.bf16 %v1339_v24  ;;  %v1025_v49 = vld [vmem:[%s1660_s7] sm:$0xff]  }
  0x53   : > { %v598_v23 = vadd.f32 %v597_v21, %v596_v14  ;;  %v838_v54 = vadd.f32 %v837_v57, %v836_v60  ;;  %v857_v34 = vsel %vm400_vm0, %v1275_v42, 0.0  ;;  %v1026_v8 = vunpack.c.l.bf16 %v1025_v49  ;;  %v1281_v60 = vld [vmem:[%s1660_s7 + $0x10] sm:$0xff]  }
  0x54   : > { %v729_v38 = vadd.f32 %v728_v56, %v727_v59  ;;  %v859_v43 = vsel %vm400_vm0, %v1278_v22, 0.0  ;;  %v861_v39 = vsel %vm400_vm0, %v1279_v31, 0.0  ;;  %v1027_v50 = vunpack.c.h.bf16 %v1025_v49 }
  0x55   : > { %v599_v40 = vrot.slane %v598_v23, 2  ;;  %v840_v3 = vadd.f32 %v839_v62, %v838_v54  ;;  %v1030_v52 = vunpack.c.l.bf16 %v1280_v51  ;;  %v1031_v57 = vunpack.c.h.bf16 %v1280_v51 }
  0x56   : > { %v730_v2 = vrot.slane %v729_v38, 4  ;;  %v402_v56 = vsel %vm400_vm0, %v1027_v50, 0.0  ;;  %v1034_v32 = vunpack.c.l.bf16 %v1281_v60  ;;  %v1035_v63 = vunpack.c.h.bf16 %v1281_v60 }
  0x57   : > { %v600_v47 = vadd.f32 %v599_v40, %v598_v23  ;;  %v842_v5 = vadd.f32 %v841_v1, %v840_v3  ;;  %v855_v23 = vsel %vm400_vm0, %v1274_v19, 0.0  ;;  %v404_v59 = vsel %vm400_vm0, %v1030_v52, 0.0 }
  0x58   : > { %v731_v33 = vadd.f32 %v730_v2, %v729_v38  ;;  %v406_v62 = vsel %vm400_vm0, %v1031_v57, 0.0  ;;  %v408_v54 = vsel %vm400_vm0, %v1034_v32, 0.0  ;;  %v1038_v2 = vunpack.c.l.bf16 %v1282_v0 }
  0x59   : > { %v601_v55 = vrot.slane %v600_v47, 1  ;;  %v844_v11 = vadd.f32 %v843_v4, %v842_v5  ;;  %v410_v3 = vsel %vm400_vm0, %v1035_v63, 0.0  ;;  %v1039_v4 = vunpack.c.h.bf16 %v1282_v0 }
  0x5a   : > { %v732_v10 = vrot.slane %v731_v33, 2  ;;  %v1042_v6 = vunpack.c.l.bf16 %v1283_v58 }
  0x5b   : > { %v602_v61 = vadd.f32 %v601_v55, %v600_v47  ;;  %v846_v44 = vadd.f32 %v845_v9, %v844_v11  ;;  %v401_v55 = vsel %vm400_vm0, %v1026_v8, 0.0  ;;  %v414_v9 = vsel %vm400_vm0, %v1039_v4, 0.0 }
  0x5c   : > { %v733_v14 = vadd.f32 %v732_v10, %v731_v33  ;;  %v403_v53 = vadd.f32 %v402_v56, %v401_v55  ;;  %v412_v33 = vsel %vm400_vm0, %v1038_v2, 0.0  ;;  %v1043_v11 = vunpack.c.h.bf16 %v1283_v58 }
  0x5d   : > { %870 = vrot.lane.b32.xlu0 %v602_v61, %s1392_s29  ;;  %v848_v17 = vadd.f32 %v847_v13, %v846_v44  ;;  %v416_v12 = vsel %vm400_vm0, %v1042_v6, 0.0  ;;  %v1284_v13 = vld [vmem:[%s1660_s7 + $0x28] sm:$0xff]  }
  0x5e   : > { %v734_v16 = vrot.slane %v733_v14, 1  ;;  %v405_v61 = vadd.f32 %v404_v59, %v403_v53  ;;  %v1046_v37 = vunpack.c.l.bf16 %v1284_v13  ;;  %v418_v44 = vsel %vm400_vm0, %v1043_v11, 0.0  ;;  %v1290_v59 = vld [vmem:[%s1660_s7 + $0x58] sm:$0xff]  }
  0x5f   : > { %v850_v25 = vadd.f32 %v849_v7, %v848_v17  ;;  %v1047_v7 = vunpack.c.h.bf16 %v1284_v13  ;;  %v1285_v17 = vld [vmem:[%s1660_s7 + $0x30] sm:$0xff]  }
  0x60   : > { %v735_v21 = vadd.f32 %v734_v16, %v733_v14  ;;  %v407_v38 = vadd.f32 %v406_v62, %v405_v61  ;;  %v420_v16 = vsel %vm400_vm0, %v1046_v37, 0.0  ;;  %v1070_v61 = vunpack.c.l.bf16 %v1290_v59 }
  0x61   : > { %v852_v29 = vadd.f32 %v851_v20, %v850_v25  ;;  %v1050_v20 = vunpack.c.l.bf16 %v1285_v17  ;;  %v1051_v25 = vunpack.c.h.bf16 %v1285_v17 }
  0x62   : > { %v409_v1 = vadd.f32 %v408_v54, %v407_v38  ;;  %v1071_v38 = vunpack.c.h.bf16 %v1290_v59  ;;  %v444_v63 = vsel %vm400_vm0, %v1070_v61, 0.0  ;;  %v1291_v54 = vld [vmem:[%s1660_s7 + $0x60] sm:$0xff]  }
  0x63   : > { %v854_v30 = vadd.f32 %v853_v26, %v852_v29  ;;  %v424_v42 = vsel %vm400_vm0, %v1050_v20, 0.0  ;;  %v1286_v26 = vld [vmem:[%s1660_s7 + $0x38] sm:$0xff]  }
  0x64   : > { %v411_v18 = vadd.f32 %v410_v3, %v409_v1  ;;  %v1054_v22 = vunpack.c.l.bf16 %v1286_v26  ;;  %v1055_v31 = vunpack.c.h.bf16 %v1286_v26  ;;  %v1074_v1 = vunpack.c.l.bf16 %v1291_v54 }
  0x65   : > { %874 = vrot.lane.b32.xlu0 %v735_v21, %s1393_s30  ;;  %v856_v35 = vadd.f32 %v855_v23, %v854_v30  ;;  %v422_v21 = vsel %vm400_vm0, %v1047_v7, 0.0  ;;  %v426_v23 = vsel %vm400_vm0, %v1051_v25, 0.0  ;;  %v446_v2 = vsel %vm400_vm0, %v1071_v38, 0.0 }
  0x66   : > { %v413_v5 = vadd.f32 %v412_v33, %v411_v18  ;;  %v1075_v18 = vunpack.c.h.bf16 %v1291_v54  ;;  %v448_v4 = vsel %vm400_vm0, %v1074_v1, 0.0  ;;  %v1292_v33 = vld [vmem:[%s1660_s7 + $0x68] sm:$0xff]  }
  0x67   : > { %v858_v36 = vadd.f32 %v857_v34, %v856_v35  ;;  %v428_v34 = vsel %vm400_vm0, %v1054_v22, 0.0  ;;  %v1287_v35 = vld [vmem:[%s1660_s7 + $0x40] sm:$0xff]  }
  0x68   : > { %v415_v10 = vadd.f32 %v414_v9, %v413_v5  ;;  %v1078_v5 = vunpack.c.l.bf16 %v1292_v33  ;;  %v450_v6 = vsel %vm400_vm0, %v1075_v18, 0.0 }
  0x69   : > { %v860_v40 = vadd.f32 %v859_v43, %v858_v36  ;;  %v1058_v36 = vunpack.c.l.bf16 %v1287_v35 }
  0x6a   : > { %v417_v14 = vadd.f32 %v416_v12, %v415_v10  ;;  %v1079_v10 = vunpack.c.h.bf16 %v1292_v33  ;;  %v452_v11 = vsel %vm400_vm0, %v1078_v5, 0.0  ;;  %v1293_v12 = vld [vmem:[%s1660_s7 + $0x70] sm:$0xff]  }
  0x6b   : > { %v862_v41 = vadd.f32 %v861_v39, %v860_v40  ;;  %v430_v39 = vsel %vm400_vm0, %v1055_v31, 0.0 }
  0x6c   : > { %v419_v15 = vadd.f32 %v418_v44, %v417_v14  ;;  %v1082_v14 = vunpack.c.l.bf16 %v1293_v12  ;;  %v454_v37 = vsel %vm400_vm0, %v1079_v10, 0.0 }
  0x6d   : > { %v863_v45 = vrot.slane %v862_v41, 4 }
  0x6e   : > { %v421_v19 = vadd.f32 %v420_v16, %v419_v15  ;;  %v1083_v15 = vunpack.c.h.bf16 %v1293_v12  ;;  %v456_v7 = vsel %vm400_vm0, %v1082_v14, 0.0  ;;  %v1294_v16 = vld [vmem:[%s1660_s7 + $0x78] sm:$0xff]  }
  0x6f   : > { %v864_v46 = vadd.f32 %v863_v45, %v862_v41  ;;  %v1059_v41 = vunpack.c.h.bf16 %v1287_v35  ;;  %v432_v45 = vsel %vm400_vm0, %v1058_v36, 0.0  ;;  %v1087_v25 = vunpack.c.h.bf16 %v1294_v16 }
  0x70   : > { %v423_v24 = vadd.f32 %v422_v21, %v421_v19  ;;  %v1086_v19 = vunpack.c.l.bf16 %v1294_v16  ;;  %v458_v20 = vsel %vm400_vm0, %v1083_v15, 0.0 }
  0x71   : > { %v865_v28 = vrot.slane %v864_v46, 2 }
  0x72   : > { %v425_v29 = vadd.f32 %v424_v42, %v423_v24  ;;  %v1395_v24 = vmov 0.0   ;;  %v460_v42 = vsel %vm400_vm0, %v1086_v19, 0.0 }
  0x73   : > { %v866_v48 = vadd.f32 %v865_v28, %v864_v46  ;;  %v1288_v46 = vld [vmem:[%s1660_s7 + $0x48] sm:$0xff]   ;;  %335 = vst.msk [vmem:[%s329_s11] sm:$0x1] %vm334_vm1, %v1395_v24 }
  0x74   : > { %v427_v30 = vadd.f32 %v426_v23, %v425_v29  ;;  %v1063_v8 = vunpack.c.h.bf16 %v1288_v46  ;;  %v462_v29 = vsel %vm400_vm0, %v1087_v25, 0.0 }
  0x75   : > { %v867_v47 = vrot.slane %v866_v48, 1 }
  0x76   : > { %v429_v43 = vadd.f32 %v428_v34, %v427_v30  ;;  %v438_v55 = vsel %vm400_vm0, %v1063_v8, 0.0 }
  0x77   : > { %v868_v27 = vadd.f32 %v867_v47, %v866_v48  ;;  %v1062_v48 = vunpack.c.l.bf16 %v1288_v46  ;;  %v434_v47 = vsel %vm400_vm0, %v1059_v41, 0.0 }
  0x78   : > { %v431_v40 = vadd.f32 %v430_v39, %v429_v43 }
  0x79   : > { %878 = vrot.lane.b32.xlu1 %v868_v27, %s1394_s8  ;;  %v436_v50 = vsel %vm400_vm0, %v1062_v48, 0.0  ;;  %v1289_v27 = vld [vmem:[%s1660_s7 + $0x50] sm:$0xff]  }
  0x7a   : > { %v433_v28 = vadd.f32 %v432_v45, %v431_v40  ;;  %v1066_v52 = vunpack.c.l.bf16 %v1289_v27  ;;  %v1067_v53 = vunpack.c.h.bf16 %v1289_v27  ;;  %v886_v45 = vld [vmem:[%s329_s11] sm:$0x1] }
  0x7c   : > { %v435_v49 = vadd.f32 %v434_v47, %v433_v28  ;;  %v440_v57 = vsel %vm400_vm0, %v1066_v52, 0.0  ;;  %v442_v32 = vsel %vm400_vm0, %v1067_v53, 0.0 }
  0x7e   : > { %v437_v51 = vadd.f32 %v436_v50, %v435_v49 }
  0x80   : > { %v439_v56 = vadd.f32 %v438_v55, %v437_v51 }
  0x82   : > { %v441_v60 = vadd.f32 %v440_v57, %v439_v56 }
  0x84   : > { %v443_v62 = vadd.f32 %v442_v32, %v441_v60 }
  0x86   : > { %v445_v0 = vadd.f32 %v444_v63, %v443_v62 }
  0x88   : > { %v447_v3 = vadd.f32 %v446_v2, %v445_v0 }
  0x8a   : > { %v449_v58 = vadd.f32 %v448_v4, %v447_v3 }
  0x8c   : > { %v451_v9 = vadd.f32 %v450_v6, %v449_v58 }
  0x8e   : > { %v453_v13 = vadd.f32 %v452_v11, %v451_v9 }
  0x90   : > { %v455_v44 = vadd.f32 %v454_v37, %v453_v13 }
  0x92   : > { %v457_v17 = vadd.f32 %v456_v7, %v455_v44 }
  0x94   : > { %v459_v21 = vadd.f32 %v458_v20, %v457_v17 }
  0x96   : > { %v461_v26 = vadd.f32 %v460_v42, %v459_v21 }
  0x98   : > { %v463_v22 = vadd.f32 %v462_v29, %v461_v26 }
  0x9a   : > { %v464_v23 = vrot.slane %v463_v22, 4 }
  0x9c   : > { %v465_v30 = vadd.f32 %v464_v23, %v463_v22 }
  0x9e   : > { %v466_v31 = vrot.slane %v465_v30, 2 }
  0xa0   : > { %v467_v35 = vadd.f32 %v466_v31, %v465_v30 }
  0xa2   : > { %v468_v43 = vrot.slane %v467_v35, 1 }
  0xa4   : > { %v469_v36 = vadd.f32 %v468_v43, %v467_v35 }
  0xcf   : > { %v871_v34 = vpop.permute.xlu0 %870 }
  0xd0   : > { %v881_v40 = vsel %vm400_vm0, %v469_v36, %v871_v34 }
  0xd7   : > { %v875_v39 = vpop.permute.xlu0 %874 }
  0xd8   : > { %v883_v41 = vsel %vm882_vm2, %v881_v40, %v875_v39 }
  0xeb   : > { %v879_v46 = vpop.permute.xlu1 %878 }
  0xec   : > { %v885_v28 = vsel %vm884_vm3, %v883_v41, %v879_v46 }
  0xed   : > { %v887_v48 = vadd.f32 %v886_v45, %v885_v28 }
  0xef   : > { %889 = vst.msk [vmem:[%s329_s11] sm:$0x1] %vm334_vm1, %v887_v48 }
  0xf0 PF: > { %s14_s17 = sadd.s32 1, %s1390_s17   ;;  %s1731_s15 = smov %s1386_s16 }
  0xf1   : > { %p11_p5 = scmp.ge.s32.totalorder %s14_s17, 4   ;;  %s1732_s16 = smov %s1734_s18 }
  0xf3   :  { %13 = sbr.rel (!%p11_p5) target bundleno = 2 (0x2), region = 79 }

// kernel: inception_block.15
= control target key start
LH: loop header
LB: loop body
LE: loop exit
PB: predicated region body
PF: predicated region fallthrough
CT: control target
= control target key end

     0   :  { %10 = vsyncpa [#allocation3], 0  ;;  %s2834_s0 = inlined_call_operand.vmem [shape: f32[2,1,32], index: 0, kind: input, shape index: {}]   ;;  %s2835_s1 = inlined_call_operand.vmem [shape: bf16[2,256,8], index: 1, kind: input, shape index: {}]   ;;  %s2836_s2 = inlined_call_operand.vmem [shape: bf16[2,256,8], index: 2, kind: input, shape index: {}]   ;;  %s2837_s3 = inlined_call_operand.vmem [shape: bf16[2,256,8], index: 3, kind: input, shape index: {}]   ;;  %s2838_s4 = inlined_call_operand.vmem [shape: bf16[2,256,8], index: 4, kind: input, shape index: {}]   ;;  %s2839_s5 = inlined_call_operand.hbm [shape: f32[2,256,32], index: 5, kind: output, shape index: {}]  }
   0x1   :  { %12 = vsyncpa [#allocation3 + $0x1], 0  ;;  %s1970_s18 = smov 0   ;;  %s1972_s19 = smov 0  }
   0x2   :  { %s1974_s20 = smov 0   ;;  %s1976_s21 = smov 0  }
   0x3   :  { %s1978_s22 = smov 0   ;;  %s1980_s23 = smov 0  }
   0x4 LB: > { %s1449_s24 = sadd.s32 4294967295, %s1931_s23   ;;  %s1450_s25 = sadd.s32 4294967294, %s1931_s23   ;;  %s1931_s23 = sphi %s1980_s23, %s18_s23   ;;  %s1927_s22 = sphi %s1978_s22, %s2848_s22   ;;  %s1923_s21 = sphi %s1976_s21, %s2847_s21   ;;  %s1919_s20 = sphi %s1974_s20, %s2846_s20   ;;  %s1915_s19 = sphi %s1972_s19, %s2845_s19   ;;  %s1911_s18 = sphi %s1970_s18, %s2844_s18  }
   0x5   : > { %s30_s26 = sadd.s32 1, %s1927_s22  ;;  %s177_s27 = sadd.s32 1, %s1919_s20 }
   0x6   : > { %p32_p0 = scmp.ge.s32.totalorder %s30_s26, 2  ;;  %p187_p1 = scmp.ne.s32.totalorder %s1919_s20, %s1915_s19 }
   0x7   : > { %p188_p2 = scmp.eq.s32.totalorder %s1449_s24, 1  ;;  %p193_p3 = scmp.ne.s32.totalorder %s1915_s19, %s1911_s18 }
   0x8   : > { %s2850_s26 = smov (%p32_p0, %s30_s26), 0  ;;  %p194_p5 = scmp.eq.s32.totalorder %s1450_s25, 1 }
   0x9   : > { %p2010_p4 = por %p188_p2, %p187_p1  ;;  %s172_s29 = ssub.s32 %s1927_s22, %s2850_s26 }
   0xa   : > { %p1453_p6 = scmp.ge.s32.totalorder %s1931_s23, 1  ;;  %p175_p7 = scmp.eq.s32.totalorder %s172_s29, 0 }
   0xb   : > { %p2017_p8 = por %p194_p5, %p193_p3  ;;  %p270_p9 = scmp.lt.s32.totalorder %s1931_s23, 3 }
   0xc   : > { %s2023_s6 = scalar_select %p175_p7, %s1919_s20, %s177_s27  }
   0xd   : > { %p271_p10 = pnand %p1453_p6, %p270_p9 }
   0xf   : > { %274 = sbr.rel (%p271_p10) target bundleno = 512 (0x200), region = 40 }
  0x14   : > { %p332_p11 = scmp.lt.s32.totalorder %s1923_s21, 1  ;;  %s1933_s11 = smov 120   ;;  %vm1190_vm0 = vcmask 130048   ;;  %vm1157_vm1 = vcmask 64512   ;;  %vm1223_vm2 = vcmask 195584   ;;  %vm1256_vm3 = vcmask 261120  }
  0x15   : > { %s1934_s12 = smov 104   ;;  %s1935_s13 = smov 112  }
  0x16   : > { %s333_s7 = scalar_select %p332_p11, %s1923_s21, 1 }
  0x17   : > { %s1936_s24 = smov 8   ;;  %s1938_s16 = smov 24  }
  0x18   : > { %s2030_s10 = scalar_lea.vmem %s2834_s0, %s333_s7  ;;  %s2038_s14 = sshll.u32 %s333_s7, 7 }
  0x19   : > { %v2033_v0 = vld [vmem:[%s2030_s10] ss:$0 sm:$0xff]  ;;  %s2044_s17 = scalar_lea.vmem %s2836_s2, %s2038_s14  ;;  %s2140_s29 = scalar_lea.vmem %s2837_s3, %s2038_s14 }
  0x1a   : > { %540 = vrot.lane.b32.xlu0 %v2033_v0, %s1933_s11  ;;  %738 = vrot.lane.b32.xlu1 %v2033_v0, %s1934_s12  ;;  %v1744_v1 = vld [vmem:[%s2044_s17 + $0x8] sm:$0xff]   ;;  %v1538_v2 = vld [vmem:[%s2044_s17] sm:$0xff]   ;;  %s1937_s7 = smov 16   ;;  %s2197_s11 = scalar_lea.vmem %s2838_s4, %s2038_s14 }
  0x1b   : > { %v1544_v3 = vunpack.c.h.bf16 %v1744_v1  ;;  %v1539_v4 = vunpack.c.l.bf16 %v1538_v2  ;;  %v1540_v5 = vunpack.c.h.bf16 %v1538_v2  ;;  %v1756_v7 = vld [vmem:[%s2044_s17 + $0x68] sm:$0xff]   ;;  %v1758_v11 = vld [vmem:[%s2044_s17 + $0x78] sm:$0xff]   ;;  %v1757_v12 = vld [vmem:[%s2044_s17 + $0x70] sm:$0xff]   ;;  %v1543_v21 = vunpack.c.l.bf16 %v1744_v1  ;;  %s2346_s15 = scalar_lea.vmem %s2835_s1, %s2038_s14  ;;  %s1472_s25 = sshll.u32 %s1923_s21, 8 }
  0x1c   : > { %v1746_v13 = vld [vmem:[%s2044_s17 + $0x18] sm:$0xff]   ;;  %v1745_v14 = vld [vmem:[%s2044_s17 + $0x10] sm:$0xff]   ;;  %v1592_v15 = vunpack.c.h.bf16 %v1756_v7  ;;  %v1599_v16 = vunpack.c.l.bf16 %v1758_v11  ;;  %v1591_v17 = vunpack.c.l.bf16 %v1756_v7  ;;  %v1595_v18 = vunpack.c.l.bf16 %v1757_v12  ;;  %v1747_v33 = vld [vmem:[%s2044_s17 + $0x20] sm:$0xff]  }
  0x1d   : > { %v1596_v19 = vunpack.c.h.bf16 %v1757_v12  ;;  %v1551_v20 = vunpack.c.l.bf16 %v1746_v13  ;;  %v1600_v22 = vunpack.c.h.bf16 %v1758_v11  ;;  %v1547_v23 = vunpack.c.l.bf16 %v1745_v14  ;;  %v1749_v40 = vld [vmem:[%s2044_s17 + $0x30] sm:$0xff]   ;;  %v1748_v41 = vld [vmem:[%s2044_s17 + $0x28] sm:$0xff]   ;;  %v1750_v48 = vld [vmem:[%s2044_s17 + $0x38] sm:$0xff]  }
  0x1e   : > { %v1556_v34 = vunpack.c.h.bf16 %v1747_v33  ;;  %v1548_v35 = vunpack.c.h.bf16 %v1745_v14  ;;  %v1552_v36 = vunpack.c.h.bf16 %v1746_v13  ;;  %v1563_v42 = vunpack.c.l.bf16 %v1749_v40  ;;  %v1752_v55 = vld [vmem:[%s2044_s17 + $0x48] sm:$0xff]   ;;  %v1751_v56 = vld [vmem:[%s2044_s17 + $0x40] sm:$0xff]   ;;  %v1753_v63 = vld [vmem:[%s2044_s17 + $0x50] sm:$0xff]  }
  0x1f   : > { %v1555_v43 = vunpack.c.l.bf16 %v1747_v33  ;;  %v1559_v44 = vunpack.c.l.bf16 %v1748_v41  ;;  %v1568_v49 = vunpack.c.h.bf16 %v1750_v48  ;;  %v1560_v50 = vunpack.c.h.bf16 %v1748_v41 }
  0x20   : > { %v1564_v51 = vunpack.c.h.bf16 %v1749_v40  ;;  %v1575_v57 = vunpack.c.l.bf16 %v1752_v55  ;;  %v1567_v58 = vunpack.c.l.bf16 %v1750_v48  ;;  %v1571_v59 = vunpack.c.l.bf16 %v1751_v56 }
  0x21   : > { %v1580_v1 = vunpack.c.h.bf16 %v1753_v63  ;;  %v1572_v2 = vunpack.c.h.bf16 %v1751_v56  ;;  %v1579_v11 = vunpack.c.l.bf16 %v1753_v63  ;;  %v1785_v56 = vld [vmem:[%s2197_s11 + $0x60] sm:$0xff]   ;;  %v1787_v63 = vld [vmem:[%s2197_s11 + $0x70] sm:$0xff]  }
  0x22   : > { %639 = vrot.lane.b32.xlu0 %v2033_v0, %s1935_s13 }
  0x8c   : > { %v2048_v6 = vpop.permute.xlu0 %540 }
  0x8d   : > { %v546_v8 = vmul.f32 %v1544_v3, %v2048_v6  ;;  %v544_v9 = vmul.f32 %v1540_v5, %v2048_v6  ;;  %v543_v10 = vmul.f32 %v1539_v4, %v2048_v6  ;;  %v2062_v24 = vmul.f32 %v1592_v15, %v2048_v6 }
  0x8e   : > { %v2065_v25 = vmul.f32 %v1599_v16, %v2048_v6  ;;  %v2068_v26 = vmul.f32 %v1591_v17, %v2048_v6  ;;  %v2071_v27 = vmul.f32 %v1595_v18, %v2048_v6  ;;  %v2074_v28 = vmul.f32 %v1596_v19, %v2048_v6 }
  0x8f   : > { %811 = vrot.lane.b32.xlu0 %v546_v8, %s1936_s24  ;;  %807 = vrot.lane.b32.xlu2 %v544_v9, %s1936_s24  ;;  %v549_v29 = vmul.f32 %v1551_v20, %v2048_v6  ;;  %v545_v30 = vmul.f32 %v1543_v21, %v2048_v6  ;;  %v2079_v31 = vmul.f32 %v1600_v22, %v2048_v6  ;;  %v1576_v3 = vunpack.c.h.bf16 %v1752_v55  ;;  %v1755_v8 = vld [vmem:[%s2044_s17 + $0x60] sm:$0xff]   ;;  %v1754_v9 = vld [vmem:[%s2044_s17 + $0x58] sm:$0xff]  }
  0x90   : > { %805 = vrot.lane.b32.xlu1 %v543_v10, %s1936_s24  ;;  %v547_v32 = vmul.f32 %v1547_v23, %v2048_v6  ;;  %v552_v37 = vmul.f32 %v1556_v34, %v2048_v6  ;;  %v548_v38 = vmul.f32 %v1548_v35, %v2048_v6  ;;  %v550_v39 = vmul.f32 %v1552_v36, %v2048_v6  ;;  %v1770_v20 = vld [vmem:[%s2140_s29 + $0x60] sm:$0xff]   ;;  %v1771_v21 = vld [vmem:[%s2140_s29 + $0x68] sm:$0xff]  }
  0x91   : > { %v555_v45 = vmul.f32 %v1563_v42, %v2048_v6  ;;  %v551_v46 = vmul.f32 %v1555_v43, %v2048_v6  ;;  %v553_v47 = vmul.f32 %v1559_v44, %v2048_v6  ;;  %v558_v52 = vmul.f32 %v1568_v49, %v2048_v6  ;;  %v1602_v22 = vld [vmem:[%s2140_s29] sm:$0xff]  }
  0x92   : > { %v554_v53 = vmul.f32 %v1560_v50, %v2048_v6  ;;  %v556_v54 = vmul.f32 %v1564_v51, %v2048_v6  ;;  %v561_v60 = vmul.f32 %v1575_v57, %v2048_v6  ;;  %v557_v61 = vmul.f32 %v1567_v58, %v2048_v6  ;;  %v1786_v57 = vld [vmem:[%s2197_s11 + $0x68] sm:$0xff]   ;;  %v2204_v58 = vpop.permute.xlu1 %738 }
  0x93   : > { %v559_v62 = vmul.f32 %v1571_v59, %v2048_v6  ;;  %v564_v4 = vmul.f32 %v1580_v1, %v2048_v6  ;;  %v560_v5 = vmul.f32 %v1572_v2, %v2048_v6  ;;  %v562_v7 = vmul.f32 %v1576_v3, %v2048_v6  ;;  %v1788_v3 = vld [vmem:[%s2197_s11 + $0x78] sm:$0xff]  }
  0x94   : > { %v1587_v10 = vunpack.c.l.bf16 %v1755_v8  ;;  %v1583_v12 = vunpack.c.l.bf16 %v1754_v9  ;;  %v563_v14 = vmul.f32 %v1579_v11, %v2048_v6  ;;  %v1584_v16 = vunpack.c.h.bf16 %v1754_v9 }
  0x95   : > { %v1588_v17 = vunpack.c.h.bf16 %v1755_v8  ;;  %v1652_v23 = vunpack.c.h.bf16 %v1770_v20  ;;  %v1604_v33 = vunpack.c.h.bf16 %v1602_v22  ;;  %v1651_v35 = vunpack.c.l.bf16 %v1770_v20 }
  0x96   : > { %v567_v13 = vmul.f32 %v1587_v10, %v2048_v6  ;;  %v565_v15 = vmul.f32 %v1583_v12, %v2048_v6  ;;  %v566_v18 = vmul.f32 %v1584_v16, %v2048_v6  ;;  %v1656_v41 = vunpack.c.h.bf16 %v1771_v21 }
  0x97   : > { %817 = vrot.lane.b32.xlu0 %v549_v29, %s1936_s24  ;;  %809 = vrot.lane.b32.xlu2 %v545_v30, %s1936_s24  ;;  %v568_v19 = vmul.f32 %v1588_v17, %v2048_v6  ;;  %v1772_v6 = vld [vmem:[%s2140_s29 + $0x70] sm:$0xff]   ;;  %v2147_v29 = vpop.permute.xlu0 %639  ;;  %v1655_v30 = vunpack.c.l.bf16 %v1771_v21  ;;  %v1603_v48 = vunpack.c.l.bf16 %v1602_v22  ;;  %v1719_v2 = vunpack.c.l.bf16 %v1786_v57 }
  0x98   : > { %813 = vrot.lane.b32.xlu1 %v547_v32, %s1936_s24  ;;  %v1659_v32 = vunpack.c.l.bf16 %v1772_v6  ;;  %v2150_v34 = vmul.f32 %v1652_v23, %v2147_v29  ;;  %v2165_v40 = vmul.f32 %v1651_v35, %v2147_v29  ;;  %v2174_v43 = vmul.f32 %v1656_v41, %v2147_v29 }
  0x99   : > { %v2157_v36 = vmul.f32 %v1655_v30, %v2147_v29  ;;  %v642_v51 = vmul.f32 %v1603_v48, %v2147_v29  ;;  %v2220_v9 = vmul.f32 %v1719_v2, %v2204_v58  ;;  %v1724_v10 = vunpack.c.h.bf16 %v1787_v63  ;;  %v1764_v30 = vld [vmem:[%s2140_s29 + $0x30] sm:$0xff]  }
  0x9a   : > { %v1716_v11 = vunpack.c.h.bf16 %v1785_v56  ;;  %v1723_v16 = vunpack.c.l.bf16 %v1787_v63  ;;  %v1628_v35 = vunpack.c.h.bf16 %v1764_v30 }
  0x9c   : > { %v2237_v21 = vmul.f32 %v1723_v16, %v2204_v58  ;;  %v655_v41 = vmul.f32 %v1628_v35, %v2147_v29 }
  0x9f   : > { %823 = vrot.lane.b32.xlu0 %v552_v37, %s1936_s24  ;;  %815 = vrot.lane.b32.xlu2 %v548_v38, %s1936_s24  ;;  %v2160_v37 = vmul.f32 %v1659_v32, %v2147_v29  ;;  %v1660_v38 = vunpack.c.h.bf16 %v1772_v6  ;;  %v1728_v6 = vunpack.c.h.bf16 %v1788_v3 }
  0xa0   : > { %819 = vrot.lane.b32.xlu1 %v550_v39, %s1936_s24 }
  0xa1   : > { %v2168_v42 = vmul.f32 %v1660_v38, %v2147_v29  ;;  %v2244_v32 = vmul.f32 %v1728_v6, %v2204_v58 }
  0xa7   : > { %829 = vrot.lane.b32.xlu0 %v555_v45, %s1936_s24  ;;  %821 = vrot.lane.b32.xlu2 %v551_v46, %s1936_s24  ;;  %v1760_v45 = vld [vmem:[%s2140_s29 + $0x10] sm:$0xff]   ;;  %v1759_v46 = vld [vmem:[%s2140_s29 + $0x8] sm:$0xff]  }
  0xa8   : > { %825 = vrot.lane.b32.xlu1 %v553_v47, %s1936_s24  ;;  %v1611_v47 = vunpack.c.l.bf16 %v1760_v45  ;;  %v1607_v49 = vunpack.c.l.bf16 %v1759_v46  ;;  %v1612_v55 = vunpack.c.h.bf16 %v1760_v45  ;;  %v1766_v45 = vld [vmem:[%s2140_s29 + $0x40] sm:$0xff]  }
  0xaa   : > { %v646_v50 = vmul.f32 %v1611_v47, %v2147_v29  ;;  %v647_v1 = vmul.f32 %v1612_v55, %v2147_v29  ;;  %v1767_v55 = vld [vmem:[%s2140_s29 + $0x48] sm:$0xff]  }
  0xaf   : > { %835 = vrot.lane.b32.xlu0 %v558_v52, %s1936_s24  ;;  %827 = vrot.lane.b32.xlu2 %v554_v53, %s1936_s24  ;;  %v644_v52 = vmul.f32 %v1607_v49, %v2147_v29  ;;  %v1761_v53 = vld [vmem:[%s2140_s29 + $0x18] sm:$0xff]   ;;  %v1635_v49 = vunpack.c.l.bf16 %v1766_v45 }
  0xb0   : > { %831 = vrot.lane.b32.xlu1 %v556_v54, %s1936_s24  ;;  %v1608_v54 = vunpack.c.h.bf16 %v1759_v46  ;;  %v1765_v46 = vld [vmem:[%s2140_s29 + $0x38] sm:$0xff]  }
  0xb7   : > { %841 = vrot.lane.b32.xlu0 %v561_v60, %s1936_s24  ;;  %833 = vrot.lane.b32.xlu2 %v557_v61, %s1936_s24  ;;  %v645_v60 = vmul.f32 %v1608_v54, %v2147_v29  ;;  %v1763_v61 = vld [vmem:[%s2140_s29 + $0x28] sm:$0xff]  }
  0xb8   : > { %837 = vrot.lane.b32.xlu1 %v559_v62, %s1936_s24  ;;  %v1715_v62 = vunpack.c.l.bf16 %v1785_v56  ;;  %v1623_v8 = vunpack.c.l.bf16 %v1763_v61 }
  0xba   : > { %v652_v22 = vmul.f32 %v1623_v8, %v2147_v29 }
  0xbf   : > { %847 = vrot.lane.b32.xlu0 %v564_v4, %s1936_s24  ;;  %839 = vrot.lane.b32.xlu2 %v560_v5, %s1936_s24  ;;  %v1762_v4 = vld [vmem:[%s2140_s29 + $0x20] sm:$0xff]   ;;  %v2216_v5 = vmul.f32 %v1715_v62, %v2204_v58  ;;  %v1636_v62 = vunpack.c.h.bf16 %v1766_v45 }
  0xc0   : > { %843 = vrot.lane.b32.xlu1 %v562_v7, %s1936_s24  ;;  %v1720_v7 = vunpack.c.h.bf16 %v1786_v57  ;;  %v1619_v17 = vunpack.c.l.bf16 %v1762_v4  ;;  %v1620_v38 = vunpack.c.h.bf16 %v1762_v4  ;;  %v1768_v4 = vld [vmem:[%s2140_s29 + $0x50] sm:$0xff]  }
  0xc1   : > { %v659_v2 = vmul.f32 %v1636_v62, %v2147_v29 }
  0xc7   : > { %853 = vrot.lane.b32.xlu0 %v567_v13, %s1936_s24  ;;  %845 = vrot.lane.b32.xlu2 %v563_v14, %s1936_s24  ;;  %v1615_v13 = vunpack.c.l.bf16 %v1761_v53  ;;  %v2225_v14 = vmul.f32 %v1720_v7, %v2204_v58 }
  0xc8   : > { %849 = vrot.lane.b32.xlu1 %v565_v15, %s1936_s24  ;;  %v1727_v15 = vunpack.c.l.bf16 %v1788_v3  ;;  %v1769_v3 = vld [vmem:[%s2140_s29 + $0x58] sm:$0xff]  }
  0xc9   : > { %v648_v23 = vmul.f32 %v1615_v13, %v2147_v29  ;;  %v1648_v35 = vunpack.c.h.bf16 %v1769_v3 }
  0xca   : > { %v2234_v20 = vmul.f32 %v1727_v15, %v2204_v58  ;;  %v1643_v15 = vunpack.c.l.bf16 %v1768_v4 }
  0xcc   : > { %v662_v6 = vmul.f32 %v1643_v15, %v2147_v29 }
  0xcf   : > { %859 = vrot.lane.b32.xlu0 %v2062_v24, %s1936_s24  ;;  %851 = vrot.lane.b32.xlu2 %v566_v18, %s1936_s24  ;;  %v1773_v24 = vld [vmem:[%s2140_s29 + $0x78] sm:$0xff]   ;;  %v2228_v18 = vmul.f32 %v1724_v10, %v2204_v58  ;;  %v1647_v10 = vunpack.c.l.bf16 %v1769_v3 }
  0xd0   : > { %855 = vrot.lane.b32.xlu1 %v568_v19, %s1936_s24  ;;  %v1664_v39 = vunpack.c.h.bf16 %v1773_v24  ;;  %v2231_v19 = vmul.f32 %v1716_v11, %v2204_v58  ;;  %v1639_v11 = vunpack.c.l.bf16 %v1767_v55 }
  0xd1   : > { %v664_v16 = vmul.f32 %v1647_v10, %v2147_v29  ;;  %v1776_v10 = vld [vmem:[%s2197_s11 + $0x18] sm:$0xff]  }
  0xd7   : > { %865 = vrot.lane.b32.xlu0 %v2065_v25, %s1936_s24  ;;  %857 = vrot.lane.b32.xlu2 %v2068_v26, %s1936_s24  ;;  %v1663_v25 = vunpack.c.l.bf16 %v1773_v24  ;;  %v2171_v26 = vmul.f32 %v1664_v39, %v2147_v29  ;;  %v650_v24 = vmul.f32 %v1619_v17, %v2147_v29  ;;  %v1624_v39 = vunpack.c.h.bf16 %v1763_v61 }
  0xd8   : > { %861 = vrot.lane.b32.xlu1 %v2071_v27, %s1936_s24  ;;  %v643_v27 = vmul.f32 %v1604_v33, %v2147_v29  ;;  %v660_v17 = vmul.f32 %v1639_v11, %v2147_v29  ;;  %v1729_v11 = vld [vmem:[%s2346_s15 + $0x8] sm:$0xff]  }
  0xd9   : > { %v2177_v44 = vmul.f32 %v1663_v25, %v2147_v29  ;;  %v651_v25 = vmul.f32 %v1620_v38, %v2147_v29 }
  0xdf   : > { %863 = vrot.lane.b32.xlu2 %v2074_v28, %s1936_s24  ;;  %935 = vrot.lane.b32.xlu0 %v643_v27, %s1937_s7  ;;  %v653_v27 = vmul.f32 %v1624_v39, %v2147_v29  ;;  %v665_v39 = vmul.f32 %v1648_v35, %v2147_v29 }
  0xe0   : > { %867 = vrot.lane.b32.xlu1 %v2079_v31, %s1936_s24  ;;  %v1616_v31 = vunpack.c.h.bf16 %v1761_v53  ;;  %v658_v53 = vmul.f32 %v1635_v49, %v2147_v29 }
  0xe2   : > { %v649_v59 = vmul.f32 %v1616_v31, %v2147_v29 }
  0xe7   : > { %941 = vrot.lane.b32.xlu0 %v646_v50, %s1937_s7  ;;  %933 = vrot.lane.b32.xlu2 %v642_v51, %s1937_s7  ;;  %v1627_v50 = vunpack.c.l.bf16 %v1764_v30 }
  0xe8   : > { %937 = vrot.lane.b32.xlu1 %v644_v52, %s1937_s7  ;;  %v1631_v52 = vunpack.c.l.bf16 %v1765_v46 }
  0xe9   : > { %v2200_v28 = vpop.permute.xlu2 %807  ;;  %v654_v31 = vmul.f32 %v1627_v50, %v2147_v29 }
  0xea   : > { %v656_v54 = vmul.f32 %v1631_v52, %v2147_v29 }
  0xef   : > { %947 = vrot.lane.b32.xlu0 %v649_v59, %s1937_s7  ;;  %939 = vrot.lane.b32.xlu2 %v645_v60, %s1937_s7  ;;  %v1640_v59 = vunpack.c.h.bf16 %v1767_v55  ;;  %v1632_v60 = vunpack.c.h.bf16 %v1765_v46  ;;  %v1774_v46 = vld [vmem:[%s2197_s11 + $0x8] sm:$0xff]  }
  0xf0   : > { %943 = vrot.lane.b32.xlu1 %v647_v1, %s1937_s7  ;;  %v1671_v49 = vunpack.c.l.bf16 %v1774_v46 }
  0xf1   : > { %v2222_v12 = vpop.permute.xlu2 %809  ;;  %v661_v63 = vmul.f32 %v1640_v59, %v2147_v29  ;;  %v657_v1 = vmul.f32 %v1632_v60, %v2147_v29 }
  0xf7   : > { %953 = vrot.lane.b32.xlu0 %v652_v22, %s1937_s7  ;;  %945 = vrot.lane.b32.xlu2 %v648_v23, %s1937_s7 }
  0xf8   : > { %949 = vrot.lane.b32.xlu1 %v650_v24, %s1937_s7  ;;  %v1644_v24 = vunpack.c.h.bf16 %v1768_v4  ;;  %v1777_v4 = vld [vmem:[%s2197_s11 + $0x20] sm:$0xff]  }
  0xf9   : > { %v2249_v33 = vpop.permute.xlu2 %815 }
  0xfa   : > { %v663_v38 = vmul.f32 %v1644_v24, %v2147_v29  ;;  %v1683_v24 = vunpack.c.l.bf16 %v1777_v4 }
  0xff   : > { %959 = vrot.lane.b32.xlu0 %v655_v41, %s1937_s7  ;;  %951 = vrot.lane.b32.xlu2 %v651_v25, %s1937_s7 }
 0x100   : > { %955 = vrot.lane.b32.xlu1 %v653_v27, %s1937_s7 }
 0x101   : > { %v2259_v47 = vpop.permute.xlu2 %821  ;;  %v2261_v48 = vpop.permute.xlu0 %811 }
 0x102   : > { %v2263_v51 = vpop.permute.xlu1 %805 }
 0x107   : > { %965 = vrot.lane.b32.xlu0 %v658_v53, %s1937_s7  ;;  %957 = vrot.lane.b32.xlu2 %v654_v31, %s1937_s7  ;;  %v1775_v53 = vld [vmem:[%s2197_s11 + $0x10] sm:$0xff]  }
 0x108   : > { %961 = vrot.lane.b32.xlu1 %v656_v54, %s1937_s7  ;;  %v1676_v59 = vunpack.c.h.bf16 %v1775_v53  ;;  %v1675_v35 = vunpack.c.l.bf16 %v1775_v53 }
 0x109   : > { %v2272_v56 = vpop.permute.xlu2 %827  ;;  %v2274_v57 = vpop.permute.xlu0 %817 }
 0x10a   : > { %v2276_v61 = vpop.permute.xlu1 %813 }
 0x10f   : > { %971 = vrot.lane.b32.xlu0 %v661_v63, %s1937_s7  ;;  %963 = vrot.lane.b32.xlu2 %v657_v1, %s1937_s7  ;;  %v1672_v63 = vunpack.c.h.bf16 %v1774_v46  ;;  %v1679_v46 = vunpack.c.l.bf16 %v1776_v10 }
 0x110   : > { %967 = vrot.lane.b32.xlu1 %v659_v2, %s1937_s7  ;;  %v746_v2 = vmul.f32 %v1676_v59, %v2204_v58 }
 0x111   : > { %v2286_v7 = vpop.permute.xlu2 %833  ;;  %v2288_v8 = vpop.permute.xlu0 %823  ;;  %v744_v3 = vmul.f32 %v1672_v63, %v2204_v58 }
 0x112   : > { %v2290_v13 = vpop.permute.xlu1 %819 }
 0x117   : > { %977 = vrot.lane.b32.xlu0 %v664_v16, %s1937_s7  ;;  %969 = vrot.lane.b32.xlu2 %v660_v17, %s1937_s7  ;;  %v1480_v16 = vunpack.c.h.bf16 %v1729_v11 }
 0x118   : > { %973 = vrot.lane.b32.xlu1 %v662_v6, %s1937_s7 }
 0x119   : > { %v2298_v22 = vpop.permute.xlu2 %839  ;;  %v2300_v23 = vpop.permute.xlu0 %829 }
 0x11a   : > { %v2302_v30 = vpop.permute.xlu1 %825 }
 0x11f   : > { %983 = vrot.lane.b32.xlu0 %v2150_v34, %s1937_s7  ;;  %975 = vrot.lane.b32.xlu2 %v663_v38, %s1937_s7 }
 0x120   : > { %979 = vrot.lane.b32.xlu1 %v665_v39, %s1937_s7 }
 0x121   : > { %v2310_v41 = vpop.permute.xlu2 %845  ;;  %v2312_v25 = vpop.permute.xlu0 %835 }
 0x122   : > { %v2314_v27 = vpop.permute.xlu1 %831 }
 0x127   : > { %989 = vrot.lane.b32.xlu0 %v2160_v37, %s1937_s7  ;;  %981 = vrot.lane.b32.xlu2 %v2165_v40, %s1937_s7  ;;  %v1666_v37 = vld [vmem:[%s2197_s11] sm:$0xff]  }
 0x128   : > { %985 = vrot.lane.b32.xlu1 %v2157_v36, %s1937_s7  ;;  %v1667_v52 = vunpack.c.l.bf16 %v1666_v37  ;;  %v1668_v60 = vunpack.c.h.bf16 %v1666_v37  ;;  %v447_v37 = vmul.f32 %v2033_v0, %v1480_v16 }
 0x129   : > { %v2322_v29 = vpop.permute.xlu2 %851  ;;  %v2324_v34 = vpop.permute.xlu0 %841 }
 0x12a   : > { %v2326_v45 = vpop.permute.xlu1 %837 }
 0x12f   : > { %995 = vrot.lane.b32.xlu0 %v2171_v26, %s1937_s7  ;;  %987 = vrot.lane.b32.xlu2 %v2174_v43, %s1937_s7  ;;  %v743_v26 = vmul.f32 %v1671_v49, %v2204_v58  ;;  %v741_v43 = vmul.f32 %v1667_v52, %v2204_v58  ;;  %v749_v49 = vmul.f32 %v1683_v24, %v2204_v58  ;;  %v1780_v24 = vld [vmem:[%s2197_s11 + $0x38] sm:$0xff]  }
 0x130   : > { %991 = vrot.lane.b32.xlu1 %v2168_v42, %s1937_s7  ;;  %v1474_v42 = vld [vmem:[%s2346_s15] sm:$0xff]   ;;  %v745_v52 = vmul.f32 %v1675_v35, %v2204_v58 }
 0x131   : > { %v2336_v40 = vpop.permute.xlu2 %857  ;;  %v2338_v36 = vpop.permute.xlu0 %847  ;;  %v1475_v31 = vunpack.c.l.bf16 %v1474_v42  ;;  %v1476_v53 = vunpack.c.h.bf16 %v1474_v42  ;;  %v1684_v42 = vunpack.c.h.bf16 %v1777_v4  ;;  %v1695_v4 = vunpack.c.l.bf16 %v1780_v24 }
 0x132   : > { %v2340_v50 = vpop.permute.xlu1 %843 }
 0x133   : > { %v444_v1 = vmul.f32 %v2033_v0, %v1475_v31  ;;  %v1161_v31 = vsel %vm1157_vm1, %v447_v37, %v2261_v48  ;;  %v750_v35 = vmul.f32 %v1684_v42, %v2204_v58  ;;  %v2413_v37 = vld [vmem:[%s2346_s15 + $0x20] sm:$0xff]  }
 0x135   : > { %v1158_v15 = vsel %vm1157_vm1, %v444_v1, %v2263_v51  ;;  %v747_v51 = vmul.f32 %v1679_v46, %v2204_v58  ;;  %v1730_v46 = vld [vmem:[%s2346_s15 + $0x10] sm:$0xff]  }
 0x137   : > { %1065 = vrot.lane.b32.xlu0 %v743_v26, %s1938_s16  ;;  %993 = vrot.lane.b32.xlu2 %v2177_v44, %s1937_s7  ;;  %v742_v44 = vmul.f32 %v1668_v60, %v2204_v58  ;;  %v2385_v26 = vld [vmem:[%s2346_s15 + $0x18] sm:$0xff]   ;;  %s1303_s7 = scalar_lea.hbm %s2839_s5, %s1472_s25 }
 0x138   : > { %1061 = vrot.lane.b32.xlu1 %v741_v43, %s1938_s16  ;;  %v1778_v43 = vld [vmem:[%s2197_s11 + $0x28] sm:$0xff]   ;;  %v1487_v59 = vunpack.c.l.bf16 %v2385_v26  ;;  %s1306_s9 = sshll.u32 %s1303_s7, 4  ;;  %s1307_s9 = int_to_ptr.hbm [resolvable:$true] %s1306_s9 }
 0x139   : > { %v2356_v54 = vpop.permute.xlu2 %863  ;;  %v2358_v55 = vpop.permute.xlu0 %853  ;;  %v1688_v1 = vunpack.c.h.bf16 %v1778_v43 }
 0x13a   : > { %v2360_v62 = vpop.permute.xlu1 %849  ;;  %v450_v48 = vmul.f32 %v2033_v0, %v1487_v59 }
 0x13b   : > { %v752_v16 = vmul.f32 %v1688_v1, %v2204_v58  ;;  %v1479_v1 = vunpack.c.l.bf16 %v1729_v11 }
 0x13d   : > { %v446_v11 = vmul.f32 %v2033_v0, %v1479_v1 }
 0x13f   : > { %1071 = vrot.lane.b32.xlu0 %v746_v2, %s1938_s16  ;;  %1063 = vrot.lane.b32.xlu2 %v742_v44, %s1938_s16  ;;  %v1680_v2 = vunpack.c.h.bf16 %v1776_v10  ;;  %v1779_v10 = vld [vmem:[%s2197_s11 + $0x30] sm:$0xff]  }
 0x140   : > { %1067 = vrot.lane.b32.xlu1 %v744_v3, %s1938_s16 }
 0x141   : > { %v934_v17 = vpop.permute.xlu2 %933  ;;  %v2374_v6 = vpop.permute.xlu0 %859 }
 0x142   : > { %v2376_v38 = vpop.permute.xlu1 %855  ;;  %v2379_v39 = vsel %vm1190_vm0, %v1158_v15, %v934_v17  ;;  %v445_v15 = vmul.f32 %v2033_v0, %v1476_v53  ;;  %v748_v17 = vmul.f32 %v1680_v2, %v2204_v58  ;;  %v1164_v53 = vsel %vm1157_vm1, %v450_v48, %v2274_v57 }
 0x143   : > { %v755_v57 = vmul.f32 %v1695_v4, %v2204_v58 }
 0x147   : > { %1077 = vrot.lane.b32.xlu0 %v749_v49, %s1938_s16  ;;  %1069 = vrot.lane.b32.xlu2 %v745_v52, %s1938_s16  ;;  %v1687_v49 = vunpack.c.l.bf16 %v1778_v43  ;;  %v1159_v52 = vsel %vm1157_vm1, %v445_v15, %v2200_v28 }
 0x148   : > { %1073 = vrot.lane.b32.xlu1 %v747_v51, %s1938_s16  ;;  %v1483_v51 = vunpack.c.l.bf16 %v1730_v46 }
 0x149   : > { %v940_v60 = vpop.permute.xlu2 %939  ;;  %v2395_v63 = vpop.permute.xlu0 %865  ;;  %v751_v48 = vmul.f32 %v1687_v49, %v2204_v58  ;;  %v1488_v49 = vunpack.c.h.bf16 %v2385_v26  ;;  %v1696_v26 = vunpack.c.h.bf16 %v1780_v24  ;;  %v1782_v24 = vld [vmem:[%s2197_s11 + $0x48] sm:$0xff]  }
 0x14a   : > { %v2397_v44 = vpop.permute.xlu1 %861  ;;  %v2400_v3 = vsel %vm1190_vm0, %v1161_v31, %v940_v60  ;;  %v1492_v31 = vunpack.c.h.bf16 %v2413_v37  ;;  %v448_v28 = vmul.f32 %v2033_v0, %v1483_v51 }
 0x14c   : > { %v453_v15 = vmul.f32 %v2033_v0, %v1492_v31  ;;  %v1692_v31 = vunpack.c.h.bf16 %v1779_v10  ;;  %v1162_v4 = vsel %vm1157_vm1, %v448_v28, %v2276_v61  ;;  %v451_v28 = vmul.f32 %v2033_v0, %v1488_v49  ;;  %v2472_v49 = vld [vmem:[%s2346_s15 + $0x38] sm:$0xff]  }
 0x14f   : > { %1083 = vrot.lane.b32.xlu0 %v752_v16, %s1938_s16  ;;  %1075 = vrot.lane.b32.xlu2 %v748_v17, %s1938_s16  ;;  %v1691_v16 = vunpack.c.l.bf16 %v1779_v10  ;;  %v1781_v17 = vld [vmem:[%s2197_s11 + $0x40] sm:$0xff]  }
 0x150   : > { %1079 = vrot.lane.b32.xlu1 %v750_v35, %s1938_s16  ;;  %v2436_v35 = vld [vmem:[%s2346_s15 + $0x30] sm:$0xff]   ;;  %v1700_v51 = vunpack.c.h.bf16 %v1781_v17 }
 0x151   : > { %v946_v59 = vpop.permute.xlu2 %945  ;;  %v936_v60 = vpop.permute.xlu0 %935 }
 0x152   : > { %v2421_v2 = vpop.permute.xlu1 %867  ;;  %v2424_v42 = vsel %vm1190_vm0, %v1164_v53, %v946_v59  ;;  %v2427_v43 = vsel %vm1190_vm0, %v1159_v52, %v936_v60  ;;  %v753_v53 = vmul.f32 %v1691_v16, %v2204_v58  ;;  %v1484_v52 = vunpack.c.h.bf16 %v1730_v46 }
 0x153   : > { %v1167_v59 = vsel %vm1157_vm1, %v453_v15, %v2288_v8  ;;  %v1499_v60 = vunpack.c.l.bf16 %v2436_v35  ;;  %v1160_v46 = vsel %vm1157_vm1, %v446_v11, %v2222_v12  ;;  %v754_v12 = vmul.f32 %v1692_v31, %v2204_v58  ;;  %v1783_v11 = vld [vmem:[%s2197_s11 + $0x50] sm:$0xff]  }
 0x154   : > { %v1165_v31 = vsel %vm1157_vm1, %v451_v28, %v2290_v13  ;;  %v1703_v13 = vunpack.c.l.bf16 %v1782_v24 }
 0x155   : > { %v456_v15 = vmul.f32 %v2033_v0, %v1499_v60  ;;  %v1699_v60 = vunpack.c.l.bf16 %v1781_v17 }
 0x157   : > { %1089 = vrot.lane.b32.xlu0 %v755_v57, %s1938_s16  ;;  %1081 = vrot.lane.b32.xlu2 %v751_v48, %s1938_s16  ;;  %v758_v48 = vmul.f32 %v1700_v51, %v2204_v58  ;;  %v1707_v51 = vunpack.c.l.bf16 %v1783_v11 }
 0x158   : > { %1085 = vrot.lane.b32.xlu1 %v753_v53, %s1938_s16  ;;  %v449_v53 = vmul.f32 %v2033_v0, %v1484_v52 }
 0x159   : > { %v952_v1 = vpop.permute.xlu2 %951  ;;  %v942_v16 = vpop.permute.xlu0 %941 }
 0x15a   : > { %v938_v57 = vpop.permute.xlu1 %937  ;;  %v2451_v10 = vsel %vm1190_vm0, %v1167_v59, %v952_v1  ;;  %v2454_v61 = vsel %vm1190_vm0, %v1162_v4, %v942_v16  ;;  %v756_v59 = vmul.f32 %v1696_v26, %v2204_v58  ;;  %v1491_v4 = vunpack.c.l.bf16 %v2413_v37  ;;  %v1733_v1 = vld [vmem:[%s2346_s15 + $0x28] sm:$0xff]  }
 0x15b   : > { %2842 = vst [vmem:[#allocation5_spill] sm:$0xff] %v2451_v10  ;;  %v2457_v8 = vsel %vm1190_vm0, %v1160_v46, %v938_v57  ;;  %v1495_v52 = vunpack.c.l.bf16 %v1733_v1  ;;  %v1170_v16 = vsel %vm1157_vm1, %v456_v15, %v2300_v23  ;;  %v1504_v46 = vunpack.c.h.bf16 %v2472_v49 }
 0x15c   : > { %v1163_v26 = vsel %vm1157_vm1, %v449_v53, %v2249_v33  ;;  %v757_v10 = vmul.f32 %v1699_v60, %v2204_v58  ;;  %v1784_v33 = vld [vmem:[%s2197_s11 + $0x58] sm:$0xff]   ;;  %v452_v53 = vmul.f32 %v2033_v0, %v1491_v4  ;;  %v1500_v60 = vunpack.c.h.bf16 %v2436_v35  ;;  %s1867_s11 = sshra.s32 %s1307_s9, 4  ;;  %s1868_s11 = int_to_ptr.hbm [resolvable:$true] %s1867_s11 }
 0x15d   : > { %v454_v23 = vmul.f32 %v2033_v0, %v1495_v52  ;;  %v459_v15 = vmul.f32 %v2033_v0, %v1504_v46  ;;  %v1712_v52 = vunpack.c.h.bf16 %v1784_v33  ;;  %v1704_v46 = vunpack.c.h.bf16 %v1782_v24  ;;  %s1869_s12 = scalar_lea.hbm %s1868_s11, 256  ;;  %p1874_p1 = scmp.lt.s32.totalorder %s1868_s11, %s2839_s5 }
 0x15e   : > { %v1708_v35 = vunpack.c.h.bf16 %v1783_v11  ;;  %v1736_v11 = vld [vmem:[%s2346_s15 + $0x40] sm:$0xff]   ;;  %p1870_p12 = scmp.ne.s32.totalorder %s1868_s11, %s1869_s12 }
 0x15f   : > { %1095 = vrot.lane.b32.xlu0 %v758_v48, %s1938_s16  ;;  %1087 = vrot.lane.b32.xlu2 %v754_v12, %s1938_s16  ;;  %v1173_v4 = vsel %vm1157_vm1, %v459_v15, %v2312_v25  ;;  %v457_v25 = vmul.f32 %v2033_v0, %v1500_v60  ;;  %v764_v15 = vmul.f32 %v1712_v52, %v2204_v58  ;;  %v1507_v52 = vunpack.c.l.bf16 %v1736_v11 }
 0x160   : > { %1091 = vrot.lane.b32.xlu1 %v756_v59, %s1938_s16  ;;  %v761_v59 = vmul.f32 %v1707_v51, %v2204_v58  ;;  %v1168_v51 = vsel %vm1157_vm1, %v454_v23, %v2302_v30  ;;  %p1871_p13 = pnand %p1870_p12, %p2010_p4 }
 0x161   : > { %v958_v57 = vpop.permute.xlu2 %957  ;;  %v948_v37 = vpop.permute.xlu0 %947  ;;  %v1171_v60 = vsel %vm1157_vm1, %v457_v25, %v2314_v27 }
 0x162   : > { %v944_v48 = vpop.permute.xlu1 %943  ;;  %v2483_v12 = vsel %vm1190_vm0, %v1170_v16, %v958_v57  ;;  %v2486_v17 = vsel %vm1190_vm0, %v1165_v31, %v948_v37  ;;  %v2498_v16 = vld [vmem:[%s2346_s15 + $0x48] sm:$0xff]   ;;  %v759_v31 = vmul.f32 %v1703_v13, %v2204_v58  ;;  %v1496_v57 = vunpack.c.h.bf16 %v1733_v1  ;;  %p1872_p0 = pneg %p1871_p13 }
 0x163   : > { %v2489_v28 = vsel %vm1190_vm0, %v1163_v26, %v944_v48  ;;  %v1511_v37 = vunpack.c.l.bf16 %v2498_v16 }
 0x165   : > { %v462_v23 = vmul.f32 %v2033_v0, %v1511_v37 }
 0x167   : > { %1101 = vrot.lane.b32.xlu0 %v761_v59, %s1938_s16  ;;  %1093 = vrot.lane.b32.xlu2 %v757_v10, %s1938_s16  ;;  %v1166_v10 = vsel %vm1157_vm1, %v452_v53, %v2259_v47  ;;  %v760_v59 = vmul.f32 %v1704_v46, %v2204_v58  ;;  %v455_v47 = vmul.f32 %v2033_v0, %v1496_v57 }
 0x168   : > { %1097 = vrot.lane.b32.xlu1 %v759_v31, %s1938_s16  ;;  %v762_v53 = vmul.f32 %v1708_v35, %v2204_v58  ;;  %v1738_v31 = vld [vmem:[%s2346_s15 + $0x50] sm:$0xff]   ;;  %v1176_v46 = vsel %vm1157_vm1, %v462_v23, %v2324_v34  ;;  %v460_v34 = vmul.f32 %v2033_v0, %v1507_v52  ;;  %v1740_v23 = vld [vmem:[%s2346_s15 + $0x60] sm:$0xff]  }
 0x169   : > { %v964_v26 = vpop.permute.xlu2 %963  ;;  %v954_v48 = vpop.permute.xlu0 %953  ;;  %v1516_v57 = vunpack.c.h.bf16 %v1738_v31 }
 0x16a   : > { %v950_v1 = vpop.permute.xlu1 %949  ;;  %v2513_v24 = vsel %vm1190_vm0, %v1173_v4, %v964_v26  ;;  %v2516_v30 = vsel %vm1190_vm0, %v1168_v51, %v954_v48  ;;  %v1711_v51 = vunpack.c.l.bf16 %v1784_v33  ;;  %v1169_v26 = vsel %vm1157_vm1, %v455_v47, %v2272_v56 }
 0x16b   : > { %v2519_v13 = vsel %vm1190_vm0, %v1166_v10, %v950_v1  ;;  %v1503_v48 = vunpack.c.l.bf16 %v2472_v49  ;;  %v465_v35 = vmul.f32 %v2033_v0, %v1516_v57  ;;  %v1174_v49 = vsel %vm1157_vm1, %v460_v34, %v2326_v45 }
 0x16c   : > { %v763_v25 = vmul.f32 %v1711_v51, %v2204_v58  ;;  %v1508_v51 = vunpack.c.h.bf16 %v1736_v11  ;;  %v1741_v11 = vld [vmem:[%s2346_s15 + $0x68] sm:$0xff]  }
 0x16d   : > { %v458_v56 = vmul.f32 %v2033_v0, %v1503_v48  ;;  %v1179_v58 = vsel %vm1157_vm1, %v465_v35, %v2338_v36 }
 0x16f   : > { %1107 = vrot.lane.b32.xlu0 %v764_v15, %s1938_s16  ;;  %1099 = vrot.lane.b32.xlu2 %v760_v59, %s1938_s16  ;;  %v1512_v15 = vunpack.c.h.bf16 %v2498_v16  ;;  %v1523_v59 = vunpack.c.l.bf16 %v1740_v23 }
 0x170   : > { %1103 = vrot.lane.b32.xlu1 %v762_v53, %s1938_s16 }
 0x171   : > { %v970_v4 = vpop.permute.xlu2 %969  ;;  %v960_v37 = vpop.permute.xlu0 %959  ;;  %v463_v36 = vmul.f32 %v2033_v0, %v1512_v15  ;;  %v468_v52 = vmul.f32 %v2033_v0, %v1523_v59  ;;  %v1743_v15 = vld [vmem:[%s2346_s15 + $0x78] sm:$0xff]  }
 0x172   : > { %v956_v10 = vpop.permute.xlu1 %955  ;;  %v2540_v1 = vsel %vm1190_vm0, %v1176_v46, %v970_v4  ;;  %v2543_v33 = vsel %vm1190_vm0, %v1171_v60, %v960_v37  ;;  %v461_v46 = vmul.f32 %v2033_v0, %v1508_v51  ;;  %v1535_v59 = vunpack.c.l.bf16 %v1743_v15 }
 0x173   : > { %v2546_v27 = vsel %vm1190_vm0, %v1169_v26, %v956_v10  ;;  %v1177_v57 = vsel %vm1157_vm1, %v463_v36, %v2340_v50  ;;  %v1182_v37 = vsel %vm1157_vm1, %v468_v52, %v2358_v55  ;;  %v1528_v26 = vunpack.c.h.bf16 %v1741_v11 }
 0x174   : > { %v1515_v10 = vunpack.c.l.bf16 %v1738_v31  ;;  %v1524_v31 = vunpack.c.h.bf16 %v1740_v23 }
 0x175   : > { %v471_v55 = vmul.f32 %v2033_v0, %v1528_v26 }
 0x177   : > { %1113 = vrot.lane.b32.xlu0 %v2220_v9, %s1938_s16  ;;  %1105 = vrot.lane.b32.xlu2 %v763_v25, %s1938_s16  ;;  %v1172_v9 = vsel %vm1157_vm1, %v458_v56, %v2286_v7  ;;  %v1739_v7 = vld [vmem:[%s2346_s15 + $0x58] sm:$0xff]   ;;  %v1852_v56 = vld [vmem:[%s2030_s10] ss:$0 sm:$0xff]  ;;  %s329_s10 = sand.u32 1, %s1915_s19  }
 0x178   : > { %1109 = vrot.lane.b32.xlu1 %v2216_v5, %s1938_s16  ;;  %v1519_v4 = vunpack.c.l.bf16 %v1739_v7  ;;  %v469_v23 = vmul.f32 %v1852_v56, %v1524_v31  ;;  %s1454_s14 = sshll.u32 %s329_s10, 8  ;;  %s1290_s21 = scalar_lea.sflag [#allocation3], %s329_s10 }
 0x179   : > { %v976_v47 = vpop.permute.xlu2 %975  ;;  %v966_v53 = vpop.permute.xlu0 %965  ;;  %s2656_s17 = scalar_lea.vmem [#allocation2], %s1454_s14 }
 0x17a   : > { %v962_v60 = vpop.permute.xlu1 %961  ;;  %v2566_v5 = vsel %vm1190_vm0, %v1179_v58, %v976_v47  ;;  %v2569_v45 = vsel %vm1190_vm0, %v1174_v49, %v966_v53  ;;  %v466_v25 = vmul.f32 %v2033_v0, %v1519_v4  ;;  %v464_v49 = vmul.f32 %v1852_v56, %v1515_v10  ;;  %s1304_s8 = sshll.u32 %s2656_s17, 4  ;;  %s1305_s8 = int_to_ptr.vmem [resolvable:$true] %s1304_s8 }
 0x17b   : > { %v2572_v16 = vsel %vm1190_vm0, %v1172_v9, %v962_v60  ;;  %v1185_v58 = vsel %vm1157_vm1, %v471_v55, %v2374_v6  ;;  %v1520_v9 = vunpack.c.h.bf16 %v1739_v7  ;;  %v474_v6 = vmul.f32 %v1852_v56, %v1535_v59 }
 0x17c   : > { %v1178_v53 = vsel %vm1157_vm1, %v464_v49, %v2310_v41  ;;  %v1742_v41 = vld [vmem:[%s2346_s15 + $0x70] sm:$0xff]   ;;  %v1183_v36 = vsel %vm1157_vm1, %v469_v23, %v2376_v38 }
 0x17d   : > { %v467_v60 = vmul.f32 %v1852_v56, %v1520_v9  ;;  %v1531_v52 = vunpack.c.l.bf16 %v1742_v41 }
 0x17f   : > { %1119 = vrot.lane.b32.xlu0 %v2228_v18, %s1938_s16  ;;  %1111 = vrot.lane.b32.xlu2 %v2231_v19, %s1938_s16  ;;  %v1175_v19 = vsel %vm1157_vm1, %v461_v46, %v2298_v22  ;;  %v1180_v22 = vsel %vm1157_vm1, %v466_v25, %v2360_v62  ;;  %v1188_v46 = vsel %vm1157_vm1, %v474_v6, %v2395_v63  ;;  %v1532_v25 = vunpack.c.h.bf16 %v1742_v41 }
 0x180   : > { %1115 = vrot.lane.b32.xlu1 %v2225_v14, %s1938_s16  ;;  %v1181_v4 = vsel %vm1157_vm1, %v467_v60, %v2322_v29 }
 0x181   : > { %v982_v48 = vpop.permute.xlu2 %981  ;;  %v972_v18 = vpop.permute.xlu0 %971 }
 0x182   : > { %v968_v34 = vpop.permute.xlu1 %967  ;;  %v2592_v35 = vsel %vm1190_vm0, %v1182_v37, %v982_v48  ;;  %v2595_v14 = vsel %vm1190_vm0, %v1177_v57, %v972_v18  ;;  %v1527_v37 = vunpack.c.l.bf16 %v1741_v11  ;;  %v472_v18 = vmul.f32 %v1852_v56, %v1531_v52 }
 0x183   : > { %v2598_v50 = vsel %vm1190_vm0, %v1175_v19, %v968_v34  ;;  %v1536_v11 = vunpack.c.h.bf16 %v1743_v15  ;;  %v473_v15 = vmul.f32 %v1852_v56, %v1532_v25 }
 0x184   : > { %v470_v63 = vmul.f32 %v1852_v56, %v1527_v37  ;;  %v1186_v29 = vsel %vm1157_vm1, %v472_v18, %v2397_v44  ;;  %v2843_v37 = vld [vmem:[#allocation5_spill] sm:$0xff] }
 0x185   : > { %v475_v44 = vmul.f32 %v1852_v56, %v1536_v11  ;;  %v1187_v59 = vsel %vm1157_vm1, %v473_v15, %v2356_v54 }
 0x186   : > { %v1184_v34 = vsel %vm1157_vm1, %v470_v63, %v2336_v40 }
 0x187   : > { %1117 = vrot.lane.b32.xlu2 %v2237_v21, %s1938_s16  ;;  %v1189_v40 = vsel %vm1157_vm1, %v475_v44, %v2421_v2 }
 0x188   : > { %1121 = vrot.lane.b32.xlu1 %v2234_v20, %s1938_s16 }
 0x189   : > { %v988_v47 = vpop.permute.xlu2 %987  ;;  %v978_v0 = vpop.permute.xlu0 %977 }
 0x18a   : > { %v974_v51 = vpop.permute.xlu1 %973  ;;  %v2615_v21 = vsel %vm1190_vm0, %v1185_v58, %v988_v47  ;;  %v2618_v20 = vsel %vm1190_vm0, %v1180_v22, %v978_v0 }
 0x18b   : > { %v2621_v62 = vsel %vm1190_vm0, %v1178_v53, %v974_v51 }
 0x18f   : > { %1123 = vrot.lane.b32.xlu2 %v2244_v32, %s1938_s16  ;;  %s1873_s16 = scalar_lea.hbm %s2839_s5, 512 }
 0x190   : > { %p1875_p2 = scmp.lt.s32.totalorder %s1873_s16, %s1869_s12 }
 0x191   : > { %v994_v7 = vpop.permute.xlu2 %993  ;;  %v984_v57 = vpop.permute.xlu0 %983 }
 0x192   : > { %v980_v26 = vpop.permute.xlu1 %979  ;;  %v2633_v48 = vsel %vm1190_vm0, %v1188_v46, %v994_v7  ;;  %v2636_v32 = vsel %vm1190_vm0, %v1183_v36, %v984_v57  ;;  %p1876_p3 = por %p1875_p2, %p1874_p1 }
 0x193   : > { %v2640_v38 = vsel %vm1190_vm0, %v1181_v4, %v980_v26 }
 0x194   : > { %p1877_p5 = pnand %p1876_p3, %p1872_p0 }
 0x199   : > { %v1064_v19 = vpop.permute.xlu2 %1063  ;;  %v990_v10 = vpop.permute.xlu0 %989 }
 0x19a   : > { %v986_v55 = vpop.permute.xlu1 %985  ;;  %v1225_v49 = vsel %vm1223_vm2, %v2427_v43, %v1064_v19  ;;  %v2651_v22 = vsel %vm1190_vm0, %v1186_v29, %v990_v10 }
 0x19b   : > { %v2654_v31 = vsel %vm1190_vm0, %v1184_v34, %v986_v55  ;;  %1258 = vst.msk [vmem:[%s2656_s17 + $0x8] sm:$0xff] %vm1256_vm3, %v1225_v49 }
 0x1a1   : > { %v1070_v43 = vpop.permute.xlu2 %1069  ;;  %v996_v58 = vpop.permute.xlu0 %995 }
 0x1a2   : > { %v992_v47 = vpop.permute.xlu1 %991  ;;  %v1228_v0 = vsel %vm1223_vm2, %v2454_v61, %v1070_v43  ;;  %v2667_v53 = vsel %vm1190_vm0, %v1189_v40, %v996_v58 }
 0x1a3   : > { %v2670_v56 = vsel %vm1190_vm0, %v1187_v59, %v992_v47  ;;  %1261 = vst.msk [vmem:[%s2656_s17 + $0x20] sm:$0xff] %vm1256_vm3, %v1228_v0 }
 0x1a9   : > { %v1076_v2 = vpop.permute.xlu2 %1075  ;;  %v1066_v9 = vpop.permute.xlu0 %1065 }
 0x1aa   : > { %v1062_v51 = vpop.permute.xlu1 %1061  ;;  %v1231_v54 = vsel %vm1223_vm2, %v2486_v17, %v1076_v2  ;;  %v1226_v61 = vsel %vm1223_vm2, %v2457_v8, %v1066_v9 }
 0x1ab   : > { %v1224_v23 = vsel %vm1223_vm2, %v2379_v39, %v1062_v51  ;;  %1264 = vst.msk [vmem:[%s2656_s17 + $0x38] sm:$0xff] %vm1256_vm3, %v1231_v54 }
 0x1ac   : > { %1257 = vst.msk [vmem:[%s2656_s17] sm:$0xff] %vm1256_vm3, %v1224_v23 }
 0x1ad   : > { %1259 = vst.msk [vmem:[%s2656_s17 + $0x10] sm:$0xff] %vm1256_vm3, %v1226_v61 }
 0x1b1   : > { %v1082_v6 = vpop.permute.xlu2 %1081  ;;  %v1072_v60 = vpop.permute.xlu0 %1071 }
 0x1b2   : > { %v1068_v41 = vpop.permute.xlu1 %1067  ;;  %v1234_v17 = vsel %vm1223_vm2, %v2516_v30, %v1082_v6  ;;  %v1229_v8 = vsel %vm1223_vm2, %v2489_v28, %v1072_v60 }
 0x1b3   : > { %v1227_v39 = vsel %vm1223_vm2, %v2400_v3, %v1068_v41  ;;  %1267 = vst.msk [vmem:[%s2656_s17 + $0x50] sm:$0xff] %vm1256_vm3, %v1234_v17 }
 0x1b4   : > { %1260 = vst.msk [vmem:[%s2656_s17 + $0x18] sm:$0xff] %vm1256_vm3, %v1227_v39 }
 0x1b5   : > { %1262 = vst.msk [vmem:[%s2656_s17 + $0x28] sm:$0xff] %vm1256_vm3, %v1229_v8 }
 0x1b9   : > { %v1088_v36 = vpop.permute.xlu2 %1087  ;;  %v1078_v52 = vpop.permute.xlu0 %1077 }
 0x1ba   : > { %v1074_v46 = vpop.permute.xlu1 %1073  ;;  %v1237_v30 = vsel %vm1223_vm2, %v2543_v33, %v1088_v36  ;;  %v1232_v28 = vsel %vm1223_vm2, %v2519_v13, %v1078_v52 }
 0x1bb   : > { %v1230_v3 = vsel %vm1223_vm2, %v2424_v42, %v1074_v46  ;;  %1270 = vst.msk [vmem:[%s2656_s17 + $0x68] sm:$0xff] %vm1256_vm3, %v1237_v30 }
 0x1bc   : > { %1263 = vst.msk [vmem:[%s2656_s17 + $0x30] sm:$0xff] %vm1256_vm3, %v1230_v3 }
 0x1bd   : > { %1265 = vst.msk [vmem:[%s2656_s17 + $0x40] sm:$0xff] %vm1256_vm3, %v1232_v28 }
 0x1c1   : > { %v1094_v7 = vpop.permute.xlu2 %1093  ;;  %v1084_v57 = vpop.permute.xlu0 %1083 }
 0x1c2   : > { %v1080_v4 = vpop.permute.xlu1 %1079  ;;  %v1240_v33 = vsel %vm1223_vm2, %v2569_v45, %v1094_v7  ;;  %v1235_v13 = vsel %vm1223_vm2, %v2546_v27, %v1084_v57 }
 0x1c3   : > { %v1233_v42 = vsel %vm1223_vm2, %v2843_v37, %v1080_v4  ;;  %1273 = vst.msk [vmem:[%s2656_s17 + $0x80] sm:$0xff] %vm1256_vm3, %v1240_v33 }
 0x1c4   : > { %1266 = vst.msk [vmem:[%s2656_s17 + $0x48] sm:$0xff] %vm1256_vm3, %v1233_v42 }
 0x1c5   : > { %1268 = vst.msk [vmem:[%s2656_s17 + $0x58] sm:$0xff] %vm1256_vm3, %v1235_v13 }
 0x1c9   : > { %v1100_v26 = vpop.permute.xlu2 %1099  ;;  %v1090_v18 = vpop.permute.xlu0 %1089 }
 0x1ca   : > { %v1086_v63 = vpop.permute.xlu1 %1085  ;;  %v1243_v45 = vsel %vm1223_vm2, %v2595_v14, %v1100_v26  ;;  %v1238_v27 = vsel %vm1223_vm2, %v2572_v16, %v1090_v18 }
 0x1cb   : > { %v1236_v29 = vsel %vm1223_vm2, %v2483_v12, %v1086_v63  ;;  %1276 = vst.msk [vmem:[%s2656_s17 + $0x98] sm:$0xff] %vm1256_vm3, %v1243_v45 }
 0x1cc   : > { %1269 = vst.msk [vmem:[%s2656_s17 + $0x60] sm:$0xff] %vm1256_vm3, %v1236_v29 }
 0x1cd   : > { %1271 = vst.msk [vmem:[%s2656_s17 + $0x70] sm:$0xff] %vm1256_vm3, %v1238_v27 }
 0x1d1   : > { %v1106_v11 = vpop.permute.xlu2 %1105  ;;  %v1096_v19 = vpop.permute.xlu0 %1095 }
 0x1d2   : > { %v1092_v10 = vpop.permute.xlu1 %1091  ;;  %v1246_v14 = vsel %vm1223_vm2, %v2618_v20, %v1106_v11  ;;  %v1241_v16 = vsel %vm1223_vm2, %v2598_v50, %v1096_v19 }
 0x1d3   : > { %v1239_v12 = vsel %vm1223_vm2, %v2513_v24, %v1092_v10  ;;  %1279 = vst.msk [vmem:[%s2656_s17 + $0xb0] sm:$0xff] %vm1256_vm3, %v1246_v14 }
 0x1d4   : > { %1272 = vst.msk [vmem:[%s2656_s17 + $0x78] sm:$0xff] %vm1256_vm3, %v1239_v12 }
 0x1d5   : > { %1274 = vst.msk [vmem:[%s2656_s17 + $0x88] sm:$0xff] %vm1256_vm3, %v1241_v16 }
 0x1d9   : > { %v1112_v34 = vpop.permute.xlu2 %1111  ;;  %v1102_v25 = vpop.permute.xlu0 %1101 }
 0x1da   : > { %v1098_v55 = vpop.permute.xlu1 %1097  ;;  %v1249_v20 = vsel %vm1223_vm2, %v2636_v32, %v1112_v34  ;;  %v1244_v50 = vsel %vm1223_vm2, %v2621_v62, %v1102_v25 }
 0x1db   : > { %v1242_v24 = vsel %vm1223_vm2, %v2540_v1, %v1098_v55  ;;  %1282 = vst.msk [vmem:[%s2656_s17 + $0xc8] sm:$0xff] %vm1256_vm3, %v1249_v20 }
 0x1dc   : > { %1275 = vst.msk [vmem:[%s2656_s17 + $0x90] sm:$0xff] %vm1256_vm3, %v1242_v24 }
 0x1dd   : > { %1277 = vst.msk [vmem:[%s2656_s17 + $0xa0] sm:$0xff] %vm1256_vm3, %v1244_v50 }
 0x1e1   : > { %v1118_v49 = vpop.permute.xlu2 %1117  ;;  %v1108_v44 = vpop.permute.xlu0 %1107 }
 0x1e2   : > { %v1104_v15 = vpop.permute.xlu1 %1103  ;;  %v1252_v32 = vsel %vm1223_vm2, %v2651_v22, %v1118_v49  ;;  %v1247_v62 = vsel %vm1223_vm2, %v2640_v38, %v1108_v44 }
 0x1e3   : > { %v1245_v1 = vsel %vm1223_vm2, %v2566_v5, %v1104_v15  ;;  %1285 = vst.msk [vmem:[%s2656_s17 + $0xe0] sm:$0xff] %vm1256_vm3, %v1252_v32 }
 0x1e4   : > { %1278 = vst.msk [vmem:[%s2656_s17 + $0xa8] sm:$0xff] %vm1256_vm3, %v1245_v1 }
 0x1e5   : > { %1280 = vst.msk [vmem:[%s2656_s17 + $0xb8] sm:$0xff] %vm1256_vm3, %v1247_v62 }
 0x1e9   : > { %v1124_v40 = vpop.permute.xlu2 %1123  ;;  %v1114_v43 = vpop.permute.xlu0 %1113 }
 0x1ea   : > { %v1110_v58 = vpop.permute.xlu1 %1109  ;;  %v1255_v22 = vsel %vm1223_vm2, %v2667_v53, %v1124_v40  ;;  %v1250_v38 = vsel %vm1223_vm2, %v2654_v31, %v1114_v43 }
 0x1eb   : > { %v1248_v5 = vsel %vm1223_vm2, %v2592_v35, %v1110_v58  ;;  %1288 = vst.msk [vmem:[%s2656_s17 + $0xf8] sm:$0xff] %vm1256_vm3, %v1255_v22 }
 0x1ec   : > { %1281 = vst.msk [vmem:[%s2656_s17 + $0xc0] sm:$0xff] %vm1256_vm3, %v1248_v5 }
 0x1ed   : > { %1283 = vst.msk [vmem:[%s2656_s17 + $0xd0] sm:$0xff] %vm1256_vm3, %v1250_v38 }
 0x1f1   : > { %v1120_v59 = vpop.permute.xlu0 %1119 }
 0x1f2   : > { %v1116_v47 = vpop.permute.xlu1 %1115  ;;  %v1253_v0 = vsel %vm1223_vm2, %v2670_v56, %v1120_v59 }
 0x1f3   : > { %v1251_v31 = vsel %vm1223_vm2, %v2615_v21, %v1116_v47  ;;  %1286 = vst.msk [vmem:[%s2656_s17 + $0xe8] sm:$0xff] %vm1256_vm3, %v1253_v0 }
 0x1f4   : > { %1284 = vst.msk [vmem:[%s2656_s17 + $0xd8] sm:$0xff] %vm1256_vm3, %v1251_v31 }
 0x1fa   : > { %v1122_v35 = vpop.permute.xlu1 %1121 }
 0x1fb   : > { %v1254_v53 = vsel %vm1223_vm2, %v2633_v48, %v1122_v35 }
 0x1fc   : > { %1287 = vst.msk [vmem:[%s2656_s17 + $0xf0] sm:$0xff] %vm1256_vm3, %v1254_v53 }
 0x1fd   : > { %1880 = shalt.err (!%p1877_p5)
}
 0x1fe   : > { %s1939_s10 = smov 128  }
 0x1ff   : > { %1789 = dma.vmem_to_hbm [thread:$0]  (%p2010_p4), %s1305_s8, 4096, %s1307_s9, %s1290_s21, %s1939_s10, %s1939_s10, %s1936_s24  }
 0x200 PF: > { %p1795_p6 = scmp.ge.s32.totalorder %s1931_s23, 2  ;;  %s1321_s17 = sand.u32 1, %s1911_s18  }
 0x201   : > { %s1322_s27 = scalar_lea.sflag [#allocation3], %s1321_s17 }
 0x202   : > { %p1792_p7 = pnand %p1795_p6, %p2017_p8 }
 0x204   : > { %p1793_p9 = pneg %p1792_p7 }
 0x206   : > { %1906 = dma.done.wait (%p1793_p9), %s1322_s27, 4096  }
 0x207   : > { %1908 = vsyncadd (%p1793_p9), %s1322_s27, 4294963200  ;;  %s18_s23 = sadd.s32 1, %s1931_s23   ;;  %s2844_s18 = smov %s1915_s19 }
 0x208   : > { %p15_p10 = scmp.ge.s32.totalorder %s18_s23, 4   ;;  %s2845_s19 = smov %s1919_s20 }
 0x209   : > { %s2846_s20 = smov %s2023_s6  ;;  %s2847_s21 = smov %s1927_s22 }
 0x20a   : > { %s2848_s22 = smov %s2850_s26  ;;  %17 = sbr.rel (!%p15_p10) target bundleno = 4 (0x4), region = 87 }
 0x20f   :  { %1328 = vsyncpa [#allocation3], 1 }
 0x210   :  { %1330 = vsyncpa [#allocation3 + $0x1], 1 }

</bundles_post_ra>
